<compile_context>
chip_gen: v7x
topology: tpu7x:2x2x1
jax: 0.10.0
libtpu: 0.0.40
codegen_flags: <defaults>
</compile_context>

<pallas_src>
import functools

import jax
import jax.numpy as jnp
import numpy as np
from jax.experimental import pallas as pl
from jax.experimental.pallas import tpu as pltpu


# ============================================================================
# In-kernel math helpers (f32 activation math, bf16 MXU operands)
# ============================================================================

def _layernorm_f32(x, g, b, eps):
    mean = jnp.mean(x, axis=-1, keepdims=True)
    c = x - mean
    var = jnp.mean(c * c, axis=-1, keepdims=True)
    return c * jax.lax.rsqrt(var + eps) * g + b


def _quick_gelu_f32(x):
    return x * jax.nn.sigmoid(1.702 * x)


def _mm(a, w):
    """bf16 operands on the MXU, f32 accumulation (weights already bf16 in HBM)."""
    return jnp.dot(a.astype(jnp.bfloat16), w.astype(jnp.bfloat16),
                   preferred_element_type=jnp.float32)


def _softmax_f32(s):
    s = s - jnp.max(s, axis=-1, keepdims=True)
    p = jnp.exp(s)
    return p * pl.reciprocal(jnp.sum(p, axis=-1, keepdims=True), approx=True)


def _mha(q, k, v, num_heads):
    """Batched multi-head attention over a batch block.

    q: (Bb, T, E) with scale already applied; k, v: (Bb, S, E).
    Per-head batched 3-D einsums (no explicit k transpose); per-head contexts are
    reassembled with a lane concat.  Returns (Bb, T, E) f32.
    """
    E = q.shape[-1]
    hd = E // num_heads
    outs = []
    for h in range(num_heads):
        sl = slice(h * hd, (h + 1) * hd)
        s = jnp.einsum("btd,bsd->bts",
                       q[..., sl].astype(jnp.bfloat16),
                       k[..., sl].astype(jnp.bfloat16),
                       preferred_element_type=jnp.float32)
        p = _softmax_f32(s)
        outs.append(jnp.einsum("bts,bsd->btd",
                               p.astype(jnp.bfloat16),
                               v[..., sl].astype(jnp.bfloat16),
                               preferred_element_type=jnp.float32))
    return jnp.concatenate(outs, axis=-1)


# ============================================================================
# Pallas kernels
# ============================================================================
# Packed operand layouts (built once in pack_params):
#   plain layer : w_e (E, 4E+I) = [wqkv | o_w | fc1_w]          bf16
#                 w_i (I, E)    = fc2_w                          bf16
#                 vec (9, E)    = [ln1_g, ln1_b, bq, bk, bv, o_b, ln2_g, ln2_b, fc2_b]
#                 ib  (1, I)    = fc1_b
#   bridge layer: w_e (E, 6E+2I)= [wqkv | o_w | cq_w | co_w | cfc1_w | fc1_w]
#                 w_i (I, 2E)   = [cfc2_w | fc2_w]
#                 vec (14, E)   = [ln1_g, ln1_b, bq, bk, bv, o_b, cn_g, cn_b,
#                                  cq_b, co_b, cfc2_b, ln2_g, ln2_b, fc2_b]
#                 ib  (2, I)    = [cfc1_b ; fc1_b]


def _encoder_layer_kernel(h_ref, we_ref, wi_ref, vec_ref, ib_ref, o_ref,
                          *, num_heads, scale, eps, E, I):
    Bb, T, _ = h_ref.shape
    vec = vec_ref[...]                                            # (9, E) f32
    hf = h_ref[...].astype(jnp.float32).reshape(Bb * T, E)
    # --- self-attention block: LN1 + fused QKV + MHA + out-proj + residual ---
    hn = _layernorm_f32(hf, vec[0], vec[1], eps)
    qkv = _mm(hn, we_ref[:, 0:3 * E])
    q = (qkv[:, 0:E] + vec[2]) * scale
    k = qkv[:, E:2 * E] + vec[3]
    v = qkv[:, 2 * E:3 * E] + vec[4]
    ctx = _mha(q.reshape(Bb, T, E), k.reshape(Bb, T, E), v.reshape(Bb, T, E),
               num_heads).reshape(Bb * T, E)
    hf = hf + _mm(ctx, we_ref[:, 3 * E:4 * E]) + vec[5]
    # --- MLP block: LN2 + fc1 + QuickGELU + fc2 + residual ---
    hn = _layernorm_f32(hf, vec[6], vec[7], eps)
    y = _quick_gelu_f32(_mm(hn, we_ref[:, 4 * E:4 * E + I]) + ib_ref[0])
    hf = hf + _mm(y, wi_ref[...]) + vec[8]
    o_ref[...] = hf.reshape(Bb, T, E).astype(o_ref.dtype)


def _bridge_layer_kernel(h_ref, ckv_ref, we_ref, wi_ref, vec_ref, ib_ref, o_ref,
                         *, num_heads, scale, eps, E, I):
    Bb, T, _ = h_ref.shape
    vec = vec_ref[...]                                            # (14, E) f32
    hf = h_ref[...].astype(jnp.float32).reshape(Bb * T, E)
    # --- self-attention block ---
    hn = _layernorm_f32(hf, vec[0], vec[1], eps)
    qkv = _mm(hn, we_ref[:, 0:3 * E])
    q = (qkv[:, 0:E] + vec[2]) * scale
    k = qkv[:, E:2 * E] + vec[3]
    v = qkv[:, 2 * E:3 * E] + vec[4]
    ctx = _mha(q.reshape(Bb, T, E), k.reshape(Bb, T, E), v.reshape(Bb, T, E),
               num_heads).reshape(Bb * T, E)
    hf = hf + _mm(ctx, we_ref[:, 3 * E:4 * E]) + vec[5]
    # --- cross-modal bridge: cross_norm + cross-attn + out-proj + cross_mlp + residual ---
    hn = _layernorm_f32(hf, vec[6], vec[7], eps)
    cq = (_mm(hn, we_ref[:, 4 * E:5 * E]) + vec[8]) * scale
    ckv = ckv_ref[...]                                            # (Bb, S, 2E) bf16, K/V pre-projected
    cctx = _mha(cq.reshape(Bb, T, E), ckv[..., 0:E], ckv[..., E:2 * E],
                num_heads).reshape(Bb * T, E)
    ao = _mm(cctx, we_ref[:, 5 * E:6 * E]) + vec[9]
    y = _quick_gelu_f32(_mm(ao, we_ref[:, 6 * E:6 * E + I]) + ib_ref[0])
    hf = hf + _mm(y, wi_ref[:, 0:E]) + vec[10]
    # --- MLP block ---
    hn = _layernorm_f32(hf, vec[11], vec[12], eps)
    y = _quick_gelu_f32(_mm(hn, we_ref[:, 6 * E + I:6 * E + 2 * I]) + ib_ref[1])
    hf = hf + _mm(y, wi_ref[:, E:2 * E]) + vec[13]
    o_ref[...] = hf.reshape(Bb, T, E).astype(o_ref.dtype)


def _text_bridge_kernel(t_ref, emb_ref, gw_ref, gb_ref, kvw_ref, kvb_ref, o_ref):
    # Rows are ordered s-major / b-minor (row r = s*B + b), i.e. exactly the raw memory
    # order of the torch gate-output .permute(1,0,2); the gate + K/V projections are
    # per-row linears so this ordering commutes with them.
    t = t_ref[...].astype(jnp.float32)                            # (S*B, C)
    a = emb_ref[...].astype(jnp.float32) * t + t                  # adaptive re-weighting
    adpt = _mm(a, gw_ref[...]) + gb_ref[...]                      # cross_gate   (S*B, E)
    kv = _mm(adpt, kvw_ref[...]) + kvb_ref[...]                   # fused K/V    (S*B, 2E)
    o_ref[...] = kv.astype(o_ref.dtype)


# ============================================================================
# pallas_call wrappers
# ============================================================================

_PARALLEL = pltpu.CompilerParams(dimension_semantics=("parallel",))
# TODO(synk): for real CLIP sizes (E~1024, I~4096) on v7x (64 MiB VMEM), also set
# vmem_limit_bytes and single-buffer the constant-index weight specs.


def _rep(arr):
    """Full-array block, same block index every grid step (Pallas skips the re-DMA)."""
    nd = arr.ndim
    return pl.BlockSpec(arr.shape, lambda *_: (0,) * nd)


def encoder_layer_pallas(h, p, cfg, batch_block):
    B, T, E = h.shape
    I = cfg["intermediate_size"]
    H = cfg["num_heads"]
    kern = functools.partial(_encoder_layer_kernel, num_heads=H,
                             scale=(E // H) ** -0.5, eps=cfg["layer_norm_eps"],
                             E=E, I=I)
    args = (p["w_e"], p["w_i"], p["vec"], p["ib"])
    return pl.pallas_call(
        kern,
        out_shape=jax.ShapeDtypeStruct((B, T, E), h.dtype),
        grid=(B // batch_block,),
        in_specs=[pl.BlockSpec((batch_block, T, E), lambda b: (b, 0, 0))]
                 + [_rep(a) for a in args],
        out_specs=pl.BlockSpec((batch_block, T, E), lambda b: (b, 0, 0)),
        input_output_aliases={0: 0},          # write h back in place (bf16 residual stream)
        compiler_params=_PARALLEL,
    )(h, *args)


def bridge_layer_pallas(h, ckv, p, cfg, batch_block):
    B, T, E = h.shape
    S = ckv.shape[1]
    I = cfg["intermediate_size"]
    H = cfg["num_heads"]
    kern = functools.partial(_bridge_layer_kernel, num_heads=H,
                             scale=(E // H) ** -0.5, eps=cfg["layer_norm_eps"],
                             E=E, I=I)
    args = (p["w_e"], p["w_i"], p["vec"], p["ib"])
    return pl.pallas_call(
        kern,
        out_shape=jax.ShapeDtypeStruct((B, T, E), h.dtype),
        grid=(B // batch_block,),
        in_specs=[pl.BlockSpec((batch_block, T, E), lambda b: (b, 0, 0)),
                  pl.BlockSpec((batch_block, S, 2 * E), lambda b: (b, 0, 0))]
                 + [_rep(a) for a in args],
        out_specs=pl.BlockSpec((batch_block, T, E), lambda b: (b, 0, 0)),
        input_output_aliases={0: 0},
        compiler_params=_PARALLEL,
    )(h, ckv, *args)


def text_bridge_pallas(text_flat, emb_rep, gate_w, gate_b, ckv_w, ckv_b):
    R = text_flat.shape[0]
    E = gate_w.shape[-1]
    return pl.pallas_call(
        _text_bridge_kernel,
        out_shape=jax.ShapeDtypeStruct((R, 2 * E), jnp.bfloat16),
        grid=(1,),
        in_specs=[_rep(text_flat), _rep(emb_rep), _rep(gate_w), _rep(gate_b),
                  _rep(ckv_w), _rep(ckv_b)],
        out_specs=pl.BlockSpec((R, 2 * E), lambda i: (0, 0)),
        compiler_params=_PARALLEL,
    )(text_flat, emb_rep, gate_w, gate_b, ckv_w, ckv_b)


# ============================================================================
# Encoder forward (Pallas path)
# ============================================================================

def encoder_forward_pallas(inputs_embeds, adapt_layer, text_states, packed_layers, cfg):
    B, T, E = inputs_embeds.shape
    bb = min(cfg.get("batch_block", 1), B)
    assert B % bb == 0, "batch must be divisible by batch_block"
    h = inputs_embeds.astype(jnp.bfloat16)                        # bf16 residual stream
    # Multi-layer text states concatenated once along channels and laid out s-major /
    # b-minor: this row ordering reproduces the torch permute(1,0,2) + raw .view()
    # used by CLIP_Cross_Attention._shape, so no per-layer transpose is needed.
    text_cat = jnp.concatenate(text_states, axis=-1)              # (B, 77, L*Dt)
    S, C = text_cat.shape[1], text_cat.shape[2]
    text_flat = jnp.transpose(text_cat, (1, 0, 2)).reshape(S * B, C)
    for idx, p in enumerate(packed_layers):
        if idx in adapt_layer:
            # TODO(synk): only the args.enable_adaptive_weights=True branch is implemented
            # (HiVG default); attention/causal masks are None (vision-encoder path).
            emb_rep = jnp.repeat(p["adapt_emb"], B, axis=0)       # row s*B+b <- emb[s]
            ckv = text_bridge_pallas(text_flat, emb_rep, p["gate_w"], p["gate_b"],
                                     p["ckv_w"], p["ckv_b"])
            ckv = ckv.reshape(B, S, 2 * E)                        # raw view == torch view
            h = bridge_layer_pallas(h, ckv, p, cfg, bb)
        else:
            h = encoder_layer_pallas(h, p, cfg, bb)
    return h


# ============================================================================
# Pure-JAX f32 reference (torch-faithful) for the correctness cross-check
# ============================================================================

def _ln_ref(x, g, b, eps):
    mean = jnp.mean(x, axis=-1, keepdims=True)
    var = jnp.mean((x - mean) ** 2, axis=-1, keepdims=True)
    return (x - mean) * jax.lax.rsqrt(var + eps) * g + b


def _qgelu_ref(x):
    return x * jax.nn.sigmoid(1.702 * x)


def _mha_ref(q, k, v, num_heads):
    B, T, E = q.shape
    S = k.shape[1]
    hd = E // num_heads
    qh = q.reshape(B, T, num_heads, hd).transpose(0, 2, 1, 3)
    kh = k.reshape(B, S, num_heads, hd).transpose(0, 2, 1, 3)
    vh = v.reshape(B, S, num_heads, hd).transpose(0, 2, 1, 3)
    s = jnp.einsum("bhtd,bhsd->bhts", qh, kh)
    pr = jax.nn.softmax(s, axis=-1)
    o = jnp.einsum("bhts,bhsd->bhtd", pr, vh)
    return o.transpose(0, 2, 1, 3).reshape(B, T, E)


def encoder_forward_ref(inputs_embeds, adapt_layer, text_states, params, cfg):
    H = cfg["num_heads"]
    E = cfg["hidden_size"]
    eps = cfg["layer_norm_eps"]
    scale = (E // H) ** -0.5
    text_cat = jnp.concatenate(text_states, axis=-1)
    h = inputs_embeds
    B = h.shape[0]
    for idx, p in enumerate(params["layers"]):
        res = h
        hn = _ln_ref(h, p["ln1_g"], p["ln1_b"], eps)
        qkv = hn @ p["wqkv"] + p["bqkv"]
        q, k, v = qkv[..., :E] * scale, qkv[..., E:2 * E], qkv[..., 2 * E:]
        h = res + _mha_ref(q, k, v, H) @ p["o_w"] + p["o_b"]
        if idx in adapt_layer:
            res = h
            hn = _ln_ref(h, p["cross_norm_g"], p["cross_norm_b"], eps)
            adpt = p["adapt_emb"][None] * text_cat + text_cat
            adpt = adpt @ p["gate_w"] + p["gate_b"]                    # (B, 77, E)
            S = adpt.shape[1]
            text_kv = jnp.transpose(adpt, (1, 0, 2)).reshape(B, S, E)  # torch view replica
            c, m = p["cross_attn"], p["cross_mlp"]
            q = (hn @ c["q_w"] + c["q_b"]) * scale
            kv = text_kv @ c["kv_w"] + c["kv_b"]
            k, v = kv[..., :E], kv[..., E:]
            a = _mha_ref(q, k, v, H) @ c["o_w"] + c["o_b"]
            y = _qgelu_ref(a @ m["fc1_w"] + m["fc1_b"]) @ m["fc2_w"] + m["fc2_b"]
            h = res + y
        res = h
        hn = _ln_ref(h, p["ln2_g"], p["ln2_b"], eps)
        y = _qgelu_ref(hn @ p["fc1_w"] + p["fc1_b"]) @ p["fc2_w"] + p["fc2_b"]
        h = res + y
    return h


# ============================================================================
# Deterministic synthetic parameter init + packing for the Pallas path
# ============================================================================

def _init_linear(k, fan_in, fan_out):
    kw, kb = jax.random.split(k)
    w = jax.random.normal(kw, (fan_in, fan_out), jnp.float32) * 0.02
    b = jax.random.normal(kb, (1, fan_out), jnp.float32) * 0.02
    return w, b


def init_params(key, cfg):
    E, I = cfg["hidden_size"], cfg["intermediate_size"]
    Dt, L = cfg["text_hidden_size"], cfg["num_extract_text_layers"]
    layers = []
    for i in range(cfg["num_hidden_layers"]):
        kl = jax.random.fold_in(key, i)
        ks = jax.random.split(kl, 16)
        qw, qb = _init_linear(ks[0], E, E)
        kw_, kb_ = _init_linear(ks[1], E, E)
        vw, vb = _init_linear(ks[2], E, E)
        ow, ob = _init_linear(ks[3], E, E)
        f1w, f1b = _init_linear(ks[4], E, I)
        f2w, f2b = _init_linear(ks[5], I, E)
        p = {
            "ln1_g": jnp.ones((1, E), jnp.float32), "ln1_b": jnp.zeros((1, E), jnp.float32),
            "ln2_g": jnp.ones((1, E), jnp.float32), "ln2_b": jnp.zeros((1, E), jnp.float32),
            "wqkv": jnp.concatenate([qw, kw_, vw], axis=1),       # fused q/k/v projection
            "bqkv": jnp.concatenate([qb, kb_, vb], axis=1),
            "o_w": ow, "o_b": ob,
            "fc1_w": f1w, "fc1_b": f1b, "fc2_w": f2w, "fc2_b": f2b,
        }
        if i in cfg["adapt_layer"]:
            cqw, cqb = _init_linear(ks[6], E, E)
            ckw, ckb = _init_linear(ks[7], E, E)
            cvw, cvb = _init_linear(ks[8], E, E)
            cow, cob = _init_linear(ks[9], E, E)
            cf1w, cf1b = _init_linear(ks[10], E, I)
            cf2w, cf2b = _init_linear(ks[11], I, E)
            gw, gb = _init_linear(ks[12], Dt * L, E)
            p["cross_norm_g"] = jnp.ones((1, E), jnp.float32)
            p["cross_norm_b"] = jnp.zeros((1, E), jnp.float32)
            p["cross_attn"] = {"q_w": cqw, "q_b": cqb,
                               "kv_w": jnp.concatenate([ckw, cvw], axis=1),  # fused k/v
                               "kv_b": jnp.concatenate([ckb, cvb], axis=1),
                               "o_w": cow, "o_b": cob}
            p["cross_mlp"] = {"fc1_w": cf1w, "fc1_b": cf1b, "fc2_w": cf2w, "fc2_b": cf2b}
            p["gate_w"], p["gate_b"] = gw, gb
            # nn.Embedding(77, text_embed_dim) per extracted text layer, concatenated
            # channel-wise to match torch.cat([emb_i*t_i + t_i], dim=-1).
            p["adapt_emb"] = jnp.concatenate(
                [jax.random.normal(jax.random.fold_in(ks[13], j), (77, Dt), jnp.float32) * 0.02
                 for j in range(L)], axis=-1)                     # (77, L*Dt)
        layers.append(p)
    return {"layers": layers}


def pack_params(params, cfg):
    """Pack per-layer params into few bf16 weight slabs + f32 vector slabs (done once)."""
    E = cfg["hidden_size"]
    bf16 = jnp.bfloat16
    packed = []
    for p in params["layers"]:
        d = {}
        if "cross_attn" in p:
            c, m = p["cross_attn"], p["cross_mlp"]
            d["w_e"] = jnp.concatenate(
                [p["wqkv"], p["o_w"], c["q_w"], c["o_w"], m["fc1_w"], p["fc1_w"]],
                axis=1).astype(bf16)                                       # (E, 6E+2I)
            d["w_i"] = jnp.concatenate([m["fc2_w"], p["fc2_w"]], axis=1).astype(bf16)  # (I, 2E)
            d["vec"] = jnp.concatenate(
                [p["ln1_g"], p["ln1_b"], p["bqkv"].reshape(3, E), p["o_b"],
                 p["cross_norm_g"], p["cross_norm_b"], c["q_b"], c["o_b"], m["fc2_b"],
                 p["ln2_g"], p["ln2_b"], p["fc2_b"]], axis=0)              # (14, E) f32
            d["ib"] = jnp.concatenate([m["fc1_b"], p["fc1_b"]], axis=0)    # (2, I) f32
            d["gate_w"] = p["gate_w"].astype(bf16)
            d["gate_b"] = p["gate_b"]
            d["ckv_w"] = c["kv_w"].astype(bf16)
            d["ckv_b"] = c["kv_b"]
            d["adapt_emb"] = p["adapt_emb"]
        else:
            d["w_e"] = jnp.concatenate([p["wqkv"], p["o_w"], p["fc1_w"]],
                                       axis=1).astype(bf16)                # (E, 4E+I)
            d["w_i"] = p["fc2_w"].astype(bf16)                             # (I, E)
            d["vec"] = jnp.concatenate(
                [p["ln1_g"], p["ln1_b"], p["bqkv"].reshape(3, E), p["o_b"],
                 p["ln2_g"], p["ln2_b"], p["fc2_b"]], axis=0)              # (9, E) f32
            d["ib"] = p["fc1_b"]                                           # (1, I) f32
        packed.append(d)
    return packed


# ============================================================================

if __name__ == "__main__":
    cfg = dict(
        hidden_size=128,            # config.hidden_size (vision) -> lane-dense stores
        intermediate_size=256,      # config.intermediate_size
        num_heads=4,                # config.num_attention_heads (head_dim = 32)
        num_hidden_layers=2,        # config.num_hidden_layers
        layer_norm_eps=1e-5,
        text_hidden_size=64,        # text_config.hidden_size
        num_extract_text_layers=2,  # len(extract_text_layer) -> Dt*L = 128
        adapt_layer=(1,),           # layers carrying the cross-modal bridge
        batch_block=2,              # sequences per grid step (grid = B // batch_block)
    )
    B, T = 4, 32                    # batch, vision sequence length (T multiple of 8)
    TEXT_SEQ = 77                   # fixed by nn.Embedding(77, text_embed_dim)

    key = jax.random.PRNGKey(0)
    kp, kx, kt = jax.random.split(key, 3)
    params = init_params(kp, cfg)
    packed = pack_params(params, cfg)
    inputs_embeds = jax.random.normal(kx, (B, T, cfg["hidden_size"]), jnp.float32)
    text_states = [jax.random.normal(jax.random.fold_in(kt, j),
                                     (B, TEXT_SEQ, cfg["text_hidden_size"]), jnp.float32)
                   for j in range(cfg["num_extract_text_layers"])]

    # attention_mask / causal_attention_mask are None (vision encoder path).
    fwd = jax.jit(lambda x, ts, pp: encoder_forward_pallas(x, cfg["adapt_layer"], ts, pp, cfg))
    out = jax.block_until_ready(fwd(inputs_embeds, text_states, packed))

    ref = encoder_forward_ref(inputs_embeds, cfg["adapt_layer"], text_states, params, cfg)
    np.testing.assert_allclose(np.asarray(out.astype(jnp.float32)), np.asarray(ref),
                               rtol=2e-2, atol=2e-2)

    print("KERNEL_OK")
</pallas_src>

<mosaic_0001>
module attributes {stable_mosaic.version = 11 : i64} {
  func.func @_text_bridge_kernel(%arg0: i32, %arg1: memref<308x128xf32, #tpu.memory_space<vmem>>, %arg2: memref<308x128xf32, #tpu.memory_space<vmem>>, %arg3: memref<128x128xbf16, #tpu.memory_space<vmem>>, %arg4: memref<1x128xf32, #tpu.memory_space<vmem>>, %arg5: memref<128x256xbf16, #tpu.memory_space<vmem>>, %arg6: memref<1x256xf32, #tpu.memory_space<vmem>>, %arg7: memref<308x256xbf16, #tpu.memory_space<vmem>>) attributes {dimension_semantics = [#tpu.dimension_semantics<parallel>], iteration_bounds = array<i64: 1>, scalar_prefetch = 0 : i64, scratch_operands = 0 : i64, tpu.core_type = #tpu.core_type<tc>, window_params = [{pipeline_mode = #tpu.pipeline_mode<synchronous>, transform_indices = @transform_0, window_bounds = array<i64: 308, 128>}, {pipeline_mode = #tpu.pipeline_mode<synchronous>, transform_indices = @transform_1, window_bounds = array<i64: 308, 128>}, {pipeline_mode = #tpu.pipeline_mode<synchronous>, transform_indices = @transform_2, window_bounds = array<i64: 128, 128>}, {pipeline_mode = #tpu.pipeline_mode<synchronous>, transform_indices = @transform_3, window_bounds = array<i64: 1, 128>}, {pipeline_mode = #tpu.pipeline_mode<synchronous>, transform_indices = @transform_4, window_bounds = array<i64: 128, 256>}, {pipeline_mode = #tpu.pipeline_mode<synchronous>, transform_indices = @transform_5, window_bounds = array<i64: 1, 256>}, {pipeline_mode = #tpu.pipeline_mode<synchronous>, transform_indices = @transform_6, window_bounds = array<i64: 308, 256>}]} {
    %c0 = arith.constant 0 : index
    %c0_0 = arith.constant 0 : index
    %0 = vector.load %arg1[%c0, %c0_0] : memref<308x128xf32, #tpu.memory_space<vmem>>, vector<308x128xf32>
    %c0_1 = arith.constant 0 : index
    %c0_2 = arith.constant 0 : index
    %1 = vector.load %arg2[%c0_1, %c0_2] : memref<308x128xf32, #tpu.memory_space<vmem>>, vector<308x128xf32>
    %2 = arith.mulf %1, %0 : vector<308x128xf32>
    %3 = arith.addf %2, %0 : vector<308x128xf32>
    %c0_3 = arith.constant 0 : index
    %c0_4 = arith.constant 0 : index
    %4 = vector.load %arg3[%c0_3, %c0_4] : memref<128x128xbf16, #tpu.memory_space<vmem>>, vector<128x128xbf16>
    %5 = arith.truncf %3 : vector<308x128xf32> to vector<308x128xbf16>
    %cst = arith.constant dense<0.000000e+00> : vector<308x128xf32>
    %6 = tpu.matmul %5, %4, %cst {dimension_numbers = #tpu.dot_dimension_numbers<[1], [0], [0], [1], [0, 0, 1, 1], [], []>} : vector<308x128xbf16>, vector<128x128xbf16>, vector<308x128xf32> -> vector<308x128xf32>
    %c0_5 = arith.constant 0 : index
    %c0_6 = arith.constant 0 : index
    %7 = vector.load %arg4[%c0_5, %c0_6] : memref<1x128xf32, #tpu.memory_space<vmem>>, vector<1x128xf32>
    %8 = vector.broadcast %7 : vector<1x128xf32> to vector<308x128xf32>
    %9 = arith.addf %6, %8 : vector<308x128xf32>
    %c0_7 = arith.constant 0 : index
    %c0_8 = arith.constant 0 : index
    %10 = vector.load %arg5[%c0_7, %c0_8] : memref<128x256xbf16, #tpu.memory_space<vmem>>, vector<128x256xbf16>
    %11 = arith.truncf %9 : vector<308x128xf32> to vector<308x128xbf16>
    %cst_9 = arith.constant dense<0.000000e+00> : vector<308x256xf32>
    %12 = tpu.matmul %11, %10, %cst_9 {dimension_numbers = #tpu.dot_dimension_numbers<[1], [0], [0], [1], [0, 0, 1, 1], [], []>} : vector<308x128xbf16>, vector<128x256xbf16>, vector<308x256xf32> -> vector<308x256xf32>
    %c0_10 = arith.constant 0 : index
    %c0_11 = arith.constant 0 : index
    %13 = vector.load %arg6[%c0_10, %c0_11] : memref<1x256xf32, #tpu.memory_space<vmem>>, vector<1x256xf32>
    %14 = vector.broadcast %13 : vector<1x256xf32> to vector<308x256xf32>
    %15 = arith.addf %12, %14 : vector<308x256xf32>
    %16 = arith.truncf %15 : vector<308x256xf32> to vector<308x256xbf16>
    %c0_12 = arith.constant 0 : index
    %c0_13 = arith.constant 0 : index
    %17 = vector.load %arg7[%c0_12, %c0_13] : memref<308x256xbf16, #tpu.memory_space<vmem>>, vector<308x256xbf16>
    tpu.vector_store %arg7[%c0_12, %c0_13], %16 {strides = array<i32>} : memref<308x256xbf16, #tpu.memory_space<vmem>>, vector<308x256xbf16>,
    return
  }
  func.func @transform_0(%arg0: i32) -> (i32, i32) {
    %c0_i32 = arith.constant 0 : i32
    %c0_i32_0 = arith.constant 0 : i32
    %c0_i32_1 = arith.constant 0 : i32
    return %c0_i32, %c0_i32_0 : i32, i32
  }
  func.func @transform_1(%arg0: i32) -> (i32, i32) {
    %c0_i32 = arith.constant 0 : i32
    %c0_i32_0 = arith.constant 0 : i32
    %c0_i32_1 = arith.constant 0 : i32
    return %c0_i32, %c0_i32_0 : i32, i32
  }
  func.func @transform_2(%arg0: i32) -> (i32, i32) {
    %c0_i32 = arith.constant 0 : i32
    %c0_i32_0 = arith.constant 0 : i32
    %c0_i32_1 = arith.constant 0 : i32
    return %c0_i32, %c0_i32_0 : i32, i32
  }
  func.func @transform_3(%arg0: i32) -> (i32, i32) {
    %c0_i32 = arith.constant 0 : i32
    %c0_i32_0 = arith.constant 0 : i32
    %c0_i32_1 = arith.constant 0 : i32
    return %c0_i32, %c0_i32_0 : i32, i32
  }
  func.func @transform_4(%arg0: i32) -> (i32, i32) {
    %c0_i32 = arith.constant 0 : i32
    %c0_i32_0 = arith.constant 0 : i32
    %c0_i32_1 = arith.constant 0 : i32
    return %c0_i32, %c0_i32_0 : i32, i32
  }
  func.func @transform_5(%arg0: i32) -> (i32, i32) {
    %c0_i32 = arith.constant 0 : i32
    %c0_i32_0 = arith.constant 0 : i32
    %c0_i32_1 = arith.constant 0 : i32
    return %c0_i32, %c0_i32_0 : i32, i32
  }
  func.func @transform_6(%arg0: i32) -> (i32, i32) {
    %c0_i32 = arith.constant 0 : i32
    %c0_i32_0 = arith.constant 0 : i32
    %c0_i32_1 = arith.constant 0 : i32
    return %c0_i32, %c0_i32_0 : i32, i32
  }
}

module attributes {stable_mosaic.version = 11 : i64} {
  func.func @_encoder_layer_kernel(%arg0: i32, %arg1: memref<2x32x128xbf16, #tpu.memory_space<vmem>>, %arg2: memref<128x768xbf16, #tpu.memory_space<vmem>>, %arg3: memref<256x128xbf16, #tpu.memory_space<vmem>>, %arg4: memref<9x128xf32, #tpu.memory_space<vmem>>, %arg5: memref<1x256xf32, #tpu.memory_space<vmem>>, %arg6: memref<2x32x128xbf16, #tpu.memory_space<vmem>>) attributes {dimension_semantics = [#tpu.dimension_semantics<parallel>], iteration_bounds = array<i64: 2>, scalar_prefetch = 0 : i64, scratch_operands = 0 : i64, tpu.core_type = #tpu.core_type<tc>, window_params = [{transform_indices = @transform_0, window_bounds = array<i64: 2, 32, 128>}, {pipeline_mode = #tpu.pipeline_mode<synchronous>, transform_indices = @transform_1, window_bounds = array<i64: 128, 768>}, {pipeline_mode = #tpu.pipeline_mode<synchronous>, transform_indices = @transform_2, window_bounds = array<i64: 256, 128>}, {pipeline_mode = #tpu.pipeline_mode<synchronous>, transform_indices = @transform_3, window_bounds = array<i64: 9, 128>}, {pipeline_mode = #tpu.pipeline_mode<synchronous>, transform_indices = @transform_4, window_bounds = array<i64: 1, 256>}, {transform_indices = @transform_5, window_bounds = array<i64: 2, 32, 128>}]} {
    %c0 = arith.constant 0 : index
    %c0_0 = arith.constant 0 : index
    %0 = vector.load %arg4[%c0, %c0_0] : memref<9x128xf32, #tpu.memory_space<vmem>>, vector<9x128xf32>
    %c0_1 = arith.constant 0 : index
    %c0_2 = arith.constant 0 : index
    %c0_3 = arith.constant 0 : index
    %1 = vector.load %arg1[%c0_1, %c0_2, %c0_3] : memref<2x32x128xbf16, #tpu.memory_space<vmem>>, vector<2x32x128xbf16>
    %2 = arith.extf %1 : vector<2x32x128xbf16> to vector<2x32x128xf32>
    %3 = vector.shape_cast %2 : vector<2x32x128xf32> to vector<64x128xf32>
    %4 = vector.extract_strided_slice %0 {offsets = [0, 0], sizes = [1, 128], strides = [1, 1]} : vector<9x128xf32> to vector<1x128xf32>
    %5 = vector.shape_cast %4 : vector<1x128xf32> to vector<128xf32>
    %6 = vector.extract_strided_slice %0 {offsets = [1, 0], sizes = [1, 128], strides = [1, 1]} : vector<9x128xf32> to vector<1x128xf32>
    %7 = vector.shape_cast %6 : vector<1x128xf32> to vector<128xf32>
    %cst = arith.constant dense<0.000000e+00> : vector<64xf32>
    %8 = vector.multi_reduction <add>, %3, %cst [1] : vector<64x128xf32> to vector<64xf32>
    %9 = vector.shape_cast %8 : vector<64xf32> to vector<64x1xf32>
    %cst_4 = arith.constant 1.280000e+02 : f32
    %10 = vector.broadcast %cst_4 : f32 to vector<64x1xf32>
    %11 = arith.divf %9, %10 : vector<64x1xf32>
    %12 = vector.broadcast %11 : vector<64x1xf32> to vector<64x128xf32>
    %13 = arith.subf %3, %12 : vector<64x128xf32>
    %14 = arith.mulf %13, %13 : vector<64x128xf32>
    %cst_5 = arith.constant dense<0.000000e+00> : vector<64xf32>
    %15 = vector.multi_reduction <add>, %14, %cst_5 [1] : vector<64x128xf32> to vector<64xf32>
    %16 = vector.shape_cast %15 : vector<64xf32> to vector<64x1xf32>
    %cst_6 = arith.constant 1.280000e+02 : f32
    %17 = vector.broadcast %cst_6 : f32 to vector<64x1xf32>
    %18 = arith.divf %16, %17 : vector<64x1xf32>
    %cst_7 = arith.constant 9.99999974E-6 : f32
    %19 = vector.broadcast %cst_7 : f32 to vector<64x1xf32>
    %20 = arith.addf %18, %19 : vector<64x1xf32>
    %21 = math.rsqrt %20 : vector<64x1xf32>
    %22 = vector.broadcast %21 : vector<64x1xf32> to vector<64x128xf32>
    %23 = arith.mulf %13, %22 : vector<64x128xf32>
    %24 = vector.shape_cast %5 : vector<128xf32> to vector<1x128xf32>
    %25 = vector.broadcast %24 : vector<1x128xf32> to vector<64x128xf32>
    %26 = arith.mulf %23, %25 : vector<64x128xf32>
    %27 = vector.shape_cast %7 : vector<128xf32> to vector<1x128xf32>
    %28 = vector.broadcast %27 : vector<1x128xf32> to vector<64x128xf32>
    %29 = arith.addf %26, %28 : vector<64x128xf32>
    %c0_8 = arith.constant 0 : index
    %c0_9 = arith.constant 0 : index
    %30 = vector.load %arg2[%c0_8, %c0_9] : memref<128x768xbf16, #tpu.memory_space<vmem>>, vector<128x384xbf16>
    %31 = arith.truncf %29 : vector<64x128xf32> to vector<64x128xbf16>
    %cst_10 = arith.constant dense<0.000000e+00> : vector<64x384xf32>
    %32 = tpu.matmul %31, %30, %cst_10 {dimension_numbers = #tpu.dot_dimension_numbers<[1], [0], [0], [1], [0, 0, 1, 1], [], []>} : vector<64x128xbf16>, vector<128x384xbf16>, vector<64x384xf32> -> vector<64x384xf32>
    %33 = vector.extract_strided_slice %32 {offsets = [0, 0], sizes = [64, 128], strides = [1, 1]} : vector<64x384xf32> to vector<64x128xf32>
    %34 = vector.extract_strided_slice %0 {offsets = [2, 0], sizes = [1, 128], strides = [1, 1]} : vector<9x128xf32> to vector<1x128xf32>
    %35 = vector.shape_cast %34 : vector<1x128xf32> to vector<128xf32>
    %36 = vector.shape_cast %35 : vector<128xf32> to vector<1x128xf32>
    %37 = vector.broadcast %36 : vector<1x128xf32> to vector<64x128xf32>
    %38 = arith.addf %33, %37 : vector<64x128xf32>
    %cst_11 = arith.constant 0.176776692 : f32
    %39 = vector.broadcast %cst_11 : f32 to vector<64x128xf32>
    %40 = arith.mulf %38, %39 : vector<64x128xf32>
    %41 = vector.extract_strided_slice %32 {offsets = [0, 128], sizes = [64, 128], strides = [1, 1]} : vector<64x384xf32> to vector<64x128xf32>
    %42 = vector.extract_strided_slice %0 {offsets = [3, 0], sizes = [1, 128], strides = [1, 1]} : vector<9x128xf32> to vector<1x128xf32>
    %43 = vector.shape_cast %42 : vector<1x128xf32> to vector<128xf32>
    %44 = vector.shape_cast %43 : vector<128xf32> to vector<1x128xf32>
    %45 = vector.broadcast %44 : vector<1x128xf32> to vector<64x128xf32>
    %46 = arith.addf %41, %45 : vector<64x128xf32>
    %47 = vector.extract_strided_slice %32 {offsets = [0, 256], sizes = [64, 128], strides = [1, 1]} : vector<64x384xf32> to vector<64x128xf32>
    %48 = vector.extract_strided_slice %0 {offsets = [4, 0], sizes = [1, 128], strides = [1, 1]} : vector<9x128xf32> to vector<1x128xf32>
    %49 = vector.shape_cast %48 : vector<1x128xf32> to vector<128xf32>
    %50 = vector.shape_cast %49 : vector<128xf32> to vector<1x128xf32>
    %51 = vector.broadcast %50 : vector<1x128xf32> to vector<64x128xf32>
    %52 = arith.addf %47, %51 : vector<64x128xf32>
    %53 = vector.shape_cast %40 : vector<64x128xf32> to vector<2x32x128xf32>
    %54 = vector.shape_cast %46 : vector<64x128xf32> to vector<2x32x128xf32>
    %55 = vector.shape_cast %52 : vector<64x128xf32> to vector<2x32x128xf32>
    %56 = vector.extract_strided_slice %53 {offsets = [0, 0, 0], sizes = [2, 32, 32], strides = [1, 1, 1]} : vector<2x32x128xf32> to vector<2x32x32xf32>
    %57 = arith.truncf %56 : vector<2x32x32xf32> to vector<2x32x32xbf16>
    %58 = vector.extract_strided_slice %54 {offsets = [0, 0, 0], sizes = [2, 32, 32], strides = [1, 1, 1]} : vector<2x32x128xf32> to vector<2x32x32xf32>
    %59 = arith.truncf %58 : vector<2x32x32xf32> to vector<2x32x32xbf16>
    "tpu.trace_start"() <{level = 10 : i32, message = "btd,bsd->bts"}> : () -> ()
    %cst_12 = arith.constant dense<0.000000e+00> : vector<2x32x32xf32>
    %60 = tpu.matmul %57, %59, %cst_12 {dimension_numbers = #tpu.dot_dimension_numbers<[2], [2], [1], [1], [0, 0, 0, 1, 1, 1], [0], [0]>} : vector<2x32x32xbf16>, vector<2x32x32xbf16>, vector<2x32x32xf32> -> vector<2x32x32xf32>
    "tpu.trace_stop"() : () -> ()
    %cst_13 = arith.constant dense<0xFF800000> : vector<2x32xf32>
    %61 = vector.multi_reduction <maximumf>, %60, %cst_13 [2] : vector<2x32x32xf32> to vector<2x32xf32>
    %62 = vector.shape_cast %61 : vector<2x32xf32> to vector<2x32x1xf32>
    %63 = vector.broadcast %62 : vector<2x32x1xf32> to vector<2x32x32xf32>
    %64 = arith.subf %60, %63 : vector<2x32x32xf32>
    %65 = math.exp %64 : vector<2x32x32xf32>
    %cst_14 = arith.constant dense<0.000000e+00> : vector<2x32xf32>
    %66 = vector.multi_reduction <add>, %65, %cst_14 [2] : vector<2x32x32xf32> to vector<2x32xf32>
    %67 = vector.shape_cast %66 : vector<2x32xf32> to vector<2x32x1xf32>
    %68 = tpu.reciprocal %67 {approx = true} : vector<2x32x1xf32> -> vector<2x32x1xf32>
    %69 = vector.broadcast %68 : vector<2x32x1xf32> to vector<2x32x32xf32>
    %70 = arith.mulf %65, %69 : vector<2x32x32xf32>
    %71 = arith.truncf %70 : vector<2x32x32xf32> to vector<2x32x32xbf16>
    %72 = vector.extract_strided_slice %55 {offsets = [0, 0, 0], sizes = [2, 32, 32], strides = [1, 1, 1]} : vector<2x32x128xf32> to vector<2x32x32xf32>
    %73 = arith.truncf %72 : vector<2x32x32xf32> to vector<2x32x32xbf16>
    "tpu.trace_start"() <{level = 10 : i32, message = "bts,bsd->btd"}> : () -> ()
    %cst_15 = arith.constant dense<0.000000e+00> : vector<2x32x32xf32>
    %74 = tpu.matmul %71, %73, %cst_15 {dimension_numbers = #tpu.dot_dimension_numbers<[2], [1], [1], [2], [0, 0, 0, 1, 1, 2], [0], [0]>} : vector<2x32x32xbf16>, vector<2x32x32xbf16>, vector<2x32x32xf32> -> vector<2x32x32xf32>
    "tpu.trace_stop"() : () -> ()
    %75 = vector.extract_strided_slice %53 {offsets = [0, 0, 32], sizes = [2, 32, 32], strides = [1, 1, 1]} : vector<2x32x128xf32> to vector<2x32x32xf32>
    %76 = arith.truncf %75 : vector<2x32x32xf32> to vector<2x32x32xbf16>
    %77 = vector.extract_strided_slice %54 {offsets = [0, 0, 32], sizes = [2, 32, 32], strides = [1, 1, 1]} : vector<2x32x128xf32> to vector<2x32x32xf32>
    %78 = arith.truncf %77 : vector<2x32x32xf32> to vector<2x32x32xbf16>
    "tpu.trace_start"() <{level = 10 : i32, message = "btd,bsd->bts"}> : () -> ()
    %cst_16 = arith.constant dense<0.000000e+00> : vector<2x32x32xf32>
    %79 = tpu.matmul %76, %78, %cst_16 {dimension_numbers = #tpu.dot_dimension_numbers<[2], [2], [1], [1], [0, 0, 0, 1, 1, 1], [0], [0]>} : vector<2x32x32xbf16>, vector<2x32x32xbf16>, vector<2x32x32xf32> -> vector<2x32x32xf32>
    "tpu.trace_stop"() : () -> ()
    %cst_17 = arith.constant dense<0xFF800000> : vector<2x32xf32>
    %80 = vector.multi_reduction <maximumf>, %79, %cst_17 [2] : vector<2x32x32xf32> to vector<2x32xf32>
    %81 = vector.shape_cast %80 : vector<2x32xf32> to vector<2x32x1xf32>
    %82 = vector.broadcast %81 : vector<2x32x1xf32> to vector<2x32x32xf32>
    %83 = arith.subf %79, %82 : vector<2x32x32xf32>
    %84 = math.exp %83 : vector<2x32x32xf32>
    %cst_18 = arith.constant dense<0.000000e+00> : vector<2x32xf32>
    %85 = vector.multi_reduction <add>, %84, %cst_18 [2] : vector<2x32x32xf32> to vector<2x32xf32>
    %86 = vector.shape_cast %85 : vector<2x32xf32> to vector<2x32x1xf32>
    %87 = tpu.reciprocal %86 {approx = true} : vector<2x32x1xf32> -> vector<2x32x1xf32>
    %88 = vector.broadcast %87 : vector<2x32x1xf32> to vector<2x32x32xf32>
    %89 = arith.mulf %84, %88 : vector<2x32x32xf32>
    %90 = arith.truncf %89 : vector<2x32x32xf32> to vector<2x32x32xbf16>
    %91 = vector.extract_strided_slice %55 {offsets = [0, 0, 32], sizes = [2, 32, 32], strides = [1, 1, 1]} : vector<2x32x128xf32> to vector<2x32x32xf32>
    %92 = arith.truncf %91 : vector<2x32x32xf32> to vector<2x32x32xbf16>
    "tpu.trace_start"() <{level = 10 : i32, message = "bts,bsd->btd"}> : () -> ()
    %cst_19 = arith.constant dense<0.000000e+00> : vector<2x32x32xf32>
    %93 = tpu.matmul %90, %92, %cst_19 {dimension_numbers = #tpu.dot_dimension_numbers<[2], [1], [1], [2], [0, 0, 0, 1, 1, 2], [0], [0]>} : vector<2x32x32xbf16>, vector<2x32x32xbf16>, vector<2x32x32xf32> -> vector<2x32x32xf32>
    "tpu.trace_stop"() : () -> ()
    %94 = vector.extract_strided_slice %53 {offsets = [0, 0, 64], sizes = [2, 32, 32], strides = [1, 1, 1]} : vector<2x32x128xf32> to vector<2x32x32xf32>
    %95 = arith.truncf %94 : vector<2x32x32xf32> to vector<2x32x32xbf16>
    %96 = vector.extract_strided_slice %54 {offsets = [0, 0, 64], sizes = [2, 32, 32], strides = [1, 1, 1]} : vector<2x32x128xf32> to vector<2x32x32xf32>
    %97 = arith.truncf %96 : vector<2x32x32xf32> to vector<2x32x32xbf16>
    "tpu.trace_start"() <{level = 10 : i32, message = "btd,bsd->bts"}> : () -> ()
    %cst_20 = arith.constant dense<0.000000e+00> : vector<2x32x32xf32>
    %98 = tpu.matmul %95, %97, %cst_20 {dimension_numbers = #tpu.dot_dimension_numbers<[2], [2], [1], [1], [0, 0, 0, 1, 1, 1], [0], [0]>} : vector<2x32x32xbf16>, vector<2x32x32xbf16>, vector<2x32x32xf32> -> vector<2x32x32xf32>
    "tpu.trace_stop"() : () -> ()
    %cst_21 = arith.constant dense<0xFF800000> : vector<2x32xf32>
    %99 = vector.multi_reduction <maximumf>, %98, %cst_21 [2] : vector<2x32x32xf32> to vector<2x32xf32>
    %100 = vector.shape_cast %99 : vector<2x32xf32> to vector<2x32x1xf32>
    %101 = vector.broadcast %100 : vector<2x32x1xf32> to vector<2x32x32xf32>
    %102 = arith.subf %98, %101 : vector<2x32x32xf32>
    %103 = math.exp %102 : vector<2x32x32xf32>
    %cst_22 = arith.constant dense<0.000000e+00> : vector<2x32xf32>
    %104 = vector.multi_reduction <add>, %103, %cst_22 [2] : vector<2x32x32xf32> to vector<2x32xf32>
    %105 = vector.shape_cast %104 : vector<2x32xf32> to vector<2x32x1xf32>
    %106 = tpu.reciprocal %105 {approx = true} : vector<2x32x1xf32> -> vector<2x32x1xf32>
    %107 = vector.broadcast %106 : vector<2x32x1xf32> to vector<2x32x32xf32>
    %108 = arith.mulf %103, %107 : vector<2x32x32xf32>
    %109 = arith.truncf %108 : vector<2x32x32xf32> to vector<2x32x32xbf16>
    %110 = vector.extract_strided_slice %55 {offsets = [0, 0, 64], sizes = [2, 32, 32], strides = [1, 1, 1]} : vector<2x32x128xf32> to vector<2x32x32xf32>
    %111 = arith.truncf %110 : vector<2x32x32xf32> to vector<2x32x32xbf16>
    "tpu.trace_start"() <{level = 10 : i32, message = "bts,bsd->btd"}> : () -> ()
    %cst_23 = arith.constant dense<0.000000e+00> : vector<2x32x32xf32>
    %112 = tpu.matmul %109, %111, %cst_23 {dimension_numbers = #tpu.dot_dimension_numbers<[2], [1], [1], [2], [0, 0, 0, 1, 1, 2], [0], [0]>} : vector<2x32x32xbf16>, vector<2x32x32xbf16>, vector<2x32x32xf32> -> vector<2x32x32xf32>
    "tpu.trace_stop"() : () -> ()
    %113 = vector.extract_strided_slice %53 {offsets = [0, 0, 96], sizes = [2, 32, 32], strides = [1, 1, 1]} : vector<2x32x128xf32> to vector<2x32x32xf32>
    %114 = arith.truncf %113 : vector<2x32x32xf32> to vector<2x32x32xbf16>
    %115 = vector.extract_strided_slice %54 {offsets = [0, 0, 96], sizes = [2, 32, 32], strides = [1, 1, 1]} : vector<2x32x128xf32> to vector<2x32x32xf32>
    %116 = arith.truncf %115 : vector<2x32x32xf32> to vector<2x32x32xbf16>
    "tpu.trace_start"() <{level = 10 : i32, message = "btd,bsd->bts"}> : () -> ()
    %cst_24 = arith.constant dense<0.000000e+00> : vector<2x32x32xf32>
    %117 = tpu.matmul %114, %116, %cst_24 {dimension_numbers = #tpu.dot_dimension_numbers<[2], [2], [1], [1], [0, 0, 0, 1, 1, 1], [0], [0]>} : vector<2x32x32xbf16>, vector<2x32x32xbf16>, vector<2x32x32xf32> -> vector<2x32x32xf32>
    "tpu.trace_stop"() : () -> ()
    %cst_25 = arith.constant dense<0xFF800000> : vector<2x32xf32>
    %118 = vector.multi_reduction <maximumf>, %117, %cst_25 [2] : vector<2x32x32xf32> to vector<2x32xf32>
    %119 = vector.shape_cast %118 : vector<2x32xf32> to vector<2x32x1xf32>
    %120 = vector.broadcast %119 : vector<2x32x1xf32> to vector<2x32x32xf32>
    %121 = arith.subf %117, %120 : vector<2x32x32xf32>
    %122 = math.exp %121 : vector<2x32x32xf32>
    %cst_26 = arith.constant dense<0.000000e+00> : vector<2x32xf32>
    %123 = vector.multi_reduction <add>, %122, %cst_26 [2] : vector<2x32x32xf32> to vector<2x32xf32>
    %124 = vector.shape_cast %123 : vector<2x32xf32> to vector<2x32x1xf32>
    %125 = tpu.reciprocal %124 {approx = true} : vector<2x32x1xf32> -> vector<2x32x1xf32>
    %126 = vector.broadcast %125 : vector<2x32x1xf32> to vector<2x32x32xf32>
    %127 = arith.mulf %122, %126 : vector<2x32x32xf32>
    %128 = arith.truncf %127 : vector<2x32x32xf32> to vector<2x32x32xbf16>
    %129 = vector.extract_strided_slice %55 {offsets = [0, 0, 96], sizes = [2, 32, 32], strides = [1, 1, 1]} : vector<2x32x128xf32> to vector<2x32x32xf32>
    %130 = arith.truncf %129 : vector<2x32x32xf32> to vector<2x32x32xbf16>
    "tpu.trace_start"() <{level = 10 : i32, message = "bts,bsd->btd"}> : () -> ()
    %cst_27 = arith.constant dense<0.000000e+00> : vector<2x32x32xf32>
    %131 = tpu.matmul %128, %130, %cst_27 {dimension_numbers = #tpu.dot_dimension_numbers<[2], [1], [1], [2], [0, 0, 0, 1, 1, 2], [0], [0]>} : vector<2x32x32xbf16>, vector<2x32x32xbf16>, vector<2x32x32xf32> -> vector<2x32x32xf32>
    "tpu.trace_stop"() : () -> ()
    %132 = tpu.concatenate %74, %93, %112, %131 in 2 : vector<2x32x32xf32>, vector<2x32x32xf32>, vector<2x32x32xf32>, vector<2x32x32xf32> -> vector<2x32x128xf32>
    %133 = vector.shape_cast %132 : vector<2x32x128xf32> to vector<64x128xf32>
    %c0_28 = arith.constant 0 : index
    %c384 = arith.constant 384 : index
    %134 = vector.load %arg2[%c0_28, %c384] : memref<128x768xbf16, #tpu.memory_space<vmem>>, vector<128x128xbf16>
    %135 = arith.truncf %133 : vector<64x128xf32> to vector<64x128xbf16>
    %cst_29 = arith.constant dense<0.000000e+00> : vector<64x128xf32>
    %136 = tpu.matmul %135, %134, %cst_29 {dimension_numbers = #tpu.dot_dimension_numbers<[1], [0], [0], [1], [0, 0, 1, 1], [], []>} : vector<64x128xbf16>, vector<128x128xbf16>, vector<64x128xf32> -> vector<64x128xf32>
    %137 = arith.addf %3, %136 : vector<64x128xf32>
    %138 = vector.extract_strided_slice %0 {offsets = [5, 0], sizes = [1, 128], strides = [1, 1]} : vector<9x128xf32> to vector<1x128xf32>
    %139 = vector.shape_cast %138 : vector<1x128xf32> to vector<128xf32>
    %140 = vector.shape_cast %139 : vector<128xf32> to vector<1x128xf32>
    %141 = vector.broadcast %140 : vector<1x128xf32> to vector<64x128xf32>
    %142 = arith.addf %137, %141 : vector<64x128xf32>
    %143 = vector.extract_strided_slice %0 {offsets = [6, 0], sizes = [1, 128], strides = [1, 1]} : vector<9x128xf32> to vector<1x128xf32>
    %144 = vector.shape_cast %143 : vector<1x128xf32> to vector<128xf32>
    %145 = vector.extract_strided_slice %0 {offsets = [7, 0], sizes = [1, 128], strides = [1, 1]} : vector<9x128xf32> to vector<1x128xf32>
    %146 = vector.shape_cast %145 : vector<1x128xf32> to vector<128xf32>
    %cst_30 = arith.constant dense<0.000000e+00> : vector<64xf32>
    %147 = vector.multi_reduction <add>, %142, %cst_30 [1] : vector<64x128xf32> to vector<64xf32>
    %148 = vector.shape_cast %147 : vector<64xf32> to vector<64x1xf32>
    %cst_31 = arith.constant 1.280000e+02 : f32
    %149 = vector.broadcast %cst_31 : f32 to vector<64x1xf32>
    %150 = arith.divf %148, %149 : vector<64x1xf32>
    %151 = vector.broadcast %150 : vector<64x1xf32> to vector<64x128xf32>
    %152 = arith.subf %142, %151 : vector<64x128xf32>
    %153 = arith.mulf %152, %152 : vector<64x128xf32>
    %cst_32 = arith.constant dense<0.000000e+00> : vector<64xf32>
    %154 = vector.multi_reduction <add>, %153, %cst_32 [1] : vector<64x128xf32> to vector<64xf32>
    %155 = vector.shape_cast %154 : vector<64xf32> to vector<64x1xf32>
    %cst_33 = arith.constant 1.280000e+02 : f32
    %156 = vector.broadcast %cst_33 : f32 to vector<64x1xf32>
    %157 = arith.divf %155, %156 : vector<64x1xf32>
    %cst_34 = arith.constant 9.99999974E-6 : f32
    %158 = vector.broadcast %cst_34 : f32 to vector<64x1xf32>
    %159 = arith.addf %157, %158 : vector<64x1xf32>
    %160 = math.rsqrt %159 : vector<64x1xf32>
    %161 = vector.broadcast %160 : vector<64x1xf32> to vector<64x128xf32>
    %162 = arith.mulf %152, %161 : vector<64x128xf32>
    %163 = vector.shape_cast %144 : vector<128xf32> to vector<1x128xf32>
    %164 = vector.broadcast %163 : vector<1x128xf32> to vector<64x128xf32>
    %165 = arith.mulf %162, %164 : vector<64x128xf32>
    %166 = vector.shape_cast %146 : vector<128xf32> to vector<1x128xf32>
    %167 = vector.broadcast %166 : vector<1x128xf32> to vector<64x128xf32>
    %168 = arith.addf %165, %167 : vector<64x128xf32>
    %c0_35 = arith.constant 0 : index
    %c512 = arith.constant 512 : index
    %169 = vector.load %arg2[%c0_35, %c512] : memref<128x768xbf16, #tpu.memory_space<vmem>>, vector<128x256xbf16>
    %170 = arith.truncf %168 : vector<64x128xf32> to vector<64x128xbf16>
    %cst_36 = arith.constant dense<0.000000e+00> : vector<64x256xf32>
    %171 = tpu.matmul %170, %169, %cst_36 {dimension_numbers = #tpu.dot_dimension_numbers<[1], [0], [0], [1], [0, 0, 1, 1], [], []>} : vector<64x128xbf16>, vector<128x256xbf16>, vector<64x256xf32> -> vector<64x256xf32>
    %c0_37 = arith.constant 0 : index
    %c0_38 = arith.constant 0 : index
    %172 = vector.load %arg5[%c0_37, %c0_38] : memref<1x256xf32, #tpu.memory_space<vmem>>, vector<1x256xf32>
    %173 = vector.shape_cast %172 : vector<1x256xf32> to vector<256xf32>
    %174 = vector.shape_cast %173 : vector<256xf32> to vector<1x256xf32>
    %175 = vector.broadcast %174 : vector<1x256xf32> to vector<64x256xf32>
    %176 = arith.addf %171, %175 : vector<64x256xf32>
    %cst_39 = arith.constant 1.702000e+00 : f32
    %177 = vector.broadcast %cst_39 : f32 to vector<64x256xf32>
    %178 = arith.mulf %177, %176 : vector<64x256xf32>
    %179 = arith.negf %178 : vector<64x256xf32>
    %180 = math.exp %179 : vector<64x256xf32>
    %cst_40 = arith.constant 1.000000e+00 : f32
    %181 = vector.broadcast %cst_40 : f32 to vector<64x256xf32>
    %182 = arith.addf %181, %180 : vector<64x256xf32>
    %183 = arith.divf %181, %182 : vector<64x256xf32>
    %184 = arith.mulf %176, %183 : vector<64x256xf32>
    %c0_41 = arith.constant 0 : index
    %c0_42 = arith.constant 0 : index
    %185 = vector.load %arg3[%c0_41, %c0_42] : memref<256x128xbf16, #tpu.memory_space<vmem>>, vector<256x128xbf16>
    %186 = arith.truncf %184 : vector<64x256xf32> to vector<64x256xbf16>
    %cst_43 = arith.constant dense<0.000000e+00> : vector<64x128xf32>
    %187 = tpu.matmul %186, %185, %cst_43 {dimension_numbers = #tpu.dot_dimension_numbers<[1], [0], [0], [1], [0, 0, 1, 1], [], []>} : vector<64x256xbf16>, vector<256x128xbf16>, vector<64x128xf32> -> vector<64x128xf32>
    %188 = arith.addf %142, %187 : vector<64x128xf32>
    %189 = vector.extract_strided_slice %0 {offsets = [8, 0], sizes = [1, 128], strides = [1, 1]} : vector<9x128xf32> to vector<1x128xf32>
    %190 = vector.shape_cast %189 : vector<1x128xf32> to vector<128xf32>
    %191 = vector.shape_cast %190 : vector<128xf32> to vector<1x128xf32>
    %192 = vector.broadcast %191 : vector<1x128xf32> to vector<64x128xf32>
    %193 = arith.addf %188, %192 : vector<64x128xf32>
    %194 = vector.shape_cast %193 : vector<64x128xf32> to vector<2x32x128xf32>
    %195 = arith.truncf %194 : vector<2x32x128xf32> to vector<2x32x128xbf16>
    %c0_44 = arith.constant 0 : index
    %c0_45 = arith.constant 0 : index
    %c0_46 = arith.constant 0 : index
    %196 = vector.load %arg6[%c0_44, %c0_45, %c0_46] : memref<2x32x128xbf16, #tpu.memory_space<vmem>>, vector<2x32x128xbf16>
    tpu.vector_store %arg6[%c0_44, %c0_45, %c0_46], %195 {strides = array<i32>} : memref<2x32x128xbf16, #tpu.memory_space<vmem>>, vector<2x32x128xbf16>,
    return
  }
  func.func @transform_0(%arg0: i32) -> (i32, i32, i32) {
    %c0_i32 = arith.constant 0 : i32
    %c0_i32_0 = arith.constant 0 : i32
    %c0_i32_1 = arith.constant 0 : i32
    return %arg0, %c0_i32, %c0_i32_0 : i32, i32, i32
  }
  func.func @transform_1(%arg0: i32) -> (i32, i32) {
    %c0_i32 = arith.constant 0 : i32
    %c0_i32_0 = arith.constant 0 : i32
    %c0_i32_1 = arith.constant 0 : i32
    return %c0_i32, %c0_i32_0 : i32, i32
  }
  func.func @transform_2(%arg0: i32) -> (i32, i32) {
    %c0_i32 = arith.constant 0 : i32
    %c0_i32_0 = arith.constant 0 : i32
    %c0_i32_1 = arith.constant 0 : i32
    return %c0_i32, %c0_i32_0 : i32, i32
  }
  func.func @transform_3(%arg0: i32) -> (i32, i32) {
    %c0_i32 = arith.constant 0 : i32
    %c0_i32_0 = arith.constant 0 : i32
    %c0_i32_1 = arith.constant 0 : i32
    return %c0_i32, %c0_i32_0 : i32, i32
  }
  func.func @transform_4(%arg0: i32) -> (i32, i32) {
    %c0_i32 = arith.constant 0 : i32
    %c0_i32_0 = arith.constant 0 : i32
    %c0_i32_1 = arith.constant 0 : i32
    return %c0_i32, %c0_i32_0 : i32, i32
  }
  func.func @transform_5(%arg0: i32) -> (i32, i32, i32) {
    %c0_i32 = arith.constant 0 : i32
    %c0_i32_0 = arith.constant 0 : i32
    %c0_i32_1 = arith.constant 0 : i32
    return %arg0, %c0_i32, %c0_i32_0 : i32, i32, i32
  }
}

module attributes {stable_mosaic.version = 11 : i64} {
  func.func @_bridge_layer_kernel(%arg0: i32, %arg1: memref<2x32x128xbf16, #tpu.memory_space<vmem>>, %arg2: memref<2x77x256xbf16, #tpu.memory_space<vmem>>, %arg3: memref<128x1280xbf16, #tpu.memory_space<vmem>>, %arg4: memref<256x256xbf16, #tpu.memory_space<vmem>>, %arg5: memref<14x128xf32, #tpu.memory_space<vmem>>, %arg6: memref<2x256xf32, #tpu.memory_space<vmem>>, %arg7: memref<2x32x128xbf16, #tpu.memory_space<vmem>>) attributes {dimension_semantics = [#tpu.dimension_semantics<parallel>], iteration_bounds = array<i64: 2>, scalar_prefetch = 0 : i64, scratch_operands = 0 : i64, tpu.core_type = #tpu.core_type<tc>, window_params = [{transform_indices = @transform_0, window_bounds = array<i64: 2, 32, 128>}, {transform_indices = @transform_1, window_bounds = array<i64: 2, 77, 256>}, {pipeline_mode = #tpu.pipeline_mode<synchronous>, transform_indices = @transform_2, window_bounds = array<i64: 128, 1280>}, {pipeline_mode = #tpu.pipeline_mode<synchronous>, transform_indices = @transform_3, window_bounds = array<i64: 256, 256>}, {pipeline_mode = #tpu.pipeline_mode<synchronous>, transform_indices = @transform_4, window_bounds = array<i64: 14, 128>}, {pipeline_mode = #tpu.pipeline_mode<synchronous>, transform_indices = @transform_5, window_bounds = array<i64: 2, 256>}, {transform_indices = @transform_6, window_bounds = array<i64: 2, 32, 128>}]} {
    %c0 = arith.constant 0 : index
    %c0_0 = arith.constant 0 : index
    %0 = vector.load %arg5[%c0, %c0_0] : memref<14x128xf32, #tpu.memory_space<vmem>>, vector<14x128xf32>
    %c0_1 = arith.constant 0 : index
    %c0_2 = arith.constant 0 : index
    %c0_3 = arith.constant 0 : index
    %1 = vector.load %arg1[%c0_1, %c0_2, %c0_3] : memref<2x32x128xbf16, #tpu.memory_space<vmem>>, vector<2x32x128xbf16>
    %2 = arith.extf %1 : vector<2x32x128xbf16> to vector<2x32x128xf32>
    %3 = vector.shape_cast %2 : vector<2x32x128xf32> to vector<64x128xf32>
    %4 = vector.extract_strided_slice %0 {offsets = [0, 0], sizes = [1, 128], strides = [1, 1]} : vector<14x128xf32> to vector<1x128xf32>
    %5 = vector.shape_cast %4 : vector<1x128xf32> to vector<128xf32>
    %6 = vector.extract_strided_slice %0 {offsets = [1, 0], sizes = [1, 128], strides = [1, 1]} : vector<14x128xf32> to vector<1x128xf32>
    %7 = vector.shape_cast %6 : vector<1x128xf32> to vector<128xf32>
    %cst = arith.constant dense<0.000000e+00> : vector<64xf32>
    %8 = vector.multi_reduction <add>, %3, %cst [1] : vector<64x128xf32> to vector<64xf32>
    %9 = vector.shape_cast %8 : vector<64xf32> to vector<64x1xf32>
    %cst_4 = arith.constant 1.280000e+02 : f32
    %10 = vector.broadcast %cst_4 : f32 to vector<64x1xf32>
    %11 = arith.divf %9, %10 : vector<64x1xf32>
    %12 = vector.broadcast %11 : vector<64x1xf32> to vector<64x128xf32>
    %13 = arith.subf %3, %12 : vector<64x128xf32>
    %14 = arith.mulf %13, %13 : vector<64x128xf32>
    %cst_5 = arith.constant dense<0.000000e+00> : vector<64xf32>
    %15 = vector.multi_reduction <add>, %14, %cst_5 [1] : vector<64x128xf32> to vector<64xf32>
    %16 = vector.shape_cast %15 : vector<64xf32> to vector<64x1xf32>
    %cst_6 = arith.constant 1.280000e+02 : f32
    %17 = vector.broadcast %cst_6 : f32 to vector<64x1xf32>
    %18 = arith.divf %16, %17 : vector<64x1xf32>
    %cst_7 = arith.constant 9.99999974E-6 : f32
    %19 = vector.broadcast %cst_7 : f32 to vector<64x1xf32>
    %20 = arith.addf %18, %19 : vector<64x1xf32>
    %21 = math.rsqrt %20 : vector<64x1xf32>
    %22 = vector.broadcast %21 : vector<64x1xf32> to vector<64x128xf32>
    %23 = arith.mulf %13, %22 : vector<64x128xf32>
    %24 = vector.shape_cast %5 : vector<128xf32> to vector<1x128xf32>
    %25 = vector.broadcast %24 : vector<1x128xf32> to vector<64x128xf32>
    %26 = arith.mulf %23, %25 : vector<64x128xf32>
    %27 = vector.shape_cast %7 : vector<128xf32> to vector<1x128xf32>
    %28 = vector.broadcast %27 : vector<1x128xf32> to vector<64x128xf32>
    %29 = arith.addf %26, %28 : vector<64x128xf32>
    %c0_8 = arith.constant 0 : index
    %c0_9 = arith.constant 0 : index
    %30 = vector.load %arg3[%c0_8, %c0_9] : memref<128x1280xbf16, #tpu.memory_space<vmem>>, vector<128x384xbf16>
    %31 = arith.truncf %29 : vector<64x128xf32> to vector<64x128xbf16>
    %cst_10 = arith.constant dense<0.000000e+00> : vector<64x384xf32>
    %32 = tpu.matmul %31, %30, %cst_10 {dimension_numbers = #tpu.dot_dimension_numbers<[1], [0], [0], [1], [0, 0, 1, 1], [], []>} : vector<64x128xbf16>, vector<128x384xbf16>, vector<64x384xf32> -> vector<64x384xf32>
    %33 = vector.extract_strided_slice %32 {offsets = [0, 0], sizes = [64, 128], strides = [1, 1]} : vector<64x384xf32> to vector<64x128xf32>
    %34 = vector.extract_strided_slice %0 {offsets = [2, 0], sizes = [1, 128], strides = [1, 1]} : vector<14x128xf32> to vector<1x128xf32>
    %35 = vector.shape_cast %34 : vector<1x128xf32> to vector<128xf32>
    %36 = vector.shape_cast %35 : vector<128xf32> to vector<1x128xf32>
    %37 = vector.broadcast %36 : vector<1x128xf32> to vector<64x128xf32>
    %38 = arith.addf %33, %37 : vector<64x128xf32>
    %cst_11 = arith.constant 0.176776692 : f32
    %39 = vector.broadcast %cst_11 : f32 to vector<64x128xf32>
    %40 = arith.mulf %38, %39 : vector<64x128xf32>
    %41 = vector.extract_strided_slice %32 {offsets = [0, 128], sizes = [64, 128], strides = [1, 1]} : vector<64x384xf32> to vector<64x128xf32>
    %42 = vector.extract_strided_slice %0 {offsets = [3, 0], sizes = [1, 128], strides = [1, 1]} : vector<14x128xf32> to vector<1x128xf32>
    %43 = vector.shape_cast %42 : vector<1x128xf32> to vector<128xf32>
    %44 = vector.shape_cast %43 : vector<128xf32> to vector<1x128xf32>
    %45 = vector.broadcast %44 : vector<1x128xf32> to vector<64x128xf32>
    %46 = arith.addf %41, %45 : vector<64x128xf32>
    %47 = vector.extract_strided_slice %32 {offsets = [0, 256], sizes = [64, 128], strides = [1, 1]} : vector<64x384xf32> to vector<64x128xf32>
    %48 = vector.extract_strided_slice %0 {offsets = [4, 0], sizes = [1, 128], strides = [1, 1]} : vector<14x128xf32> to vector<1x128xf32>
    %49 = vector.shape_cast %48 : vector<1x128xf32> to vector<128xf32>
    %50 = vector.shape_cast %49 : vector<128xf32> to vector<1x128xf32>
    %51 = vector.broadcast %50 : vector<1x128xf32> to vector<64x128xf32>
    %52 = arith.addf %47, %51 : vector<64x128xf32>
    %53 = vector.shape_cast %40 : vector<64x128xf32> to vector<2x32x128xf32>
    %54 = vector.shape_cast %46 : vector<64x128xf32> to vector<2x32x128xf32>
    %55 = vector.shape_cast %52 : vector<64x128xf32> to vector<2x32x128xf32>
    %56 = vector.extract_strided_slice %53 {offsets = [0, 0, 0], sizes = [2, 32, 32], strides = [1, 1, 1]} : vector<2x32x128xf32> to vector<2x32x32xf32>
    %57 = arith.truncf %56 : vector<2x32x32xf32> to vector<2x32x32xbf16>
    %58 = vector.extract_strided_slice %54 {offsets = [0, 0, 0], sizes = [2, 32, 32], strides = [1, 1, 1]} : vector<2x32x128xf32> to vector<2x32x32xf32>
    %59 = arith.truncf %58 : vector<2x32x32xf32> to vector<2x32x32xbf16>
    "tpu.trace_start"() <{level = 10 : i32, message = "btd,bsd->bts"}> : () -> ()
    %cst_12 = arith.constant dense<0.000000e+00> : vector<2x32x32xf32>
    %60 = tpu.matmul %57, %59, %cst_12 {dimension_numbers = #tpu.dot_dimension_numbers<[2], [2], [1], [1], [0, 0, 0, 1, 1, 1], [0], [0]>} : vector<2x32x32xbf16>, vector<2x32x32xbf16>, vector<2x32x32xf32> -> vector<2x32x32xf32>
    "tpu.trace_stop"() : () -> ()
    %cst_13 = arith.constant dense<0xFF800000> : vector<2x32xf32>
    %61 = vector.multi_reduction <maximumf>, %60, %cst_13 [2] : vector<2x32x32xf32> to vector<2x32xf32>
    %62 = vector.shape_cast %61 : vector<2x32xf32> to vector<2x32x1xf32>
    %63 = vector.broadcast %62 : vector<2x32x1xf32> to vector<2x32x32xf32>
    %64 = arith.subf %60, %63 : vector<2x32x32xf32>
    %65 = math.exp %64 : vector<2x32x32xf32>
    %cst_14 = arith.constant dense<0.000000e+00> : vector<2x32xf32>
    %66 = vector.multi_reduction <add>, %65, %cst_14 [2] : vector<2x32x32xf32> to vector<2x32xf32>
    %67 = vector.shape_cast %66 : vector<2x32xf32> to vector<2x32x1xf32>
    %68 = tpu.reciprocal %67 {approx = true} : vector<2x32x1xf32> -> vector<2x32x1xf32>
    %69 = vector.broadcast %68 : vector<2x32x1xf32> to vector<2x32x32xf32>
    %70 = arith.mulf %65, %69 : vector<2x32x32xf32>
    %71 = arith.truncf %70 : vector<2x32x32xf32> to vector<2x32x32xbf16>
    %72 = vector.extract_strided_slice %55 {offsets = [0, 0, 0], sizes = [2, 32, 32], strides = [1, 1, 1]} : vector<2x32x128xf32> to vector<2x32x32xf32>
    %73 = arith.truncf %72 : vector<2x32x32xf32> to vector<2x32x32xbf16>
    "tpu.trace_start"() <{level = 10 : i32, message = "bts,bsd->btd"}> : () -> ()
    %cst_15 = arith.constant dense<0.000000e+00> : vector<2x32x32xf32>
    %74 = tpu.matmul %71, %73, %cst_15 {dimension_numbers = #tpu.dot_dimension_numbers<[2], [1], [1], [2], [0, 0, 0, 1, 1, 2], [0], [0]>} : vector<2x32x32xbf16>, vector<2x32x32xbf16>, vector<2x32x32xf32> -> vector<2x32x32xf32>
    "tpu.trace_stop"() : () -> ()
    %75 = vector.extract_strided_slice %53 {offsets = [0, 0, 32], sizes = [2, 32, 32], strides = [1, 1, 1]} : vector<2x32x128xf32> to vector<2x32x32xf32>
    %76 = arith.truncf %75 : vector<2x32x32xf32> to vector<2x32x32xbf16>
    %77 = vector.extract_strided_slice %54 {offsets = [0, 0, 32], sizes = [2, 32, 32], strides = [1, 1, 1]} : vector<2x32x128xf32> to vector<2x32x32xf32>
    %78 = arith.truncf %77 : vector<2x32x32xf32> to vector<2x32x32xbf16>
    "tpu.trace_start"() <{level = 10 : i32, message = "btd,bsd->bts"}> : () -> ()
    %cst_16 = arith.constant dense<0.000000e+00> : vector<2x32x32xf32>
    %79 = tpu.matmul %76, %78, %cst_16 {dimension_numbers = #tpu.dot_dimension_numbers<[2], [2], [1], [1], [0, 0, 0, 1, 1, 1], [0], [0]>} : vector<2x32x32xbf16>, vector<2x32x32xbf16>, vector<2x32x32xf32> -> vector<2x32x32xf32>
    "tpu.trace_stop"() : () -> ()
    %cst_17 = arith.constant dense<0xFF800000> : vector<2x32xf32>
    %80 = vector.multi_reduction <maximumf>, %79, %cst_17 [2] : vector<2x32x32xf32> to vector<2x32xf32>
    %81 = vector.shape_cast %80 : vector<2x32xf32> to vector<2x32x1xf32>
    %82 = vector.broadcast %81 : vector<2x32x1xf32> to vector<2x32x32xf32>
    %83 = arith.subf %79, %82 : vector<2x32x32xf32>
    %84 = math.exp %83 : vector<2x32x32xf32>
    %cst_18 = arith.constant dense<0.000000e+00> : vector<2x32xf32>
    %85 = vector.multi_reduction <add>, %84, %cst_18 [2] : vector<2x32x32xf32> to vector<2x32xf32>
    %86 = vector.shape_cast %85 : vector<2x32xf32> to vector<2x32x1xf32>
    %87 = tpu.reciprocal %86 {approx = true} : vector<2x32x1xf32> -> vector<2x32x1xf32>
    %88 = vector.broadcast %87 : vector<2x32x1xf32> to vector<2x32x32xf32>
    %89 = arith.mulf %84, %88 : vector<2x32x32xf32>
    %90 = arith.truncf %89 : vector<2x32x32xf32> to vector<2x32x32xbf16>
    %91 = vector.extract_strided_slice %55 {offsets = [0, 0, 32], sizes = [2, 32, 32], strides = [1, 1, 1]} : vector<2x32x128xf32> to vector<2x32x32xf32>
    %92 = arith.truncf %91 : vector<2x32x32xf32> to vector<2x32x32xbf16>
    "tpu.trace_start"() <{level = 10 : i32, message = "bts,bsd->btd"}> : () -> ()
    %cst_19 = arith.constant dense<0.000000e+00> : vector<2x32x32xf32>
    %93 = tpu.matmul %90, %92, %cst_19 {dimension_numbers = #tpu.dot_dimension_numbers<[2], [1], [1], [2], [0, 0, 0, 1, 1, 2], [0], [0]>} : vector<2x32x32xbf16>, vector<2x32x32xbf16>, vector<2x32x32xf32> -> vector<2x32x32xf32>
    "tpu.trace_stop"() : () -> ()
    %94 = vector.extract_strided_slice %53 {offsets = [0, 0, 64], sizes = [2, 32, 32], strides = [1, 1, 1]} : vector<2x32x128xf32> to vector<2x32x32xf32>
    %95 = arith.truncf %94 : vector<2x32x32xf32> to vector<2x32x32xbf16>
    %96 = vector.extract_strided_slice %54 {offsets = [0, 0, 64], sizes = [2, 32, 32], strides = [1, 1, 1]} : vector<2x32x128xf32> to vector<2x32x32xf32>
    %97 = arith.truncf %96 : vector<2x32x32xf32> to vector<2x32x32xbf16>
    "tpu.trace_start"() <{level = 10 : i32, message = "btd,bsd->bts"}> : () -> ()
    %cst_20 = arith.constant dense<0.000000e+00> : vector<2x32x32xf32>
    %98 = tpu.matmul %95, %97, %cst_20 {dimension_numbers = #tpu.dot_dimension_numbers<[2], [2], [1], [1], [0, 0, 0, 1, 1, 1], [0], [0]>} : vector<2x32x32xbf16>, vector<2x32x32xbf16>, vector<2x32x32xf32> -> vector<2x32x32xf32>
    "tpu.trace_stop"() : () -> ()
    %cst_21 = arith.constant dense<0xFF800000> : vector<2x32xf32>
    %99 = vector.multi_reduction <maximumf>, %98, %cst_21 [2] : vector<2x32x32xf32> to vector<2x32xf32>
    %100 = vector.shape_cast %99 : vector<2x32xf32> to vector<2x32x1xf32>
    %101 = vector.broadcast %100 : vector<2x32x1xf32> to vector<2x32x32xf32>
    %102 = arith.subf %98, %101 : vector<2x32x32xf32>
    %103 = math.exp %102 : vector<2x32x32xf32>
    %cst_22 = arith.constant dense<0.000000e+00> : vector<2x32xf32>
    %104 = vector.multi_reduction <add>, %103, %cst_22 [2] : vector<2x32x32xf32> to vector<2x32xf32>
    %105 = vector.shape_cast %104 : vector<2x32xf32> to vector<2x32x1xf32>
    %106 = tpu.reciprocal %105 {approx = true} : vector<2x32x1xf32> -> vector<2x32x1xf32>
    %107 = vector.broadcast %106 : vector<2x32x1xf32> to vector<2x32x32xf32>
    %108 = arith.mulf %103, %107 : vector<2x32x32xf32>
    %109 = arith.truncf %108 : vector<2x32x32xf32> to vector<2x32x32xbf16>
    %110 = vector.extract_strided_slice %55 {offsets = [0, 0, 64], sizes = [2, 32, 32], strides = [1, 1, 1]} : vector<2x32x128xf32> to vector<2x32x32xf32>
    %111 = arith.truncf %110 : vector<2x32x32xf32> to vector<2x32x32xbf16>
    "tpu.trace_start"() <{level = 10 : i32, message = "bts,bsd->btd"}> : () -> ()
    %cst_23 = arith.constant dense<0.000000e+00> : vector<2x32x32xf32>
    %112 = tpu.matmul %109, %111, %cst_23 {dimension_numbers = #tpu.dot_dimension_numbers<[2], [1], [1], [2], [0, 0, 0, 1, 1, 2], [0], [0]>} : vector<2x32x32xbf16>, vector<2x32x32xbf16>, vector<2x32x32xf32> -> vector<2x32x32xf32>
    "tpu.trace_stop"() : () -> ()
    %113 = vector.extract_strided_slice %53 {offsets = [0, 0, 96], sizes = [2, 32, 32], strides = [1, 1, 1]} : vector<2x32x128xf32> to vector<2x32x32xf32>
    %114 = arith.truncf %113 : vector<2x32x32xf32> to vector<2x32x32xbf16>
    %115 = vector.extract_strided_slice %54 {offsets = [0, 0, 96], sizes = [2, 32, 32], strides = [1, 1, 1]} : vector<2x32x128xf32> to vector<2x32x32xf32>
    %116 = arith.truncf %115 : vector<2x32x32xf32> to vector<2x32x32xbf16>
    "tpu.trace_start"() <{level = 10 : i32, message = "btd,bsd->bts"}> : () -> ()
    %cst_24 = arith.constant dense<0.000000e+00> : vector<2x32x32xf32>
    %117 = tpu.matmul %114, %116, %cst_24 {dimension_numbers = #tpu.dot_dimension_numbers<[2], [2], [1], [1], [0, 0, 0, 1, 1, 1], [0], [0]>} : vector<2x32x32xbf16>, vector<2x32x32xbf16>, vector<2x32x32xf32> -> vector<2x32x32xf32>
    "tpu.trace_stop"() : () -> ()
    %cst_25 = arith.constant dense<0xFF800000> : vector<2x32xf32>
    %118 = vector.multi_reduction <maximumf>, %117, %cst_25 [2] : vector<2x32x32xf32> to vector<2x32xf32>
    %119 = vector.shape_cast %118 : vector<2x32xf32> to vector<2x32x1xf32>
    %120 = vector.broadcast %119 : vector<2x32x1xf32> to vector<2x32x32xf32>
    %121 = arith.subf %117, %120 : vector<2x32x32xf32>
    %122 = math.exp %121 : vector<2x32x32xf32>
    %cst_26 = arith.constant dense<0.000000e+00> : vector<2x32xf32>
    %123 = vector.multi_reduction <add>, %122, %cst_26 [2] : vector<2x32x32xf32> to vector<2x32xf32>
    %124 = vector.shape_cast %123 : vector<2x32xf32> to vector<2x32x1xf32>
    %125 = tpu.reciprocal %124 {approx = true} : vector<2x32x1xf32> -> vector<2x32x1xf32>
    %126 = vector.broadcast %125 : vector<2x32x1xf32> to vector<2x32x32xf32>
    %127 = arith.mulf %122, %126 : vector<2x32x32xf32>
    %128 = arith.truncf %127 : vector<2x32x32xf32> to vector<2x32x32xbf16>
    %129 = vector.extract_strided_slice %55 {offsets = [0, 0, 96], sizes = [2, 32, 32], strides = [1, 1, 1]} : vector<2x32x128xf32> to vector<2x32x32xf32>
    %130 = arith.truncf %129 : vector<2x32x32xf32> to vector<2x32x32xbf16>
    "tpu.trace_start"() <{level = 10 : i32, message = "bts,bsd->btd"}> : () -> ()
    %cst_27 = arith.constant dense<0.000000e+00> : vector<2x32x32xf32>
    %131 = tpu.matmul %128, %130, %cst_27 {dimension_numbers = #tpu.dot_dimension_numbers<[2], [1], [1], [2], [0, 0, 0, 1, 1, 2], [0], [0]>} : vector<2x32x32xbf16>, vector<2x32x32xbf16>, vector<2x32x32xf32> -> vector<2x32x32xf32>
    "tpu.trace_stop"() : () -> ()
    %132 = tpu.concatenate %74, %93, %112, %131 in 2 : vector<2x32x32xf32>, vector<2x32x32xf32>, vector<2x32x32xf32>, vector<2x32x32xf32> -> vector<2x32x128xf32>
    %133 = vector.shape_cast %132 : vector<2x32x128xf32> to vector<64x128xf32>
    %c0_28 = arith.constant 0 : index
    %c384 = arith.constant 384 : index
    %134 = vector.load %arg3[%c0_28, %c384] : memref<128x1280xbf16, #tpu.memory_space<vmem>>, vector<128x128xbf16>
    %135 = arith.truncf %133 : vector<64x128xf32> to vector<64x128xbf16>
    %cst_29 = arith.constant dense<0.000000e+00> : vector<64x128xf32>
    %136 = tpu.matmul %135, %134, %cst_29 {dimension_numbers = #tpu.dot_dimension_numbers<[1], [0], [0], [1], [0, 0, 1, 1], [], []>} : vector<64x128xbf16>, vector<128x128xbf16>, vector<64x128xf32> -> vector<64x128xf32>
    %137 = arith.addf %3, %136 : vector<64x128xf32>
    %138 = vector.extract_strided_slice %0 {offsets = [5, 0], sizes = [1, 128], strides = [1, 1]} : vector<14x128xf32> to vector<1x128xf32>
    %139 = vector.shape_cast %138 : vector<1x128xf32> to vector<128xf32>
    %140 = vector.shape_cast %139 : vector<128xf32> to vector<1x128xf32>
    %141 = vector.broadcast %140 : vector<1x128xf32> to vector<64x128xf32>
    %142 = arith.addf %137, %141 : vector<64x128xf32>
    %143 = vector.extract_strided_slice %0 {offsets = [6, 0], sizes = [1, 128], strides = [1, 1]} : vector<14x128xf32> to vector<1x128xf32>
    %144 = vector.shape_cast %143 : vector<1x128xf32> to vector<128xf32>
    %145 = vector.extract_strided_slice %0 {offsets = [7, 0], sizes = [1, 128], strides = [1, 1]} : vector<14x128xf32> to vector<1x128xf32>
    %146 = vector.shape_cast %145 : vector<1x128xf32> to vector<128xf32>
    %cst_30 = arith.constant dense<0.000000e+00> : vector<64xf32>
    %147 = vector.multi_reduction <add>, %142, %cst_30 [1] : vector<64x128xf32> to vector<64xf32>
    %148 = vector.shape_cast %147 : vector<64xf32> to vector<64x1xf32>
    %cst_31 = arith.constant 1.280000e+02 : f32
    %149 = vector.broadcast %cst_31 : f32 to vector<64x1xf32>
    %150 = arith.divf %148, %149 : vector<64x1xf32>
    %151 = vector.broadcast %150 : vector<64x1xf32> to vector<64x128xf32>
    %152 = arith.subf %142, %151 : vector<64x128xf32>
    %153 = arith.mulf %152, %152 : vector<64x128xf32>
    %cst_32 = arith.constant dense<0.000000e+00> : vector<64xf32>
    %154 = vector.multi_reduction <add>, %153, %cst_32 [1] : vector<64x128xf32> to vector<64xf32>
    %155 = vector.shape_cast %154 : vector<64xf32> to vector<64x1xf32>
    %cst_33 = arith.constant 1.280000e+02 : f32
    %156 = vector.broadcast %cst_33 : f32 to vector<64x1xf32>
    %157 = arith.divf %155, %156 : vector<64x1xf32>
    %cst_34 = arith.constant 9.99999974E-6 : f32
    %158 = vector.broadcast %cst_34 : f32 to vector<64x1xf32>
    %159 = arith.addf %157, %158 : vector<64x1xf32>
    %160 = math.rsqrt %159 : vector<64x1xf32>
    %161 = vector.broadcast %160 : vector<64x1xf32> to vector<64x128xf32>
    %162 = arith.mulf %152, %161 : vector<64x128xf32>
    %163 = vector.shape_cast %144 : vector<128xf32> to vector<1x128xf32>
    %164 = vector.broadcast %163 : vector<1x128xf32> to vector<64x128xf32>
    %165 = arith.mulf %162, %164 : vector<64x128xf32>
    %166 = vector.shape_cast %146 : vector<128xf32> to vector<1x128xf32>
    %167 = vector.broadcast %166 : vector<1x128xf32> to vector<64x128xf32>
    %168 = arith.addf %165, %167 : vector<64x128xf32>
    %c0_35 = arith.constant 0 : index
    %c512 = arith.constant 512 : index
    %169 = vector.load %arg3[%c0_35, %c512] : memref<128x1280xbf16, #tpu.memory_space<vmem>>, vector<128x128xbf16>
    %170 = arith.truncf %168 : vector<64x128xf32> to vector<64x128xbf16>
    %cst_36 = arith.constant dense<0.000000e+00> : vector<64x128xf32>
    %171 = tpu.matmul %170, %169, %cst_36 {dimension_numbers = #tpu.dot_dimension_numbers<[1], [0], [0], [1], [0, 0, 1, 1], [], []>} : vector<64x128xbf16>, vector<128x128xbf16>, vector<64x128xf32> -> vector<64x128xf32>
    %172 = vector.extract_strided_slice %0 {offsets = [8, 0], sizes = [1, 128], strides = [1, 1]} : vector<14x128xf32> to vector<1x128xf32>
    %173 = vector.shape_cast %172 : vector<1x128xf32> to vector<128xf32>
    %174 = vector.shape_cast %173 : vector<128xf32> to vector<1x128xf32>
    %175 = vector.broadcast %174 : vector<1x128xf32> to vector<64x128xf32>
    %176 = arith.addf %171, %175 : vector<64x128xf32>
    %cst_37 = arith.constant 0.176776692 : f32
    %177 = vector.broadcast %cst_37 : f32 to vector<64x128xf32>
    %178 = arith.mulf %176, %177 : vector<64x128xf32>
    %c0_38 = arith.constant 0 : index
    %c0_39 = arith.constant 0 : index
    %c0_40 = arith.constant 0 : index
    %179 = vector.load %arg2[%c0_38, %c0_39, %c0_40] : memref<2x77x256xbf16, #tpu.memory_space<vmem>>, vector<2x77x256xbf16>
    %180 = vector.shape_cast %178 : vector<64x128xf32> to vector<2x32x128xf32>
    %181 = vector.extract_strided_slice %179 {offsets = [0, 0, 0], sizes = [2, 77, 128], strides = [1, 1, 1]} : vector<2x77x256xbf16> to vector<2x77x128xbf16>
    %182 = vector.extract_strided_slice %179 {offsets = [0, 0, 128], sizes = [2, 77, 128], strides = [1, 1, 1]} : vector<2x77x256xbf16> to vector<2x77x128xbf16>
    %183 = vector.extract_strided_slice %180 {offsets = [0, 0, 0], sizes = [2, 32, 32], strides = [1, 1, 1]} : vector<2x32x128xf32> to vector<2x32x32xf32>
    %184 = arith.truncf %183 : vector<2x32x32xf32> to vector<2x32x32xbf16>
    %185 = vector.extract_strided_slice %181 {offsets = [0, 0, 0], sizes = [2, 77, 32], strides = [1, 1, 1]} : vector<2x77x128xbf16> to vector<2x77x32xbf16>
    "tpu.trace_start"() <{level = 10 : i32, message = "btd,bsd->bts"}> : () -> ()
    %cst_41 = arith.constant dense<0.000000e+00> : vector<2x32x77xf32>
    %186 = tpu.matmul %184, %185, %cst_41 {dimension_numbers = #tpu.dot_dimension_numbers<[2], [2], [1], [1], [0, 0, 0, 1, 1, 1], [0], [0]>} : vector<2x32x32xbf16>, vector<2x77x32xbf16>, vector<2x32x77xf32> -> vector<2x32x77xf32>
    "tpu.trace_stop"() : () -> ()
    %cst_42 = arith.constant dense<0xFF800000> : vector<2x32xf32>
    %187 = vector.multi_reduction <maximumf>, %186, %cst_42 [2] : vector<2x32x77xf32> to vector<2x32xf32>
    %188 = vector.shape_cast %187 : vector<2x32xf32> to vector<2x32x1xf32>
    %189 = vector.broadcast %188 : vector<2x32x1xf32> to vector<2x32x77xf32>
    %190 = arith.subf %186, %189 : vector<2x32x77xf32>
    %191 = math.exp %190 : vector<2x32x77xf32>
    %cst_43 = arith.constant dense<0.000000e+00> : vector<2x32xf32>
    %192 = vector.multi_reduction <add>, %191, %cst_43 [2] : vector<2x32x77xf32> to vector<2x32xf32>
    %193 = vector.shape_cast %192 : vector<2x32xf32> to vector<2x32x1xf32>
    %194 = tpu.reciprocal %193 {approx = true} : vector<2x32x1xf32> -> vector<2x32x1xf32>
    %195 = vector.broadcast %194 : vector<2x32x1xf32> to vector<2x32x77xf32>
    %196 = arith.mulf %191, %195 : vector<2x32x77xf32>
    %197 = arith.truncf %196 : vector<2x32x77xf32> to vector<2x32x77xbf16>
    %198 = vector.extract_strided_slice %182 {offsets = [0, 0, 0], sizes = [2, 77, 32], strides = [1, 1, 1]} : vector<2x77x128xbf16> to vector<2x77x32xbf16>
    "tpu.trace_start"() <{level = 10 : i32, message = "bts,bsd->btd"}> : () -> ()
    %cst_44 = arith.constant dense<0.000000e+00> : vector<2x32x32xf32>
    %199 = tpu.matmul %197, %198, %cst_44 {dimension_numbers = #tpu.dot_dimension_numbers<[2], [1], [1], [2], [0, 0, 0, 1, 1, 2], [0], [0]>} : vector<2x32x77xbf16>, vector<2x77x32xbf16>, vector<2x32x32xf32> -> vector<2x32x32xf32>
    "tpu.trace_stop"() : () -> ()
    %200 = vector.extract_strided_slice %180 {offsets = [0, 0, 32], sizes = [2, 32, 32], strides = [1, 1, 1]} : vector<2x32x128xf32> to vector<2x32x32xf32>
    %201 = arith.truncf %200 : vector<2x32x32xf32> to vector<2x32x32xbf16>
    %202 = vector.extract_strided_slice %181 {offsets = [0, 0, 32], sizes = [2, 77, 32], strides = [1, 1, 1]} : vector<2x77x128xbf16> to vector<2x77x32xbf16>
    "tpu.trace_start"() <{level = 10 : i32, message = "btd,bsd->bts"}> : () -> ()
    %cst_45 = arith.constant dense<0.000000e+00> : vector<2x32x77xf32>
    %203 = tpu.matmul %201, %202, %cst_45 {dimension_numbers = #tpu.dot_dimension_numbers<[2], [2], [1], [1], [0, 0, 0, 1, 1, 1], [0], [0]>} : vector<2x32x32xbf16>, vector<2x77x32xbf16>, vector<2x32x77xf32> -> vector<2x32x77xf32>
    "tpu.trace_stop"() : () -> ()
    %cst_46 = arith.constant dense<0xFF800000> : vector<2x32xf32>
    %204 = vector.multi_reduction <maximumf>, %203, %cst_46 [2] : vector<2x32x77xf32> to vector<2x32xf32>
    %205 = vector.shape_cast %204 : vector<2x32xf32> to vector<2x32x1xf32>
    %206 = vector.broadcast %205 : vector<2x32x1xf32> to vector<2x32x77xf32>
    %207 = arith.subf %203, %206 : vector<2x32x77xf32>
    %208 = math.exp %207 : vector<2x32x77xf32>
    %cst_47 = arith.constant dense<0.000000e+00> : vector<2x32xf32>
    %209 = vector.multi_reduction <add>, %208, %cst_47 [2] : vector<2x32x77xf32> to vector<2x32xf32>
    %210 = vector.shape_cast %209 : vector<2x32xf32> to vector<2x32x1xf32>
    %211 = tpu.reciprocal %210 {approx = true} : vector<2x32x1xf32> -> vector<2x32x1xf32>
    %212 = vector.broadcast %211 : vector<2x32x1xf32> to vector<2x32x77xf32>
    %213 = arith.mulf %208, %212 : vector<2x32x77xf32>
    %214 = arith.truncf %213 : vector<2x32x77xf32> to vector<2x32x77xbf16>
    %215 = vector.extract_strided_slice %182 {offsets = [0, 0, 32], sizes = [2, 77, 32], strides = [1, 1, 1]} : vector<2x77x128xbf16> to vector<2x77x32xbf16>
    "tpu.trace_start"() <{level = 10 : i32, message = "bts,bsd->btd"}> : () -> ()
    %cst_48 = arith.constant dense<0.000000e+00> : vector<2x32x32xf32>
    %216 = tpu.matmul %214, %215, %cst_48 {dimension_numbers = #tpu.dot_dimension_numbers<[2], [1], [1], [2], [0, 0, 0, 1, 1, 2], [0], [0]>} : vector<2x32x77xbf16>, vector<2x77x32xbf16>, vector<2x32x32xf32> -> vector<2x32x32xf32>
    "tpu.trace_stop"() : () -> ()
    %217 = vector.extract_strided_slice %180 {offsets = [0, 0, 64], sizes = [2, 32, 32], strides = [1, 1, 1]} : vector<2x32x128xf32> to vector<2x32x32xf32>
    %218 = arith.truncf %217 : vector<2x32x32xf32> to vector<2x32x32xbf16>
    %219 = vector.extract_strided_slice %181 {offsets = [0, 0, 64], sizes = [2, 77, 32], strides = [1, 1, 1]} : vector<2x77x128xbf16> to vector<2x77x32xbf16>
    "tpu.trace_start"() <{level = 10 : i32, message = "btd,bsd->bts"}> : () -> ()
    %cst_49 = arith.constant dense<0.000000e+00> : vector<2x32x77xf32>
    %220 = tpu.matmul %218, %219, %cst_49 {dimension_numbers = #tpu.dot_dimension_numbers<[2], [2], [1], [1], [0, 0, 0, 1, 1, 1], [0], [0]>} : vector<2x32x32xbf16>, vector<2x77x32xbf16>, vector<2x32x77xf32> -> vector<2x32x77xf32>
    "tpu.trace_stop"() : () -> ()
    %cst_50 = arith.constant dense<0xFF800000> : vector<2x32xf32>
    %221 = vector.multi_reduction <maximumf>, %220, %cst_50 [2] : vector<2x32x77xf32> to vector<2x32xf32>
    %222 = vector.shape_cast %221 : vector<2x32xf32> to vector<2x32x1xf32>
    %223 = vector.broadcast %222 : vector<2x32x1xf32> to vector<2x32x77xf32>
    %224 = arith.subf %220, %223 : vector<2x32x77xf32>
    %225 = math.exp %224 : vector<2x32x77xf32>
    %cst_51 = arith.constant dense<0.000000e+00> : vector<2x32xf32>
    %226 = vector.multi_reduction <add>, %225, %cst_51 [2] : vector<2x32x77xf32> to vector<2x32xf32>
    %227 = vector.shape_cast %226 : vector<2x32xf32> to vector<2x32x1xf32>
    %228 = tpu.reciprocal %227 {approx = true} : vector<2x32x1xf32> -> vector<2x32x1xf32>
    %229 = vector.broadcast %228 : vector<2x32x1xf32> to vector<2x32x77xf32>
    %230 = arith.mulf %225, %229 : vector<2x32x77xf32>
    %231 = arith.truncf %230 : vector<2x32x77xf32> to vector<2x32x77xbf16>
    %232 = vector.extract_strided_slice %182 {offsets = [0, 0, 64], sizes = [2, 77, 32], strides = [1, 1, 1]} : vector<2x77x128xbf16> to vector<2x77x32xbf16>
    "tpu.trace_start"() <{level = 10 : i32, message = "bts,bsd->btd"}> : () -> ()
    %cst_52 = arith.constant dense<0.000000e+00> : vector<2x32x32xf32>
    %233 = tpu.matmul %231, %232, %cst_52 {dimension_numbers = #tpu.dot_dimension_numbers<[2], [1], [1], [2], [0, 0, 0, 1, 1, 2], [0], [0]>} : vector<2x32x77xbf16>, vector<2x77x32xbf16>, vector<2x32x32xf32> -> vector<2x32x32xf32>
    "tpu.trace_stop"() : () -> ()
    %234 = vector.extract_strided_slice %180 {offsets = [0, 0, 96], sizes = [2, 32, 32], strides = [1, 1, 1]} : vector<2x32x128xf32> to vector<2x32x32xf32>
    %235 = arith.truncf %234 : vector<2x32x32xf32> to vector<2x32x32xbf16>
    %236 = vector.extract_strided_slice %181 {offsets = [0, 0, 96], sizes = [2, 77, 32], strides = [1, 1, 1]} : vector<2x77x128xbf16> to vector<2x77x32xbf16>
    "tpu.trace_start"() <{level = 10 : i32, message = "btd,bsd->bts"}> : () -> ()
    %cst_53 = arith.constant dense<0.000000e+00> : vector<2x32x77xf32>
    %237 = tpu.matmul %235, %236, %cst_53 {dimension_numbers = #tpu.dot_dimension_numbers<[2], [2], [1], [1], [0, 0, 0, 1, 1, 1], [0], [0]>} : vector<2x32x32xbf16>, vector<2x77x32xbf16>, vector<2x32x77xf32> -> vector<2x32x77xf32>
    "tpu.trace_stop"() : () -> ()
    %cst_54 = arith.constant dense<0xFF800000> : vector<2x32xf32>
    %238 = vector.multi_reduction <maximumf>, %237, %cst_54 [2] : vector<2x32x77xf32> to vector<2x32xf32>
    %239 = vector.shape_cast %238 : vector<2x32xf32> to vector<2x32x1xf32>
    %240 = vector.broadcast %239 : vector<2x32x1xf32> to vector<2x32x77xf32>
    %241 = arith.subf %237, %240 : vector<2x32x77xf32>
    %242 = math.exp %241 : vector<2x32x77xf32>
    %cst_55 = arith.constant dense<0.000000e+00> : vector<2x32xf32>
    %243 = vector.multi_reduction <add>, %242, %cst_55 [2] : vector<2x32x77xf32> to vector<2x32xf32>
    %244 = vector.shape_cast %243 : vector<2x32xf32> to vector<2x32x1xf32>
    %245 = tpu.reciprocal %244 {approx = true} : vector<2x32x1xf32> -> vector<2x32x1xf32>
    %246 = vector.broadcast %245 : vector<2x32x1xf32> to vector<2x32x77xf32>
    %247 = arith.mulf %242, %246 : vector<2x32x77xf32>
    %248 = arith.truncf %247 : vector<2x32x77xf32> to vector<2x32x77xbf16>
    %249 = vector.extract_strided_slice %182 {offsets = [0, 0, 96], sizes = [2, 77, 32], strides = [1, 1, 1]} : vector<2x77x128xbf16> to vector<2x77x32xbf16>
    "tpu.trace_start"() <{level = 10 : i32, message = "bts,bsd->btd"}> : () -> ()
    %cst_56 = arith.constant dense<0.000000e+00> : vector<2x32x32xf32>
    %250 = tpu.matmul %248, %249, %cst_56 {dimension_numbers = #tpu.dot_dimension_numbers<[2], [1], [1], [2], [0, 0, 0, 1, 1, 2], [0], [0]>} : vector<2x32x77xbf16>, vector<2x77x32xbf16>, vector<2x32x32xf32> -> vector<2x32x32xf32>
    "tpu.trace_stop"() : () -> ()
    %251 = tpu.concatenate %199, %216, %233, %250 in 2 : vector<2x32x32xf32>, vector<2x32x32xf32>, vector<2x32x32xf32>, vector<2x32x32xf32> -> vector<2x32x128xf32>
    %252 = vector.shape_cast %251 : vector<2x32x128xf32> to vector<64x128xf32>
    %c0_57 = arith.constant 0 : index
    %c640 = arith.constant 640 : index
    %253 = vector.load %arg3[%c0_57, %c640] : memref<128x1280xbf16, #tpu.memory_space<vmem>>, vector<128x128xbf16>
    %254 = arith.truncf %252 : vector<64x128xf32> to vector<64x128xbf16>
    %cst_58 = arith.constant dense<0.000000e+00> : vector<64x128xf32>
    %255 = tpu.matmul %254, %253, %cst_58 {dimension_numbers = #tpu.dot_dimension_numbers<[1], [0], [0], [1], [0, 0, 1, 1], [], []>} : vector<64x128xbf16>, vector<128x128xbf16>, vector<64x128xf32> -> vector<64x128xf32>
    %256 = vector.extract_strided_slice %0 {offsets = [9, 0], sizes = [1, 128], strides = [1, 1]} : vector<14x128xf32> to vector<1x128xf32>
    %257 = vector.shape_cast %256 : vector<1x128xf32> to vector<128xf32>
    %258 = vector.shape_cast %257 : vector<128xf32> to vector<1x128xf32>
    %259 = vector.broadcast %258 : vector<1x128xf32> to vector<64x128xf32>
    %260 = arith.addf %255, %259 : vector<64x128xf32>
    %c0_59 = arith.constant 0 : index
    %c768 = arith.constant 768 : index
    %261 = vector.load %arg3[%c0_59, %c768] : memref<128x1280xbf16, #tpu.memory_space<vmem>>, vector<128x256xbf16>
    %262 = arith.truncf %260 : vector<64x128xf32> to vector<64x128xbf16>
    %cst_60 = arith.constant dense<0.000000e+00> : vector<64x256xf32>
    %263 = tpu.matmul %262, %261, %cst_60 {dimension_numbers = #tpu.dot_dimension_numbers<[1], [0], [0], [1], [0, 0, 1, 1], [], []>} : vector<64x128xbf16>, vector<128x256xbf16>, vector<64x256xf32> -> vector<64x256xf32>
    %c0_61 = arith.constant 0 : index
    %c0_62 = arith.constant 0 : index
    %264 = vector.load %arg6[%c0_61, %c0_62] : memref<2x256xf32, #tpu.memory_space<vmem>>, vector<1x256xf32>
    %265 = vector.shape_cast %264 : vector<1x256xf32> to vector<256xf32>
    %266 = vector.shape_cast %265 : vector<256xf32> to vector<1x256xf32>
    %267 = vector.broadcast %266 : vector<1x256xf32> to vector<64x256xf32>
    %268 = arith.addf %263, %267 : vector<64x256xf32>
    %cst_63 = arith.constant 1.702000e+00 : f32
    %269 = vector.broadcast %cst_63 : f32 to vector<64x256xf32>
    %270 = arith.mulf %269, %268 : vector<64x256xf32>
    %271 = arith.negf %270 : vector<64x256xf32>
    %272 = math.exp %271 : vector<64x256xf32>
    %cst_64 = arith.constant 1.000000e+00 : f32
    %273 = vector.broadcast %cst_64 : f32 to vector<64x256xf32>
    %274 = arith.addf %273, %272 : vector<64x256xf32>
    %275 = arith.divf %273, %274 : vector<64x256xf32>
    %276 = arith.mulf %268, %275 : vector<64x256xf32>
    %c0_65 = arith.constant 0 : index
    %c0_66 = arith.constant 0 : index
    %277 = vector.load %arg4[%c0_65, %c0_66] : memref<256x256xbf16, #tpu.memory_space<vmem>>, vector<256x128xbf16>
    %278 = arith.truncf %276 : vector<64x256xf32> to vector<64x256xbf16>
    %cst_67 = arith.constant dense<0.000000e+00> : vector<64x128xf32>
    %279 = tpu.matmul %278, %277, %cst_67 {dimension_numbers = #tpu.dot_dimension_numbers<[1], [0], [0], [1], [0, 0, 1, 1], [], []>} : vector<64x256xbf16>, vector<256x128xbf16>, vector<64x128xf32> -> vector<64x128xf32>
    %280 = arith.addf %142, %279 : vector<64x128xf32>
    %281 = vector.extract_strided_slice %0 {offsets = [10, 0], sizes = [1, 128], strides = [1, 1]} : vector<14x128xf32> to vector<1x128xf32>
    %282 = vector.shape_cast %281 : vector<1x128xf32> to vector<128xf32>
    %283 = vector.shape_cast %282 : vector<128xf32> to vector<1x128xf32>
    %284 = vector.broadcast %283 : vector<1x128xf32> to vector<64x128xf32>
    %285 = arith.addf %280, %284 : vector<64x128xf32>
    %286 = vector.extract_strided_slice %0 {offsets = [11, 0], sizes = [1, 128], strides = [1, 1]} : vector<14x128xf32> to vector<1x128xf32>
    %287 = vector.shape_cast %286 : vector<1x128xf32> to vector<128xf32>
    %288 = vector.extract_strided_slice %0 {offsets = [12, 0], sizes = [1, 128], strides = [1, 1]} : vector<14x128xf32> to vector<1x128xf32>
    %289 = vector.shape_cast %288 : vector<1x128xf32> to vector<128xf32>
    %cst_68 = arith.constant dense<0.000000e+00> : vector<64xf32>
    %290 = vector.multi_reduction <add>, %285, %cst_68 [1] : vector<64x128xf32> to vector<64xf32>
    %291 = vector.shape_cast %290 : vector<64xf32> to vector<64x1xf32>
    %cst_69 = arith.constant 1.280000e+02 : f32
    %292 = vector.broadcast %cst_69 : f32 to vector<64x1xf32>
    %293 = arith.divf %291, %292 : vector<64x1xf32>
    %294 = vector.broadcast %293 : vector<64x1xf32> to vector<64x128xf32>
    %295 = arith.subf %285, %294 : vector<64x128xf32>
    %296 = arith.mulf %295, %295 : vector<64x128xf32>
    %cst_70 = arith.constant dense<0.000000e+00> : vector<64xf32>
    %297 = vector.multi_reduction <add>, %296, %cst_70 [1] : vector<64x128xf32> to vector<64xf32>
    %298 = vector.shape_cast %297 : vector<64xf32> to vector<64x1xf32>
    %cst_71 = arith.constant 1.280000e+02 : f32
    %299 = vector.broadcast %cst_71 : f32 to vector<64x1xf32>
    %300 = arith.divf %298, %299 : vector<64x1xf32>
    %cst_72 = arith.constant 9.99999974E-6 : f32
    %301 = vector.broadcast %cst_72 : f32 to vector<64x1xf32>
    %302 = arith.addf %300, %301 : vector<64x1xf32>
    %303 = math.rsqrt %302 : vector<64x1xf32>
    %304 = vector.broadcast %303 : vector<64x1xf32> to vector<64x128xf32>
    %305 = arith.mulf %295, %304 : vector<64x128xf32>
    %306 = vector.shape_cast %287 : vector<128xf32> to vector<1x128xf32>
    %307 = vector.broadcast %306 : vector<1x128xf32> to vector<64x128xf32>
    %308 = arith.mulf %305, %307 : vector<64x128xf32>
    %309 = vector.shape_cast %289 : vector<128xf32> to vector<1x128xf32>
    %310 = vector.broadcast %309 : vector<1x128xf32> to vector<64x128xf32>
    %311 = arith.addf %308, %310 : vector<64x128xf32>
    %c0_73 = arith.constant 0 : index
    %c1024 = arith.constant 1024 : index
    %312 = vector.load %arg3[%c0_73, %c1024] : memref<128x1280xbf16, #tpu.memory_space<vmem>>, vector<128x256xbf16>
    %313 = arith.truncf %311 : vector<64x128xf32> to vector<64x128xbf16>
    %cst_74 = arith.constant dense<0.000000e+00> : vector<64x256xf32>
    %314 = tpu.matmul %313, %312, %cst_74 {dimension_numbers = #tpu.dot_dimension_numbers<[1], [0], [0], [1], [0, 0, 1, 1], [], []>} : vector<64x128xbf16>, vector<128x256xbf16>, vector<64x256xf32> -> vector<64x256xf32>
    %c1 = arith.constant 1 : index
    %c0_75 = arith.constant 0 : index
    %315 = vector.load %arg6[%c1, %c0_75] : memref<2x256xf32, #tpu.memory_space<vmem>>, vector<1x256xf32>
    %316 = vector.shape_cast %315 : vector<1x256xf32> to vector<256xf32>
    %317 = vector.shape_cast %316 : vector<256xf32> to vector<1x256xf32>
    %318 = vector.broadcast %317 : vector<1x256xf32> to vector<64x256xf32>
    %319 = arith.addf %314, %318 : vector<64x256xf32>
    %cst_76 = arith.constant 1.702000e+00 : f32
    %320 = vector.broadcast %cst_76 : f32 to vector<64x256xf32>
    %321 = arith.mulf %320, %319 : vector<64x256xf32>
    %322 = arith.negf %321 : vector<64x256xf32>
    %323 = math.exp %322 : vector<64x256xf32>
    %cst_77 = arith.constant 1.000000e+00 : f32
    %324 = vector.broadcast %cst_77 : f32 to vector<64x256xf32>
    %325 = arith.addf %324, %323 : vector<64x256xf32>
    %326 = arith.divf %324, %325 : vector<64x256xf32>
    %327 = arith.mulf %319, %326 : vector<64x256xf32>
    %c0_78 = arith.constant 0 : index
    %c128 = arith.constant 128 : index
    %328 = vector.load %arg4[%c0_78, %c128] : memref<256x256xbf16, #tpu.memory_space<vmem>>, vector<256x128xbf16>
    %329 = arith.truncf %327 : vector<64x256xf32> to vector<64x256xbf16>
    %cst_79 = arith.constant dense<0.000000e+00> : vector<64x128xf32>
    %330 = tpu.matmul %329, %328, %cst_79 {dimension_numbers = #tpu.dot_dimension_numbers<[1], [0], [0], [1], [0, 0, 1, 1], [], []>} : vector<64x256xbf16>, vector<256x128xbf16>, vector<64x128xf32> -> vector<64x128xf32>
    %331 = arith.addf %285, %330 : vector<64x128xf32>
    %332 = vector.extract_strided_slice %0 {offsets = [13, 0], sizes = [1, 128], strides = [1, 1]} : vector<14x128xf32> to vector<1x128xf32>
    %333 = vector.shape_cast %332 : vector<1x128xf32> to vector<128xf32>
    %334 = vector.shape_cast %333 : vector<128xf32> to vector<1x128xf32>
    %335 = vector.broadcast %334 : vector<1x128xf32> to vector<64x128xf32>
    %336 = arith.addf %331, %335 : vector<64x128xf32>
    %337 = vector.shape_cast %336 : vector<64x128xf32> to vector<2x32x128xf32>
    %338 = arith.truncf %337 : vector<2x32x128xf32> to vector<2x32x128xbf16>
    %c0_80 = arith.constant 0 : index
    %c0_81 = arith.constant 0 : index
    %c0_82 = arith.constant 0 : index
    %339 = vector.load %arg7[%c0_80, %c0_81, %c0_82] : memref<2x32x128xbf16, #tpu.memory_space<vmem>>, vector<2x32x128xbf16>
    tpu.vector_store %arg7[%c0_80, %c0_81, %c0_82], %338 {strides = array<i32>} : memref<2x32x128xbf16, #tpu.memory_space<vmem>>, vector<2x32x128xbf16>,
    return
  }
  func.func @transform_0(%arg0: i32) -> (i32, i32, i32) {
    %c0_i32 = arith.constant 0 : i32
    %c0_i32_0 = arith.constant 0 : i32
    %c0_i32_1 = arith.constant 0 : i32
    return %arg0, %c0_i32, %c0_i32_0 : i32, i32, i32
  }
  func.func @transform_1(%arg0: i32) -> (i32, i32, i32) {
    %c0_i32 = arith.constant 0 : i32
    %c0_i32_0 = arith.constant 0 : i32
    %c0_i32_1 = arith.constant 0 : i32
    return %arg0, %c0_i32, %c0_i32_0 : i32, i32, i32
  }
  func.func @transform_2(%arg0: i32) -> (i32, i32) {
    %c0_i32 = arith.constant 0 : i32
    %c0_i32_0 = arith.constant 0 : i32
    %c0_i32_1 = arith.constant 0 : i32
    return %c0_i32, %c0_i32_0 : i32, i32
  }
  func.func @transform_3(%arg0: i32) -> (i32, i32) {
    %c0_i32 = arith.constant 0 : i32
    %c0_i32_0 = arith.constant 0 : i32
    %c0_i32_1 = arith.constant 0 : i32
    return %c0_i32, %c0_i32_0 : i32, i32
  }
  func.func @transform_4(%arg0: i32) -> (i32, i32) {
    %c0_i32 = arith.constant 0 : i32
    %c0_i32_0 = arith.constant 0 : i32
    %c0_i32_1 = arith.constant 0 : i32
    return %c0_i32, %c0_i32_0 : i32, i32
  }
  func.func @transform_5(%arg0: i32) -> (i32, i32) {
    %c0_i32 = arith.constant 0 : i32
    %c0_i32_0 = arith.constant 0 : i32
    %c0_i32_1 = arith.constant 0 : i32
    return %c0_i32, %c0_i32_0 : i32, i32
  }
  func.func @transform_6(%arg0: i32) -> (i32, i32, i32) {
    %c0_i32 = arith.constant 0 : i32
    %c0_i32_0 = arith.constant 0 : i32
    %c0_i32_1 = arith.constant 0 : i32
    return %arg0, %c0_i32, %c0_i32_0 : i32, i32, i32
  }
}

</mosaic_0001>

<bundles_post_ra>
// kernel: _lambda_.4
= control target key start
LH: loop header
LB: loop body
LE: loop exit
PB: predicated region body
PF: predicated region fallthrough
CT: control target
= control target key end

     0   :  { %s2028_s2 = inlined_call_operand.vmem [shape: bf16[128,128], index: 2, kind: input, shape index: {}]   ;;  %s2029_s0 = inlined_call_operand.vmem [shape: f32[308,128], index: 0, kind: input, shape index: {}]   ;;  %s2030_s1 = inlined_call_operand.vmem [shape: f32[308,128], index: 1, kind: input, shape index: {}]   ;;  %s2031_s4 = inlined_call_operand.vmem [shape: bf16[128,256], index: 4, kind: input, shape index: {}]   ;;  %s2032_s3 = inlined_call_operand.vmem [shape: f32[1,128], index: 3, kind: input, shape index: {}]   ;;  %s2033_s5 = inlined_call_operand.vmem [shape: f32[1,256], index: 5, kind: input, shape index: {}]   ;;  %s2034_s6 = inlined_call_operand.vmem [shape: bf16[308,256], index: 6, kind: output, shape index: {}]  }
   0x1   :  { %v1305_v0 = vld [vmem:[%s2028_s2] sm:$0xff]   ;;  %v1306_v1 = vld [vmem:[%s2028_s2 + $0x8] sm:$0xff]   ;;  %v1307_v2 = vld [vmem:[%s2028_s2 + $0x10] sm:$0xff]  }
   0x2   :  { %1232 = vmatprep.subr.bf16.mxu0 %v1305_v0  ;;  %v1308_v3 = vld [vmem:[%s2028_s2 + $0x18] sm:$0xff]   ;;  %v24_v4 = vld [vmem:[%s2029_s0] sm:$0xff]  ;;  %v25_v5 = vld [vmem:[%s2029_s0 + $0x8] sm:$0xff] }
   0x3   :  { %1233 = vmatpush3.bf16.msra.mxu0 %v1305_v0  ;;  %v63_v6 = vld [vmem:[%s2030_s1] sm:$0xff]  ;;  %v64_v7 = vld [vmem:[%s2030_s1 + $0x8] sm:$0xff]  ;;  %v26_v15 = vld [vmem:[%s2029_s0 + $0x10] sm:$0xff] }
   0x4   :  { %1234 = vmatprep.subr.bf16.mxu0 %v1306_v1  ;;  %v102_v8 = vmul.f32 %v63_v6, %v24_v4  ;;  %v103_v9 = vmul.f32 %v64_v7, %v25_v5  ;;  %v1309_v11 = vld [vmem:[%s2028_s2 + $0x20] sm:$0xff]   ;;  %v1310_v14 = vld [vmem:[%s2028_s2 + $0x28] sm:$0xff]   ;;  %v27_v16 = vld [vmem:[%s2029_s0 + $0x18] sm:$0xff] }
   0x5   :  { %v65_v17 = vld [vmem:[%s2030_s1 + $0x10] sm:$0xff]  ;;  %v66_v18 = vld [vmem:[%s2030_s1 + $0x18] sm:$0xff]  ;;  %v28_v19 = vld [vmem:[%s2029_s0 + $0x20] sm:$0xff] }
   0x6   :  { %v141_v10 = vadd.f32 %v102_v8, %v24_v4  ;;  %v142_v12 = vadd.f32 %v103_v9, %v25_v5  ;;  %v29_v20 = vld [vmem:[%s2029_s0 + $0x28] sm:$0xff]  ;;  %v67_v21 = vld [vmem:[%s2030_s1 + $0x20] sm:$0xff]  ;;  %v104_v23 = vmul.f32 %v65_v17, %v26_v15  ;;  %v105_v24 = vmul.f32 %v66_v18, %v27_v16  ;;  %v1311_v25 = vld [vmem:[%s2028_s2 + $0x30] sm:$0xff]  }
   0x7   :  { %1235 = vmatpush3.bf16.msra.mxu0 %v1306_v1  ;;  %v68_v22 = vld [vmem:[%s2030_s1 + $0x28] sm:$0xff]  ;;  %v106_v26 = vmul.f32 %v67_v21, %v28_v19  ;;  %v30_v28 = vld [vmem:[%s2029_s0 + $0x30] sm:$0xff]  ;;  %v31_v30 = vld [vmem:[%s2029_s0 + $0x38] sm:$0xff] }
   0x8   :  { %1236 = vmatprep.subr.bf16.mxu0 %v1307_v2  ;;  %v196_v13 = vpack.c.bf16 %v142_v12, %v141_v10  ;;  %v107_v27 = vmul.f32 %v68_v22, %v29_v20  ;;  %v69_v29 = vld [vmem:[%s2030_s1 + $0x30] sm:$0xff]  ;;  %v70_v31 = vld [vmem:[%s2030_s1 + $0x38] sm:$0xff]  ;;  %v1442_v32 = vadd.f32 %v104_v23, %v26_v15  ;;  %v1444_v33 = vadd.f32 %v105_v24, %v27_v16  ;;  %v32_v35 = vld [vmem:[%s2029_s0 + $0x40] sm:$0xff] }
   0x9   :  { %v108_v34 = vmul.f32 %v69_v29, %v30_v28  ;;  %v71_v36 = vld [vmem:[%s2030_s1 + $0x40] sm:$0xff]  ;;  %v1312_v37 = vld [vmem:[%s2028_s2 + $0x38] sm:$0xff]   ;;  %v1455_v38 = vadd.f32 %v106_v26, %v28_v19  ;;  %v1462_v40 = vld [vmem:[%s2029_s0 + $0x48] sm:$0xff]  ;;  %v109_v41 = vmul.f32 %v70_v31, %v31_v30 }
   0xa   :  { %1248 = vmatprep.mubr.bf16.mxu0 %v196_v13  ;;  %v1457_v39 = vadd.f32 %v107_v27, %v29_v20  ;;  %v72_v42 = vld [vmem:[%s2030_s1 + $0x48] sm:$0xff]  ;;  %v50_v43 = vld [vmem:[%s2029_s0 + $0xd0] sm:$0xff]  ;;  %v51_v44 = vld [vmem:[%s2029_s0 + $0xd8] sm:$0xff]  ;;  %v110_v45 = vmul.f32 %v71_v36, %v32_v35  ;;  %v197_v49 = vpack.c.bf16 %v1444_v33, %v1442_v32 }
   0xb   :  { %1237 = vmatpush3.bf16.msra.mxu0 %v1307_v2  ;;  %v89_v46 = vld [vmem:[%s2030_s1 + $0xd0] sm:$0xff]  ;;  %v90_v47 = vld [vmem:[%s2030_s1 + $0xd8] sm:$0xff]  ;;  %v52_v48 = vld [vmem:[%s2029_s0 + $0xe0] sm:$0xff]  ;;  %v1484_v50 = vadd.f32 %v108_v34, %v30_v28  ;;  %v111_v56 = vmul.f32 %v72_v42, %v1462_v40  ;;  %v1507_v62 = vadd.f32 %v109_v41, %v31_v30 }
   0xc   :  { %1238 = vmatprep.subr.bf16.mxu0 %v1308_v3  ;;  %v128_v51 = vmul.f32 %v89_v46, %v50_v43  ;;  %v53_v52 = vld [vmem:[%s2029_s0 + $0xe8] sm:$0xff]  ;;  %v91_v53 = vld [vmem:[%s2030_s1 + $0xe0] sm:$0xff]  ;;  %v198_v55 = vpack.c.bf16 %v1457_v39, %v1455_v38  ;;  %v129_v57 = vmul.f32 %v90_v47, %v51_v44  ;;  %v54_v59 = vld [vmem:[%s2029_s0 + $0xf0] sm:$0xff]  ;;  %v1520_v5 = vadd.f32 %v110_v45, %v32_v35 }
   0xd   :  { %v92_v54 = vld [vmem:[%s2030_s1 + $0xe8] sm:$0xff]  ;;  %v130_v58 = vmul.f32 %v91_v53, %v52_v48  ;;  %v55_v60 = vld [vmem:[%s2029_s0 + $0xf8] sm:$0xff]  ;;  %v93_v61 = vld [vmem:[%s2030_s1 + $0xf0] sm:$0xff]  ;;  %v150_v46 = vadd.f32 %v111_v56, %v1462_v40 }
   0xe   :  { %v1509_v63 = vadd.f32 %v128_v51, %v50_v43  ;;  %v131_v0 = vmul.f32 %v92_v54, %v53_v52  ;;  %v94_v1 = vld [vmem:[%s2030_s1 + $0xf8] sm:$0xff]  ;;  %v132_v2 = vmul.f32 %v93_v61, %v54_v59  ;;  %v57_v4 = vld [vmem:[%s2029_s0 + $0x108] sm:$0xff]  ;;  %v1522_v6 = vadd.f32 %v129_v57, %v51_v44  ;;  %v95_v9 = vld [vmem:[%s2030_s1 + $0x100] sm:$0xff] }
   0xf   :  { %1239 = vmatpush3.bf16.msra.mxu0 %v1308_v3  ;;  %v56_v3 = vld [vmem:[%s2029_s0 + $0x100] sm:$0xff]  ;;  %v1524_v7 = vadd.f32 %v130_v58, %v52_v48  ;;  %v133_v8 = vmul.f32 %v94_v1, %v55_v60  ;;  %v96_v10 = vld [vmem:[%s2030_s1 + $0x108] sm:$0xff]  ;;  %v59_v16 = vld [vmem:[%s2029_s0 + $0x118] sm:$0xff]  ;;  %v199_v57 = vpack.c.bf16 %v1507_v62, %v1484_v50 }
  0x10   :  { %1240 = vmatprep.subr.bf16.mxu0 %v1309_v11  ;;  %v1535_v12 = vadd.f32 %v131_v0, %v53_v52  ;;  %v1537_v13 = vadd.f32 %v132_v2, %v54_v59  ;;  %v135_v15 = vmul.f32 %v96_v10, %v57_v4  ;;  %v97_v17 = vld [vmem:[%s2030_s1 + $0x110] sm:$0xff]  ;;  %v98_v18 = vld [vmem:[%s2030_s1 + $0x118] sm:$0xff]  ;;  %v209_v21 = vpack.c.bf16 %v1522_v6, %v1509_v63  ;;  %v61_v26 = vld [vmem:[%s2029_s0 + $0x128] sm:$0xff] }
  0x11   :  { %v34_v19 = vld [vmem:[%s2029_s0 + $0x50] sm:$0xff]  ;;  %v1556_v22 = vadd.f32 %v133_v8, %v55_v60  ;;  %v137_v24 = vmul.f32 %v98_v18, %v59_v16  ;;  %v99_v27 = vld [vmem:[%s2030_s1 + $0x120] sm:$0xff]  ;;  %v35_v28 = vld [vmem:[%s2029_s0 + $0x58] sm:$0xff]  ;;  %v200_v60 = vpack.c.bf16 %v150_v46, %v1520_v5 }
  0x12   :  { %v73_v20 = vld [vmem:[%s2030_s1 + $0x50] sm:$0xff]  ;;  %v74_v29 = vld [vmem:[%s2030_s1 + $0x58] sm:$0xff]  ;;  %v210_v30 = vpack.c.bf16 %v1535_v12, %v1524_v7  ;;  %v1577_v32 = vadd.f32 %v135_v15, %v57_v4  ;;  %v100_v33 = vld [vmem:[%s2030_s1 + $0x128] sm:$0xff] }
  0x13   :  { %1241 = vmatpush3.bf16.msra.mxu0 %v1309_v11  ;;  %v58_v11 = vld [vmem:[%s2029_s0 + $0x110] sm:$0xff]  ;;  %v37_v38 = vld [vmem:[%s2029_s0 + $0x68] sm:$0xff]  ;;  %v75_v39 = vld [vmem:[%s2030_s1 + $0x60] sm:$0xff]  ;;  %v211_v41 = vpack.c.bf16 %v1556_v22, %v1537_v13  ;;  %v1601_v43 = vadd.f32 %v137_v24, %v59_v16  ;;  %v139_v44 = vmul.f32 %v100_v33, %v61_v26  ;;  %v113_v58 = vmul.f32 %v74_v29, %v35_v28 }
  0x14   :  { %1242 = vmatprep.subr.bf16.mxu0 %v1310_v14  ;;  %v136_v23 = vmul.f32 %v97_v17, %v58_v11  ;;  %v62_v35 = vld [vmem:[%s2029_s0 + $0x130] sm:$0xf]  ;;  %v1313_v45 = vld [vmem:[%s2031_s4] ss:$8 sps:$4 sm:$0xff]   ;;  %v1315_v51 = vld [vmem:[%s2031_s4 + $0x4] ss:$8 sps:$4 sm:$0xff]  }
  0x15   :  { %v101_v36 = vld [vmem:[%s2030_s1 + $0x130] sm:$0xf]  ;;  %v76_v52 = vld [vmem:[%s2030_s1 + $0x68] sm:$0xff]  ;;  %v1619_v54 = vadd.f32 %v139_v44, %v61_v26  ;;  %v1318_v40 = vld [vmem:[%s2031_s4 + $0x14] ss:$8 sps:$4 sm:$0xff]   ;;  %1288 = vmatprep.subr.bf16.mxu1 %v1315_v51  ;;  %v152_v8 = vadd.f32 %v113_v58, %v35_v28 }
  0x16   :  { %v1599_v42 = vadd.f32 %v136_v23, %v58_v11  ;;  %1296 = vmatpush1.bf16.msra.mxu1 %v1313_v45  ;;  %v115_v0 = vmul.f32 %v76_v52, %v37_v38  ;;  %v1316_v1 = vld [vmem:[%s2031_s4 + $0x10] ss:$8 sps:$4 sm:$0xff]   ;;  %v1321_v50 = vld [vmem:[%s2031_s4 + $0x24] ss:$8 sps:$4 sm:$0xff]   ;;  %v1319_v15 = vld [vmem:[%s2031_s4 + $0x20] ss:$8 sps:$4 sm:$0xff]  }
  0x17   :  { %1243 = vmatpush3.bf16.msra.mxu0 %v1310_v14  ;;  %v134_v14 = vmul.f32 %v95_v9, %v56_v3  ;;  %1289 = vmatprep.subr.bf16.mxu1 %v1318_v40  ;;  %v38_v62 = vld [vmem:[%s2029_s0 + $0x70] sm:$0xff]  ;;  %v39_v2 = vld [vmem:[%s2029_s0 + $0x78] sm:$0xff]  ;;  %v40_v9 = vld [vmem:[%s2029_s0 + $0x80] sm:$0xff] }
  0x18   :  { %1244 = vmatprep.subr.bf16.mxu0 %v1311_v25  ;;  %v213_v53 = vpack.c.bf16 %v1601_v43, %v1599_v42  ;;  %v78_v4 = vld [vmem:[%s2030_s1 + $0x78] sm:$0xff]  ;;  %v154_v11 = vadd.f32 %v115_v0, %v37_v38  ;;  %v79_v16 = vld [vmem:[%s2030_s1 + $0x80] sm:$0xff]  ;;  %v80_v17 = vld [vmem:[%s2030_s1 + $0x88] sm:$0xff] }
  0x19   :  { %v1575_v31 = vadd.f32 %v134_v14, %v56_v3  ;;  %v77_v3 = vld [vmem:[%s2030_s1 + $0x70] sm:$0xff]  ;;  %v41_v14 = vld [vmem:[%s2029_s0 + $0x88] sm:$0xff]  ;;  %v117_v23 = vmul.f32 %v78_v4, %v39_v2  ;;  %v44_v44 = vld [vmem:[%s2029_s0 + $0xa0] sm:$0xff] }
  0x1a   :  { %1297 = vmatpush1.bf16.msra.mxu1 %v1316_v1  ;;  %v1324_v18 = vld [vmem:[%s2031_s4 + $0x34] ss:$8 sps:$4 sm:$0xff]   ;;  %v119_v26 = vmul.f32 %v80_v17, %v41_v14  ;;  %v1327_v28 = vld [vmem:[%s2031_s4 + $0x44] ss:$8 sps:$4 sm:$0xff]   ;;  %v1325_v46 = vld [vmem:[%s2031_s4 + $0x40] ss:$8 sps:$4 sm:$0xff]  }
  0x1b   :  { %1245 = vmatpush3.bf16.msra.mxu0 %v1311_v25  ;;  %v60_v25 = vld [vmem:[%s2029_s0 + $0x120] sm:$0xff]  ;;  %v212_v47 = vpack.c.bf16 %v1577_v32, %v1575_v31  ;;  %1290 = vmatprep.subr.bf16.mxu1 %v1321_v50  ;;  %v42_v29 = vld [vmem:[%s2029_s0 + $0x90] sm:$0xff] }
  0x1c   :  { %1246 = vmatprep.subr.bf16.mxu0 %v1312_v37  ;;  %v138_v34 = vmul.f32 %v99_v27, %v60_v25  ;;  %v1322_v27 = vld [vmem:[%s2031_s4 + $0x30] ss:$8 sps:$4 sm:$0xff]   ;;  %v1330_v52 = vld [vmem:[%s2031_s4 + $0x54] ss:$8 sps:$4 sm:$0xff]   ;;  %v1333_v6 = vld [vmem:[%s2031_s4 + $0x64] ss:$8 sps:$4 sm:$0xff]  }
  0x1d   :  { %v1328_v0 = vld [vmem:[%s2031_s4 + $0x50] ss:$8 sps:$4 sm:$0xff]   ;;  %v1331_v7 = vld [vmem:[%s2031_s4 + $0x60] ss:$8 sps:$4 sm:$0xff]   ;;  %v1336_v12 = vld [vmem:[%s2031_s4 + $0x74] ss:$8 sps:$4 sm:$0xff]  }
  0x1e   :  { %v1609_v48 = vadd.f32 %v138_v34, %v60_v25  ;;  %1298 = vmatpush1.bf16.msra.mxu1 %v1319_v15  ;;  %v118_v25 = vmul.f32 %v79_v16, %v40_v9  ;;  %v156_v34 = vadd.f32 %v117_v23, %v39_v2  ;;  %v47_v2 = vld [vmem:[%s2029_s0 + $0xb8] sm:$0xff] }
  0x1f   :  { %1247 = vmatpush3.bf16.msra.mxu0 %v1312_v37  ;;  %v36_v37 = vld [vmem:[%s2029_s0 + $0x60] sm:$0xff]  ;;  %1291 = vmatprep.subr.bf16.mxu1 %v1324_v18  ;;  %v1334_v13 = vld [vmem:[%s2031_s4 + $0x70] ss:$8 sps:$4 sm:$0xff]  }
  0x20   :  { %591 = vmatprep.subr.bf16.mxu0 %v1315_v51  ;;  %v214_v59 = vpack.c.bf16 %v1619_v54, %v1609_v48  ;;  %v114_v61 = vmul.f32 %v75_v39, %v36_v37  ;;  %v157_v38 = vadd.f32 %v118_v25, %v40_v9  ;;  %v158_v39 = vadd.f32 %v119_v26, %v41_v14  ;;  %v84_v51 = vld [vmem:[%s2030_s1 + $0xa8] sm:$0xff]  ;;  %v48_v9 = vld [vmem:[%s2029_s0 + $0xc0] sm:$0xff] }
  0x21   :  { %v88_v14 = vld [vmem:[%s2030_s1 + $0xc8] sm:$0xff] }
  0x22   :  { %1249 = vmatmul.mubr.bf16.vlgmr.msra.gmra.mrb[0].mxu0 %v197_v49  ;;  %v140_v49 = vmul.f32 %v101_v36, %v62_v35  ;;  %v153_v10 = vadd.f32 %v114_v61, %v36_v37  ;;  %v81_v36 = vld [vmem:[%s2030_s1 + $0x90] sm:$0xff]  ;;  %v82_v37 = vld [vmem:[%s2030_s1 + $0x98] sm:$0xff]  ;;  %1299 = vmatpush1.bf16.msra.mxu1 %v1322_v27  ;;  %v204_v58 = vpack.c.bf16 %v158_v39, %v157_v38 }
  0x23   :  { %1252 = vmatprep.mubr.bf16.mxu0 %v198_v55  ;;  %v112_v55 = vmul.f32 %v73_v20, %v34_v19  ;;  %592 = vmatpush1.bf16.msra.mxu0 %v1313_v45  ;;  %v116_v20 = vmul.f32 %v77_v3, %v38_v62  ;;  %v45_v45 = vld [vmem:[%s2029_s0 + $0xa8] sm:$0xff] }
  0x24   :  { %v1624_v56 = vadd.f32 %v140_v49, %v62_v35  ;;  %593 = vmatprep.subr.bf16.mxu0 %v1318_v40  ;;  %v202_v24 = vpack.c.bf16 %v154_v11, %v153_v10  ;;  %v43_v35 = vld [vmem:[%s2029_s0 + $0x98] sm:$0xff]  ;;  %v83_v49 = vld [vmem:[%s2030_s1 + $0xa0] sm:$0xff]  ;;  %1292 = vmatprep.subr.bf16.mxu1 %v1327_v28  ;;  %v123_v61 = vmul.f32 %v84_v51, %v45_v45  ;;  %v49_v10 = vld [vmem:[%s2029_s0 + $0xc8] sm:$0xff] }
  0x25   :  { %v151_v5 = vadd.f32 %v112_v55, %v34_v19  ;;  %v155_v33 = vadd.f32 %v116_v20, %v38_v62  ;;  %v120_v55 = vmul.f32 %v81_v36, %v42_v29  ;;  %v46_v62 = vld [vmem:[%s2029_s0 + $0xb0] sm:$0xff]  ;;  %v87_v11 = vld [vmem:[%s2030_s1 + $0xc0] sm:$0xff]  ;;  %v127_v20 = vmul.f32 %v88_v14, %v49_v10 }
  0x26   :  { %1300 = vmatpush1.bf16.msra.mxu1 %v1325_v46  ;;  %v162_v4 = vadd.f32 %v123_v61, %v45_v45  ;;  %v215_v63 = vpack.c.bf16 %v1624_v56, %v1624_v56 }
  0x27   :  { %594 = vmatpush1.bf16.msra.mxu0 %v1316_v1  ;;  %v201_v19 = vpack.c.bf16 %v152_v8, %v151_v5  ;;  %v203_v40 = vpack.c.bf16 %v156_v34, %v155_v33  ;;  %1293 = vmatprep.subr.bf16.mxu1 %v1330_v52  ;;  %v159_v1 = vadd.f32 %v120_v55, %v42_v29  ;;  %v85_v5 = vld [vmem:[%s2030_s1 + $0xb0] sm:$0xff]  ;;  %v86_v8 = vld [vmem:[%s2030_s1 + $0xb8] sm:$0xff] }
  0x28   :  { %595 = vmatprep.subr.bf16.mxu0 %v1321_v50  ;;  %v124_v16 = vmul.f32 %v85_v5, %v46_v62  ;;  %v125_v17 = vmul.f32 %v86_v8, %v47_v2  ;;  %v166_v26 = vadd.f32 %v127_v20, %v49_v10 }
  0x2a   :  { %1253 = vmatmul.mubr.bf16.gmra.mrb[4].mxu0 %v199_v57  ;;  %v121_v57 = vmul.f32 %v82_v37, %v43_v35  ;;  %1301 = vmatpush1.bf16.msra.mxu1 %v1328_v0  ;;  %v163_v23 = vadd.f32 %v124_v16, %v46_v62 }
  0x2b   :  { %1256 = vmatprep.mubr.bf16.mxu0 %v200_v60  ;;  %596 = vmatpush1.bf16.msra.mxu0 %v1319_v15  ;;  %v122_v60 = vmul.f32 %v83_v49, %v44_v44 }
  0x2c   :  { %597 = vmatprep.subr.bf16.mxu0 %v1324_v18  ;;  %v160_v50 = vadd.f32 %v121_v57, %v43_v35  ;;  %1294 = vmatprep.subr.bf16.mxu1 %v1333_v6 }
  0x2d   :  { %v161_v3 = vadd.f32 %v122_v60, %v44_v44 }
  0x2e   :  { %v205_v15 = vpack.c.bf16 %v160_v50, %v159_v1  ;;  %1302 = vmatpush1.bf16.msra.mxu1 %v1331_v7 }
  0x2f   :  { %598 = vmatpush1.bf16.msra.mxu0 %v1322_v27  ;;  %v206_v18 = vpack.c.bf16 %v162_v4, %v161_v3  ;;  %1295 = vmatprep.subr.bf16.mxu1 %v1336_v12 }
  0x30   :  { %599 = vmatprep.subr.bf16.mxu0 %v1327_v28 }
  0x32   :  { %1257 = vmatmul.mubr.bf16.gmra.mrb[8].mxu0 %v201_v19  ;;  %v126_v19 = vmul.f32 %v87_v11, %v48_v9  ;;  %1303 = vmatpush1.bf16.msra.mxu1 %v1334_v13 }
  0x33   :  { %1260 = vmatprep.mubr.bf16.mxu0 %v202_v24  ;;  %600 = vmatpush1.bf16.msra.mxu0 %v1325_v46  ;;  %v164_v24 = vadd.f32 %v125_v17, %v47_v2 }
  0x34   :  { %601 = vmatprep.subr.bf16.mxu0 %v1330_v52  ;;  %v165_v25 = vadd.f32 %v126_v19, %v48_v9 }
  0x35   :  { %v207_v27 = vpack.c.bf16 %v164_v24, %v163_v23 }
  0x36   :  { %v208_v28 = vpack.c.bf16 %v166_v26, %v165_v25 }
  0x37   :  { %602 = vmatpush1.bf16.msra.mxu0 %v1328_v0 }
  0x38   :  { %603 = vmatprep.subr.bf16.mxu0 %v1333_v6 }
  0x3a   :  { %1261 = vmatmul.mubr.bf16.gmra.mrb[12].mxu0 %v203_v40 }
  0x3b   :  { %1264 = vmatprep.mubr.bf16.mxu0 %v204_v58  ;;  %604 = vmatpush1.bf16.msra.mxu0 %v1331_v7 }
  0x3c   :  { %605 = vmatprep.subr.bf16.mxu0 %v1336_v12 }
  0x3f   :  { %606 = vmatpush1.bf16.msra.mxu0 %v1334_v13 }
  0x42   :  { %1265 = vmatmul.mubr.bf16.gmra.mrb[16].mxu0 %v205_v15 }
  0x43   :  { %1268 = vmatprep.mubr.bf16.mxu0 %v206_v18 }
  0x4a   :  { %1269 = vmatmul.mubr.bf16.gmra.mrb[20].mxu0 %v207_v27 }
  0x4b   :  { %1272 = vmatprep.mubr.bf16.mxu0 %v208_v28 }
  0x52   :  { %1273 = vmatmul.mubr.bf16.gmra.mrb[24].mxu0 %v209_v21  ;;  %v1337_v21 = vmov 0  }
  0x53   :  { %1276 = vmatprep.mubr.bf16.mxu0 %v210_v30  ;;  %673 = vmatprep.mubr.bf16.mxu1 %v1337_v21  ;;  %v1767_v30 = vld [vmem:[%s2032_s3] ss:$0 sm:$0xff] }
  0x5a   :  { %1277 = vmatmul.mubr.bf16.gmra.mrb[28].mxu0 %v211_v41 }
  0x5b   :  { %1280 = vmatprep.mubr.bf16.mxu0 %v212_v47 }
  0x62   :  { %1281 = vmatmul.mubr.bf16.gmra.mrb[32].mxu0 %v213_v53 }
  0x63   :  { %1284 = vmatprep.mubr.bf16.mxu0 %v214_v59 }
  0x6a   :  { %1285 = vmatmul.mubr.bf16.gmra.mrb[36].mxu0 %v215_v63 }
  0x6b   :  { %623 = vmatprep.mubr.bf16.mxu0 %v1337_v21 }
  0xf5   :  { %v1250_v22 = vpop.f32.mrb[0].mxu0 }
  0xf6   :  { %v305_v31 = vpop.f32.mrb[1].mxu0  ;;  %v314_v41 = vadd.f32 %v1250_v22, %v1767_v30 }
  0xf7   :  { %v1251_v32 = vpop.f32.mrb[2].mxu0  ;;  %v306_v47 = vadd.f32 %v1767_v30, %v305_v31 }
  0xf8   :  { %v317_v42 = vadd.f32 %v1251_v32, %v1767_v30  ;;  %v308_v43 = vpop.f32.mrb[3].mxu0 }
  0xf9   :  { %v309_v48 = vadd.f32 %v1767_v30, %v308_v43 }
  0xfa   :  { %v480_v53 = vpack.c.bf16 %v317_v42, %v314_v41 }
  0xfb   :  { %v479_v54 = vpack.c.bf16 %v309_v48, %v306_v47 }
  0xfd   :  { %v1254_v56 = vpop.f32.mrb[4].mxu0  ;;  %624 = vmatmul.mubr.bf16.vlgmr.msra.gmra.mrb[40].mxu0 %v479_v54 }
  0xfe   :  { %v321_v59 = vpop.f32.mrb[5].mxu0  ;;  %633 = vmatprep.mubr.bf16.mxu0 %v1337_v21  ;;  %v330_v33 = vadd.f32 %v1254_v56, %v1767_v30 }
  0xff   :  { %v1255_v29 = vpop.f32.mrb[6].mxu0  ;;  %v322_v36 = vadd.f32 %v1767_v30, %v321_v59 }
 0x100   :  { %v333_v34 = vadd.f32 %v1255_v29, %v1767_v30  ;;  %v324_v35 = vpop.f32.mrb[7].mxu0 }
 0x101   :  { %v325_v37 = vadd.f32 %v1767_v30, %v324_v35 }
 0x102   :  { %v482_v38 = vpack.c.bf16 %v333_v34, %v330_v33 }
 0x103   :  { %v481_v39 = vpack.c.bf16 %v325_v37, %v322_v36 }
 0x105   :  { %v1258_v44 = vpop.f32.mrb[8].mxu0  ;;  %634 = vmatmul.mubr.bf16.gmra.mrb[44].mxu0 %v480_v53 }
 0x106   :  { %v337_v45 = vpop.f32.mrb[9].mxu0  ;;  %643 = vmatprep.mubr.bf16.mxu0 %v1337_v21  ;;  %v346_v49 = vadd.f32 %v1258_v44, %v1767_v30 }
 0x107   :  { %v1259_v46 = vpop.f32.mrb[10].mxu0  ;;  %v338_v40 = vadd.f32 %v1767_v30, %v337_v45 }
 0x108   :  { %v349_v51 = vadd.f32 %v1259_v46, %v1767_v30  ;;  %v340_v52 = vpop.f32.mrb[11].mxu0 }
 0x109   :  { %v341_v55 = vadd.f32 %v1767_v30, %v340_v52 }
 0x10a   :  { %v484_v57 = vpack.c.bf16 %v349_v51, %v346_v49 }
 0x10b   :  { %v483_v58 = vpack.c.bf16 %v341_v55, %v338_v40 }
 0x10c   :  { %674 = vmatmul.mubr.bf16.vlgmr.msra.gmra.mrb[0].mxu1 %v484_v57 }
 0x10d   :  { %v1262_v60 = vpop.f32.mrb[12].mxu0  ;;  %644 = vmatmul.mubr.bf16.gmra.mrb[48].mxu0 %v481_v39  ;;  %683 = vmatprep.mubr.bf16.mxu1 %v1337_v21 }
 0x10e   :  { %v353_v61 = vpop.f32.mrb[13].mxu0  ;;  %653 = vmatprep.mubr.bf16.mxu0 %v1337_v21  ;;  %v362_v1 = vadd.f32 %v1262_v60, %v1767_v30 }
 0x10f   :  { %v1263_v0 = vpop.f32.mrb[14].mxu0  ;;  %v354_v2 = vadd.f32 %v1767_v30, %v353_v61 }
 0x110   :  { %v365_v50 = vadd.f32 %v1263_v0, %v1767_v30  ;;  %v356_v62 = vpop.f32.mrb[15].mxu0 }
 0x111   :  { %v357_v3 = vadd.f32 %v1767_v30, %v356_v62 }
 0x112   :  { %v486_v4 = vpack.c.bf16 %v365_v50, %v362_v1 }
 0x113   :  { %v485_v5 = vpack.c.bf16 %v357_v3, %v354_v2  ;;  %v501_v3 = vlaneseq }
 0x115   :  { %654 = vmatmul.mubr.bf16.gmra.mrb[52].mxu0 %v482_v38  ;;  %684 = vmatmul.mubr.bf16.gmra.mrb[4].mxu1 %v485_v5  ;;  %v1266_v8 = vpop.f32.mrb[16].mxu0 }
 0x116   :  { %v378_v9 = vadd.f32 %v1266_v8, %v1767_v30  ;;  %v369_v10 = vpop.f32.mrb[17].mxu0  ;;  %663 = vmatprep.mubr.bf16.mxu0 %v1337_v21  ;;  %693 = vmatprep.mubr.bf16.mxu1 %v1337_v21  ;;  %v499_v8 = vld [vmem:[%s2033_s5] sm:$0x3] }
 0x117   :  { %v370_v11 = vadd.f32 %v1767_v30, %v369_v10  ;;  %v1267_v14 = vpop.f32.mrb[18].mxu0 }
 0x118   :  { %v381_v15 = vadd.f32 %v1267_v14, %v1767_v30  ;;  %v372_v16 = vpop.f32.mrb[19].mxu0 }
 0x119   :  { %v373_v17 = vadd.f32 %v1767_v30, %v372_v16 }
 0x11a   :  { %v488_v18 = vpack.c.bf16 %v381_v15, %v378_v9 }
 0x11b   :  { %v487_v19 = vpack.c.bf16 %v373_v17, %v370_v11 }
 0x11d   :  { %664 = vmatmul.mubr.bf16.gmra.mrb[56].mxu0 %v483_v58  ;;  %694 = vmatmul.mubr.bf16.gmra.mrb[8].mxu1 %v486_v4  ;;  %v1270_v20 = vpop.f32.mrb[20].mxu0  ;;  %v502_v4 = vshrl.u32 %v501_v3, 7 }
 0x11e   :  { %703 = vmatprep.mubr.bf16.mxu1 %v1337_v21  ;;  %v394_v23 = vadd.f32 %v1270_v20, %v1767_v30  ;;  %v385_v24 = vpop.f32.mrb[21].mxu0 }
 0x11f   :  { %v386_v25 = vadd.f32 %v1767_v30, %v385_v24  ;;  %v1271_v26 = vpop.f32.mrb[22].mxu0  ;;  %v503_v5 = vsub.s32 0, %v502_v4  ;;  %v507_v9 = vsub.s32 1, %v502_v4 }
 0x120   :  { %v397_v27 = vadd.f32 %v1271_v26, %v1767_v30  ;;  %v388_v28 = vpop.f32.mrb[23].mxu0 }
 0x121   :  { %v389_v63 = vadd.f32 %v1767_v30, %v388_v28  ;;  %v1829_v10 = vrot.slane %v499_v8, %v503_v5  ;;  %v1831_v11 = vrot.slane %v499_v8, %v507_v9 }
 0x122   :  { %v490_v6 = vpack.c.bf16 %v397_v27, %v394_v23 }
 0x123   :  { %v489_v7 = vpack.c.bf16 %v389_v63, %v386_v25 }
 0x125   :  { %704 = vmatmul.mubr.bf16.gmra.mrb[12].mxu1 %v487_v19  ;;  %v1274_v12 = vpop.f32.mrb[24].mxu0 }
 0x126   :  { %713 = vmatprep.mubr.bf16.mxu1 %v1337_v21  ;;  %v410_v13 = vadd.f32 %v1274_v12, %v1767_v30  ;;  %v401_v22 = vpop.f32.mrb[25].mxu0 }
 0x127   :  { %v402_v31 = vadd.f32 %v1767_v30, %v401_v22  ;;  %v1275_v32 = vpop.f32.mrb[26].mxu0 }
 0x128   :  { %v413_v41 = vadd.f32 %v1275_v32, %v1767_v30  ;;  %v404_v42 = vpop.f32.mrb[27].mxu0 }
 0x129   :  { %v405_v43 = vadd.f32 %v1767_v30, %v404_v42 }
 0x12a   :  { %v492_v47 = vpack.c.bf16 %v413_v41, %v410_v13 }
 0x12b   :  { %v491_v48 = vpack.c.bf16 %v405_v43, %v402_v31 }
 0x12d   :  { %714 = vmatmul.mubr.bf16.gmra.mrb[16].mxu1 %v488_v18  ;;  %v1278_v53 = vpop.f32.mrb[28].mxu0 }
 0x12e   :  { %723 = vmatprep.mubr.bf16.mxu1 %v1337_v21  ;;  %v426_v54 = vadd.f32 %v1278_v53, %v1767_v30  ;;  %v417_v56 = vpop.f32.mrb[29].mxu0 }
 0x12f   :  { %v418_v59 = vadd.f32 %v1767_v30, %v417_v56  ;;  %v1279_v29 = vpop.f32.mrb[30].mxu0 }
 0x130   :  { %v429_v33 = vadd.f32 %v1279_v29, %v1767_v30  ;;  %v420_v34 = vpop.f32.mrb[31].mxu0 }
 0x131   :  { %v421_v35 = vadd.f32 %v1767_v30, %v420_v34 }
 0x132   :  { %v494_v36 = vpack.c.bf16 %v429_v33, %v426_v54 }
 0x133   :  { %v493_v37 = vpack.c.bf16 %v421_v35, %v418_v59 }
 0x135   :  { %724 = vmatmul.mubr.bf16.gmra.mrb[20].mxu1 %v489_v7  ;;  %v1282_v38 = vpop.f32.mrb[32].mxu0 }
 0x136   :  { %733 = vmatprep.mubr.bf16.mxu1 %v1337_v21  ;;  %v442_v39 = vadd.f32 %v1282_v38, %v1767_v30  ;;  %v433_v44 = vpop.f32.mrb[33].mxu0 }
 0x137   :  { %v434_v45 = vadd.f32 %v1767_v30, %v433_v44  ;;  %v1283_v46 = vpop.f32.mrb[34].mxu0 }
 0x138   :  { %v445_v49 = vadd.f32 %v1283_v46, %v1767_v30  ;;  %v436_v51 = vpop.f32.mrb[35].mxu0 }
 0x139   :  { %v437_v52 = vadd.f32 %v1767_v30, %v436_v51 }
 0x13a   :  { %v496_v40 = vpack.c.bf16 %v445_v49, %v442_v39 }
 0x13b   :  { %v495_v55 = vpack.c.bf16 %v437_v52, %v434_v45 }
 0x13d   :  { %734 = vmatmul.mubr.bf16.gmra.mrb[24].mxu1 %v490_v6  ;;  %v1286_v57 = vpop.f32.mrb[36].mxu0 }
 0x13e   :  { %743 = vmatprep.mubr.bf16.mxu1 %v1337_v21  ;;  %v449_v58 = vpop.f32.mrb[37].mxu0  ;;  %v458_v62 = vadd.f32 %v1286_v57, %v1767_v30 }
 0x13f   :  { %v450_v60 = vadd.f32 %v1767_v30, %v449_v58  ;;  %v1287_v61 = vpop.f32.mrb[38].mxu0 }
 0x140   :  { %v452_v0 = vpop.f32.mrb[39].mxu0  ;;  %v498_v2 = vpack.c.bf16 %v458_v62, %v458_v62 }
 0x141   :  { %v453_v1 = vadd.f32 %v1767_v30, %v452_v0 }
 0x143   :  { %v497_v50 = vpack.c.bf16 %v453_v1, %v450_v60 }
 0x145   :  { %744 = vmatmul.mubr.bf16.gmra.mrb[28].mxu1 %v491_v48 }
 0x146   :  { %753 = vmatprep.mubr.bf16.mxu1 %v1337_v21 }
 0x14d   :  { %754 = vmatmul.mubr.bf16.gmra.mrb[32].mxu1 %v492_v47 }
 0x14e   :  { %763 = vmatprep.mubr.bf16.mxu1 %v1337_v21 }
 0x155   :  { %764 = vmatmul.mubr.bf16.gmra.mrb[36].mxu1 %v493_v37 }
 0x156   :  { %773 = vmatprep.mubr.bf16.mxu1 %v1337_v21 }
 0x15d   :  { %774 = vmatmul.mubr.bf16.gmra.mrb[40].mxu1 %v494_v36 }
 0x15e   :  { %783 = vmatprep.mubr.bf16.mxu1 %v1337_v21 }
 0x165   :  { %784 = vmatmul.mubr.bf16.gmra.mrb[44].mxu1 %v495_v55 }
 0x166   :  { %793 = vmatprep.mubr.bf16.mxu1 %v1337_v21 }
 0x16d   :  { %794 = vmatmul.mubr.bf16.gmra.mrb[48].mxu1 %v496_v40 }
 0x16e   :  { %803 = vmatprep.mubr.bf16.mxu1 %v1337_v21 }
 0x175   :  { %804 = vmatmul.mubr.bf16.gmra.mrb[52].mxu1 %v497_v50 }
 0x176   :  { %813 = vmatprep.mubr.bf16.mxu1 %v1337_v21 }
 0x17d   :  { %814 = vmatmul.mubr.bf16.gmra.mrb[56].mxu1 %v498_v2 }
 0x1d0   :  { %v625_v14 = vpop.f32.mrb[40].mxu0 }
 0x1d1   :  { %v626_v15 = vadd.f32 %v625_v14, %v1829_v10  ;;  %v627_v21 = vpop.f32.mrb[41].mxu0 }
 0x1d2   :  { %v628_v30 = vadd.f32 %v627_v21, %v1831_v11  ;;  %v629_v16 = vpop.f32.mrb[42].mxu0 }
 0x1d3   :  { %v630_v17 = vadd.f32 %v629_v16, %v1829_v10  ;;  %v631_v18 = vpop.f32.mrb[43].mxu0 }
 0x1d4   :  { %v1165_v19 = vpack.c.bf16 %v628_v30, %v626_v15  ;;  %v632_v20 = vadd.f32 %v631_v18, %v1831_v11 }
 0x1d6   :  { %1058 = vst [vmem:[%s2034_s6] sm:$0xff] %v1165_v19  ;;  %v1166_v23 = vpack.c.bf16 %v632_v20, %v630_v17 }
 0x1d8   :  { %1059 = vst [vmem:[%s2034_s6 + $0x8] sm:$0xff] %v1166_v23  ;;  %v635_v24 = vpop.f32.mrb[44].mxu0 }
 0x1d9   :  { %v636_v25 = vadd.f32 %v635_v24, %v1829_v10  ;;  %v637_v26 = vpop.f32.mrb[45].mxu0 }
 0x1da   :  { %v638_v27 = vadd.f32 %v637_v26, %v1831_v11  ;;  %v639_v28 = vpop.f32.mrb[46].mxu0 }
 0x1db   :  { %v640_v63 = vadd.f32 %v639_v28, %v1829_v10  ;;  %v641_v6 = vpop.f32.mrb[47].mxu0 }
 0x1dc   :  { %v1167_v7 = vpack.c.bf16 %v638_v27, %v636_v25  ;;  %v642_v12 = vadd.f32 %v641_v6, %v1831_v11 }
 0x1de   :  { %1060 = vst [vmem:[%s2034_s6 + $0x10] sm:$0xff] %v1167_v7  ;;  %v1168_v13 = vpack.c.bf16 %v642_v12, %v640_v63 }
 0x1df   :  { %v675_v22 = vpop.f32.mrb[0].mxu1 }
 0x1e0   :  { %1061 = vst [vmem:[%s2034_s6 + $0x18] sm:$0xff] %v1168_v13  ;;  %v676_v31 = vadd.f32 %v675_v22, %v1829_v10  ;;  %v645_v32 = vpop.f32.mrb[48].mxu0  ;;  %v677_v41 = vpop.f32.mrb[1].mxu1 }
 0x1e1   :  { %v646_v42 = vadd.f32 %v645_v32, %v1829_v10  ;;  %v678_v43 = vadd.f32 %v677_v41, %v1831_v11  ;;  %v647_v47 = vpop.f32.mrb[49].mxu0  ;;  %v679_v48 = vpop.f32.mrb[2].mxu1 }
 0x1e2   :  { %v648_v53 = vadd.f32 %v647_v47, %v1831_v11  ;;  %v680_v54 = vadd.f32 %v679_v48, %v1829_v10  ;;  %v649_v56 = vpop.f32.mrb[50].mxu0  ;;  %v681_v59 = vpop.f32.mrb[3].mxu1 }
 0x1e3   :  { %v1175_v29 = vpack.c.bf16 %v678_v43, %v676_v31  ;;  %v650_v33 = vadd.f32 %v649_v56, %v1829_v10  ;;  %v682_v34 = vadd.f32 %v681_v59, %v1831_v11  ;;  %v651_v35 = vpop.f32.mrb[51].mxu0 }
 0x1e4   :  { %v1169_v36 = vpack.c.bf16 %v648_v53, %v646_v42  ;;  %v652_v37 = vadd.f32 %v651_v35, %v1831_v11 }
 0x1e5   :  { %1068 = vst [vmem:[%s2034_s6 + $0x50] sm:$0xff] %v1175_v29  ;;  %v1176_v38 = vpack.c.bf16 %v682_v34, %v680_v54 }
 0x1e6   :  { %1062 = vst [vmem:[%s2034_s6 + $0x20] sm:$0xff] %v1169_v36  ;;  %v1170_v39 = vpack.c.bf16 %v652_v37, %v650_v33 }
 0x1e7   :  { %1069 = vst [vmem:[%s2034_s6 + $0x58] sm:$0xff] %v1176_v38 }
 0x1e8   :  { %1063 = vst [vmem:[%s2034_s6 + $0x28] sm:$0xff] %v1170_v39  ;;  %v655_v44 = vpop.f32.mrb[52].mxu0  ;;  %v685_v45 = vpop.f32.mrb[4].mxu1 }
 0x1e9   :  { %v656_v46 = vadd.f32 %v655_v44, %v1829_v10  ;;  %v686_v49 = vadd.f32 %v685_v45, %v1829_v10  ;;  %v657_v51 = vpop.f32.mrb[53].mxu0  ;;  %v687_v52 = vpop.f32.mrb[5].mxu1 }
 0x1ea   :  { %v658_v40 = vadd.f32 %v657_v51, %v1831_v11  ;;  %v688_v55 = vadd.f32 %v687_v52, %v1831_v11  ;;  %v659_v57 = vpop.f32.mrb[54].mxu0  ;;  %v689_v58 = vpop.f32.mrb[6].mxu1 }
 0x1eb   :  { %v660_v60 = vadd.f32 %v659_v57, %v1829_v10  ;;  %v690_v61 = vadd.f32 %v689_v58, %v1829_v10  ;;  %v661_v0 = vpop.f32.mrb[55].mxu0  ;;  %v691_v1 = vpop.f32.mrb[7].mxu1 }
 0x1ec   :  { %v1171_v50 = vpack.c.bf16 %v658_v40, %v656_v46  ;;  %v1177_v62 = vpack.c.bf16 %v688_v55, %v686_v49  ;;  %v662_v2 = vadd.f32 %v661_v0, %v1831_v11  ;;  %v692_v3 = vadd.f32 %v691_v1, %v1831_v11 }
 0x1ee   :  { %1064 = vst [vmem:[%s2034_s6 + $0x30] sm:$0xff] %v1171_v50  ;;  %1070 = vst [vmem:[%s2034_s6 + $0x60] sm:$0xff] %v1177_v62  ;;  %v1172_v4 = vpack.c.bf16 %v662_v2, %v660_v60  ;;  %v1178_v5 = vpack.c.bf16 %v692_v3, %v690_v61 }
 0x1f0   :  { %1065 = vst [vmem:[%s2034_s6 + $0x38] sm:$0xff] %v1172_v4  ;;  %1071 = vst [vmem:[%s2034_s6 + $0x68] sm:$0xff] %v1178_v5  ;;  %v665_v8 = vpop.f32.mrb[56].mxu0  ;;  %v695_v9 = vpop.f32.mrb[8].mxu1 }
 0x1f1   :  { %v666_v14 = vadd.f32 %v665_v8, %v1829_v10  ;;  %v696_v15 = vadd.f32 %v695_v9, %v1829_v10  ;;  %v667_v21 = vpop.f32.mrb[57].mxu0  ;;  %v697_v30 = vpop.f32.mrb[9].mxu1 }
 0x1f2   :  { %v668_v16 = vadd.f32 %v667_v21, %v1831_v11  ;;  %v698_v17 = vadd.f32 %v697_v30, %v1831_v11  ;;  %v669_v18 = vpop.f32.mrb[58].mxu0  ;;  %v699_v19 = vpop.f32.mrb[10].mxu1 }
 0x1f3   :  { %v670_v20 = vadd.f32 %v669_v18, %v1829_v10  ;;  %v700_v23 = vadd.f32 %v699_v19, %v1829_v10  ;;  %v671_v24 = vpop.f32.mrb[59].mxu0  ;;  %v701_v25 = vpop.f32.mrb[11].mxu1 }
 0x1f4   :  { %v1173_v26 = vpack.c.bf16 %v668_v16, %v666_v14  ;;  %v1179_v27 = vpack.c.bf16 %v698_v17, %v696_v15  ;;  %v672_v28 = vadd.f32 %v671_v24, %v1831_v11  ;;  %v702_v63 = vadd.f32 %v701_v25, %v1831_v11 }
 0x1f6   :  { %1066 = vst [vmem:[%s2034_s6 + $0x40] sm:$0xff] %v1173_v26  ;;  %1072 = vst [vmem:[%s2034_s6 + $0x70] sm:$0xff] %v1179_v27  ;;  %v1174_v6 = vpack.c.bf16 %v672_v28, %v670_v20  ;;  %v1180_v7 = vpack.c.bf16 %v702_v63, %v700_v23 }
 0x1f8   :  { %1067 = vst [vmem:[%s2034_s6 + $0x48] sm:$0xff] %v1174_v6  ;;  %1073 = vst [vmem:[%s2034_s6 + $0x78] sm:$0xff] %v1180_v7  ;;  %v705_v12 = vpop.f32.mrb[12].mxu1 }
 0x1f9   :  { %v706_v13 = vadd.f32 %v705_v12, %v1829_v10  ;;  %v707_v22 = vpop.f32.mrb[13].mxu1 }
 0x1fa   :  { %v708_v31 = vadd.f32 %v707_v22, %v1831_v11  ;;  %v709_v32 = vpop.f32.mrb[14].mxu1 }
 0x1fb   :  { %v710_v41 = vadd.f32 %v709_v32, %v1829_v10  ;;  %v711_v42 = vpop.f32.mrb[15].mxu1 }
 0x1fc   :  { %v1181_v43 = vpack.c.bf16 %v708_v31, %v706_v13  ;;  %v712_v47 = vadd.f32 %v711_v42, %v1831_v11 }
 0x1fe   :  { %1074 = vst [vmem:[%s2034_s6 + $0x80] sm:$0xff] %v1181_v43  ;;  %v1182_v48 = vpack.c.bf16 %v712_v47, %v710_v41 }
 0x200   :  { %1075 = vst [vmem:[%s2034_s6 + $0x88] sm:$0xff] %v1182_v48  ;;  %v715_v53 = vpop.f32.mrb[16].mxu1 }
 0x201   :  { %v716_v54 = vadd.f32 %v715_v53, %v1829_v10  ;;  %v717_v56 = vpop.f32.mrb[17].mxu1 }
 0x202   :  { %v718_v59 = vadd.f32 %v717_v56, %v1831_v11  ;;  %v719_v29 = vpop.f32.mrb[18].mxu1 }
 0x203   :  { %v720_v33 = vadd.f32 %v719_v29, %v1829_v10  ;;  %v721_v34 = vpop.f32.mrb[19].mxu1 }
 0x204   :  { %v1183_v35 = vpack.c.bf16 %v718_v59, %v716_v54  ;;  %v722_v36 = vadd.f32 %v721_v34, %v1831_v11 }
 0x206   :  { %1076 = vst [vmem:[%s2034_s6 + $0x90] sm:$0xff] %v1183_v35  ;;  %v1184_v37 = vpack.c.bf16 %v722_v36, %v720_v33 }
 0x208   :  { %1077 = vst [vmem:[%s2034_s6 + $0x98] sm:$0xff] %v1184_v37  ;;  %v725_v38 = vpop.f32.mrb[20].mxu1 }
 0x209   :  { %v726_v39 = vadd.f32 %v725_v38, %v1829_v10  ;;  %v727_v44 = vpop.f32.mrb[21].mxu1 }
 0x20a   :  { %v728_v45 = vadd.f32 %v727_v44, %v1831_v11  ;;  %v729_v46 = vpop.f32.mrb[22].mxu1 }
 0x20b   :  { %v730_v49 = vadd.f32 %v729_v46, %v1829_v10  ;;  %v731_v51 = vpop.f32.mrb[23].mxu1 }
 0x20c   :  { %v1185_v52 = vpack.c.bf16 %v728_v45, %v726_v39  ;;  %v732_v40 = vadd.f32 %v731_v51, %v1831_v11 }
 0x20e   :  { %1078 = vst [vmem:[%s2034_s6 + $0xa0] sm:$0xff] %v1185_v52  ;;  %v1186_v55 = vpack.c.bf16 %v732_v40, %v730_v49 }
 0x210   :  { %1079 = vst [vmem:[%s2034_s6 + $0xa8] sm:$0xff] %v1186_v55  ;;  %v735_v57 = vpop.f32.mrb[24].mxu1 }
 0x211   :  { %v736_v58 = vadd.f32 %v735_v57, %v1829_v10  ;;  %v737_v60 = vpop.f32.mrb[25].mxu1 }
 0x212   :  { %v738_v61 = vadd.f32 %v737_v60, %v1831_v11  ;;  %v739_v0 = vpop.f32.mrb[26].mxu1 }
 0x213   :  { %v740_v1 = vadd.f32 %v739_v0, %v1829_v10  ;;  %v741_v50 = vpop.f32.mrb[27].mxu1 }
 0x214   :  { %v1187_v62 = vpack.c.bf16 %v738_v61, %v736_v58  ;;  %v742_v2 = vadd.f32 %v741_v50, %v1831_v11 }
 0x216   :  { %1080 = vst [vmem:[%s2034_s6 + $0xb0] sm:$0xff] %v1187_v62  ;;  %v1188_v3 = vpack.c.bf16 %v742_v2, %v740_v1 }
 0x218   :  { %1081 = vst [vmem:[%s2034_s6 + $0xb8] sm:$0xff] %v1188_v3  ;;  %v745_v4 = vpop.f32.mrb[28].mxu1 }
 0x219   :  { %v746_v5 = vadd.f32 %v745_v4, %v1829_v10  ;;  %v747_v8 = vpop.f32.mrb[29].mxu1 }
 0x21a   :  { %v748_v9 = vadd.f32 %v747_v8, %v1831_v11  ;;  %v749_v14 = vpop.f32.mrb[30].mxu1 }
 0x21b   :  { %v750_v15 = vadd.f32 %v749_v14, %v1829_v10  ;;  %v751_v21 = vpop.f32.mrb[31].mxu1 }
 0x21c   :  { %v1189_v30 = vpack.c.bf16 %v748_v9, %v746_v5  ;;  %v752_v16 = vadd.f32 %v751_v21, %v1831_v11 }
 0x21e   :  { %1082 = vst [vmem:[%s2034_s6 + $0xc0] sm:$0xff] %v1189_v30  ;;  %v1190_v17 = vpack.c.bf16 %v752_v16, %v750_v15 }
 0x220   :  { %1083 = vst [vmem:[%s2034_s6 + $0xc8] sm:$0xff] %v1190_v17  ;;  %v755_v18 = vpop.f32.mrb[32].mxu1 }
 0x221   :  { %v756_v19 = vadd.f32 %v755_v18, %v1829_v10  ;;  %v757_v20 = vpop.f32.mrb[33].mxu1 }
 0x222   :  { %v758_v23 = vadd.f32 %v757_v20, %v1831_v11  ;;  %v759_v24 = vpop.f32.mrb[34].mxu1 }
 0x223   :  { %v760_v25 = vadd.f32 %v759_v24, %v1829_v10  ;;  %v761_v26 = vpop.f32.mrb[35].mxu1 }
 0x224   :  { %v1191_v27 = vpack.c.bf16 %v758_v23, %v756_v19  ;;  %v762_v28 = vadd.f32 %v761_v26, %v1831_v11 }
 0x226   :  { %1084 = vst [vmem:[%s2034_s6 + $0xd0] sm:$0xff] %v1191_v27  ;;  %v1192_v63 = vpack.c.bf16 %v762_v28, %v760_v25 }
 0x228   :  { %1085 = vst [vmem:[%s2034_s6 + $0xd8] sm:$0xff] %v1192_v63  ;;  %v765_v6 = vpop.f32.mrb[36].mxu1 }
 0x229   :  { %v766_v7 = vadd.f32 %v765_v6, %v1829_v10  ;;  %v767_v12 = vpop.f32.mrb[37].mxu1 }
 0x22a   :  { %v768_v13 = vadd.f32 %v767_v12, %v1831_v11  ;;  %v769_v22 = vpop.f32.mrb[38].mxu1 }
 0x22b   :  { %v770_v31 = vadd.f32 %v769_v22, %v1829_v10  ;;  %v771_v32 = vpop.f32.mrb[39].mxu1 }
 0x22c   :  { %v1193_v41 = vpack.c.bf16 %v768_v13, %v766_v7  ;;  %v772_v42 = vadd.f32 %v771_v32, %v1831_v11 }
 0x22e   :  { %1086 = vst [vmem:[%s2034_s6 + $0xe0] sm:$0xff] %v1193_v41  ;;  %v1194_v43 = vpack.c.bf16 %v772_v42, %v770_v31 }
 0x230   :  { %1087 = vst [vmem:[%s2034_s6 + $0xe8] sm:$0xff] %v1194_v43  ;;  %v775_v47 = vpop.f32.mrb[40].mxu1 }
 0x231   :  { %v776_v48 = vadd.f32 %v775_v47, %v1829_v10  ;;  %v777_v53 = vpop.f32.mrb[41].mxu1 }
 0x232   :  { %v778_v54 = vadd.f32 %v777_v53, %v1831_v11  ;;  %v779_v56 = vpop.f32.mrb[42].mxu1 }
 0x233   :  { %v780_v59 = vadd.f32 %v779_v56, %v1829_v10  ;;  %v781_v29 = vpop.f32.mrb[43].mxu1 }
 0x234   :  { %v1195_v33 = vpack.c.bf16 %v778_v54, %v776_v48  ;;  %v782_v34 = vadd.f32 %v781_v29, %v1831_v11 }
 0x236   :  { %1088 = vst [vmem:[%s2034_s6 + $0xf0] sm:$0xff] %v1195_v33  ;;  %v1196_v35 = vpack.c.bf16 %v782_v34, %v780_v59 }
 0x238   :  { %1089 = vst [vmem:[%s2034_s6 + $0xf8] sm:$0xff] %v1196_v35  ;;  %v785_v36 = vpop.f32.mrb[44].mxu1 }
 0x239   :  { %v786_v37 = vadd.f32 %v785_v36, %v1829_v10  ;;  %v787_v38 = vpop.f32.mrb[45].mxu1 }
 0x23a   :  { %v788_v39 = vadd.f32 %v787_v38, %v1831_v11  ;;  %v789_v44 = vpop.f32.mrb[46].mxu1 }
 0x23b   :  { %v790_v45 = vadd.f32 %v789_v44, %v1829_v10  ;;  %v791_v46 = vpop.f32.mrb[47].mxu1 }
 0x23c   :  { %v1197_v49 = vpack.c.bf16 %v788_v39, %v786_v37  ;;  %v792_v51 = vadd.f32 %v791_v46, %v1831_v11 }
 0x23e   :  { %1090 = vst [vmem:[%s2034_s6 + $0x100] sm:$0xff] %v1197_v49  ;;  %v1198_v52 = vpack.c.bf16 %v792_v51, %v790_v45 }
 0x240   :  { %1091 = vst [vmem:[%s2034_s6 + $0x108] sm:$0xff] %v1198_v52  ;;  %v795_v40 = vpop.f32.mrb[48].mxu1 }
 0x241   :  { %v796_v55 = vadd.f32 %v795_v40, %v1829_v10  ;;  %v797_v57 = vpop.f32.mrb[49].mxu1 }
 0x242   :  { %v798_v58 = vadd.f32 %v797_v57, %v1831_v11  ;;  %v799_v60 = vpop.f32.mrb[50].mxu1 }
 0x243   :  { %v800_v61 = vadd.f32 %v799_v60, %v1829_v10  ;;  %v801_v0 = vpop.f32.mrb[51].mxu1 }
 0x244   :  { %v1199_v1 = vpack.c.bf16 %v798_v58, %v796_v55  ;;  %v802_v50 = vadd.f32 %v801_v0, %v1831_v11 }
 0x246   :  { %1092 = vst [vmem:[%s2034_s6 + $0x110] sm:$0xff] %v1199_v1  ;;  %v1200_v62 = vpack.c.bf16 %v802_v50, %v800_v61 }
 0x248   :  { %1093 = vst [vmem:[%s2034_s6 + $0x118] sm:$0xff] %v1200_v62  ;;  %v805_v2 = vpop.f32.mrb[52].mxu1 }
 0x249   :  { %v806_v3 = vadd.f32 %v805_v2, %v1829_v10  ;;  %v807_v4 = vpop.f32.mrb[53].mxu1 }
 0x24a   :  { %v808_v5 = vadd.f32 %v807_v4, %v1831_v11  ;;  %v809_v8 = vpop.f32.mrb[54].mxu1 }
 0x24b   :  { %v810_v9 = vadd.f32 %v809_v8, %v1829_v10  ;;  %v811_v14 = vpop.f32.mrb[55].mxu1 }
 0x24c   :  { %v1201_v15 = vpack.c.bf16 %v808_v5, %v806_v3  ;;  %v812_v21 = vadd.f32 %v811_v14, %v1831_v11 }
 0x24e   :  { %1094 = vst [vmem:[%s2034_s6 + $0x120] sm:$0xff] %v1201_v15  ;;  %v1202_v30 = vpack.c.bf16 %v812_v21, %v810_v9 }
 0x250   :  { %1095 = vst [vmem:[%s2034_s6 + $0x128] sm:$0xff] %v1202_v30  ;;  %v815_v16 = vpop.f32.mrb[56].mxu1 }
 0x251   :  { %v816_v17 = vadd.f32 %v815_v16, %v1829_v10  ;;  %v817_v18 = vpop.f32.mrb[57].mxu1 }
 0x252   :  { %v818_v19 = vadd.f32 %v817_v18, %v1831_v11  ;;  %v819_v20 = vpop.f32.mrb[58].mxu1 }
 0x253   :  { %v820_v23 = vpop.f32.mrb[59].mxu1 }
 0x254   :  { %v1203_v24 = vpack.c.bf16 %v818_v19, %v816_v17 }
 0x256   :  { %1096 = vst [vmem:[%s2034_s6 + $0x130] sm:$0x33] %v1203_v24 }

// kernel: _lambda_.3
= control target key start
LH: loop header
LB: loop body
LE: loop exit
PB: predicated region body
PF: predicated region fallthrough
CT: control target
= control target key end

     0   :  { %s4060_s18 = smov 0   ;;  %s5056_s0 = inlined_call_operand.vmem [shape: bf16[4,32,128], index: 0, kind: input, shape index: {}, may-alias: {0,5}]   ;;  %s5057_s1 = inlined_call_operand.vmem [shape: bf16[128,768], index: 1, kind: input, shape index: {}]   ;;  %s5058_s2 = inlined_call_operand.vmem [shape: bf16[256,128], index: 2, kind: input, shape index: {}]   ;;  %s5059_s3 = inlined_call_operand.vmem [shape: f32[9,128], index: 3, kind: input, shape index: {}]   ;;  %s5060_s4 = inlined_call_operand.vmem [shape: f32[1,256], index: 4, kind: input, shape index: {}]   ;;  %s5061_s5 = inlined_call_operand.vmem [shape: bf16[4,32,128], index: 5, kind: output, shape index: {}, may-alias: {0,5}]  }
   0x1 LB: > { %s3135_s19 = sadd.s32 4294967295, %s4024_s18   ;;  %p3139_p0 = scmp.ge.s32.totalorder %s4024_s18, 1  ;;  %s4024_s18 = sphi %s4060_s18, %s15_s18  }
   0x2   : > { %p189_p1 = scmp.lt.s32.totalorder %s4024_s18, 3 }
   0x4   : > { %p190_p2 = pnand %p3139_p0, %p189_p1 }
   0x5   : > { %s3140_s20 = sshll.u32 (!%p190_p2), %s3135_s19, 1  ;;  %v3713_v12 = vld [vmem:[%s5057_s1 + $0x4] ss:$24 sps:$4 sm:$0xff] (!%p190_p2)   ;;  %v3715_v13 = vld [vmem:[%s5057_s1] ss:$24 sps:$4 sm:$0xff] (!%p190_p2)   ;;  %vm719_vm0 = vcmask (!%p190_p2), 261120  }
   0x6   : > { %193 = sbr.rel (%p190_p2) target bundleno = 4258 (0x10a2), region = 40  ;;  %p220_p3 = scmp.lt.s32.totalorder (!%p190_p2), %s3140_s20, 3  ;;  %v3716_v14 = vld [vmem:[%s5057_s1 + $0x34] ss:$24 sps:$4 sm:$0xff] (!%p190_p2)   ;;  %v3718_v15 = vld [vmem:[%s5057_s1 + $0x8] ss:$24 sps:$4 sm:$0xff] (!%p190_p2)   ;;  %529 = vmatprep.subr.bf16.mxu0 (!%p190_p2), %v3713_v12 }
   0x7   : > { %530 = vmatpush1.bf16.msra.mxu0 (!%p190_p2), %v3715_v13  ;;  %3449 = vmatprep.subr.bf16.mxu1 (!%p190_p2), %v3718_v15  ;;  %v3719_v48 = vld [vmem:[%s5057_s1 + $0x30] ss:$24 sps:$4 sm:$0xff] (!%p190_p2)   ;;  %v3720_v49 = vld [vmem:[%s5057_s1 + $0x64] ss:$24 sps:$4 sm:$0xff] (!%p190_p2)   ;;  %v3723_v51 = vld [vmem:[%s5057_s1 + $0x60] ss:$24 sps:$4 sm:$0xff] (!%p190_p2)  }
   0x8   : > { %531 = vmatprep.subr.bf16.mxu0 (!%p190_p2), %v3716_v14  ;;  %3450 = vmatpush3.bf16.msra.mxu1 (!%p190_p2), %v3718_v15  ;;  %v3722_v50 = vld [vmem:[%s5057_s1 + $0x38] ss:$24 sps:$4 sm:$0xff] (!%p190_p2)   ;;  %v3724_v52 = vld [vmem:[%s5057_s1 + $0x94] ss:$24 sps:$4 sm:$0xff] (!%p190_p2)   ;;  %v3726_v53 = vld [vmem:[%s5057_s1 + $0x68] ss:$24 sps:$4 sm:$0xff] (!%p190_p2)  }
   0x9   : > { %3451 = vmatprep.subr.bf16.mxu1 (!%p190_p2), %v3722_v50  ;;  %v3727_v54 = vld [vmem:[%s5057_s1 + $0x90] ss:$24 sps:$4 sm:$0xff] (!%p190_p2)   ;;  %v3728_v55 = vld [vmem:[%s5057_s1 + $0xc4] ss:$24 sps:$4 sm:$0xff] (!%p190_p2)   ;;  %v3731_v57 = vld [vmem:[%s5057_s1 + $0xc0] ss:$24 sps:$4 sm:$0xff] (!%p190_p2)  }
   0xa   : > { %v3730_v56 = vld [vmem:[%s5057_s1 + $0x98] ss:$24 sps:$4 sm:$0xff] (!%p190_p2)   ;;  %v3732_v58 = vld [vmem:[%s5057_s1 + $0xf4] ss:$24 sps:$4 sm:$0xff] (!%p190_p2)   ;;  %v3734_v59 = vld [vmem:[%s5057_s1 + $0xc8] ss:$24 sps:$4 sm:$0xff] (!%p190_p2)  }
   0xb   : > { %532 = vmatpush1.bf16.msra.mxu0 (!%p190_p2), %v3719_v48  ;;  %v3735_v60 = vld [vmem:[%s5057_s1 + $0xf0] ss:$24 sps:$4 sm:$0xff] (!%p190_p2)   ;;  %v3736_v61 = vld [vmem:[%s5057_s1 + $0x124] ss:$24 sps:$4 sm:$0xff] (!%p190_p2)   ;;  %v3739_v63 = vld [vmem:[%s5057_s1 + $0x120] ss:$24 sps:$4 sm:$0xff] (!%p190_p2)  }
   0xc   : > { %533 = vmatprep.subr.bf16.mxu0 (!%p190_p2), %v3720_v49  ;;  %3452 = vmatpush3.bf16.msra.mxu1 (!%p190_p2), %v3722_v50  ;;  %v3738_v62 = vld [vmem:[%s5057_s1 + $0xf8] ss:$24 sps:$4 sm:$0xff] (!%p190_p2)   ;;  %s4027_s6 = smov (!%p190_p2), 96   ;;  %s4028_s7 = smov (!%p190_p2), 64   ;;  %vm2220_vm1 = vcmask (!%p190_p2), 523264   ;;  %vm2229_vm2 = vcmask (!%p190_p2), 785408  }
   0xd   : > { %s5074_s20 = smov (!%p220_p3, %s3140_s20), 3  ;;  %3453 = vmatprep.subr.bf16.mxu1 %v3726_v53  ;;  %v3744_v12 = vld [vmem:[%s5057_s1 + $0x158] ss:$24 sps:$4 sm:$0xff]   ;;  %s4029_s8 = smov 32  }
   0xe   : > { %s3269_s21 = sshll.u32 %s5074_s20, 4 }
   0xf   : > { %s224_s24 = scalar_lea.vmem %s5056_s0, %s3269_s21  ;;  %534 = vmatpush1.bf16.msra.mxu0 %v3723_v51  ;;  %s5041_s9 = scalar_lea.vmem %s5061_s5, %s3269_s21 }
  0x10   : > { %v3280_v0 = vld [vmem:[%s224_s24] sm:$0xff]   ;;  %v3315_v1 = vld [vmem:[%s224_s24 + $0x8] sm:$0xff]   ;;  %v3316_v4 = vld [vmem:[%s224_s24 + $0x10] sm:$0xff]   ;;  %535 = vmatprep.subr.bf16.mxu0 %v3724_v52  ;;  %3454 = vmatpush3.bf16.msra.mxu1 %v3726_v53 }
  0x11   : > { %v4076_v2 = vunpack.c.l.bf16 %v3280_v0  ;;  %v4078_v3 = vunpack.c.l.bf16 %v3315_v1  ;;  %v4082_v5 = vunpack.c.h.bf16 %v3280_v0  ;;  %v4084_v6 = vunpack.c.h.bf16 %v3315_v1  ;;  %v3317_v7 = vld [vmem:[%s224_s24 + $0x18] sm:$0xff]   ;;  %3455 = vmatprep.subr.bf16.mxu1 %v3730_v56  ;;  %v3740_v0 = vld [vmem:[%s5057_s1 + $0x154] ss:$24 sps:$4 sm:$0xff]   ;;  %v3742_v1 = vld [vmem:[%s5057_s1 + $0x128] ss:$24 sps:$4 sm:$0xff]  }
  0x12   : > { %v4088_v8 = vunpack.c.l.bf16 %v3316_v4  ;;  %v4090_v9 = vunpack.c.h.bf16 %v3316_v4  ;;  %v4094_v10 = vunpack.c.l.bf16 %v3317_v7  ;;  %v4096_v11 = vunpack.c.h.bf16 %v3317_v7  ;;  %v3743_v4 = vld [vmem:[%s5057_s1 + $0x150] ss:$24 sps:$4 sm:$0xff]  }
  0x13   : > { %252 = vadd.xlane.f32.xlu0 %v4076_v2  ;;  %256 = vadd.xlane.f32.xlu1 %v4078_v3  ;;  %v5064_v7 = vmov 0  }
  0x14   : > { %536 = vmatpush1.bf16.msra.mxu0 %v3727_v54  ;;  %3456 = vmatpush3.bf16.msra.mxu1 %v3730_v56 }
  0x15   : > { %537 = vmatprep.subr.bf16.mxu0 %v3728_v55  ;;  %3457 = vmatprep.subr.bf16.mxu1 %v3734_v59 }
  0x16   : > { %561 = vmatprep.mubr.bf16.mxu0 %v5064_v7 }
  0x17   : > { %254 = vadd.xlane.f32.xlu0 %v4082_v5  ;;  %258 = vadd.xlane.f32.xlu1 %v4084_v6 }
  0x18   : > { %538 = vmatpush1.bf16.msra.mxu0 %v3731_v57  ;;  %3458 = vmatpush3.bf16.msra.mxu1 %v3734_v59 }
  0x19   : > { %539 = vmatprep.subr.bf16.mxu0 %v3732_v58  ;;  %3459 = vmatprep.subr.bf16.mxu1 %v3738_v62 }
  0x1b   : > { %260 = vadd.xlane.f32.xlu0 %v4088_v8  ;;  %262 = vadd.xlane.f32.xlu1 %v4090_v9 }
  0x1c   : > { %540 = vmatpush1.bf16.msra.mxu0 %v3735_v60  ;;  %3460 = vmatpush3.bf16.msra.mxu1 %v3738_v62 }
  0x1d   : > { %541 = vmatprep.subr.bf16.mxu0 %v3736_v61  ;;  %3461 = vmatprep.subr.bf16.mxu1 %v3742_v1 }
  0x1f   : > { %264 = vadd.xlane.f32.xlu0 %v4094_v10  ;;  %266 = vadd.xlane.f32.xlu1 %v4096_v11 }
  0x20   : > { %542 = vmatpush1.bf16.msra.mxu0 %v3739_v63  ;;  %3462 = vmatpush3.bf16.msra.mxu1 %v3742_v1 }
  0x21   : > { %543 = vmatprep.subr.bf16.mxu0 %v3740_v0  ;;  %3463 = vmatprep.subr.bf16.mxu1 %v3744_v12 }
  0x24   : > { %544 = vmatpush1.bf16.msra.mxu0 %v3743_v4  ;;  %3464 = vmatpush3.bf16.msra.mxu1 %v3744_v12 }
  0xa0   : > { %v253_v16 = vpop.xlane.xlu0 %252  ;;  %v257_v17 = vpop.xlane.xlu1 %256 }
  0xa1   : > { %v269_v18 = vmul.f32 0.0078125, %v253_v16  ;;  %v271_v19 = vmul.f32 0.0078125, %v257_v17 }
  0xa3   : > { %v4113_v20 = vsub.f32 %v4076_v2, %v269_v18  ;;  %v4116_v21 = vsub.f32 %v4078_v3, %v271_v19  ;;  %v341_v18 = vlaneseq }
  0xa4   : > { %v255_v22 = vpop.xlane.xlu0 %254  ;;  %v259_v23 = vpop.xlane.xlu1 %258 }
  0xa5   : > { %v270_v24 = vmul.f32 0.0078125, %v255_v22  ;;  %v285_v25 = vmul.f32 %v4113_v20, %v4113_v20  ;;  %v272_v26 = vmul.f32 0.0078125, %v259_v23  ;;  %v287_v27 = vmul.f32 %v4116_v21, %v4116_v21 }
  0xa7   : > { %293 = vadd.xlane.f32.xlu0 %v285_v25  ;;  %v4123_v28 = vsub.f32 %v4082_v5, %v270_v24  ;;  %v4126_v29 = vsub.f32 %v4084_v6, %v272_v26 }
  0xa8   : > { %v261_v30 = vpop.xlane.xlu0 %260  ;;  %v263_v31 = vpop.xlane.xlu1 %262 }
  0xa9   : > { %v273_v32 = vmul.f32 0.0078125, %v261_v30  ;;  %v286_v33 = vmul.f32 %v4123_v28, %v4123_v28  ;;  %v274_v34 = vmul.f32 0.0078125, %v263_v31  ;;  %v288_v35 = vmul.f32 %v4126_v29, %v4126_v29 }
  0xab   : > { %297 = vadd.xlane.f32.xlu0 %v287_v27  ;;  %295 = vadd.xlane.f32.xlu1 %v286_v33  ;;  %v4133_v36 = vsub.f32 %v4088_v8, %v273_v32  ;;  %v4136_v37 = vsub.f32 %v4090_v9, %v274_v34  ;;  %v4213_v27 = vshrl.u32 %v341_v18, 7 }
  0xac   : > { %v265_v38 = vpop.xlane.xlu0 %264  ;;  %v267_v39 = vpop.xlane.xlu1 %266 }
  0xad   : > { %v275_v40 = vmul.f32 0.0078125, %v265_v38  ;;  %v289_v41 = vmul.f32 %v4133_v36, %v4133_v36  ;;  %v276_v42 = vmul.f32 0.0078125, %v267_v39  ;;  %v290_v43 = vmul.f32 %v4136_v37, %v4136_v37 }
  0xae   : > { %v5063_v38 = vsub.s32 0, %v4213_v27  ;;  %v5062_v50 = vsub.s32 1, %v4213_v27 }
  0xaf   : > { %299 = vadd.xlane.f32.xlu1 %v288_v35  ;;  %301 = vadd.xlane.f32.xlu0 %v289_v41  ;;  %v4143_v44 = vsub.f32 %v4094_v10, %v275_v40  ;;  %v4146_v45 = vsub.f32 %v4096_v11, %v276_v42  ;;  %v4219_v41 = vld [vmem:[%s5059_s3] sm:$0xff] }
  0xb0   : > { %v344_v49 = vrot.slane %v4219_v41, %v5063_v38  ;;  %v356_v57 = vrot.slane %v4219_v41, %v5062_v50 }
  0xb1   : > { %v291_v46 = vmul.f32 %v4143_v44, %v4143_v44  ;;  %v292_v47 = vmul.f32 %v4146_v45, %v4146_v45 }
  0xb3   : > { %303 = vadd.xlane.f32.xlu1 %v290_v43  ;;  %305 = vadd.xlane.f32.xlu0 %v291_v46 }
  0xb7   : > { %307 = vadd.xlane.f32.xlu1 %v292_v47 }
 0x134   : > { %v294_v13 = vpop.xlane.xlu0 %293 }
 0x135   : > { %v309_v14 = vmul.f32 0.0078125, %v294_v13 }
 0x137   : > { %v317_v15 = vadd.f32 1e-05, %v309_v14 }
 0x138   : > { %v296_v16 = vpop.xlane.xlu1 %295  ;;  %v298_v17 = vpop.xlane.xlu0 %297 }
 0x139   : > { %3793 = vrsqrt.f32 %v317_v15  ;;  %v310_v19 = vmul.f32 0.0078125, %v296_v16  ;;  %v311_v22 = vmul.f32 0.0078125, %v298_v17 }
 0x13b   : > { %v318_v23 = vadd.f32 1e-05, %v310_v19  ;;  %v319_v24 = vadd.f32 1e-05, %v311_v22 }
 0x13c   : > { %v300_v25 = vpop.xlane.xlu1 %299  ;;  %v302_v26 = vpop.xlane.xlu0 %301 }
 0x13d   : > { %3795 = vrsqrt.f32 %v318_v23  ;;  %v312_v30 = vmul.f32 0.0078125, %v300_v25  ;;  %v313_v31 = vmul.f32 0.0078125, %v302_v26 }
 0x13e   : > { %3797 = vrsqrt.f32 %v319_v24 }
 0x13f   : > { %v320_v32 = vadd.f32 1e-05, %v312_v30  ;;  %v321_v33 = vadd.f32 1e-05, %v313_v31 }
 0x140   : > { %v304_v34 = vpop.xlane.xlu1 %303  ;;  %v306_v35 = vpop.xlane.xlu0 %305 }
 0x141   : > { %3799 = vrsqrt.f32 %v320_v32  ;;  %v314_v39 = vmul.f32 0.0078125, %v304_v34  ;;  %v315_v40 = vmul.f32 0.0078125, %v306_v35  ;;  %v689_v32 = vsub.s32 3, %v4213_v27 }
 0x142   : > { %3801 = vrsqrt.f32 %v321_v33  ;;  %v701_v33 = vsub.s32 4, %v4213_v27 }
 0x143   : > { %v3794_v42 = vpop.eup %3793  ;;  %v322_v43 = vadd.f32 1e-05, %v314_v39  ;;  %v323_v46 = vadd.f32 1e-05, %v315_v40  ;;  %v4246_v35 = vrot.slane %v4219_v41, %v689_v32 }
 0x144   : > { %v308_v47 = vpop.xlane.xlu1 %307  ;;  %v333_v48 = vmul.f32 %v3794_v42, %v4113_v20 }
 0x145   : > { %3803 = vrsqrt.f32 %v322_v43  ;;  %v316_v51 = vmul.f32 0.0078125, %v308_v47  ;;  %v702_v47 = vrot.slane %v4219_v41, %v701_v33 }
 0x146   : > { %3805 = vrsqrt.f32 %v323_v46  ;;  %v345_v56 = vmul.f32 %v344_v49, %v333_v48 }
 0x147   : > { %v3796_v52 = vpop.eup %3795  ;;  %v324_v53 = vadd.f32 1e-05, %v316_v51 }
 0x148   : > { %v3798_v54 = vpop.eup %3797  ;;  %v334_v55 = vmul.f32 %v3796_v52, %v4123_v28  ;;  %v357_v62 = vadd.f32 %v356_v57, %v345_v56 }
 0x149   : > { %3807 = vrsqrt.f32 %v324_v53  ;;  %v335_v20 = vmul.f32 %v3798_v54, %v4116_v21 }
 0x14a   : > { %v346_v58 = vmul.f32 %v344_v49, %v334_v55 }
 0x14b   : > { %v3800_v59 = vpop.eup %3799  ;;  %v347_v60 = vmul.f32 %v344_v49, %v335_v20 }
 0x14c   : > { %v3802_v61 = vpop.eup %3801  ;;  %v358_v63 = vadd.f32 %v356_v57, %v346_v58  ;;  %v336_v0 = vmul.f32 %v3800_v59, %v4126_v29 }
 0x14d   : > { %v337_v1 = vmul.f32 %v3802_v61, %v4133_v36  ;;  %v359_v13 = vadd.f32 %v356_v57, %v347_v60 }
 0x14e   : > { %v397_v4 = vpack.c.bf16 %v358_v63, %v357_v62  ;;  %v348_v28 = vmul.f32 %v344_v49, %v336_v0 }
 0x14f   : > { %v3804_v12 = vpop.eup %3803  ;;  %v349_v16 = vmul.f32 %v344_v49, %v337_v1 }
 0x150   : > { %v3806_v14 = vpop.eup %3805  ;;  %562 = vmatmul.mubr.bf16.vlgmr.msra.gmra.mrb[0].mxu0 %v397_v4  ;;  %3465 = vmatprep.mubr.bf16.mxu1 %v397_v4  ;;  %v360_v15 = vadd.f32 %v356_v57, %v348_v28  ;;  %v338_v21 = vmul.f32 %v3804_v12, %v4136_v37 }
 0x151   : > { %571 = vmatprep.mubr.bf16.mxu0 %v5064_v7  ;;  %v339_v17 = vmul.f32 %v3806_v14, %v4143_v44  ;;  %v361_v36 = vadd.f32 %v356_v57, %v349_v16  ;;  %v669_v44 = vsub.s32 2, %v4213_v27 }
 0x152   : > { %v398_v18 = vpack.c.bf16 %v360_v15, %v359_v13  ;;  %v350_v19 = vmul.f32 %v344_v49, %v338_v21 }
 0x153   : > { %v3808_v29 = vpop.eup %3807  ;;  %v351_v24 = vmul.f32 %v344_v49, %v339_v17 }
 0x154   : > { %3466 = vmatmul.mubr.bf16.vlgmr.msra.gmra.mrb[0].mxu1 %v398_v18  ;;  %v362_v22 = vadd.f32 %v356_v57, %v350_v19  ;;  %v340_v23 = vmul.f32 %v3808_v29, %v4146_v45  ;;  %v4242_v45 = vrot.slane %v4219_v41, %v669_v44 }
 0x155   : > { %v363_v30 = vadd.f32 %v356_v57, %v351_v24 }
 0x156   : > { %v399_v25 = vpack.c.bf16 %v362_v22, %v361_v36  ;;  %v352_v26 = vmul.f32 %v344_v49, %v340_v23 }
 0x158   : > { %572 = vmatmul.mubr.bf16.gmra.mrb[4].mxu0 %v398_v18  ;;  %3469 = vmatprep.mubr.bf16.mxu1 %v399_v25  ;;  %v364_v37 = vadd.f32 %v356_v57, %v352_v26 }
 0x159   : > { %581 = vmatprep.mubr.bf16.mxu0 %v5064_v7 }
 0x15a   : > { %v400_v31 = vpack.c.bf16 %v364_v37, %v363_v30 }
 0x15c   : > { %3470 = vmatmul.mubr.bf16.gmra.mrb[4].mxu1 %v400_v31 }
 0x160   : > { %582 = vmatmul.mubr.bf16.gmra.mrb[8].mxu0 %v399_v25 }
 0x161   : > { %591 = vmatprep.mubr.bf16.mxu0 %v5064_v7 }
 0x168   : > { %592 = vmatmul.mubr.bf16.gmra.mrb[12].mxu0 %v400_v31 }
 0x223   : > { %v563_v34 = vpop.f32.mrb[0].mxu0 }
 0x224   : > { %v671_v39 = vadd.f32 %v4242_v45, %v563_v34  ;;  %v565_v40 = vpop.f32.mrb[1].mxu0 }
 0x225   : > { %v567_v42 = vpop.f32.mrb[2].mxu0  ;;  %v691_v48 = vadd.f32 %v4246_v35, %v565_v40 }
 0x226   : > { %v672_v43 = vadd.f32 %v4242_v45, %v567_v42  ;;  %v569_v46 = vpop.f32.mrb[3].mxu0  ;;  %v679_v52 = vmul.f32 0.17677669, %v671_v39 }
 0x227   : > { %v692_v49 = vadd.f32 %v4246_v35, %v569_v46  ;;  %v3467_v51 = vpop.f32.mrb[0].mxu1 }
 0x228   : > { %v680_v53 = vmul.f32 0.17677669, %v672_v43  ;;  %v636_v54 = vpop.f32.mrb[1].mxu1  ;;  %v705_v20 = vadd.f32 %v3467_v51, %v702_v47 }
 0x229   : > { %v4253_v55 = vpack.c.bf16 %v692_v49, %v691_v48  ;;  %v3468_v56 = vpop.f32.mrb[2].mxu1  ;;  %v703_v60 = vadd.f32 %v702_v47, %v636_v54 }
 0x22a   : > { %v4255_v57 = vpack.c.bf16 %v680_v53, %v679_v52  ;;  %v706_v58 = vadd.f32 %v3468_v56, %v702_v47  ;;  %v639_v59 = vpop.f32.mrb[3].mxu1 }
 0x22b   : > { %v704_v61 = vadd.f32 %v702_v47, %v639_v59  ;;  %v573_v41 = vpop.f32.mrb[4].mxu0  ;;  %3625 = vmatprep.subr.msk.bf16.mxu1 %vm719_vm0, %v4253_v55  ;;  %v727_v62 = vsel %vm719_vm0, %v4253_v55, 0 }
 0x22c   : > { %v4261_v63 = vpack.c.bf16 %v706_v58, %v705_v20  ;;  %v673_v0 = vadd.f32 %v4242_v45, %v573_v41  ;;  %v575_v1 = vpop.f32.mrb[5].mxu0  ;;  %3474 = vmatpush3.bf16.xpose.msra.mxu1 %v727_v62  ;;  %3477 = vmatprep.mubr.msk.bf16.mxu1 %vm719_vm0, %v4255_v57 }
 0x22d   : > { %v4266_v4 = vpack.c.bf16 %v704_v61, %v703_v60  ;;  %v577_v28 = vpop.f32.mrb[6].mxu0  ;;  %v693_v14 = vadd.f32 %v4246_v35, %v575_v1 }
 0x22e   : > { %v674_v12 = vadd.f32 %v4242_v45, %v577_v28  ;;  %v579_v13 = vpop.f32.mrb[7].mxu0  ;;  %v681_v16 = vmul.f32 0.17677669, %v673_v0 }
 0x22f   : > { %v694_v15 = vadd.f32 %v4246_v35, %v579_v13  ;;  %v3471_v21 = vpop.f32.mrb[4].mxu1 }
 0x230   : > { %v682_v17 = vmul.f32 0.17677669, %v674_v12  ;;  %v709_v18 = vadd.f32 %v3471_v21, %v702_v47  ;;  %v652_v19 = vpop.f32.mrb[5].mxu1 }
 0x231   : > { %v4271_v29 = vpack.c.bf16 %v694_v15, %v693_v14  ;;  %v3472_v36 = vpop.f32.mrb[6].mxu1  ;;  %v707_v25 = vadd.f32 %v702_v47, %v652_v19 }
 0x232   : > { %v4273_v22 = vpack.c.bf16 %v682_v17, %v681_v16  ;;  %v710_v23 = vadd.f32 %v3472_v36, %v702_v47  ;;  %v655_v24 = vpop.f32.mrb[7].mxu1 }
 0x233   : > { %v708_v26 = vadd.f32 %v702_v47, %v655_v24  ;;  %v583_v30 = vpop.f32.mrb[8].mxu0  ;;  %3626 = vmatprep.subr.msk.bf16.mxu1 %vm719_vm0, %v4271_v29  ;;  %v730_v37 = vsel %vm719_vm0, %v4271_v29, 0 }
 0x234   : > { %v4279_v31 = vpack.c.bf16 %v710_v23, %v709_v18  ;;  %v675_v44 = vadd.f32 %v4242_v45, %v583_v30  ;;  %v585_v32 = vpop.f32.mrb[9].mxu0  ;;  %3476 = vmatpush3.bf16.xpose.msra.mxu1 %v730_v37 }
 0x235   : > { %v4282_v33 = vpack.c.bf16 %v708_v26, %v707_v25  ;;  %v587_v34 = vpop.f32.mrb[10].mxu0  ;;  %v695_v42 = vadd.f32 %v4246_v35, %v585_v32 }
 0x236   : > { %v676_v39 = vadd.f32 %v4242_v45, %v587_v34  ;;  %v589_v40 = vpop.f32.mrb[11].mxu0  ;;  %v683_v46 = vmul.f32 0.17677669, %v675_v44 }
 0x237   : > { %v696_v43 = vadd.f32 %v4246_v35, %v589_v40 }
 0x238   : > { %v684_v47 = vmul.f32 0.17677669, %v676_v39 }
 0x239   : > { %v4287_v48 = vpack.c.bf16 %v696_v43, %v695_v42 }
 0x23a   : > { %v4289_v49 = vpack.c.bf16 %v684_v47, %v683_v46 }
 0x23b   : > { %v593_v51 = vpop.f32.mrb[12].mxu0  ;;  %3478 = vmatmul.mubr.msk.bf16.vlgmr.msra.gmra.mrb[8].mxu1 %vm719_vm0, %v4273_v22  ;;  %3627 = vmatprep.subr.msk.bf16.mxu1 %vm719_vm0, %v4287_v48  ;;  %v788_v52 = vsel %vm719_vm0, %v4287_v48, 0 }
 0x23c   : > { %v677_v53 = vadd.f32 %v4242_v45, %v593_v51  ;;  %v595_v54 = vpop.f32.mrb[13].mxu0  ;;  %3482 = vmatpush3.bf16.xpose.msra.mxu1 %v788_v52  ;;  %3485 = vmatprep.mubr.msk.bf16.mxu1 %vm719_vm0, %v4289_v49 }
 0x23d   : > { %v597_v56 = vpop.f32.mrb[14].mxu0  ;;  %v697_v59 = vadd.f32 %v4246_v35, %v595_v54 }
 0x23e   : > { %v678_v20 = vadd.f32 %v4242_v45, %v597_v56  ;;  %v599_v58 = vpop.f32.mrb[15].mxu0  ;;  %v685_v61 = vmul.f32 0.17677669, %v677_v53 }
 0x23f   : > { %v698_v60 = vadd.f32 %v4246_v35, %v599_v58 }
 0x240   : > { %v686_v41 = vmul.f32 0.17677669, %v678_v20 }
 0x241   : > { %v4303_v62 = vpack.c.bf16 %v698_v60, %v697_v59 }
 0x242   : > { %v4305_v0 = vpack.c.bf16 %v686_v41, %v685_v61 }
 0x243   : > { %3628 = vmatprep.subr.msk.bf16.mxu1 %vm719_vm0, %v4303_v62  ;;  %v791_v1 = vsel %vm719_vm0, %v4303_v62, 0 }
 0x244   : > { %3484 = vmatpush3.bf16.xpose.msra.mxu1 %v791_v1 }
 0x245   : > { %3489 = vmatprep.subr.bf16.mxu1 %v4266_v4 }
 0x24b   : > { %3486 = vmatmul.mubr.msk.bf16.vlgmr.msra.gmra.mrb[12].mxu1 %vm719_vm0, %v4305_v0 }
 0x24c   : > { %3490 = vmatpush3.bf16.msra.mxu1 %v4266_v4 }
 0x24d   : > { %3491 = vmatprep.subr.bf16.mxu1 %v4261_v63 }
 0x250   : > { %3492 = vmatpush3.bf16.msra.mxu1 %v4261_v63 }
 0x251   : > { %3497 = vmatprep.subr.bf16.mxu1 %v4282_v33 }
 0x30e   : > { %v3479_v45 = vpop.f32.mrb[8].mxu1 }
 0x30f   : > { %v766_v35 = vpop.f32.mrb[9].mxu1  ;;  %v848_v15 = vsel %vm719_vm0, %v3479_v45, -inf }
 0x310   : > { %v3480_v28 = vpop.f32.mrb[10].mxu1  ;;  %v842_v12 = vsel %vm719_vm0, %v766_v35, -inf }
 0x311   : > { %843 = vmax.xlane.f32.xlu0 %v842_v12  ;;  %v769_v13 = vpop.f32.mrb[11].mxu1  ;;  %v851_v21 = vsel %vm719_vm0, %v3480_v28, -inf }
 0x312   : > { %v845_v14 = vsel %vm719_vm0, %v769_v13, -inf }
 0x313   : > { %846 = vmax.xlane.f32.xlu1 %v845_v14 }
 0x315   : > { %849 = vmax.xlane.f32.xlu0 %v848_v15 }
 0x317   : > { %852 = vmax.xlane.f32.xlu1 %v851_v21 }
 0x31e   : > { %v4322_v16 = vpop.f32.mrb[12].mxu1 }
 0x31f   : > { %v4324_v17 = vpop.f32.mrb[13].mxu1  ;;  %v860_v24 = vsel %vm719_vm0, %v4322_v16, -inf }
 0x320   : > { %v3488_v18 = vpop.f32.mrb[14].mxu1  ;;  %v854_v19 = vsel %vm719_vm0, %v4324_v17, -inf }
 0x321   : > { %855 = vmax.xlane.f32.xlu0 %v854_v19  ;;  %v830_v36 = vpop.f32.mrb[15].mxu1  ;;  %v863_v25 = vsel %vm719_vm0, %v3488_v18, -inf }
 0x322   : > { %v857_v23 = vsel %vm719_vm0, %v830_v36, -inf }
 0x323   : > { %858 = vmax.xlane.f32.xlu1 %v857_v23 }
 0x325   : > { %861 = vmax.xlane.f32.xlu0 %v860_v24 }
 0x327   : > { %864 = vmax.xlane.f32.xlu1 %v863_v25 }
 0x338   : > { %1058 = vrot.lane.b32.xlu1 %v4271_v29, %s4027_s6 }
 0x33c   : > { %1050 = vrot.lane.b32.xlu1 %v4255_v57, %s4027_s6 }
 0x39e   : > { %v844_v26 = vpop.xlane.xlu0 %843 }
 0x39f   : > { %v866_v30 = vsub.f32 %v766_v35, %v844_v26 }
 0x3a0   : > { %v847_v37 = vpop.xlane.xlu1 %846 }
 0x3a1   : > { %v867_v32 = vsub.f32 %v769_v13, %v847_v37  ;;  %v874_v39 = vmul.f32 1.442695, %v866_v30 }
 0x3a2   : > { %v850_v44 = vpop.xlane.xlu0 %849 }
 0x3a3   : > { %v868_v34 = vsub.f32 %v3479_v45, %v850_v44  ;;  %v876_v46 = vmul.f32 1.442695, %v867_v32 }
 0x3a4   : > { %v853_v40 = vpop.xlane.xlu1 %852 }
 0x3a5   : > { %v878_v42 = vmul.f32 1.442695, %v868_v34  ;;  %v869_v43 = vsub.f32 %v3480_v28, %v853_v40 }
 0x3a7   : > { %3809 = vpow2.f32 %v878_v42  ;;  %v880_v47 = vmul.f32 1.442695, %v869_v43 }
 0x3a8   : > { %3811 = vpow2.f32 %v874_v39 }
 0x3a9   : > { %3813 = vpow2.f32 %v880_v47 }
 0x3aa   : > { %3815 = vpow2.f32 %v876_v46 }
 0x3b0   : > { %v859_v51 = vpop.xlane.xlu1 %858 }
 0x3b1   : > { %v4336_v52 = vpop.eup %3809  ;;  %v871_v20 = vsub.f32 %v830_v36, %v859_v51 }
 0x3b2   : > { %v4338_v53 = vpop.eup %3811  ;;  %v896_v54 = vsel %vm719_vm0, %v4336_v52, 0.0 }
 0x3b3   : > { %v3814_v56 = vpop.eup %3813  ;;  %897 = vadd.xlane.f32.xlu0 %v896_v54  ;;  %v890_v41 = vsel %vm719_vm0, %v4338_v53, 0.0  ;;  %v884_v1 = vmul.f32 1.442695, %v871_v20 }
 0x3b4   : > { %v865_v58 = vpop.xlane.xlu1 %864  ;;  %v899_v59 = vsel %vm719_vm0, %v3814_v56, 0.0  ;;  %v3816_v60 = vpop.eup %3815 }
 0x3b5   : > { %v873_v61 = vsub.f32 %v3488_v18, %v865_v58  ;;  %900 = vadd.xlane.f32.xlu1 %v899_v59  ;;  %v893_v28 = vsel %vm719_vm0, %v3816_v60, 0.0  ;;  %v856_v18 = vpop.xlane.xlu0 %855 }
 0x3b6   : > { %v870_v23 = vsub.f32 %v4324_v17, %v856_v18 }
 0x3b7   : > { %v888_v45 = vmul.f32 1.442695, %v873_v61  ;;  %891 = vadd.xlane.f32.xlu0 %v890_v41 }
 0x3b8   : > { %v1059_v35 = vpop.permute.xlu1 %1058  ;;  %v882_v25 = vmul.f32 1.442695, %v870_v23 }
 0x3b9   : > { %3817 = vpow2.f32 %v888_v45  ;;  %894 = vadd.xlane.f32.xlu1 %v893_v28  ;;  %v862_v19 = vpop.xlane.xlu0 %861  ;;  %v1070_v54 = vsel %vm719_vm0, %v1059_v35, 0 }
 0x3ba   : > { %3819 = vpow2.f32 %v884_v1  ;;  %v872_v36 = vsub.f32 %v4322_v16, %v862_v19 }
 0x3bc   : > { %v1051_v12 = vpop.permute.xlu1 %1050  ;;  %v886_v24 = vmul.f32 1.442695, %v872_v36 }
 0x3bd   : > { %3509 = vmatprep.mubr.msk.bf16.mxu0 %vm719_vm0, %v1051_v12 }
 0x3be   : > { %3821 = vpow2.f32 %v886_v24 }
 0x3bf   : > { %3823 = vpow2.f32 %v882_v25 }
 0x3c3   : > { %v4347_v13 = vpop.eup %3817 }
 0x3c4   : > { %v911_v14 = vsel %vm719_vm0, %v4347_v13, 0.0  ;;  %v4351_v15 = vpop.eup %3819 }
 0x3c5   : > { %912 = vadd.xlane.f32.xlu1 %v911_v14  ;;  %v905_v21 = vsel %vm719_vm0, %v4351_v15, 0.0 }
 0x3c8   : > { %v3822_v26 = vpop.eup %3821 }
 0x3c9   : > { %906 = vadd.xlane.f32.xlu1 %v905_v21  ;;  %v908_v30 = vsel %vm719_vm0, %v3822_v26, 0.0  ;;  %v3824_v37 = vpop.eup %3823 }
 0x3ca   : > { %v902_v16 = vsel %vm719_vm0, %v3824_v37, 0.0 }
 0x3cd   : > { %1056 = vrot.lane.b32.xlu0 %v4253_v55, %s4027_s6 }
 0x3da   : > { %1052 = vrot.lane.b32.xlu1 %v4273_v22, %s4027_s6 }
 0x3de   : > { %1131 = vrot.lane.b32.xlu1 %v4303_v62, %s4027_s6 }
 0x3e2   : > { %1125 = vrot.lane.b32.xlu1 %v4305_v0, %s4027_s6 }
 0x3ec   : > { %909 = vadd.xlane.f32.xlu0 %v908_v30 }
 0x3f0   : > { %903 = vadd.xlane.f32.xlu0 %v902_v16 }
 0x406   : > { %1129 = vrot.lane.b32.xlu0 %v4287_v48, %s4027_s6 }
 0x40a   : > { %1123 = vrot.lane.b32.xlu0 %v4289_v49, %s4027_s6 }
 0x440   : > { %v898_v17 = vpop.xlane.xlu0 %897 }
 0x442   : > { %v901_v44 = vpop.xlane.xlu1 %900 }
 0x443   : > { %3825 = vrcp.f32 %v901_v44 }
 0x444   : > { %v892_v32 = vpop.xlane.xlu0 %891 }
 0x445   : > { %3827 = vrcp.f32 %v892_v32 }
 0x446   : > { %3829 = vrcp.f32 %v898_v17  ;;  %v895_v34 = vpop.xlane.xlu1 %894 }
 0x447   : > { %3831 = vrcp.f32 %v895_v34 }
 0x448   : > { %v1057_v39 = vpop.permute.xlu0 %1056 }
 0x449   : > { %3629 = vmatprep.subr.msk.bf16.mxu0 %vm719_vm0, %v1057_v39  ;;  %v1067_v40 = vsel %vm719_vm0, %v1057_v39, 0 }
 0x44a   : > { %3506 = vmatpush3.bf16.xpose.msra.mxu0 %v1067_v40 }
 0x44b   : > { %3630 = vmatprep.subr.msk.bf16.mxu0 %vm719_vm0, %v1059_v35 }
 0x44d   : > { %v3826_v42 = vpop.eup %3825 }
 0x44e   : > { %v925_v51 = vmul.f32 %v3826_v42, %v3814_v56 }
 0x44f   : > { %v3828_v43 = vpop.eup %3827 }
 0x450   : > { %v3830_v46 = vpop.eup %3829  ;;  %v922_v58 = vmul.f32 %v3828_v43, %v4338_v53 }
 0x451   : > { %v3832_v47 = vpop.eup %3831  ;;  %v924_v61 = vmul.f32 %v3830_v46, %v4336_v52 }
 0x452   : > { %3508 = vmatpush3.bf16.xpose.msra.mxu0 %v1070_v54  ;;  %v913_v20 = vpop.xlane.xlu1 %912  ;;  %v923_v59 = vmul.f32 %v3832_v47, %v3816_v60 }
 0x453   : > { %v931_v1 = vpack.c.bf16 %v925_v51, %v924_v61 }
 0x454   : > { %v930_v41 = vpack.c.bf16 %v923_v59, %v922_v58 }
 0x456   : > { %3493 = vmatprep.mubr.msk.bf16.mxu1 %vm719_vm0, %v930_v41  ;;  %v907_v45 = vpop.xlane.xlu1 %906 }
 0x457   : > { %3494 = vmatmul.mubr.msk.bf16.vlgmr.msra.gmra.mrb[16].mxu1 %vm719_vm0, %v931_v1 }
 0x458   : > { %3498 = vmatpush3.bf16.msra.mxu1 %v4282_v33 }
 0x459   : > { %3499 = vmatprep.subr.bf16.mxu1 %v4279_v31 }
 0x45a   : > { %v1053_v56 = vpop.permute.xlu1 %1052 }
 0x45b   : > { %3510 = vmatmul.mubr.msk.bf16.vlgmr.msra.gmra.mrb[16].mxu0 %vm719_vm0, %v1053_v56 }
 0x45c   : > { %3500 = vmatpush3.bf16.msra.mxu1 %v4279_v31 }
 0x45e   : > { %v1132_v16 = vpop.permute.xlu1 %1131 }
 0x479   : > { %v910_v53 = vpop.xlane.xlu0 %909 }
 0x47a   : > { %3833 = vrcp.f32 %v910_v53 }
 0x47b   : > { %3835 = vrcp.f32 %v907_v45 }
 0x47c   : > { %3837 = vrcp.f32 %v913_v20 }
 0x47d   : > { %v904_v52 = vpop.xlane.xlu0 %903 }
 0x47e   : > { %3839 = vrcp.f32 %v904_v52 }
 0x481   : > { %v1130_v60 = vpop.permute.xlu0 %1129 }
 0x482   : > { %3631 = vmatprep.subr.msk.bf16.mxu1 %vm719_vm0, %v1130_v60  ;;  %v1140_v30 = vsel %vm719_vm0, %v1130_v60, 0 }
 0x484   : > { %v3834_v35 = vpop.eup %3833 }
 0x485   : > { %v3836_v28 = vpop.eup %3835  ;;  %v928_v21 = vmul.f32 %v3834_v35, %v3822_v26  ;;  %v1124_v25 = vpop.permute.xlu0 %1123  ;;  %v1143_v26 = vsel %vm719_vm0, %v1132_v16, 0 }
 0x486   : > { %v3838_v12 = vpop.eup %3837  ;;  %v927_v19 = vmul.f32 %v3836_v28, %v4351_v15  ;;  %v1126_v15 = vpop.permute.xlu1 %1125 }
 0x487   : > { %v929_v36 = vmul.f32 %v3838_v12, %v4347_v13 }
 0x488   : > { %v3840_v14 = vpop.eup %3839 }
 0x489   : > { %v926_v18 = vmul.f32 %v3840_v14, %v3824_v37  ;;  %v933_v24 = vpack.c.bf16 %v929_v36, %v928_v21 }
 0x48b   : > { %v932_v23 = vpack.c.bf16 %v927_v19, %v926_v18 }
 0x48d   : > { %3501 = vmatprep.mubr.msk.bf16.mxu1 %vm719_vm0, %v932_v23 }
 0x48e   : > { %3502 = vmatmul.mubr.msk.bf16.vlgmr.msra.gmra.mrb[20].mxu1 %vm719_vm0, %v933_v24 }
 0x48f   : > { %3514 = vmatpush3.bf16.xpose.msra.mxu1 %v1140_v30  ;;  %3517 = vmatprep.mubr.msk.bf16.mxu1 %vm719_vm0, %v1124_v25 }
 0x490   : > { %3632 = vmatprep.subr.msk.bf16.mxu1 %vm719_vm0, %v1132_v16 }
 0x497   : > { %3516 = vmatpush3.bf16.xpose.msra.mxu1 %v1143_v26 }
 0x49e   : > { %3518 = vmatmul.mubr.msk.bf16.vlgmr.msra.gmra.mrb[24].mxu1 %vm719_vm0, %v1126_v15 }
 0x52a   : > { %v4393_v13 = vpop.f32.mrb[16].mxu1 }
 0x52b   : > { %v4395_v37 = vpop.f32.mrb[17].mxu1 }
 0x52c   : > { %v4397_v17 = vpop.f32.mrb[18].mxu1 }
 0x52d   : > { %v4399_v44 = vpop.f32.mrb[19].mxu1 }
 0x52e   : > { %v3511_v32 = vpop.f32.mrb[16].mxu0 }
 0x52f   : > { %v1106_v34 = vpop.f32.mrb[17].mxu0  ;;  %v1200_v46 = vsel %vm719_vm0, %v3511_v32, -inf }
 0x530   : > { %v3512_v39 = vpop.f32.mrb[18].mxu0  ;;  %v1194_v40 = vsel %vm719_vm0, %v1106_v34, -inf }
 0x531   : > { %1195 = vmax.xlane.f32.xlu0 %v1194_v40  ;;  %v1109_v42 = vpop.f32.mrb[19].mxu0  ;;  %v1203_v47 = vsel %vm719_vm0, %v3512_v39, -inf }
 0x532   : > { %v1197_v43 = vsel %vm719_vm0, %v1109_v42, -inf }
 0x533   : > { %1198 = vmax.xlane.f32.xlu1 %v1197_v43 }
 0x535   : > { %1201 = vmax.xlane.f32.xlu0 %v1200_v46 }
 0x539   : > { %1204 = vmax.xlane.f32.xlu0 %v1203_v47 }
 0x561   : > { %v4405_v51 = vpop.f32.mrb[20].mxu1 }
 0x562   : > { %v4407_v54 = vpop.f32.mrb[21].mxu1 }
 0x563   : > { %v4409_v20 = vpop.f32.mrb[22].mxu1 }
 0x564   : > { %v4411_v58 = vpop.f32.mrb[23].mxu1 }
 0x571   : > { %v3519_v59 = vpop.f32.mrb[24].mxu1 }
 0x572   : > { %v1179_v61 = vpop.f32.mrb[25].mxu1  ;;  %v1212_v53 = vsel %vm719_vm0, %v3519_v59, -inf }
 0x573   : > { %v3520_v41 = vpop.f32.mrb[26].mxu1  ;;  %v1206_v1 = vsel %vm719_vm0, %v1179_v61, -inf }
 0x574   : > { %1207 = vmax.xlane.f32.xlu0 %v1206_v1  ;;  %v1182_v45 = vpop.f32.mrb[27].mxu1  ;;  %v1215_v52 = vsel %vm719_vm0, %v3520_v41, -inf }
 0x575   : > { %v1209_v56 = vsel %vm719_vm0, %v1182_v45, -inf }
 0x576   : > { %1210 = vmax.xlane.f32.xlu1 %v1209_v56 }
 0x578   : > { %1213 = vmax.xlane.f32.xlu0 %v1212_v53 }
 0x57a   : > { %1216 = vmax.xlane.f32.xlu1 %v1215_v52 }
 0x5be   : > { %v1196_v60 = vpop.xlane.xlu0 %1195 }
 0x5bf   : > { %v1218_v35 = vsub.f32 %v1106_v34, %v1196_v60 }
 0x5c0   : > { %v1199_v28 = vpop.xlane.xlu1 %1198 }
 0x5c1   : > { %v1226_v12 = vmul.f32 1.442695, %v1218_v35  ;;  %v1219_v14 = vsub.f32 %v1109_v42, %v1199_v28 }
 0x5c2   : > { %v1202_v21 = vpop.xlane.xlu0 %1201 }
 0x5c3   : > { %3841 = vpow2.f32 %v1226_v12  ;;  %v1228_v18 = vmul.f32 1.442695, %v1219_v14  ;;  %v1220_v19 = vsub.f32 %v3511_v32, %v1202_v21 }
 0x5c5   : > { %3843 = vpow2.f32 %v1228_v18  ;;  %v1230_v36 = vmul.f32 1.442695, %v1220_v19 }
 0x5c6   : > { %v1205_v23 = vpop.xlane.xlu0 %1204 }
 0x5c7   : > { %3845 = vpow2.f32 %v1230_v36  ;;  %v1221_v24 = vsub.f32 %v3512_v39, %v1205_v23 }
 0x5c9   : > { %v1232_v25 = vmul.f32 1.442695, %v1221_v24 }
 0x5cb   : > { %3847 = vpow2.f32 %v1232_v25 }
 0x5cd   : > { %v4417_v30 = vpop.eup %3841 }
 0x5ce   : > { %v1242_v16 = vsel %vm719_vm0, %v4417_v30, 0.0 }
 0x5cf   : > { %v4421_v26 = vpop.eup %3843  ;;  %1243 = vadd.xlane.f32.xlu0 %v1242_v16 }
 0x5d0   : > { %v1245_v15 = vsel %vm719_vm0, %v4421_v26, 0.0 }
 0x5d1   : > { %v4425_v34 = vpop.eup %3845  ;;  %1246 = vadd.xlane.f32.xlu1 %v1245_v15 }
 0x5d2   : > { %v1248_v32 = vsel %vm719_vm0, %v4425_v34, 0.0 }
 0x5d3   : > { %1249 = vadd.xlane.f32.xlu0 %v1248_v32 }
 0x5d5   : > { %v4429_v39 = vpop.eup %3847 }
 0x5d6   : > { %v1251_v40 = vsel %vm719_vm0, %v4429_v39, 0.0 }
 0x5d7   : > { %1252 = vadd.xlane.f32.xlu1 %v1251_v40 }
 0x5e8   : > { %1290 = vrot.lane.b32.xlu1 %v4261_v63, %s4027_s6 }
 0x5e9   : > { %1288 = vrot.lane.b32.xlu0 %v4266_v4, %s4027_s6 }
 0x5ec   : > { %1351 = vrot.lane.b32.xlu1 %v4282_v33, %s4027_s6 }
 0x5ed   : > { %1416 = vrot.lane.b32.xlu0 %v4253_v55, %s4028_s7 }
 0x5f0   : > { %1418 = vrot.lane.b32.xlu1 %v4271_v29, %s4028_s7 }
 0x5f1   : > { %1353 = vrot.lane.b32.xlu0 %v4279_v31, %s4027_s6 }
 0x5f5   : > { %1412 = vrot.lane.b32.xlu0 %v4255_v57, %s4028_s7 }
 0x601   : > { %v1208_v42 = vpop.xlane.xlu0 %1207 }
 0x602   : > { %v1222_v43 = vsub.f32 %v1179_v61, %v1208_v42 }
 0x603   : > { %v1211_v46 = vpop.xlane.xlu1 %1210 }
 0x604   : > { %v1234_v47 = vmul.f32 1.442695, %v1222_v43  ;;  %v1223_v52 = vsub.f32 %v1182_v45, %v1211_v46 }
 0x605   : > { %v1214_v1 = vpop.xlane.xlu0 %1213 }
 0x606   : > { %3849 = vpow2.f32 %v1234_v47  ;;  %v1224_v56 = vsub.f32 %v3519_v59, %v1214_v1  ;;  %v1236_v12 = vmul.f32 1.442695, %v1223_v52 }
 0x607   : > { %v1217_v53 = vpop.xlane.xlu1 %1216 }
 0x608   : > { %v1238_v60 = vmul.f32 1.442695, %v1224_v56  ;;  %v1225_v35 = vsub.f32 %v3520_v41, %v1217_v53 }
 0x60a   : > { %3851 = vpow2.f32 %v1238_v60  ;;  %v1240_v28 = vmul.f32 1.442695, %v1225_v35 }
 0x60c   : > { %3853 = vpow2.f32 %v1240_v28 }
 0x60d   : > { %3855 = vpow2.f32 %v1236_v12 }
 0x610   : > { %v4447_v14 = vpop.eup %3849 }
 0x611   : > { %v1254_v21 = vsel %vm719_vm0, %v4447_v14, 0.0 }
 0x614   : > { %v4451_v61 = vpop.eup %3851  ;;  %1255 = vadd.xlane.f32.xlu0 %v1254_v21 }
 0x615   : > { %v1260_v59 = vsel %vm719_vm0, %v4451_v61, 0.0 }
 0x616   : > { %v4455_v18 = vpop.eup %3853  ;;  %1261 = vadd.xlane.f32.xlu1 %v1260_v59 }
 0x617   : > { %v1263_v41 = vsel %vm719_vm0, %v4455_v18, 0.0  ;;  %v4459_v45 = vpop.eup %3855 }
 0x618   : > { %v1257_v19 = vsel %vm719_vm0, %v4459_v45, 0.0 }
 0x61a   : > { %1264 = vadd.xlane.f32.xlu1 %v1263_v41 }
 0x61e   : > { %1258 = vadd.xlane.f32.xlu1 %v1257_v19 }
 0x62a   : > { %1485 = vrot.lane.b32.xlu0 %v4287_v48, %s4028_s7 }
 0x62e   : > { %1481 = vrot.lane.b32.xlu0 %v4289_v49, %s4028_s7 }
 0x62f   : > { %1414 = vrot.lane.b32.xlu1 %v4273_v22, %s4028_s7 }
 0x633   : > { %1487 = vrot.lane.b32.xlu1 %v4303_v62, %s4028_s7 }
 0x637   : > { %1483 = vrot.lane.b32.xlu1 %v4305_v0, %s4028_s7 }
 0x65c   : > { %v1244_v36 = vpop.xlane.xlu0 %1243 }
 0x65d   : > { %3857 = vrcp.f32 %v1244_v36 }
 0x65e   : > { %v1247_v23 = vpop.xlane.xlu1 %1246 }
 0x65f   : > { %3859 = vrcp.f32 %v1247_v23 }
 0x660   : > { %v1250_v24 = vpop.xlane.xlu0 %1249 }
 0x661   : > { %3861 = vrcp.f32 %v1250_v24 }
 0x664   : > { %v1289_v25 = vpop.permute.xlu0 %1288  ;;  %v1253_v16 = vpop.xlane.xlu1 %1252 }
 0x665   : > { %3863 = vrcp.f32 %v1253_v16  ;;  %3521 = vmatprep.subr.bf16.mxu0 %v1289_v25 }
 0x666   : > { %3522 = vmatpush3.bf16.msra.mxu0 %v1289_v25 }
 0x667   : > { %v3858_v15 = vpop.eup %3857 }
 0x668   : > { %v1417_v32 = vpop.permute.xlu0 %1416  ;;  %v1291_v40 = vpop.permute.xlu1 %1290  ;;  %v1274_v43 = vmul.f32 %v3858_v15, %v4417_v30 }
 0x669   : > { %v3860_v42 = vpop.eup %3859  ;;  %3523 = vmatprep.subr.bf16.mxu0 %v1291_v40 }
 0x66a   : > { %3524 = vmatpush3.bf16.msra.mxu0 %v1291_v40  ;;  %v1275_v46 = vmul.f32 %v3860_v42, %v4421_v26  ;;  %v1427_v26 = vsel %vm719_vm0, %v1417_v32, 0 }
 0x66b   : > { %3633 = vmatprep.subr.msk.bf16.mxu0 %vm719_vm0, %v1417_v32  ;;  %v3862_v56 = vpop.eup %3861 }
 0x66c   : > { %v1352_v47 = vpop.permute.xlu1 %1351  ;;  %v1282_v1 = vpack.c.bf16 %v1275_v46, %v1274_v43  ;;  %v1354_v53 = vpop.permute.xlu0 %1353  ;;  %v1276_v60 = vmul.f32 %v3862_v56, %v4425_v34 }
 0x66d   : > { %3529 = vmatprep.subr.bf16.mxu1 %v1352_v47 }
 0x66e   : > { %3525 = vmatprep.mubr.msk.bf16.mxu0 %vm719_vm0, %v1282_v1  ;;  %3530 = vmatpush3.bf16.msra.mxu1 %v1352_v47 }
 0x66f   : > { %v3864_v52 = vpop.eup %3863  ;;  %3531 = vmatprep.subr.bf16.mxu1 %v1354_v53 }
 0x670   : > { %v1277_v35 = vmul.f32 %v3864_v52, %v4429_v39  ;;  %v1413_v28 = vpop.permute.xlu0 %1412  ;;  %v1419_v12 = vpop.permute.xlu1 %1418 }
 0x671   : > { %v1430_v21 = vsel %vm719_vm0, %v1419_v12, 0 }
 0x672   : > { %3532 = vmatpush3.bf16.msra.mxu1 %v1354_v53  ;;  %v1283_v30 = vpack.c.bf16 %v1277_v35, %v1276_v60 }
 0x674   : > { %3526 = vmatmul.mubr.msk.bf16.vlgmr.msra.gmra.mrb[20].mxu0 %vm719_vm0, %v1283_v30 }
 0x675   : > { %3538 = vmatpush3.bf16.xpose.msra.mxu0 %v1427_v26  ;;  %3541 = vmatprep.mubr.msk.bf16.mxu0 %vm719_vm0, %v1413_v28 }
 0x676   : > { %3634 = vmatprep.subr.msk.bf16.mxu0 %vm719_vm0, %v1419_v12 }
 0x67d   : > { %3540 = vmatpush3.bf16.xpose.msra.mxu0 %v1430_v21 }
 0x6a1   : > { %v1256_v59 = vpop.xlane.xlu0 %1255 }
 0x6a3   : > { %v1262_v34 = vpop.xlane.xlu1 %1261 }
 0x6a5   : > { %v1486_v41 = vpop.permute.xlu0 %1485 }
 0x6a6   : > { %3635 = vmatprep.subr.msk.bf16.mxu1 %vm719_vm0, %v1486_v41  ;;  %v1496_v47 = vsel %vm719_vm0, %v1486_v41, 0 }
 0x6a7   : > { %v1265_v39 = vpop.xlane.xlu1 %1264 }
 0x6a8   : > { %3865 = vrcp.f32 %v1265_v39 }
 0x6a9   : > { %3867 = vrcp.f32 %v1256_v59  ;;  %v1482_v1 = vpop.permute.xlu0 %1481 }
 0x6aa   : > { %3869 = vrcp.f32 %v1262_v34 }
 0x6ab   : > { %v1259_v19 = vpop.xlane.xlu1 %1258 }
 0x6ac   : > { %3871 = vrcp.f32 %v1259_v19 }
 0x6af   : > { %v1415_v36 = vpop.permute.xlu1 %1414 }
 0x6b0   : > { %3542 = vmatmul.mubr.msk.bf16.vlgmr.msra.gmra.mrb[24].mxu0 %vm719_vm0, %v1415_v36 }
 0x6b2   : > { %v3866_v23 = vpop.eup %3865 }
 0x6b3   : > { %v3868_v24 = vpop.eup %3867  ;;  %v1281_v15 = vmul.f32 %v3866_v23, %v4455_v18  ;;  %v1488_v56 = vpop.permute.xlu1 %1487 }
 0x6b4   : > { %v3870_v25 = vpop.eup %3869  ;;  %v1278_v32 = vmul.f32 %v3868_v24, %v4447_v14  ;;  %v1499_v14 = vsel %vm719_vm0, %v1488_v56, 0 }
 0x6b5   : > { %v1280_v42 = vmul.f32 %v3870_v25, %v4451_v61 }
 0x6b6   : > { %v3872_v16 = vpop.eup %3871 }
 0x6b7   : > { %v1279_v40 = vmul.f32 %v3872_v16, %v4459_v45  ;;  %v1285_v46 = vpack.c.bf16 %v1281_v15, %v1280_v42  ;;  %v1484_v18 = vpop.permute.xlu1 %1483 }
 0x6b9   : > { %v1284_v43 = vpack.c.bf16 %v1279_v40, %v1278_v32 }
 0x6bb   : > { %3533 = vmatprep.mubr.msk.bf16.mxu1 %vm719_vm0, %v1284_v43 }
 0x6bc   : > { %3534 = vmatmul.mubr.msk.bf16.vlgmr.msra.gmra.mrb[28].mxu1 %vm719_vm0, %v1285_v46 }
 0x6bd   : > { %3546 = vmatpush3.bf16.xpose.msra.mxu1 %v1496_v47  ;;  %3549 = vmatprep.mubr.msk.bf16.mxu1 %vm719_vm0, %v1482_v1 }
 0x6be   : > { %3636 = vmatprep.subr.msk.bf16.mxu1 %vm719_vm0, %v1488_v56 }
 0x6c5   : > { %3548 = vmatpush3.bf16.xpose.msra.mxu1 %v1499_v14 }
 0x6cc   : > { %3550 = vmatmul.mubr.msk.bf16.vlgmr.msra.gmra.mrb[32].mxu1 %vm719_vm0, %v1484_v18 }
 0x747   : > { %v4497_v61 = vpop.f32.mrb[20].mxu0 }
 0x748   : > { %v4499_v45 = vpop.f32.mrb[21].mxu0 }
 0x749   : > { %v4501_v53 = vpop.f32.mrb[22].mxu0 }
 0x74a   : > { %v3658_v52 = vpack.i.bf16 %v4501_v53, %v4497_v61  ;;  %v4505_v60 = vpop.f32.mrb[23].mxu0 }
 0x74b   : > { %v3653_v35 = vpack.i.bf16 %v4505_v60, %v4499_v45 }
 0x783   : > { %v3543_v30 = vpop.f32.mrb[24].mxu0 }
 0x784   : > { %v1466_v26 = vpop.f32.mrb[25].mxu0  ;;  %v1556_v34 = vsel %vm719_vm0, %v3543_v30, -inf }
 0x785   : > { %v3544_v28 = vpop.f32.mrb[26].mxu0  ;;  %v1550_v12 = vsel %vm719_vm0, %v1466_v26, -inf }
 0x786   : > { %1551 = vmax.xlane.f32.xlu0 %v1550_v12  ;;  %v1469_v21 = vpop.f32.mrb[27].mxu0  ;;  %v1559_v41 = vsel %vm719_vm0, %v3544_v28, -inf }
 0x787   : > { %v1553_v59 = vsel %vm719_vm0, %v1469_v21, -inf }
 0x788   : > { %1554 = vmax.xlane.f32.xlu1 %v1553_v59 }
 0x78a   : > { %1557 = vmax.xlane.f32.xlu0 %v1556_v34 }
 0x78e   : > { %1560 = vmax.xlane.f32.xlu0 %v1559_v41 }
 0x78f   : > { %v4513_v39 = vpop.f32.mrb[28].mxu1 }
 0x790   : > { %v4515_v19 = vpop.f32.mrb[29].mxu1 }
 0x791   : > { %v4517_v36 = vpop.f32.mrb[30].mxu1 }
 0x792   : > { %v4521_v24 = vpop.f32.mrb[31].mxu1 }
 0x79f   : > { %v3551_v16 = vpop.f32.mrb[32].mxu1 }
 0x7a0   : > { %v1535_v15 = vpop.f32.mrb[33].mxu1  ;;  %v1568_v46 = vsel %vm719_vm0, %v3551_v16, -inf }
 0x7a1   : > { %v3552_v32 = vpop.f32.mrb[34].mxu1  ;;  %v1562_v40 = vsel %vm719_vm0, %v1535_v15, -inf }
 0x7a2   : > { %1563 = vmax.xlane.f32.xlu0 %v1562_v40  ;;  %v1538_v42 = vpop.f32.mrb[35].mxu1  ;;  %v1571_v47 = vsel %vm719_vm0, %v3552_v32, -inf }
 0x7a3   : > { %v1565_v43 = vsel %vm719_vm0, %v1538_v42, -inf }
 0x7a4   : > { %1566 = vmax.xlane.f32.xlu1 %v1565_v43 }
 0x7a6   : > { %1569 = vmax.xlane.f32.xlu0 %v1568_v46 }
 0x7a8   : > { %1572 = vmax.xlane.f32.xlu1 %v1571_v47 }
 0x813   : > { %v1552_v1 = vpop.xlane.xlu0 %1551 }
 0x814   : > { %v1574_v56 = vsub.f32 %v1466_v26, %v1552_v1 }
 0x815   : > { %v1555_v14 = vpop.xlane.xlu1 %1554 }
 0x816   : > { %v1582_v18 = vmul.f32 1.442695, %v1574_v56  ;;  %v1575_v12 = vsub.f32 %v1469_v21, %v1555_v14 }
 0x817   : > { %v1558_v59 = vpop.xlane.xlu0 %1557 }
 0x818   : > { %3873 = vpow2.f32 %v1582_v18  ;;  %v1584_v34 = vmul.f32 1.442695, %v1575_v12  ;;  %v1576_v41 = vsub.f32 %v3543_v30, %v1558_v59 }
 0x81a   : > { %3875 = vpow2.f32 %v1584_v34  ;;  %v1586_v40 = vmul.f32 1.442695, %v1576_v41 }
 0x81b   : > { %v1561_v50 = vpop.xlane.xlu0 %1560 }
 0x81c   : > { %3877 = vpow2.f32 %v1586_v40  ;;  %v1577_v43 = vsub.f32 %v3544_v28, %v1561_v50 }
 0x81e   : > { %v1588_v38 = vmul.f32 1.442695, %v1577_v43 }
 0x820   : > { %3879 = vpow2.f32 %v1588_v38 }
 0x822   : > { %v4529_v46 = vpop.eup %3873 }
 0x823   : > { %v1598_v47 = vsel %vm719_vm0, %v4529_v46, 0.0 }
 0x824   : > { %v4533_v26 = vpop.eup %3875  ;;  %1599 = vadd.xlane.f32.xlu0 %v1598_v47 }
 0x825   : > { %v1601_v21 = vsel %vm719_vm0, %v4533_v26, 0.0 }
 0x826   : > { %v4537_v1 = vpop.eup %3877  ;;  %1602 = vadd.xlane.f32.xlu1 %v1601_v21 }
 0x827   : > { %v1604_v30 = vsel %vm719_vm0, %v4537_v1, 0.0 }
 0x828   : > { %1605 = vadd.xlane.f32.xlu0 %v1604_v30 }
 0x82a   : > { %v4541_v50 = vpop.eup %3879 }
 0x82b   : > { %v1607_v38 = vsel %vm719_vm0, %v4541_v50, 0.0 }
 0x82c   : > { %1608 = vadd.xlane.f32.xlu1 %v1607_v38 }
 0x82f   : > { %v1564_v28 = vpop.xlane.xlu0 %1563 }
 0x830   : > { %v1578_v18 = vsub.f32 %v1535_v15, %v1564_v28 }
 0x831   : > { %v1567_v56 = vpop.xlane.xlu1 %1566 }
 0x832   : > { %v1590_v34 = vmul.f32 1.442695, %v1578_v18 }
 0x833   : > { %v1570_v14 = vpop.xlane.xlu0 %1569 }
 0x834   : > { %v1580_v12 = vsub.f32 %v3551_v16, %v1570_v14  ;;  %3881 = vpow2.f32 %v1590_v34 }
 0x835   : > { %v1573_v59 = vpop.xlane.xlu1 %1572 }
 0x836   : > { %v1594_v41 = vmul.f32 1.442695, %v1580_v12  ;;  %v1581_v40 = vsub.f32 %v3552_v32, %v1573_v59 }
 0x838   : > { %3883 = vpow2.f32 %v1594_v41  ;;  %v1596_v43 = vmul.f32 1.442695, %v1581_v40 }
 0x83a   : > { %3885 = vpow2.f32 %v1596_v43 }
 0x83d   : > { %1644 = vrot.lane.b32.xlu1 %v4261_v63, %s4028_s7 }
 0x83e   : > { %1642 = vrot.lane.b32.xlu0 %v4266_v4, %s4028_s7  ;;  %v4559_v47 = vpop.eup %3881 }
 0x841   : > { %1703 = vrot.lane.b32.xlu1 %v4282_v33, %s4028_s7 }
 0x842   : > { %1768 = vrot.lane.b32.xlu0 %v4253_v55, %s4029_s8  ;;  %v1579_v55 = vsub.f32 %v1538_v42, %v1567_v56  ;;  %v4561_v21 = vpop.eup %3883 }
 0x843   : > { %v1616_v16 = vsel %vm719_vm0, %v4561_v21, 0.0 }
 0x844   : > { %v4567_v15 = vpop.eup %3885 }
 0x845   : > { %1770 = vrot.lane.b32.xlu1 %v4271_v29, %s4029_s8  ;;  %v1592_v29 = vmul.f32 1.442695, %v1579_v55  ;;  %v1619_v32 = vsel %vm719_vm0, %v4567_v15, 0.0 }
 0x846   : > { %1705 = vrot.lane.b32.xlu0 %v4279_v31, %s4028_s7 }
 0x847   : > { %3887 = vpow2.f32 %v1592_v29 }
 0x84a   : > { %1764 = vrot.lane.b32.xlu0 %v4255_v57, %s4029_s8  ;;  %v1610_v57 = vsel %vm719_vm0, %v4559_v47, 0.0 }
 0x851   : > { %v4571_v42 = vpop.eup %3887 }
 0x852   : > { %v1613_v30 = vsel %vm719_vm0, %v4571_v42, 0.0 }
 0x869   : > { %1611 = vadd.xlane.f32.xlu0 %v1610_v57  ;;  %1617 = vadd.xlane.f32.xlu1 %v1616_v16 }
 0x86d   : > { %1620 = vadd.xlane.f32.xlu1 %v1619_v32 }
 0x871   : > { %1614 = vadd.xlane.f32.xlu1 %v1613_v30 }
 0x87f   : > { %1837 = vrot.lane.b32.xlu0 %v4287_v48, %s4029_s8 }
 0x882   : > { %1766 = vrot.lane.b32.xlu1 %v4273_v22, %s4029_s8 }
 0x883   : > { %1833 = vrot.lane.b32.xlu0 %v4289_v49, %s4029_s8 }
 0x886   : > { %1839 = vrot.lane.b32.xlu1 %v4303_v62, %s4029_s8 }
 0x88a   : > { %1835 = vrot.lane.b32.xlu1 %v4305_v0, %s4029_s8 }
 0x8b1   : > { %v1600_v38 = vpop.xlane.xlu0 %1599 }
 0x8b2   : > { %3889 = vrcp.f32 %v1600_v38 }
 0x8b3   : > { %v1603_v28 = vpop.xlane.xlu1 %1602 }
 0x8b4   : > { %3891 = vrcp.f32 %v1603_v28 }
 0x8b5   : > { %v1606_v56 = vpop.xlane.xlu0 %1605 }
 0x8b6   : > { %3893 = vrcp.f32 %v1606_v56 }
 0x8b9   : > { %v1643_v14 = vpop.permute.xlu0 %1642  ;;  %v1609_v48 = vpop.xlane.xlu1 %1608 }
 0x8ba   : > { %3895 = vrcp.f32 %v1609_v48  ;;  %3553 = vmatprep.subr.bf16.mxu0 %v1643_v14 }
 0x8bb   : > { %3554 = vmatpush3.bf16.msra.mxu0 %v1643_v14 }
 0x8bc   : > { %v3890_v22 = vpop.eup %3889 }
 0x8bd   : > { %v1769_v18 = vpop.permute.xlu0 %1768  ;;  %v1645_v49 = vpop.permute.xlu1 %1644  ;;  %v1630_v62 = vmul.f32 %v3890_v22, %v4529_v46 }
 0x8be   : > { %v3892_v12 = vpop.eup %3891  ;;  %3555 = vmatprep.subr.bf16.mxu0 %v1645_v49 }
 0x8bf   : > { %3556 = vmatpush3.bf16.msra.mxu0 %v1645_v49  ;;  %v1631_v0 = vmul.f32 %v3892_v12, %v4533_v26  ;;  %v1779_v26 = vsel %vm719_vm0, %v1769_v18, 0 }
 0x8c0   : > { %3637 = vmatprep.subr.msk.bf16.mxu0 %vm719_vm0, %v1769_v18  ;;  %v3894_v41 = vpop.eup %3893 }
 0x8c1   : > { %v1704_v59 = vpop.permute.xlu1 %1703  ;;  %v1638_v34 = vpack.c.bf16 %v1631_v0, %v1630_v62  ;;  %v1706_v40 = vpop.permute.xlu0 %1705  ;;  %v1632_v43 = vmul.f32 %v3894_v41, %v4537_v1 }
 0x8c2   : > { %3561 = vmatprep.subr.bf16.mxu1 %v1704_v59 }
 0x8c3   : > { %3557 = vmatprep.mubr.msk.bf16.mxu0 %vm719_vm0, %v1638_v34  ;;  %3562 = vmatpush3.bf16.msra.mxu1 %v1704_v59 }
 0x8c4   : > { %v3896_v55 = vpop.eup %3895  ;;  %3563 = vmatprep.subr.bf16.mxu1 %v1706_v40 }
 0x8c5   : > { %v1633_v29 = vmul.f32 %v3896_v55, %v4541_v50  ;;  %v1765_v57 = vpop.permute.xlu0 %1764  ;;  %v1771_v16 = vpop.permute.xlu1 %1770 }
 0x8c6   : > { %v1782_v32 = vsel %vm719_vm0, %v1771_v16, 0 }
 0x8c7   : > { %3564 = vmatpush3.bf16.msra.mxu1 %v1706_v40  ;;  %v1639_v46 = vpack.c.bf16 %v1633_v29, %v1632_v43 }
 0x8c9   : > { %3558 = vmatmul.mubr.msk.bf16.vlgmr.msra.gmra.mrb[28].mxu0 %vm719_vm0, %v1639_v46 }
 0x8ca   : > { %3570 = vmatpush3.bf16.xpose.msra.mxu0 %v1779_v26  ;;  %3573 = vmatprep.mubr.msk.bf16.mxu0 %vm719_vm0, %v1765_v57 }
 0x8cb   : > { %3638 = vmatprep.subr.msk.bf16.mxu0 %vm719_vm0, %v1771_v16 }
 0x8d2   : > { %3572 = vmatpush3.bf16.xpose.msra.mxu0 %v1782_v32 }
 0x8f6   : > { %v1612_v30 = vpop.xlane.xlu0 %1611  ;;  %v1618_v1 = vpop.xlane.xlu1 %1617 }
 0x8fa   : > { %v1838_v38 = vpop.permute.xlu0 %1837  ;;  %v1621_v50 = vpop.xlane.xlu1 %1620 }
 0x8fb   : > { %3639 = vmatprep.subr.msk.bf16.mxu1 %vm719_vm0, %v1838_v38  ;;  %3897 = vrcp.f32 %v1621_v50  ;;  %v1848_v41 = vsel %vm719_vm0, %v1838_v38, 0 }
 0x8fc   : > { %3899 = vrcp.f32 %v1612_v30 }
 0x8fd   : > { %3901 = vrcp.f32 %v1618_v1 }
 0x8fe   : > { %v1615_v28 = vpop.xlane.xlu1 %1614  ;;  %v1834_v40 = vpop.permute.xlu0 %1833 }
 0x8ff   : > { %3903 = vrcp.f32 %v1615_v28 }
 0x902   : > { %v1767_v56 = vpop.permute.xlu1 %1766 }
 0x903   : > { %3574 = vmatmul.mubr.msk.bf16.vlgmr.msra.gmra.mrb[32].mxu0 %vm719_vm0, %v1767_v56 }
 0x905   : > { %v3898_v14 = vpop.eup %3897 }
 0x906   : > { %v3900_v48 = vpop.eup %3899  ;;  %v1637_v49 = vmul.f32 %v3898_v14, %v4567_v15  ;;  %v1840_v55 = vpop.permute.xlu1 %1839 }
 0x907   : > { %v3902_v22 = vpop.eup %3901  ;;  %v1634_v12 = vmul.f32 %v3900_v48, %v4559_v47  ;;  %v1851_v47 = vsel %vm719_vm0, %v1840_v55, 0 }
 0x908   : > { %v1636_v0 = vmul.f32 %v3902_v22, %v4561_v21 }
 0x909   : > { %v3904_v18 = vpop.eup %3903 }
 0x90a   : > { %v1635_v62 = vmul.f32 %v3904_v18, %v4571_v42  ;;  %v1641_v34 = vpack.c.bf16 %v1637_v49, %v1636_v0  ;;  %v1836_v15 = vpop.permute.xlu1 %1835 }
 0x90c   : > { %v1640_v59 = vpack.c.bf16 %v1635_v62, %v1634_v12 }
 0x90e   : > { %3565 = vmatprep.mubr.msk.bf16.mxu1 %vm719_vm0, %v1640_v59 }
 0x90f   : > { %3566 = vmatmul.mubr.msk.bf16.vlgmr.msra.gmra.mrb[36].mxu1 %vm719_vm0, %v1641_v34 }
 0x910   : > { %3578 = vmatpush3.bf16.xpose.msra.mxu1 %v1848_v41  ;;  %3581 = vmatprep.mubr.msk.bf16.mxu1 %vm719_vm0, %v1834_v40 }
 0x911   : > { %3640 = vmatprep.subr.msk.bf16.mxu1 %vm719_vm0, %v1840_v55 }
 0x918   : > { %3580 = vmatpush3.bf16.xpose.msra.mxu1 %v1851_v47 }
 0x91f   : > { %3582 = vmatmul.mubr.msk.bf16.vlgmr.msra.gmra.mrb[40].mxu1 %vm719_vm0, %v1836_v15 }
 0x99c   : > { %v4609_v21 = vpop.f32.mrb[28].mxu0 }
 0x99d   : > { %v4611_v42 = vpop.f32.mrb[29].mxu0 }
 0x99e   : > { %v4613_v43 = vpop.f32.mrb[30].mxu0 }
 0x99f   : > { %v3668_v29 = vpack.i.bf16 %v4613_v43, %v4609_v21  ;;  %v4617_v46 = vpop.f32.mrb[31].mxu0 }
 0x9a0   : > { %v3663_v26 = vpack.i.bf16 %v4617_v46, %v4611_v42 }
 0x9d6   : > { %v3575_v57 = vpop.f32.mrb[32].mxu0 }
 0x9d7   : > { %v1818_v16 = vpop.f32.mrb[33].mxu0  ;;  %v1908_v50 = vsel %vm719_vm0, %v3575_v57, -inf }
 0x9d8   : > { %v3576_v32 = vpop.f32.mrb[34].mxu0  ;;  %v1902_v30 = vsel %vm719_vm0, %v1818_v16, -inf }
 0x9d9   : > { %1903 = vmax.xlane.f32.xlu0 %v1902_v30  ;;  %v1821_v1 = vpop.f32.mrb[35].mxu0  ;;  %v1911_v28 = vsel %vm719_vm0, %v3576_v32, -inf }
 0x9da   : > { %v1905_v38 = vsel %vm719_vm0, %v1821_v1, -inf }
 0x9db   : > { %1906 = vmax.xlane.f32.xlu1 %v1905_v38 }
 0x9dd   : > { %1909 = vmax.xlane.f32.xlu0 %v1908_v50 }
 0x9e1   : > { %1912 = vmax.xlane.f32.xlu0 %v1911_v28 }
 0x9e2   : > { %v4625_v56 = vpop.f32.mrb[36].mxu1 }
 0x9e3   : > { %v4627_v14 = vpop.f32.mrb[37].mxu1 }
 0x9e4   : > { %v4629_v48 = vpop.f32.mrb[38].mxu1 }
 0x9e5   : > { %v4633_v18 = vpop.f32.mrb[39].mxu1 }
 0x9f2   : > { %v3583_v12 = vpop.f32.mrb[40].mxu1 }
 0x9f3   : > { %v1887_v62 = vpop.f32.mrb[41].mxu1  ;;  %v1920_v40 = vsel %vm719_vm0, %v3583_v12, -inf }
 0x9f4   : > { %v3584_v0 = vpop.f32.mrb[42].mxu1  ;;  %v1914_v59 = vsel %vm719_vm0, %v1887_v62, -inf }
 0x9f5   : > { %1915 = vmax.xlane.f32.xlu0 %v1914_v59  ;;  %v1890_v34 = vpop.f32.mrb[43].mxu1  ;;  %v1923_v55 = vsel %vm719_vm0, %v3584_v0, -inf }
 0x9f6   : > { %v1917_v41 = vsel %vm719_vm0, %v1890_v34, -inf }
 0x9f7   : > { %1918 = vmax.xlane.f32.xlu1 %v1917_v41 }
 0x9f9   : > { %1921 = vmax.xlane.f32.xlu0 %v1920_v40 }
 0x9fb   : > { %1924 = vmax.xlane.f32.xlu1 %v1923_v55 }
 0xa66   : > { %v1904_v47 = vpop.xlane.xlu0 %1903 }
 0xa67   : > { %v1926_v15 = vsub.f32 %v1818_v16, %v1904_v47 }
 0xa68   : > { %v1907_v30 = vpop.xlane.xlu1 %1906 }
 0xa69   : > { %v1934_v38 = vmul.f32 1.442695, %v1926_v15  ;;  %v1927_v50 = vsub.f32 %v1821_v1, %v1907_v30 }
 0xa6a   : > { %v1910_v28 = vpop.xlane.xlu0 %1909 }
 0xa6b   : > { %3905 = vpow2.f32 %v1934_v38  ;;  %v1936_v49 = vmul.f32 1.442695, %v1927_v50  ;;  %v1928_v22 = vsub.f32 %v3575_v57, %v1910_v28 }
 0xa6d   : > { %3907 = vpow2.f32 %v1936_v49  ;;  %v1938_v59 = vmul.f32 1.442695, %v1928_v22 }
 0xa6e   : > { %v1913_v25 = vpop.xlane.xlu0 %1912 }
 0xa6f   : > { %3909 = vpow2.f32 %v1938_v59  ;;  %v1929_v41 = vsub.f32 %v3576_v32, %v1913_v25 }
 0xa71   : > { %v1940_v23 = vmul.f32 1.442695, %v1929_v41 }
 0xa73   : > { %3911 = vpow2.f32 %v1940_v23 }
 0xa75   : > { %v3906_v40 = vpop.eup %3905 }
 0xa76   : > { %v1950_v7 = vsel %vm719_vm0, %v3906_v40, 0.0 }
 0xa77   : > { %v3908_v55 = vpop.eup %3907  ;;  %1951 = vadd.xlane.f32.xlu0 %v1950_v7 }
 0xa78   : > { %v1953_v16 = vsel %vm719_vm0, %v3908_v55, 0.0 }
 0xa79   : > { %v4643_v47 = vpop.eup %3909  ;;  %1954 = vadd.xlane.f32.xlu1 %v1953_v16 }
 0xa7a   : > { %v1956_v57 = vsel %vm719_vm0, %v4643_v47, 0.0 }
 0xa7b   : > { %1957 = vadd.xlane.f32.xlu0 %v1956_v57 }
 0xa7d   : > { %v4647_v1 = vpop.eup %3911 }
 0xa7e   : > { %v1959_v25 = vsel %vm719_vm0, %v4647_v1, 0.0 }
 0xa7f   : > { %1960 = vadd.xlane.f32.xlu1 %v1959_v25 }
 0xa82   : > { %v1916_v23 = vpop.xlane.xlu0 %1915 }
 0xa83   : > { %v1930_v32 = vsub.f32 %v1887_v62, %v1916_v23 }
 0xa84   : > { %v1919_v62 = vpop.xlane.xlu1 %1918 }
 0xa85   : > { %v1942_v7 = vmul.f32 1.442695, %v1930_v32  ;;  %v1931_v41 = vsub.f32 %v1890_v34, %v1919_v62 }
 0xa86   : > { %v1922_v22 = vpop.xlane.xlu0 %1921 }
 0xa87   : > { %v1932_v49 = vsub.f32 %v3583_v12, %v1922_v22  ;;  %v1944_v16 = vmul.f32 1.442695, %v1931_v41 }
 0xa88   : > { %v1925_v28 = vpop.xlane.xlu1 %1924 }
 0xa89   : > { %v1946_v15 = vmul.f32 1.442695, %v1932_v49  ;;  %v1933_v59 = vsub.f32 %v3584_v0, %v1925_v28 }
 0xa8b   : > { %3913 = vpow2.f32 %v1946_v15 }
 0xa8c   : > { %3915 = vpow2.f32 %v1942_v7 }
 0xa90   : > { %1996 = vrot.lane.b32.xlu1 %v4261_v63, %s4029_s8  ;;  %v1948_v63 = vmul.f32 1.442695, %v1933_v59 }
 0xa92   : > { %3917 = vpow2.f32 %v1948_v63 }
 0xa93   : > { %3919 = vpow2.f32 %v1944_v16  ;;  %v5066_v16 = vmov 0  }
 0xa94   : > { %2055 = vrot.lane.b32.xlu1 %v4282_v33, %s4029_s8 }
 0xa95   : > { %v4655_v30 = vpop.eup %3913 }
 0xa96   : > { %v1968_v38 = vsel %vm719_vm0, %v4655_v30, 0.0  ;;  %v4659_v50 = vpop.eup %3915 }
 0xa97   : > { %1969 = vadd.xlane.f32.xlu0 %v1968_v38  ;;  %v1962_v12 = vsel %vm719_vm0, %v4659_v50, 0.0 }
 0xa9b   : > { %1963 = vadd.xlane.f32.xlu0 %v1962_v12 }
 0xa9c   : > { %v3918_v33 = vpop.eup %3917 }
 0xa9d   : > { %v1971_v57 = vsel %vm719_vm0, %v3918_v33, 0.0  ;;  %v3920_v25 = vpop.eup %3919 }
 0xa9e   : > { %v1965_v0 = vsel %vm719_vm0, %v3920_v25, 0.0 }
 0xab1   : > { %1994 = vrot.lane.b32.xlu0 %v4266_v4, %s4029_s8 }
 0xab5   : > { %3654 = vrot.lane.b32.xlu0 %v3653_v35, %s4029_s8 }
 0xab8   : > { %1972 = vadd.xlane.f32.xlu1 %v1971_v57  ;;  %v3745_v57 = vld [vmem:[%s5057_s1 + $0xc] ss:$24 sps:$4 sm:$0xff]  }
 0xab9   : > { %3664 = vrot.lane.b32.xlu0 %v3663_v26, %s4028_s7 }
 0xabc   : > { %1966 = vadd.xlane.f32.xlu1 %v1965_v0  ;;  %v3750_v0 = vld [vmem:[%s5057_s1 + $0xfc] ss:$24 sps:$4 sm:$0xff]  }
 0xacd   : > { %2057 = vrot.lane.b32.xlu1 %v4279_v31, %s4029_s8 }
 0xad1   : > { %3659 = vrot.lane.b32.xlu1 %v3658_v52, %s4029_s8 }
 0xad5   : > { %3669 = vrot.lane.b32.xlu1 %v3668_v29, %s4028_s7 }
 0xb04   : > { %v1952_v4 = vpop.xlane.xlu0 %1951 }
 0xb05   : > { %3921 = vrcp.f32 %v1952_v4  ;;  %v3751_v4 = vld [vmem:[%s5057_s1 + $0x12c] ss:$24 sps:$4 sm:$0xff]  }
 0xb06   : > { %v1955_v45 = vpop.xlane.xlu1 %1954 }
 0xb07   : > { %3923 = vrcp.f32 %v1955_v45  ;;  %v3752_v45 = vld [vmem:[%s5057_s1 + $0x15c] ss:$24 sps:$4 sm:$0xff]  }
 0xb08   : > { %v1958_v61 = vpop.xlane.xlu0 %1957 }
 0xb0c   : > { %v1961_v60 = vpop.xlane.xlu1 %1960 }
 0xb0d   : > { %3925 = vrcp.f32 %v1961_v60 }
 0xb0e   : > { %3927 = vrcp.f32 %v1958_v61  ;;  %v5069_v61 = vpack.i.bf16 %v4629_v48, %v4625_v56 }
 0xb0f   : > { %v3922_v35 = vpop.eup %3921 }
 0xb10   : > { %v1997_v42 = vpop.permute.xlu1 %1996  ;;  %v1982_v26 = vmul.f32 %v3922_v35, %v3906_v40 }
 0xb11   : > { %v3924_v46 = vpop.eup %3923 }
 0xb12   : > { %v1983_v31 = vmul.f32 %v3924_v46, %v3908_v55 }
 0xb14   : > { %v2056_v34 = vpop.permute.xlu1 %2055  ;;  %v1990_v23 = vpack.c.bf16 %v1983_v31, %v1982_v26 }
 0xb15   : > { %3593 = vmatprep.subr.bf16.mxu1 %v2056_v34 }
 0xb16   : > { %3589 = vmatprep.mubr.msk.bf16.mxu0 %vm719_vm0, %v1990_v23  ;;  %3594 = vmatpush3.bf16.msra.mxu1 %v2056_v34  ;;  %v5067_v34 = vpack.i.bf16 %v4517_v36, %v4513_v39  ;;  %v5068_v23 = vpack.i.bf16 %v4521_v24, %v4515_v19 }
 0xb17   : > { %v3926_v21 = vpop.eup %3925 }
 0xb18   : > { %v3928_v29 = vpop.eup %3927  ;;  %v1985_v32 = vmul.f32 %v3926_v21, %v4647_v1 }
 0xb19   : > { %v1984_v40 = vmul.f32 %v3928_v29, %v4643_v47 }
 0xb1b   : > { %v1991_v55 = vpack.c.bf16 %v1985_v32, %v1984_v40 }
 0xb24   : > { %v1970_v53 = vpop.xlane.xlu0 %1969 }
 0xb28   : > { %v1964_v52 = vpop.xlane.xlu0 %1963 }
 0xb2c   : > { %v1995_v43 = vpop.permute.xlu0 %1994 }
 0xb2d   : > { %3585 = vmatprep.subr.bf16.mxu0 %v1995_v43 }
 0xb2e   : > { %3586 = vmatpush3.bf16.msra.mxu0 %v1995_v43 }
 0xb2f   : > { %3587 = vmatprep.subr.bf16.mxu0 %v1997_v42 }
 0xb30   : > { %v3655_v24 = vpop.permute.xlu0 %3654 }
 0xb31   : > { %v3657_v56 = vunpack.i.h.bf16 %v3655_v24  ;;  %v3656_v48 = vunpack.i.l.bf16 %v3655_v24 }
 0xb32   : > { %3588 = vmatpush3.bf16.msra.mxu0 %v1997_v42 }
 0xb33   : > { %3601 = vmatprep.subr.bf16.mxu0 %v3745_v57 }
 0xb34   : > { %v3665_v40 = vpop.permute.xlu0 %3664 }
 0xb35   : > { %3590 = vmatmul.mubr.msk.bf16.vlgmr.msra.gmra.mrb[36].mxu0 %vm719_vm0, %v1991_v55 }
 0xb36   : > { %3602 = vmatpush3.bf16.msra.mxu0 %v3745_v57 }
 0xb45   : > { %v1973_v22 = vpop.xlane.xlu1 %1972 }
 0xb46   : > { %3929 = vrcp.f32 %v1973_v22 }
 0xb47   : > { %3931 = vrcp.f32 %v1964_v52 }
 0xb48   : > { %3933 = vrcp.f32 %v1970_v53  ;;  %v5070_v53 = vpack.i.bf16 %v4633_v18, %v4627_v14 }
 0xb49   : > { %v1967_v49 = vpop.xlane.xlu1 %1966 }
 0xb4a   : > { %3935 = vrcp.f32 %v1967_v49  ;;  %v3667_v49 = vunpack.i.h.bf16 %v3665_v40 }
 0xb4d   : > { %v2058_v7 = vpop.permute.xlu1 %2057 }
 0xb4e   : > { %3595 = vmatprep.subr.bf16.mxu1 %v2058_v7 }
 0xb4f   : > { %3596 = vmatpush3.bf16.msra.mxu1 %v2058_v7  ;;  %v3666_v7 = vunpack.i.l.bf16 %v3665_v40 }
 0xb50   : > { %v3930_v15 = vpop.eup %3929 }
 0xb51   : > { %v3932_v38 = vpop.eup %3931  ;;  %v1989_v12 = vmul.f32 %v3930_v15, %v3918_v33  ;;  %v3746_v33 = vld [vmem:[%s5057_s1 + $0x3c] ss:$24 sps:$4 sm:$0xff]   ;;  %v3660_v19 = vpop.permute.xlu1 %3659  ;;  %v2213_v15 = vsel %vm719_vm0, %v4399_v44, %v3657_v56 }
 0xb52   : > { %v3934_v62 = vpop.eup %3933  ;;  %v1986_v47 = vmul.f32 %v3932_v38, %v4659_v50  ;;  %3603 = vmatprep.subr.bf16.mxu0 %v3746_v33  ;;  %v3748_v50 = vld [vmem:[%s5057_s1 + $0x9c] ss:$24 sps:$4 sm:$0xff]   ;;  %v3662_v55 = vunpack.i.h.bf16 %v3660_v19  ;;  %v3661_v22 = vunpack.i.l.bf16 %v3660_v19  ;;  %v2212_v38 = vsel %vm719_vm0, %v4395_v37, %v3656_v48 }
 0xb53   : > { %v1988_v59 = vmul.f32 %v3934_v62, %v4655_v30  ;;  %v3747_v30 = vld [vmem:[%s5057_s1 + $0x6c] ss:$24 sps:$4 sm:$0xff]   ;;  %3604 = vmatpush3.bf16.msra.mxu0 %v3746_v33  ;;  %v2221_v37 = vsel %vm2220_vm1, %v2212_v38, %v3666_v7  ;;  %v2222_v33 = vsel %vm2220_vm1, %v2213_v15, %v3667_v49  ;;  %v2381_v49 = vsub.s32 5, %v4213_v27 }
 0xb54   : > { %v3936_v1 = vpop.eup %3935  ;;  %3605 = vmatprep.subr.bf16.mxu0 %v3747_v30  ;;  %v4774_v15 = vld [vmem:[%s5059_s3] sm:$0xff] }
 0xb55   : > { %v1987_v28 = vmul.f32 %v3936_v1, %v3920_v25  ;;  %v1993_v63 = vpack.c.bf16 %v1989_v12, %v1988_v59  ;;  %v3749_v25 = vld [vmem:[%s5057_s1 + $0xcc] ss:$24 sps:$4 sm:$0xff]   ;;  %v3670_v32 = vpop.permute.xlu1 %3669  ;;  %v2215_v1 = vsel %vm719_vm0, %v4397_v17, %v3662_v55  ;;  %v2214_v12 = vsel %vm719_vm0, %v4393_v13, %v3661_v22 }
 0xb56   : > { %v3672_v14 = vunpack.i.h.bf16 %v3670_v32  ;;  %v3671_v18 = vunpack.i.l.bf16 %v3670_v32  ;;  %v2382_v38 = vrot.slane %v4774_v15, %v2381_v49 }
 0xb57   : > { %v1992_v41 = vpack.c.bf16 %v1987_v28, %v1986_v47  ;;  %3606 = vmatpush3.bf16.msra.mxu0 %v3747_v30 }
 0xb58   : > { %3607 = vmatprep.subr.bf16.mxu0 %v3748_v50 }
 0xb59   : > { %3597 = vmatprep.mubr.msk.bf16.mxu1 %vm719_vm0, %v1992_v41  ;;  %v2223_v41 = vsel %vm2220_vm1, %v2214_v12, %v3671_v18 }
 0xb5a   : > { %3598 = vmatmul.mubr.msk.bf16.vlgmr.msra.gmra.mrb[44].mxu1 %vm719_vm0, %v1993_v63  ;;  %v2224_v63 = vsel %vm2220_vm1, %v2215_v1, %v3672_v14 }
 0xb5b   : > { %2647 = vmatprep.mubr.bf16.mxu1 %v5066_v16  ;;  %3608 = vmatpush3.bf16.msra.mxu0 %v3748_v50 }
 0xb5c   : > { %3609 = vmatprep.subr.bf16.mxu0 %v3749_v25 }
 0xb5f   : > { %3610 = vmatpush3.bf16.msra.mxu0 %v3749_v25 }
 0xb60   : > { %3611 = vmatprep.subr.bf16.mxu0 %v3750_v0 }
 0xb63   : > { %3612 = vmatpush3.bf16.msra.mxu0 %v3750_v0 }
 0xb64   : > { %3613 = vmatprep.subr.bf16.mxu0 %v3751_v4 }
 0xb67   : > { %3614 = vmatpush3.bf16.msra.mxu0 %v3751_v4 }
 0xb68   : > { %3615 = vmatprep.subr.bf16.mxu0 %v3752_v45 }
 0xb6b   : > { %3616 = vmatpush3.bf16.msra.mxu0 %v3752_v45 }
 0xc08   : > { %v3591_v60 = vpop.f32.mrb[36].mxu0 }
 0xc09   : > { %v2040_v35 = vpop.f32.mrb[37].mxu0 }
 0xc0a   : > { %v3592_v42 = vpop.f32.mrb[38].mxu0 }
 0xc0b   : > { %v3678_v46 = vpack.i.bf16 %v3592_v42, %v3591_v60  ;;  %v2043_v26 = vpop.f32.mrb[39].mxu0 }
 0xc0c   : > { %v3673_v31 = vpack.i.bf16 %v2043_v26, %v2040_v35 }
 0xc0d   : > { %3679 = vrot.lane.b32.xlu1 %v3678_v46, %s4027_s6 }
 0xc0e   : > { %3674 = vrot.lane.b32.xlu0 %v3673_v31, %s4027_s6 }
 0xc11   : > { %3689 = vrot.lane.b32.xlu1 %v5067_v34, %s4029_s8 }
 0xc12   : > { %3684 = vrot.lane.b32.xlu0 %v5068_v23, %s4029_s8 }
 0xc15   : > { %3699 = vrot.lane.b32.xlu1 %v5069_v61, %s4028_s7 }
 0xc16   : > { %3694 = vrot.lane.b32.xlu0 %v5070_v53, %s4028_s7 }
 0xc2d   : > { %v3599_v52 = vpop.f32.mrb[44].mxu1 }
 0xc2e   : > { %v2101_v21 = vpop.f32.mrb[45].mxu1 }
 0xc2f   : > { %v3600_v43 = vpop.f32.mrb[46].mxu1 }
 0xc30   : > { %v3708_v39 = vpack.i.bf16 %v3600_v43, %v3599_v52  ;;  %v2104_v36 = vpop.f32.mrb[47].mxu1 }
 0xc31   : > { %v3703_v29 = vpack.i.bf16 %v2104_v36, %v2101_v21 }
 0xc32   : > { %3709 = vrot.lane.b32.xlu1 %v3708_v39, %s4027_s6 }
 0xc33   : > { %3704 = vrot.lane.b32.xlu0 %v3703_v29, %s4027_s6 }
 0xc7f   : > { %v3680_v62 = vpop.permute.xlu1 %3679 }
 0xc80   : > { %v3682_v47 = vunpack.i.h.bf16 %v3680_v62  ;;  %v3681_v28 = vunpack.i.l.bf16 %v3680_v62  ;;  %v3675_v59 = vpop.permute.xlu0 %3674 }
 0xc81   : > { %v3677_v44 = vunpack.i.h.bf16 %v3675_v59  ;;  %v3676_v57 = vunpack.i.l.bf16 %v3675_v59 }
 0xc82   : > { %v2232_v30 = vsel %vm2229_vm2, %v2223_v41, %v3681_v28  ;;  %v2233_v17 = vsel %vm2229_vm2, %v2224_v63, %v3682_v47 }
 0xc83   : > { %v2255_v50 = vpack.c.bf16 %v2233_v17, %v2232_v30  ;;  %v2230_v13 = vsel %vm2229_vm2, %v2221_v37, %v3676_v57  ;;  %v2231_v25 = vsel %vm2229_vm2, %v2222_v33, %v3677_v44  ;;  %v3690_v4 = vpop.permute.xlu1 %3689 }
 0xc84   : > { %v2254_v0 = vpack.c.bf16 %v2231_v25, %v2230_v13  ;;  %v3685_v45 = vpop.permute.xlu0 %3684  ;;  %v3692_v35 = vunpack.i.h.bf16 %v3690_v4  ;;  %v3691_v42 = vunpack.i.l.bf16 %v3690_v4 }
 0xc85   : > { %v3687_v26 = vunpack.i.h.bf16 %v3685_v45  ;;  %v3686_v31 = vunpack.i.l.bf16 %v3685_v45 }
 0xc86   : > { %3617 = vmatprep.mubr.bf16.mxu0 %v2254_v0  ;;  %v2219_v52 = vsel %vm719_vm0, %v4409_v20, %v3692_v35  ;;  %v2218_v21 = vsel %vm719_vm0, %v4405_v51, %v3691_v42 }
 0xc87   : > { %3618 = vmatmul.mubr.bf16.vlgmr.msra.gmra.mrb[40].mxu0 %v2255_v50  ;;  %v3700_v60 = vpop.permute.xlu1 %3699  ;;  %v2217_v39 = vsel %vm719_vm0, %v4411_v58, %v3687_v26  ;;  %v2216_v36 = vsel %vm719_vm0, %v4407_v54, %v3686_v31 }
 0xc88   : > { %v3695_v46 = vpop.permute.xlu0 %3694  ;;  %v3702_v34 = vunpack.i.h.bf16 %v3700_v60  ;;  %v3701_v23 = vunpack.i.l.bf16 %v3700_v60 }
 0xc89   : > { %v3697_v61 = vunpack.i.h.bf16 %v3695_v46  ;;  %v3696_v53 = vunpack.i.l.bf16 %v3695_v46 }
 0xc8a   : > { %v2227_v32 = vsel %vm2220_vm1, %v2218_v21, %v3701_v23  ;;  %v2228_v56 = vsel %vm2220_vm1, %v2219_v52, %v3702_v34 }
 0xc8b   : > { %v2225_v20 = vsel %vm2220_vm1, %v2216_v36, %v3696_v53  ;;  %v2226_v51 = vsel %vm2220_vm1, %v2217_v39, %v3697_v61 }
 0xca4   : > { %v3710_v43 = vpop.permute.xlu1 %3709 }
 0xca5   : > { %v3712_v29 = vunpack.i.h.bf16 %v3710_v43  ;;  %v3711_v19 = vunpack.i.l.bf16 %v3710_v43  ;;  %v3705_v24 = vpop.permute.xlu0 %3704 }
 0xca6   : > { %v3707_v48 = vunpack.i.h.bf16 %v3705_v24  ;;  %v3706_v40 = vunpack.i.l.bf16 %v3705_v24  ;;  %v3764_v24 = vld [vmem:[%s5057_s1 + $0xa4] ss:$24 sps:$4 sm:$0xff]  }
 0xca7   : > { %v2236_v55 = vsel %vm2229_vm2, %v2227_v32, %v3711_v19  ;;  %v2237_v58 = vsel %vm2229_vm2, %v2228_v56, %v3712_v29  ;;  %v3761_v29 = vld [vmem:[%s5057_s1 + $0x74] ss:$24 sps:$4 sm:$0xff]   ;;  %v3759_v19 = vld [vmem:[%s5057_s1 + $0x70] ss:$24 sps:$4 sm:$0xff]   ;;  %v3762_v32 = vld [vmem:[%s5057_s1 + $0xa0] ss:$24 sps:$4 sm:$0xff]  }
 0xca8   : > { %v2234_v22 = vsel %vm2229_vm2, %v2225_v20, %v3706_v40  ;;  %v2235_v54 = vsel %vm2229_vm2, %v2226_v51, %v3707_v48  ;;  %v2257_v14 = vpack.c.bf16 %v2237_v58, %v2236_v55  ;;  %v3767_v56 = vld [vmem:[%s5057_s1 + $0xd4] ss:$24 sps:$4 sm:$0xff]   ;;  %v3765_v48 = vld [vmem:[%s5057_s1 + $0xd0] ss:$24 sps:$4 sm:$0xff]   ;;  %v3770_v40 = vld [vmem:[%s5057_s1 + $0x104] ss:$24 sps:$4 sm:$0xff]  }
 0xca9   : > { %v2256_v18 = vpack.c.bf16 %v2235_v54, %v2234_v22  ;;  %v3768_v20 = vld [vmem:[%s5057_s1 + $0x100] ss:$24 sps:$4 sm:$0xff]   ;;  %v3773_v51 = vld [vmem:[%s5057_s1 + $0x134] ss:$24 sps:$4 sm:$0xff]   ;;  %v3771_v58 = vld [vmem:[%s5057_s1 + $0x130] ss:$24 sps:$4 sm:$0xff]  }
 0xcaa   : > { %v3776_v54 = vld [vmem:[%s5057_s1 + $0x164] ss:$24 sps:$4 sm:$0xff]  }
 0xcab   : > { %3621 = vmatprep.mubr.bf16.mxu0 %v2256_v18  ;;  %v3774_v18 = vld [vmem:[%s5057_s1 + $0x160] ss:$24 sps:$4 sm:$0xff]  }
 0xcac   : > { %3622 = vmatmul.mubr.bf16.gmra.mrb[44].mxu0 %v2257_v14 }
 0xd5a   : > { %v3619_v7 = vpop.f32.mrb[40].mxu0 }
 0xd5b   : > { %v2340_v62 = vpop.f32.mrb[41].mxu0  ;;  %v2373_v28 = vadd.f32 %v3619_v7, %v4078_v3 }
 0xd5c   : > { %v2371_v1 = vadd.f32 %v4076_v2, %v2340_v62  ;;  %v3620_v12 = vpop.f32.mrb[42].mxu0 }
 0xd5d   : > { %v2343_v47 = vpop.f32.mrb[43].mxu0  ;;  %v4785_v44 = vadd.f32 %v2382_v38, %v2373_v28  ;;  %v2374_v57 = vadd.f32 %v3620_v12, %v4084_v6 }
 0xd5e   : > { %v4779_v59 = vadd.f32 %v2382_v38, %v2371_v1  ;;  %v2372_v41 = vadd.f32 %v4082_v5, %v2343_v47 }
 0xd5f   : > { %v4790_v2 = vadd.f32 %v2382_v38, %v2374_v57 }
 0xd60   : > { %v4782_v63 = vadd.f32 %v2382_v38, %v2372_v41  ;;  %2391 = vadd.xlane.f32.xlu0 %v4779_v59 }
 0xd62   : > { %2393 = vadd.xlane.f32.xlu1 %v4782_v63 }
 0xd64   : > { %2395 = vadd.xlane.f32.xlu0 %v4785_v44 }
 0xd68   : > { %2397 = vadd.xlane.f32.xlu0 %v4790_v2 }
 0xd7f   : > { %v3623_v3 = vpop.f32.mrb[44].mxu0 }
 0xd80   : > { %v2356_v37 = vpop.f32.mrb[45].mxu0  ;;  %v2377_v17 = vadd.f32 %v3623_v3, %v4094_v10  ;;  %v3758_v10 = vld [vmem:[%s5057_s1 + $0x44] ss:$24 sps:$4 sm:$0xff]  }
 0xd81   : > { %v2375_v5 = vadd.f32 %v4088_v8, %v2356_v37  ;;  %v3624_v33 = vpop.f32.mrb[46].mxu0  ;;  %v3753_v8 = vld [vmem:[%s5057_s1 + $0x10] ss:$24 sps:$4 sm:$0xff]  }
 0xd82   : > { %v2359_v30 = vpop.f32.mrb[47].mxu0  ;;  %v2378_v13 = vadd.f32 %v3624_v33, %v4096_v11  ;;  %v4802_v0 = vadd.f32 %v2382_v38, %v2377_v17  ;;  %v3756_v11 = vld [vmem:[%s5057_s1 + $0x40] ss:$24 sps:$4 sm:$0xff]  }
 0xd83   : > { %v4795_v50 = vadd.f32 %v2382_v38, %v2375_v5  ;;  %v2376_v6 = vadd.f32 %v4090_v9, %v2359_v30  ;;  %v3755_v9 = vld [vmem:[%s5057_s1 + $0x14] ss:$24 sps:$4 sm:$0xff]  }
 0xd84   : > { %v4805_v4 = vadd.f32 %v2382_v38, %v2378_v13  ;;  %2615 = vmatprep.subr.bf16.mxu1 %v3755_v9 }
 0xd85   : > { %v4799_v25 = vadd.f32 %v2382_v38, %v2376_v6  ;;  %2399 = vadd.xlane.f32.xlu0 %v4795_v50  ;;  %2616 = vmatpush1.bf16.msra.mxu1 %v3753_v8 }
 0xd86   : > { %2617 = vmatprep.subr.bf16.mxu1 %v3758_v10 }
 0xd87   : > { %2401 = vadd.xlane.f32.xlu1 %v4799_v25 }
 0xd89   : > { %2403 = vadd.xlane.f32.xlu0 %v4802_v0  ;;  %2618 = vmatpush1.bf16.msra.mxu1 %v3756_v11 }
 0xd8a   : > { %2619 = vmatprep.subr.bf16.mxu1 %v3761_v29 }
 0xd8b   : > { %2405 = vadd.xlane.f32.xlu1 %v4805_v4 }
 0xd8d   : > { %2620 = vmatpush1.bf16.msra.mxu1 %v3759_v19 }
 0xd8e   : > { %2621 = vmatprep.subr.bf16.mxu1 %v3764_v24 }
 0xd91   : > { %2622 = vmatpush1.bf16.msra.mxu1 %v3762_v32 }
 0xd92   : > { %2623 = vmatprep.subr.bf16.mxu1 %v3767_v56 }
 0xd95   : > { %2624 = vmatpush1.bf16.msra.mxu1 %v3765_v48 }
 0xd96   : > { %2625 = vmatprep.subr.bf16.mxu1 %v3770_v40 }
 0xd99   : > { %2626 = vmatpush1.bf16.msra.mxu1 %v3768_v20 }
 0xd9a   : > { %2627 = vmatprep.subr.bf16.mxu1 %v3773_v51 }
 0xd9d   : > { %2628 = vmatpush1.bf16.msra.mxu1 %v3771_v58 }
 0xd9e   : > { %2629 = vmatprep.subr.bf16.mxu1 %v3776_v54 }
 0xda1   : > { %2630 = vmatpush1.bf16.msra.mxu1 %v3774_v18 }
 0xded   : > { %v2392_v45 = vpop.xlane.xlu0 %2391 }
 0xdee   : > { %v2407_v60 = vmul.f32 0.0078125, %v2392_v45 }
 0xdef   : > { %v2394_v35 = vpop.xlane.xlu1 %2393 }
 0xdf0   : > { %v4822_v42 = vsub.f32 %v4779_v59, %v2407_v60  ;;  %v2408_v46 = vmul.f32 0.0078125, %v2394_v35  ;;  %v2481_v35 = vsub.s32 6, %v4213_v27 }
 0xdf1   : > { %v2396_v26 = vpop.xlane.xlu0 %2395 }
 0xdf2   : > { %v4825_v31 = vsub.f32 %v4782_v63, %v2408_v46  ;;  %v2409_v34 = vmul.f32 0.0078125, %v2396_v26  ;;  %v2423_v23 = vmul.f32 %v4822_v42, %v4822_v42  ;;  %v2482_v26 = vrot.slane %v4774_v15, %v2481_v35 }
 0xdf4   : > { %v4830_v61 = vsub.f32 %v4785_v44, %v2409_v34  ;;  %2431 = vadd.xlane.f32.xlu0 %v2423_v23  ;;  %v2424_v53 = vmul.f32 %v4825_v31, %v4825_v31  ;;  %v2493_v34 = vsub.s32 7, %v4213_v27 }
 0xdf5   : > { %v2398_v52 = vpop.xlane.xlu0 %2397 }
 0xdf6   : > { %v2410_v21 = vmul.f32 0.0078125, %v2398_v52  ;;  %2433 = vadd.xlane.f32.xlu1 %v2424_v53  ;;  %v2425_v43 = vmul.f32 %v4830_v61, %v4830_v61 }
 0xdf8   : > { %v4837_v39 = vsub.f32 %v4790_v2, %v2410_v21  ;;  %2435 = vadd.xlane.f32.xlu0 %v2425_v43 }
 0xdfa   : > { %v2426_v36 = vmul.f32 %v4837_v39, %v4837_v39 }
 0xdfc   : > { %2437 = vadd.xlane.f32.xlu1 %v2426_v36  ;;  %v2494_v36 = vrot.slane %v4774_v15, %v2493_v34  ;;  %v3782_v34 = vld [vmem:[%s5058_s2 + $0x10] sm:$0xff]  }
 0xe12   : > { %v2400_v55 = vpop.xlane.xlu0 %2399 }
 0xe13   : > { %v2411_v22 = vmul.f32 0.0078125, %v2400_v55 }
 0xe14   : > { %v2402_v14 = vpop.xlane.xlu1 %2401 }
 0xe15   : > { %v4878_v49 = vsub.f32 %v4795_v50, %v2411_v22  ;;  %v2412_v7 = vmul.f32 0.0078125, %v2402_v14 }
 0xe16   : > { %v2404_v38 = vpop.xlane.xlu0 %2403 }
 0xe17   : > { %v4881_v62 = vsub.f32 %v4799_v25, %v2412_v7  ;;  %v2413_v1 = vmul.f32 0.0078125, %v2404_v38  ;;  %v2427_v12 = vmul.f32 %v4878_v49, %v4878_v49 }
 0xe18   : > { %v2406_v47 = vpop.xlane.xlu1 %2405 }
 0xe19   : > { %v4886_v28 = vsub.f32 %v4802_v0, %v2413_v1  ;;  %v2414_v41 = vmul.f32 0.0078125, %v2406_v47  ;;  %2439 = vadd.xlane.f32.xlu0 %v2427_v12  ;;  %v2428_v57 = vmul.f32 %v4881_v62, %v4881_v62 }
 0xe1b   : > { %v4891_v3 = vsub.f32 %v4805_v4, %v2414_v41  ;;  %2441 = vadd.xlane.f32.xlu1 %v2428_v57  ;;  %v2429_v37 = vmul.f32 %v4886_v28, %v4886_v28 }
 0xe1d   : > { %2443 = vadd.xlane.f32.xlu0 %v2429_v37  ;;  %v2430_v5 = vmul.f32 %v4891_v3, %v4891_v3 }
 0xe1f   : > { %2445 = vadd.xlane.f32.xlu1 %v2430_v5 }
 0xe81   : > { %v2432_v33 = vpop.xlane.xlu0 %2431 }
 0xe82   : > { %v2447_v30 = vmul.f32 0.0078125, %v2432_v33 }
 0xe83   : > { %v2434_v17 = vpop.xlane.xlu1 %2433 }
 0xe84   : > { %v2455_v6 = vadd.f32 1e-05, %v2447_v30  ;;  %v2448_v13 = vmul.f32 0.0078125, %v2434_v17 }
 0xe85   : > { %v2436_v8 = vpop.xlane.xlu0 %2435 }
 0xe86   : > { %3937 = vrsqrt.f32 %v2455_v6  ;;  %v2456_v9 = vadd.f32 1e-05, %v2448_v13  ;;  %v2449_v10 = vmul.f32 0.0078125, %v2436_v8 }
 0xe88   : > { %3939 = vrsqrt.f32 %v2456_v9  ;;  %v2457_v11 = vadd.f32 1e-05, %v2449_v10 }
 0xe89   : > { %v2438_v45 = vpop.xlane.xlu1 %2437 }
 0xe8a   : > { %3941 = vrsqrt.f32 %v2457_v11  ;;  %v2450_v60 = vmul.f32 0.0078125, %v2438_v45 }
 0xe8c   : > { %v2458_v46 = vadd.f32 1e-05, %v2450_v60 }
 0xe8e   : > { %3943 = vrsqrt.f32 %v2458_v46 }
 0xe90   : > { %v3938_v23 = vpop.eup %3937 }
 0xe91   : > { %v2471_v53 = vmul.f32 %v3938_v23, %v4822_v42  ;;  %v3783_v23 = vld [vmem:[%s5058_s2 + $0x58] sm:$0xff]  }
 0xe92   : > { %v3940_v52 = vpop.eup %3939 }
 0xe93   : > { %v2472_v21 = vmul.f32 %v3940_v52, %v4825_v31  ;;  %v2483_v43 = vmul.f32 %v2482_v26, %v2471_v53  ;;  %v3784_v53 = vld [vmem:[%s5058_s2 + $0x18] sm:$0xff]   ;;  %v3785_v52 = vld [vmem:[%s5058_s2 + $0x60] sm:$0xff]  }
 0xe94   : > { %v3942_v29 = vpop.eup %3941 }
 0xe95   : > { %v2484_v19 = vmul.f32 %v2482_v26, %v2472_v21  ;;  %v2495_v24 = vadd.f32 %v2494_v36, %v2483_v43  ;;  %v2473_v56 = vmul.f32 %v3942_v29, %v4830_v61  ;;  %v3786_v21 = vld [vmem:[%s5058_s2 + $0x20] sm:$0xff]   ;;  %v3787_v43 = vld [vmem:[%s5058_s2 + $0x68] sm:$0xff]   ;;  %v3789_v29 = vld [vmem:[%s5058_s2 + $0x70] sm:$0xff]  }
 0xe97   : > { %v2496_v32 = vadd.f32 %v2494_v36, %v2484_v19  ;;  %v2485_v51 = vmul.f32 %v2482_v26, %v2473_v56  ;;  %v3790_v19 = vld [vmem:[%s5058_s2 + $0x30] sm:$0xff]   ;;  %v2523_v56 = vld [vmem:[%s5060_s4] sm:$0x3] }
 0xe98   : > { %v3944_v48 = vpop.eup %3943 }
 0xe99   : > { %v2519_v40 = vpack.c.bf16 %v2496_v32, %v2495_v24  ;;  %v2474_v20 = vmul.f32 %v3944_v48, %v4837_v39  ;;  %v2497_v31 = vadd.f32 %v2494_v36, %v2485_v51  ;;  %v3791_v24 = vld [vmem:[%s5058_s2 + $0x78] sm:$0xff]   ;;  %v5071_v48 = vsub.s32 0, %v4213_v27 }
 0xe9a   : > { %v3792_v32 = vld [vmem:[%s5058_s2 + $0x38] sm:$0xff]  }
 0xe9b   : > { %2648 = vmatmul.mubr.bf16.vlgmr.msra.gmra.mrb[48].mxu1 %v2519_v40  ;;  %v2486_v55 = vmul.f32 %v2482_v26, %v2474_v20  ;;  %v4965_v40 = vrot.slane %v2523_v56, %v5071_v48  ;;  %v5072_v20 = vsub.s32 1, %v4213_v27 }
 0xe9c   : > { %2657 = vmatprep.mubr.bf16.mxu1 %v5066_v16 }
 0xe9d   : > { %v2498_v42 = vadd.f32 %v2494_v36, %v2486_v55  ;;  %v4969_v51 = vrot.slane %v2523_v56, %v5072_v20 }
 0xe9f   : > { %v2520_v58 = vpack.c.bf16 %v2498_v42, %v2497_v31 }
 0xea3   : > { %2658 = vmatmul.mubr.bf16.gmra.mrb[52].mxu1 %v2520_v58 }
 0xea4   : > { %2667 = vmatprep.mubr.bf16.mxu1 %v5066_v16 }
 0xea6   : > { %v2440_v15 = vpop.xlane.xlu0 %2439 }
 0xea7   : > { %v2451_v22 = vmul.f32 0.0078125, %v2440_v15 }
 0xea8   : > { %v2442_v54 = vpop.xlane.xlu1 %2441 }
 0xea9   : > { %v2459_v14 = vadd.f32 1e-05, %v2451_v22  ;;  %v2452_v61 = vmul.f32 0.0078125, %v2442_v54 }
 0xeaa   : > { %v2444_v18 = vpop.xlane.xlu0 %2443 }
 0xeab   : > { %3945 = vrsqrt.f32 %v2459_v14  ;;  %v2460_v7 = vadd.f32 1e-05, %v2452_v61  ;;  %v2453_v39 = vmul.f32 0.0078125, %v2444_v18 }
 0xeac   : > { %v2446_v38 = vpop.xlane.xlu1 %2445 }
 0xead   : > { %3947 = vrsqrt.f32 %v2460_v7  ;;  %v2461_v1 = vadd.f32 1e-05, %v2453_v39  ;;  %v2454_v12 = vmul.f32 0.0078125, %v2446_v38 }
 0xeaf   : > { %3949 = vrsqrt.f32 %v2461_v1  ;;  %v2462_v47 = vadd.f32 1e-05, %v2454_v12 }
 0xeb1   : > { %3951 = vrsqrt.f32 %v2462_v47 }
 0xeb5   : > { %v3946_v41 = vpop.eup %3945 }
 0xeb6   : > { %v2475_v57 = vmul.f32 %v3946_v41, %v4878_v49 }
 0xeb7   : > { %v3948_v37 = vpop.eup %3947 }
 0xeb8   : > { %v2476_v5 = vmul.f32 %v3948_v37, %v4881_v62  ;;  %v2487_v33 = vmul.f32 %v2482_v26, %v2475_v57  ;;  %v3777_v62 = vld [vmem:[%s5058_s2 + $0x40] sm:$0xff]  }
 0xeb9   : > { %v3950_v30 = vpop.eup %3949  ;;  %3409 = vmatprep.subr.bf16.mxu0 %v3777_v62 }
 0xeba   : > { %v2488_v17 = vmul.f32 %v2482_v26, %v2476_v5  ;;  %v2499_v13 = vadd.f32 %v2494_v36, %v2487_v33  ;;  %v2477_v9 = vmul.f32 %v3950_v30, %v4886_v28  ;;  %v3778_v28 = vld [vmem:[%s5058_s2] sm:$0xff]  }
 0xebb   : > { %v3952_v6 = vpop.eup %3951  ;;  %3410 = vmatpush3.bf16.msra.mxu0 %v3778_v28 }
 0xebc   : > { %v2500_v8 = vadd.f32 %v2494_v36, %v2488_v17  ;;  %v2478_v10 = vmul.f32 %v3952_v6, %v4891_v3  ;;  %v2489_v60 = vmul.f32 %v2482_v26, %v2477_v9  ;;  %v3779_v3 = vld [vmem:[%s5058_s2 + $0x48] sm:$0xff]  }
 0xebd   : > { %3411 = vmatprep.subr.bf16.mxu0 %v3779_v3 }
 0xebe   : > { %v2521_v11 = vpack.c.bf16 %v2500_v8, %v2499_v13  ;;  %v2490_v45 = vmul.f32 %v2482_v26, %v2478_v10  ;;  %v2501_v35 = vadd.f32 %v2494_v36, %v2489_v60  ;;  %v3781_v26 = vld [vmem:[%s5058_s2 + $0x50] sm:$0xff]  }
 0xec0   : > { %2668 = vmatmul.mubr.bf16.gmra.mrb[56].mxu1 %v2521_v11  ;;  %v2502_v49 = vadd.f32 %v2494_v36, %v2490_v45  ;;  %v3788_v36 = vld [vmem:[%s5058_s2 + $0x28] sm:$0xff]  }
 0xec1   : > { %2677 = vmatprep.mubr.bf16.mxu1 %v5066_v16  ;;  %v3780_v16 = vld [vmem:[%s5058_s2 + $0x8] sm:$0xff]  }
 0xec2   : > { %v2522_v46 = vpack.c.bf16 %v2502_v49, %v2501_v35  ;;  %3412 = vmatpush3.bf16.msra.mxu0 %v3780_v16 }
 0xec3   : > { %3413 = vmatprep.subr.bf16.mxu0 %v3781_v26 }
 0xec6   : > { %3414 = vmatpush3.bf16.msra.mxu0 %v3782_v34 }
 0xec7   : > { %3415 = vmatprep.subr.bf16.mxu0 %v3783_v23 }
 0xec8   : > { %2678 = vmatmul.mubr.bf16.gmra.mrb[60].mxu1 %v2522_v46 }
 0xeca   : > { %3416 = vmatpush3.bf16.msra.mxu0 %v3784_v53 }
 0xecb   : > { %3417 = vmatprep.subr.bf16.mxu0 %v3785_v52 }
 0xece   : > { %3418 = vmatpush3.bf16.msra.mxu0 %v3786_v21 }
 0xecf   : > { %3419 = vmatprep.subr.bf16.mxu0 %v3787_v43 }
 0xed2   : > { %3420 = vmatpush3.bf16.msra.mxu0 %v3788_v36 }
 0xed3   : > { %3421 = vmatprep.subr.bf16.mxu0 %v3789_v29 }
 0xed6   : > { %3422 = vmatpush3.bf16.msra.mxu0 %v3790_v19 }
 0xed7   : > { %3423 = vmatprep.subr.bf16.mxu0 %v3791_v24 }
 0xeda   : > { %3424 = vmatpush3.bf16.msra.mxu0 %v3792_v32 }
 0xf6e   : > { %v2649_v55 = vpop.f32.mrb[48].mxu1 }
 0xf6f   : > { %v4972_v42 = vadd.f32 %v2649_v55, %v4965_v40  ;;  %v2651_v31 = vpop.f32.mrb[49].mxu1 }
 0xf70   : > { %v4975_v58 = vadd.f32 %v2651_v31, %v4969_v51  ;;  %v2653_v15 = vpop.f32.mrb[50].mxu1 }
 0xf71   : > { %v3226_v22 = vmul.f32 -1.702, %v4972_v42  ;;  %v4979_v54 = vadd.f32 %v2653_v15, %v4965_v40  ;;  %v2655_v14 = vpop.f32.mrb[51].mxu1 }
 0xf72   : > { %v3227_v61 = vmul.f32 -1.702, %v4975_v58  ;;  %v2656_v27 = vadd.f32 %v2655_v14, %v4969_v51 }
 0xf73   : > { %v2720_v18 = vmul.f32 1.442695, %v3226_v22  ;;  %v3228_v7 = vmul.f32 -1.702, %v4979_v54 }
 0xf74   : > { %v2722_v39 = vmul.f32 1.442695, %v3227_v61  ;;  %v3229_v38 = vmul.f32 -1.702, %v2656_v27 }
 0xf75   : > { %3953 = vpow2.f32 %v2720_v18  ;;  %v2724_v1 = vmul.f32 1.442695, %v3228_v7 }
 0xf76   : > { %3955 = vpow2.f32 %v2722_v39  ;;  %v2726_v12 = vmul.f32 1.442695, %v3229_v38  ;;  %v2659_v47 = vpop.f32.mrb[52].mxu1 }
 0xf77   : > { %3957 = vpow2.f32 %v2724_v1  ;;  %v4985_v41 = vadd.f32 %v2659_v47, %v4965_v40  ;;  %v2661_v57 = vpop.f32.mrb[53].mxu1 }
 0xf78   : > { %3959 = vpow2.f32 %v2726_v12  ;;  %v4988_v37 = vadd.f32 %v2661_v57, %v4969_v51  ;;  %v2663_v5 = vpop.f32.mrb[54].mxu1 }
 0xf79   : > { %v3230_v33 = vmul.f32 -1.702, %v4985_v41  ;;  %v4992_v30 = vadd.f32 %v2663_v5, %v4965_v40  ;;  %v2665_v17 = vpop.f32.mrb[55].mxu1 }
 0xf7a   : > { %v3231_v6 = vmul.f32 -1.702, %v4988_v37  ;;  %v4996_v13 = vadd.f32 %v2665_v17, %v4969_v51 }
 0xf7b   : > { %v2728_v8 = vmul.f32 1.442695, %v3230_v33  ;;  %v3232_v9 = vmul.f32 -1.702, %v4992_v30 }
 0xf7c   : > { %v2730_v10 = vmul.f32 1.442695, %v3231_v6  ;;  %v3233_v11 = vmul.f32 -1.702, %v4996_v13 }
 0xf7d   : > { %3961 = vpow2.f32 %v2728_v8  ;;  %v2732_v45 = vmul.f32 1.442695, %v3232_v9 }
 0xf7e   : > { %3963 = vpow2.f32 %v2730_v10  ;;  %v2734_v60 = vmul.f32 1.442695, %v3233_v11 }
 0xf7f   : > { %v3954_v49 = vpop.eup %3953  ;;  %3965 = vpow2.f32 %v2732_v45 }
 0xf80   : > { %v3956_v35 = vpop.eup %3955  ;;  %v2752_v46 = vadd.f32 1.0, %v3954_v49  ;;  %3967 = vpow2.f32 %v2734_v60 }
 0xf81   : > { %v3958_v62 = vpop.eup %3957  ;;  %v2753_v28 = vadd.f32 1.0, %v3956_v35 }
 0xf82   : > { %v3960_v3 = vpop.eup %3959  ;;  %3969 = vrcp.f32 %v2752_v46  ;;  %v2754_v16 = vadd.f32 1.0, %v3958_v62 }
 0xf83   : > { %3971 = vrcp.f32 %v2753_v28  ;;  %v2755_v26 = vadd.f32 1.0, %v3960_v3 }
 0xf84   : > { %3973 = vrcp.f32 %v2754_v16 }
 0xf85   : > { %3975 = vrcp.f32 %v2755_v26 }
 0xf87   : > { %v3962_v34 = vpop.eup %3961 }
 0xf88   : > { %v3964_v23 = vpop.eup %3963  ;;  %v2756_v53 = vadd.f32 1.0, %v3962_v34 }
 0xf89   : > { %v3966_v52 = vpop.eup %3965  ;;  %v2757_v21 = vadd.f32 1.0, %v3964_v23 }
 0xf8a   : > { %v3968_v43 = vpop.eup %3967  ;;  %3977 = vrcp.f32 %v2756_v53  ;;  %v2758_v36 = vadd.f32 1.0, %v3966_v52 }
 0xf8b   : > { %3979 = vrcp.f32 %v2757_v21  ;;  %v2759_v29 = vadd.f32 1.0, %v3968_v43 }
 0xf8c   : > { %v3970_v19 = vpop.eup %3969  ;;  %3981 = vrcp.f32 %v2758_v36 }
 0xf8d   : > { %v3972_v24 = vpop.eup %3971  ;;  %3983 = vrcp.f32 %v2759_v29  ;;  %v2800_v48 = vmul.f32 %v3970_v19, %v4972_v42 }
 0xf8e   : > { %v3974_v32 = vpop.eup %3973  ;;  %v2801_v55 = vmul.f32 %v3972_v24, %v4975_v58 }
 0xf8f   : > { %v3976_v56 = vpop.eup %3975  ;;  %v2802_v20 = vmul.f32 %v3974_v32, %v4979_v54 }
 0xf90   : > { %v2803_v31 = vmul.f32 %v3976_v56, %v2656_v27 }
 0xf91   : > { %v2848_v15 = vpack.c.bf16 %v2802_v20, %v2800_v48 }
 0xf92   : > { %v2849_v22 = vpack.c.bf16 %v2803_v31, %v2801_v55 }
 0xf93   : > { %v2669_v14 = vpop.f32.mrb[56].mxu1 }
 0xf94   : > { %v3978_v61 = vpop.eup %3977  ;;  %v5004_v18 = vadd.f32 %v2669_v14, %v4965_v40  ;;  %2984 = vmatprep.mubr.bf16.mxu0 %v2849_v22  ;;  %v2671_v7 = vpop.f32.mrb[57].mxu1 }
 0xf95   : > { %v3980_v39 = vpop.eup %3979  ;;  %v5007_v38 = vadd.f32 %v2671_v7, %v4969_v51  ;;  %2985 = vmatmul.mubr.bf16.vlgmr.msra.gmra.mrb[48].mxu0 %v2848_v15  ;;  %v2673_v42 = vpop.f32.mrb[58].mxu1  ;;  %v2804_v47 = vmul.f32 %v3978_v61, %v4985_v41 }
 0xf96   : > { %v3982_v1 = vpop.eup %3981  ;;  %v3234_v54 = vmul.f32 -1.702, %v5004_v18  ;;  %v5011_v58 = vadd.f32 %v2673_v42, %v4965_v40  ;;  %v2675_v27 = vpop.f32.mrb[59].mxu1  ;;  %v2805_v17 = vmul.f32 %v3980_v39, %v4988_v37 }
 0xf97   : > { %v3984_v12 = vpop.eup %3983  ;;  %v2806_v57 = vmul.f32 %v3982_v1, %v4992_v30  ;;  %v3235_v5 = vmul.f32 -1.702, %v5007_v38  ;;  %v5017_v33 = vadd.f32 %v2675_v27, %v4969_v51 }
 0xf98   : > { %v2807_v6 = vmul.f32 %v3984_v12, %v4996_v13  ;;  %v2736_v8 = vmul.f32 1.442695, %v3234_v54  ;;  %v3236_v9 = vmul.f32 -1.702, %v5011_v58 }
 0xf99   : > { %v2738_v10 = vmul.f32 1.442695, %v3235_v5  ;;  %v3237_v11 = vmul.f32 -1.702, %v5017_v33  ;;  %v2850_v45 = vpack.c.bf16 %v2806_v57, %v2804_v47 }
 0xf9a   : > { %3985 = vpow2.f32 %v2736_v8  ;;  %v2740_v41 = vmul.f32 1.442695, %v3236_v9  ;;  %v2851_v60 = vpack.c.bf16 %v2807_v6, %v2805_v17 }
 0xf9b   : > { %3987 = vpow2.f32 %v2738_v10  ;;  %v2742_v30 = vmul.f32 1.442695, %v3237_v11  ;;  %v2679_v49 = vpop.f32.mrb[60].mxu1 }
 0xf9c   : > { %3989 = vpow2.f32 %v2740_v41  ;;  %v2680_v35 = vadd.f32 %v2679_v49, %v4965_v40  ;;  %2992 = vmatprep.mubr.bf16.mxu0 %v2851_v60  ;;  %v2681_v37 = vpop.f32.mrb[61].mxu1 }
 0xf9d   : > { %3991 = vpow2.f32 %v2742_v30  ;;  %v2682_v13 = vadd.f32 %v2681_v37, %v4969_v51  ;;  %2993 = vmatmul.mubr.bf16.gmra.mrb[52].mxu0 %v2850_v45  ;;  %v2683_v46 = vpop.f32.mrb[62].mxu1 }
 0xf9e   : > { %v3238_v62 = vmul.f32 -1.702, %v2680_v35  ;;  %v2684_v28 = vadd.f32 %v2683_v46, %v4965_v40  ;;  %v2685_v3 = vpop.f32.mrb[63].mxu1 }
 0xf9f   : > { %v3239_v16 = vmul.f32 -1.702, %v2682_v13  ;;  %v2686_v26 = vadd.f32 %v2685_v3, %v4969_v51 }
 0xfa0   : > { %v2744_v34 = vmul.f32 1.442695, %v3238_v62  ;;  %v3240_v23 = vmul.f32 -1.702, %v2684_v28 }
 0xfa1   : > { %v2746_v53 = vmul.f32 1.442695, %v3239_v16  ;;  %v3241_v52 = vmul.f32 -1.702, %v2686_v26 }
 0xfa2   : > { %3993 = vpow2.f32 %v2744_v34  ;;  %v2748_v21 = vmul.f32 1.442695, %v3240_v23 }
 0xfa3   : > { %3995 = vpow2.f32 %v2746_v53  ;;  %v2750_v43 = vmul.f32 1.442695, %v3241_v52 }
 0xfa4   : > { %v3986_v36 = vpop.eup %3985  ;;  %3997 = vpow2.f32 %v2748_v21 }
 0xfa5   : > { %v3988_v29 = vpop.eup %3987  ;;  %v2760_v19 = vadd.f32 1.0, %v3986_v36  ;;  %3999 = vpow2.f32 %v2750_v43 }
 0xfa6   : > { %v3990_v24 = vpop.eup %3989  ;;  %v2761_v32 = vadd.f32 1.0, %v3988_v29 }
 0xfa7   : > { %v3992_v40 = vpop.eup %3991  ;;  %4001 = vrcp.f32 %v2760_v19  ;;  %v2762_v56 = vadd.f32 1.0, %v3990_v24 }
 0xfa8   : > { %4003 = vrcp.f32 %v2761_v32  ;;  %v2763_v51 = vadd.f32 1.0, %v3992_v40 }
 0xfa9   : > { %4005 = vrcp.f32 %v2762_v56 }
 0xfaa   : > { %4007 = vrcp.f32 %v2763_v51 }
 0xfac   : > { %v3994_v48 = vpop.eup %3993 }
 0xfad   : > { %v3996_v20 = vpop.eup %3995  ;;  %v2764_v55 = vadd.f32 1.0, %v3994_v48 }
 0xfae   : > { %v3998_v31 = vpop.eup %3997  ;;  %v2765_v15 = vadd.f32 1.0, %v3996_v20 }
 0xfaf   : > { %v4000_v22 = vpop.eup %3999  ;;  %4009 = vrcp.f32 %v2764_v55  ;;  %v2766_v14 = vadd.f32 1.0, %v3998_v31 }
 0xfb0   : > { %4011 = vrcp.f32 %v2765_v15  ;;  %v2767_v61 = vadd.f32 1.0, %v4000_v22 }
 0xfb1   : > { %v4002_v7 = vpop.eup %4001  ;;  %4013 = vrcp.f32 %v2766_v14 }
 0xfb2   : > { %v4004_v39 = vpop.eup %4003  ;;  %4015 = vrcp.f32 %v2767_v61  ;;  %v2808_v54 = vmul.f32 %v4002_v7, %v5004_v18 }
 0xfb3   : > { %v4006_v42 = vpop.eup %4005  ;;  %v2809_v12 = vmul.f32 %v4004_v39, %v5007_v38 }
 0xfb4   : > { %v4008_v1 = vpop.eup %4007  ;;  %v2810_v27 = vmul.f32 %v4006_v42, %v5011_v58 }
 0xfb5   : > { %v2811_v47 = vmul.f32 %v4008_v1, %v5017_v33 }
 0xfb6   : > { %v2852_v57 = vpack.c.bf16 %v2810_v27, %v2808_v54 }
 0xfb7   : > { %v2853_v5 = vpack.c.bf16 %v2811_v47, %v2809_v12 }
 0xfb9   : > { %v4010_v17 = vpop.eup %4009  ;;  %3000 = vmatprep.mubr.bf16.mxu0 %v2853_v5 }
 0xfba   : > { %v4012_v6 = vpop.eup %4011  ;;  %3001 = vmatmul.mubr.bf16.gmra.mrb[56].mxu0 %v2852_v57  ;;  %v2812_v10 = vmul.f32 %v4010_v17, %v2680_v35  ;;  %v3258_v35 = vld [vmem:[%s5059_s3 + $0x8] ss:$0 sm:$0xff] }
 0xfbb   : > { %v4014_v8 = vpop.eup %4013  ;;  %v2813_v45 = vmul.f32 %v4012_v6, %v2682_v13 }
 0xfbc   : > { %v4016_v9 = vpop.eup %4015  ;;  %v2814_v11 = vmul.f32 %v4014_v8, %v2684_v28 }
 0xfbd   : > { %v2815_v41 = vmul.f32 %v4016_v9, %v2686_v26 }
 0xfbe   : > { %v2854_v60 = vpack.c.bf16 %v2814_v11, %v2812_v10 }
 0xfbf   : > { %v2855_v18 = vpack.c.bf16 %v2815_v41, %v2813_v45 }
 0xfc1   : > { %3008 = vmatprep.mubr.bf16.mxu0 %v2855_v18 }
 0xfc2   : > { %3009 = vmatmul.mubr.bf16.gmra.mrb[60].mxu0 %v2854_v60 }
0x1068   : > { %v3425_v38 = vpop.f32.mrb[48].mxu0 }
0x1069   : > { %v3426_v58 = vpop.f32.mrb[49].mxu0 }
0x106a   : > { %v3427_v33 = vadd.f32 %v3426_v58, %v3425_v38  ;;  %v3428_v30 = vpop.f32.mrb[50].mxu0 }
0x106b   : > { %v3429_v49 = vpop.f32.mrb[51].mxu0 }
0x106c   : > { %v3017_v37 = vadd.f32 %v3427_v33, %v4779_v59  ;;  %v3430_v46 = vadd.f32 %v3429_v49, %v3428_v30 }
0x106e   : > { %v3018_v13 = vadd.f32 %v3430_v46, %v4782_v63  ;;  %v3029_v62 = vadd.f32 %v3258_v35, %v3017_v37 }
0x1070   : > { %v3030_v28 = vadd.f32 %v3258_v35, %v3018_v13  ;;  %v3431_v3 = vpop.f32.mrb[52].mxu0 }
0x1071   : > { %v3432_v16 = vpop.f32.mrb[53].mxu0 }
0x1072   : > { %v3298_v59 = vpack.c.bf16 %v3030_v28, %v3029_v62  ;;  %v3433_v26 = vadd.f32 %v3432_v16, %v3431_v3  ;;  %v3434_v34 = vpop.f32.mrb[54].mxu0 }
0x1073   : > { %v3435_v23 = vpop.f32.mrb[55].mxu0 }
0x1074   : > { %3299 = vst [vmem:[%s5041_s9] sm:$0xff] %v3298_v59   ;;  %v3019_v53 = vadd.f32 %v3433_v26, %v4785_v44  ;;  %v3436_v63 = vadd.f32 %v3435_v23, %v3434_v34 }
0x1076   : > { %v3020_v52 = vadd.f32 %v3436_v63, %v4790_v2  ;;  %v3031_v21 = vadd.f32 %v3258_v35, %v3019_v53 }
0x1078   : > { %v3032_v43 = vadd.f32 %v3258_v35, %v3020_v52 }
0x107a   : > { %v3303_v36 = vpack.c.bf16 %v3032_v43, %v3031_v21 }
0x107c   : > { %3318 = vst [vmem:[%s5041_s9 + $0x8] sm:$0xff] %v3303_v36  }
0x108d   : > { %v3437_v29 = vpop.f32.mrb[56].mxu0 }
0x108e   : > { %v3438_v19 = vpop.f32.mrb[57].mxu0 }
0x108f   : > { %v3439_v24 = vadd.f32 %v3438_v19, %v3437_v29  ;;  %v3440_v32 = vpop.f32.mrb[58].mxu0 }
0x1090   : > { %v3441_v40 = vpop.f32.mrb[59].mxu0 }
0x1091   : > { %v3021_v56 = vadd.f32 %v3439_v24, %v4795_v50  ;;  %v3442_v51 = vadd.f32 %v3441_v40, %v3440_v32 }
0x1093   : > { %v3022_v48 = vadd.f32 %v3442_v51, %v4799_v25  ;;  %v3033_v44 = vadd.f32 %v3258_v35, %v3021_v56 }
0x1095   : > { %v3034_v20 = vadd.f32 %v3258_v35, %v3022_v48  ;;  %v3443_v55 = vpop.f32.mrb[60].mxu0 }
0x1096   : > { %v3444_v2 = vpop.f32.mrb[61].mxu0 }
0x1097   : > { %v3308_v31 = vpack.c.bf16 %v3034_v20, %v3033_v44  ;;  %v3445_v15 = vadd.f32 %v3444_v2, %v3443_v55  ;;  %v3446_v22 = vpop.f32.mrb[62].mxu0 }
0x1098   : > { %v3447_v14 = vpop.f32.mrb[63].mxu0 }
0x1099   : > { %3319 = vst [vmem:[%s5041_s9 + $0x10] sm:$0xff] %v3308_v31   ;;  %v3023_v61 = vadd.f32 %v3445_v15, %v4802_v0  ;;  %v3448_v7 = vadd.f32 %v3447_v14, %v3446_v22 }
0x109b   : > { %v3024_v39 = vadd.f32 %v3448_v7, %v4805_v4  ;;  %v3035_v42 = vadd.f32 %v3258_v35, %v3023_v61 }
0x109d   : > { %v3036_v50 = vadd.f32 %v3258_v35, %v3024_v39 }
0x109f   : > { %v3313_v1 = vpack.c.bf16 %v3036_v50, %v3035_v42 }
0x10a1   : > { %3320 = vst [vmem:[%s5041_s9 + $0x18] sm:$0xff] %v3313_v1  }
0x10a2 PF: > { %s15_s18 = sadd.s32 1, %s4024_s18  }
0x10a3   : > { %p12_p4 = scmp.ge.s32.totalorder %s15_s18, 4  }
0x10a5   :  { %14 = sbr.rel (!%p12_p4) target bundleno = 1 (0x1), region = 70 }

// kernel: _lambda_.5
= control target key start
LH: loop header
LB: loop body
LE: loop exit
PB: predicated region body
PF: predicated region fallthrough
CT: control target
= control target key end

     0   :  { %11 = vsyncpa [#allocation3], 0  ;;  %s10624_s0 = inlined_call_operand.hbm [shape: bf16[4,32,128], index: 0, kind: input, shape index: {}, may-alias: {0,6}]   ;;  %s10625_s1 = inlined_call_operand.vmem [shape: bf16[4,77,256], index: 1, kind: input, shape index: {}]   ;;  %s10626_s2 = inlined_call_operand.vmem [shape: bf16[128,1280], index: 2, kind: input, shape index: {}]   ;;  %s10627_s3 = inlined_call_operand.vmem [shape: bf16[256,256], index: 3, kind: input, shape index: {}]   ;;  %s10628_s4 = inlined_call_operand.vmem [shape: f32[14,128], index: 4, kind: input, shape index: {}]   ;;  %s10629_s5 = inlined_call_operand.vmem [shape: f32[2,256], index: 5, kind: input, shape index: {}]   ;;  %s10630_s6 = inlined_call_operand.hbm [shape: bf16[4,32,128], index: 6, kind: output, shape index: {}, may-alias: {0,6}]  }
   0x1   :  { %13 = vsyncpa [#allocation3 + $0x1], 0 }
   0x2   :  { %14 = vsyncpa [#allocation4], 0 }
   0x3   :  { %16 = vsyncpa [#allocation4 + $0x1], 0  ;;  %s8268_s21 = smov 0   ;;  %s8270_s22 = smov 0  }
   0x4   :  { %s8272_s23 = smov 0   ;;  %s8274_s24 = smov 0  }
   0x5 LB: > { %s8289_s25 = sadd.s32 4294967295, %s8221_s24   ;;  %s6202_s26 = sadd.s32 4294967294, %s8221_s24   ;;  %s8221_s24 = sphi %s8274_s24, %s10737_s24   ;;  %s8217_s23 = sphi %s8272_s23, %s10736_s23   ;;  %s8213_s22 = sphi %s8270_s22, %s10735_s22   ;;  %s8209_s21 = sphi %s8268_s21, %s10734_s21  }
   0x6   : > { %s8293_s27 = sadd.s32 1, %s8221_s24   ;;  %s29_s28 = sadd.s32 1, %s8217_s23 }
   0x7   : > { %s26_s29 = ssub.s32 %s8221_s24, %s8293_s27  ;;  %p36_p0 = scmp.ne.s32.totalorder %s8217_s23, %s8213_s22 }
   0x8   : > { %p27_p1 = scmp.eq.s32.totalorder %s26_s29, 0  ;;  %p37_p2 = scmp.eq.s32.totalorder %s8221_s24, 0 }
   0x9   : > { %p42_p3 = scmp.ne.s32.totalorder %s8213_s22, %s8209_s21  ;;  %p43_p4 = scmp.eq.s32.totalorder %s8289_s25, 0 }
   0xa   : > { %s8305_s30 = scalar_select %p27_p1, %s8217_s23, %s29_s28  }
   0xb   : > { %p8307_p5 = por %p37_p2, %p36_p0  ;;  %p8311_p6 = por %p43_p4, %p42_p3 }
   0xc   : > { %p176_p7 = scmp.eq.s32.totalorder %s8289_s25, 1  ;;  %p182_p8 = scmp.eq.s32.totalorder %s6202_s26, 1 }
   0xd   : > { %p7362_p10 = scmp.lt.s32.totalorder %s8221_s24, 2  ;;  %s214_s11 = sand.u32 1, %s8217_s23  }
   0xe   : > { %p8318_p11 = por %p176_p7, %p36_p0  ;;  %p8322_p12 = por %p182_p8, %p42_p3 }
   0xf   : > { %s6488_s12 = sshll.u32 %s8221_s24, 9  ;;  %s6205_s13 = sshll.u32 %s214_s11, 5 }
  0x10   : > { %s10661_s9 = scalar_select %p8318_p11, 1, 0 }
  0x11   : > { %s10662_s10 = scalar_select %p8322_p12, 1, 0 }
  0x12   : > { %s8331_s16 = scalar_lea.hbm %s10624_s0, %s6488_s12  ;;  %s218_s17 = scalar_lea.vmem [#allocation2], %s6205_s13 }
  0x13   : > { %s226_s18 = sshll.u32 %s218_s17, 4  ;;  %p8335_p13 = pnand %p7362_p10, %p8307_p5  ;;  %s8339_s18 = int_to_ptr.vmem [resolvable:$true] %s226_s18 }
  0x14   : > { %s8341_s20 = scalar_lea.sflag [#allocation3], %s214_s11  ;;  %s8125_s26 = scalar_lea.hbm %s8331_s16, 512 }
  0x15   : > { %p8126_p0 = scmp.ne.s32.totalorder %s8331_s16, %s8125_s26  ;;  %p8127_p1 = pneg %p8335_p13 }
  0x16   : > { %s8130_s7 = scalar_lea.hbm %s10624_s0, 1024  ;;  %p8131_p4 = scmp.lt.u32.totalorder %s8331_s16, %s10624_s0 }
  0x17   : > { %p8128_p2 = pnand %p8127_p1, %p8126_p0  ;;  %p8132_p5 = scmp.lt.u32.totalorder %s8130_s7, %s8125_s26 }
  0x18   : > { %p8134_p8 = scmp.lt.u32.totalorder %s8125_s26, %s8331_s16 }
  0x19   : > { %p8129_p3 = pneg %p8128_p2  ;;  %p8133_p7 = por %p8132_p5, %p8131_p4 }
  0x1b   : > { %p8135_p10 = por %p8134_p8, %p8133_p7 }
  0x1d   : > { %p8136_p9 = pnand %p8135_p10, %p8129_p3 }
  0x1f   : > { %8139 = shalt.err (!%p8136_p9)
}
  0x20   : > { %s8140_s11 = scalar_lea.vmem %s8339_s18, 512  ;;  %s8223_s14 = smov [#allocation2]  }
  0x21   : > { %p8141_p0 = scmp.ne.s32.totalorder %s8339_s18, %s8140_s11  ;;  %s8145_s15 = sshll.u32 %s8223_s14, 4  ;;  %s8146_s15 = int_to_ptr.vmem [resolvable:$false] %s8145_s15 }
  0x22   : > { %s8147_s17 = scalar_lea.vmem %s8146_s15, 1024  ;;  %p8148_p11 = scmp.lt.s32.totalorder %s8339_s18, %s8146_s15 }
  0x23   : > { %p8143_p2 = pnand %p8141_p0, %p8127_p1  ;;  %p8149_p4 = scmp.lt.s32.totalorder %s8147_s17, %s8140_s11 }
  0x25   : > { %p8144_p12 = pneg %p8143_p2  ;;  %p8150_p5 = por %p8149_p4, %p8148_p11 }
  0x27   : > { %p8151_p7 = pnand %p8150_p5, %p8144_p12 }
  0x29   : > { %8154 = shalt.err (!%p8151_p7)
}
  0x2a   : > { %s8224_s26 = smov 64   ;;  %s8225_s28 = smov 4  }
  0x2b   : > { %7357 = dma.hbm_to_vmem [thread:$0]  (!%p8335_p13), %s8331_s16, 512, %s8339_s18, %s8341_s20, %s8224_s26, %s8224_s26, %s8225_s28  }
  0x2c   : > { %p6209_p9 = scmp.ge.s32.totalorder %s8221_s24, 1  ;;  %p244_p1 = scmp.lt.s32.totalorder %s8221_s24, 3 }
  0x2e   : > { %p245_p3 = pnand %p6209_p9, %p244_p1 }
  0x30   : > { %248 = sbr.rel (%p245_p3) target bundleno = 8735 (0x221f), region = 44 }
  0x37   : > { %s8372_s29 = sand.u32 1, %s8213_s22  }
  0x38   : > { %s6210_s7 = sshll.u32 %s8372_s29, 5  ;;  %s251_s12 = scalar_lea.sflag [#allocation3], %s8372_s29 }
  0x39   : > { %s254_s13 = scalar_lea.vmem [#allocation2], %s6210_s7 }
  0x3a   : > { %8200 = dma.done.wait (%p8311_p6), %s251_s12, 512  }
  0x3b   : > { %8202 = vsyncadd (%p8311_p6), %s251_s12, 4294966784  ;;  %v6500_v0 = vld [vmem:[%s254_s13] sm:$0xff]   ;;  %v6535_v1 = vld [vmem:[%s254_s13 + $0x8] sm:$0xff]   ;;  %vm784_vm0 = vcmask 261120   ;;  %s8227_s12 = smov 96   ;;  %s8229_s8 = smov 32  }
  0x3c   : > { %v8382_v2 = vunpack.c.l.bf16 %v6500_v0  ;;  %v8384_v3 = vunpack.c.l.bf16 %v6535_v1  ;;  %v6536_v4 = vld [vmem:[%s254_s13 + $0x10] sm:$0xff]   ;;  %v8388_v5 = vunpack.c.h.bf16 %v6500_v0  ;;  %v8390_v6 = vunpack.c.h.bf16 %v6535_v1  ;;  %v6537_v7 = vld [vmem:[%s254_s13 + $0x18] sm:$0xff]   ;;  %v7524_v12 = vld [vmem:[%s10626_s2 + $0x4] ss:$40 sps:$4 sm:$0xff]   ;;  %s8228_s13 = smov 64   ;;  %s6212_s11 = sshll.u32 %s8289_s25, 1 }
  0x3d   : > { %v8394_v8 = vunpack.c.l.bf16 %v6536_v4  ;;  %v8396_v9 = vunpack.c.h.bf16 %v6536_v4  ;;  %v8400_v10 = vunpack.c.l.bf16 %v6537_v7  ;;  %v8402_v11 = vunpack.c.h.bf16 %v6537_v7  ;;  %v7526_v13 = vld [vmem:[%s10626_s2] ss:$40 sps:$4 sm:$0xff]   ;;  %v7527_v14 = vld [vmem:[%s10626_s2 + $0x54] ss:$40 sps:$4 sm:$0xff]   ;;  %594 = vmatprep.subr.bf16.mxu0 %v7524_v12  ;;  %v7530_v48 = vld [vmem:[%s10626_s2 + $0x50] ss:$40 sps:$4 sm:$0xff]  }
  0x3e   : > { %317 = vadd.xlane.f32.xlu0 %v8382_v2  ;;  %321 = vadd.xlane.f32.xlu1 %v8384_v3  ;;  %v7529_v15 = vld [vmem:[%s10626_s2 + $0x8] ss:$40 sps:$4 sm:$0xff]   ;;  %v7531_v49 = vld [vmem:[%s10626_s2 + $0xa4] ss:$40 sps:$4 sm:$0xff]   ;;  %v7533_v50 = vld [vmem:[%s10626_s2 + $0x58] ss:$40 sps:$4 sm:$0xff]  }
  0x3f   : > { %595 = vmatpush1.bf16.msra.mxu0 %v7526_v13  ;;  %6845 = vmatprep.subr.bf16.mxu1 %v7529_v15  ;;  %v7534_v51 = vld [vmem:[%s10626_s2 + $0xa0] ss:$40 sps:$4 sm:$0xff]   ;;  %v7535_v52 = vld [vmem:[%s10626_s2 + $0xf4] ss:$40 sps:$4 sm:$0xff]   ;;  %v7538_v54 = vld [vmem:[%s10626_s2 + $0xf0] ss:$40 sps:$4 sm:$0xff]  }
  0x40   : > { %596 = vmatprep.subr.bf16.mxu0 %v7527_v14  ;;  %6846 = vmatpush3.bf16.msra.mxu1 %v7529_v15  ;;  %v7537_v53 = vld [vmem:[%s10626_s2 + $0xa8] ss:$40 sps:$4 sm:$0xff]   ;;  %v7539_v55 = vld [vmem:[%s10626_s2 + $0x144] ss:$40 sps:$4 sm:$0xff]   ;;  %v7541_v56 = vld [vmem:[%s10626_s2 + $0xf8] ss:$40 sps:$4 sm:$0xff]  }
  0x41   : > { %6847 = vmatprep.subr.bf16.mxu1 %v7533_v50  ;;  %v7542_v57 = vld [vmem:[%s10626_s2 + $0x140] ss:$40 sps:$4 sm:$0xff]   ;;  %v7543_v58 = vld [vmem:[%s10626_s2 + $0x194] ss:$40 sps:$4 sm:$0xff]   ;;  %v7546_v60 = vld [vmem:[%s10626_s2 + $0x190] ss:$40 sps:$4 sm:$0xff]  }
  0x42   : > { %319 = vadd.xlane.f32.xlu0 %v8388_v5  ;;  %323 = vadd.xlane.f32.xlu1 %v8390_v6  ;;  %v7545_v59 = vld [vmem:[%s10626_s2 + $0x148] ss:$40 sps:$4 sm:$0xff]   ;;  %v7547_v61 = vld [vmem:[%s10626_s2 + $0x1e4] ss:$40 sps:$4 sm:$0xff]   ;;  %v7549_v62 = vld [vmem:[%s10626_s2 + $0x198] ss:$40 sps:$4 sm:$0xff]  }
  0x43   : > { %597 = vmatpush1.bf16.msra.mxu0 %v7530_v48  ;;  %v7550_v63 = vld [vmem:[%s10626_s2 + $0x1e0] ss:$40 sps:$4 sm:$0xff]   ;;  %v7551_v0 = vld [vmem:[%s10626_s2 + $0x234] ss:$40 sps:$4 sm:$0xff]   ;;  %v7554_v4 = vld [vmem:[%s10626_s2 + $0x230] ss:$40 sps:$4 sm:$0xff]  }
  0x44   : > { %598 = vmatprep.subr.bf16.mxu0 %v7531_v49  ;;  %6848 = vmatpush3.bf16.msra.mxu1 %v7533_v50  ;;  %v7553_v1 = vld [vmem:[%s10626_s2 + $0x1e8] ss:$40 sps:$4 sm:$0xff]   ;;  %v10635_v7 = vmov 0   ;;  %v7555_v12 = vld [vmem:[%s10626_s2 + $0x238] ss:$40 sps:$4 sm:$0xff]   ;;  %vm2285_vm1 = vcmask 523264  }
  0x45   : > { %6849 = vmatprep.subr.bf16.mxu1 %v7537_v53  ;;  %626 = vmatprep.mubr.bf16.mxu0 %v10635_v7  ;;  %vm2294_vm2 = vcmask 785408   ;;  %p291_p6 = scmp.lt.s32.totalorder %s6212_s11, 3  ;;  %vm2927_vm3 = vcmask 629760   ;;  %vm3055_vm4 = vcmask 1045504   ;;  %vm3056_vm5 = vcmask 1046528   ;;  %s10559_s18 = scalar_lea.vmem [#allocation5], %s6210_s7 }
  0x46   : > { %325 = vadd.xlane.f32.xlu0 %v8394_v8  ;;  %327 = vadd.xlane.f32.xlu1 %v8396_v9  ;;  %s6117_s7 = sshll.u32 %s10559_s18, 4  ;;  %s6498_s19 = sshll.u32 %s8289_s25, 9  ;;  %s10572_s7 = int_to_ptr.vmem [resolvable:$true] %s6117_s7 }
  0x47   : > { %599 = vmatpush1.bf16.msra.mxu0 %v7534_v51  ;;  %s10739_s11 = smov (!%p291_p6, %s6212_s11), 3  ;;  %s8155_s15 = scalar_lea.vmem %s10572_s7, 512 }
  0x48   : > { %600 = vmatprep.subr.bf16.mxu0 %v7535_v52  ;;  %6850 = vmatpush3.bf16.msra.mxu1 %v7537_v53  ;;  %s7349_s14 = smul.u32 80, %s10739_s11  ;;  %s10577_s11 = scalar_lea.hbm %s10630_s6, %s6498_s19 }
  0x49   : > { %6851 = vmatprep.subr.bf16.mxu1 %v7541_v56  ;;  %p8156_p11 = scmp.ne.s32.totalorder %s10572_s7, %s8155_s15  ;;  %p10731_p12 = scmp.ne.s32.totalorder %s10661_s9, 0 }
  0x4a   : > { %329 = vadd.xlane.f32.xlu0 %v8400_v10  ;;  %331 = vadd.xlane.f32.xlu1 %v8402_v11  ;;  %s9192_s26 = scalar_lea.vmem %s10625_s1, %s7349_s14  ;;  %s6103_s14 = scalar_lea.sflag [#allocation4], %s8372_s29 }
  0x4b   : > { %601 = vmatpush1.bf16.msra.mxu0 %v7538_v54  ;;  %p8157_p13 = pnand %p8156_p11, %p10731_p12  ;;  %s8231_s25 = smov [#allocation5]  }
  0x4c   : > { %602 = vmatprep.subr.bf16.mxu0 %v7539_v55  ;;  %6852 = vmatpush3.bf16.msra.mxu1 %v7541_v56 }
  0x4d   : > { %6853 = vmatprep.subr.bf16.mxu1 %v7545_v59  ;;  %p8158_p8 = pneg %p8157_p13 }
  0x4f   : > { %603 = vmatpush1.bf16.msra.mxu0 %v7542_v57 }
  0x50   : > { %604 = vmatprep.subr.bf16.mxu0 %v7543_v58  ;;  %6854 = vmatpush3.bf16.msra.mxu1 %v7545_v59 }
  0x51   : > { %6855 = vmatprep.subr.bf16.mxu1 %v7549_v62 }
  0x53   : > { %605 = vmatpush1.bf16.msra.mxu0 %v7546_v60 }
  0x54   : > { %606 = vmatprep.subr.bf16.mxu0 %v7547_v61  ;;  %6856 = vmatpush3.bf16.msra.mxu1 %v7549_v62 }
  0x55   : > { %6857 = vmatprep.subr.bf16.mxu1 %v7553_v1 }
  0x57   : > { %607 = vmatpush1.bf16.msra.mxu0 %v7550_v63 }
  0x58   : > { %608 = vmatprep.subr.bf16.mxu0 %v7551_v0  ;;  %6858 = vmatpush3.bf16.msra.mxu1 %v7553_v1 }
  0x59   : > { %6859 = vmatprep.subr.bf16.mxu1 %v7555_v12 }
  0x5b   : > { %609 = vmatpush1.bf16.msra.mxu0 %v7554_v4 }
  0x5c   : > { %6860 = vmatpush3.bf16.msra.mxu1 %v7555_v12 }
  0xcb   : > { %v318_v16 = vpop.xlane.xlu0 %317  ;;  %v322_v17 = vpop.xlane.xlu1 %321 }
  0xcc   : > { %v334_v18 = vmul.f32 0.0078125, %v318_v16  ;;  %v336_v19 = vmul.f32 0.0078125, %v322_v17 }
  0xce   : > { %v8419_v20 = vsub.f32 %v8382_v2, %v334_v18  ;;  %v8422_v21 = vsub.f32 %v8384_v3, %v336_v19  ;;  %v406_v18 = vlaneseq }
  0xcf   : > { %v320_v22 = vpop.xlane.xlu0 %319  ;;  %v324_v23 = vpop.xlane.xlu1 %323 }
  0xd0   : > { %v335_v24 = vmul.f32 0.0078125, %v320_v22  ;;  %v350_v25 = vmul.f32 %v8419_v20, %v8419_v20  ;;  %v337_v26 = vmul.f32 0.0078125, %v324_v23  ;;  %v352_v27 = vmul.f32 %v8422_v21, %v8422_v21 }
  0xd2   : > { %358 = vadd.xlane.f32.xlu0 %v350_v25  ;;  %v8429_v28 = vsub.f32 %v8388_v5, %v335_v24  ;;  %v8432_v29 = vsub.f32 %v8390_v6, %v337_v26 }
  0xd3   : > { %v326_v30 = vpop.xlane.xlu0 %325  ;;  %v328_v31 = vpop.xlane.xlu1 %327 }
  0xd4   : > { %v338_v32 = vmul.f32 0.0078125, %v326_v30  ;;  %v351_v33 = vmul.f32 %v8429_v28, %v8429_v28  ;;  %v339_v34 = vmul.f32 0.0078125, %v328_v31  ;;  %v353_v35 = vmul.f32 %v8432_v29, %v8432_v29 }
  0xd6   : > { %362 = vadd.xlane.f32.xlu0 %v352_v27  ;;  %360 = vadd.xlane.f32.xlu1 %v351_v33  ;;  %v8439_v36 = vsub.f32 %v8394_v8, %v338_v32  ;;  %v8442_v37 = vsub.f32 %v8396_v9, %v339_v34  ;;  %v8519_v27 = vshrl.u32 %v406_v18, 7 }
  0xd7   : > { %v330_v38 = vpop.xlane.xlu0 %329  ;;  %v332_v39 = vpop.xlane.xlu1 %331 }
  0xd8   : > { %v340_v40 = vmul.f32 0.0078125, %v330_v38  ;;  %v354_v41 = vmul.f32 %v8439_v36, %v8439_v36  ;;  %v341_v42 = vmul.f32 0.0078125, %v332_v39  ;;  %v355_v43 = vmul.f32 %v8442_v37, %v8442_v37  ;;  %10664 = vst [vmem:[#allocation8_spill] sm:$0xff] %v8519_v27 }
  0xd9   : > { %v8522_v38 = vsub.s32 0, %v8519_v27  ;;  %v8533_v50 = vsub.s32 1, %v8519_v27 }
  0xda   : > { %364 = vadd.xlane.f32.xlu1 %v353_v35  ;;  %366 = vadd.xlane.f32.xlu0 %v354_v41  ;;  %v8449_v44 = vsub.f32 %v8400_v10, %v340_v40  ;;  %v8452_v45 = vsub.f32 %v8402_v11, %v341_v42  ;;  %v8527_v41 = vld [vmem:[%s10628_s4] sm:$0xff] }
  0xdb   : > { %10665 = vst [vmem:[#allocation9_spill] sm:$0xff] %v8522_v38  ;;  %v409_v49 = vrot.slane %v8527_v41, %v8522_v38  ;;  %10666 = vst [vmem:[#allocation10_spill] sm:$0xff] %v8533_v50  ;;  %v421_v57 = vrot.slane %v8527_v41, %v8533_v50 }
  0xdc   : > { %v356_v46 = vmul.f32 %v8449_v44, %v8449_v44  ;;  %v357_v47 = vmul.f32 %v8452_v45, %v8452_v45 }
  0xde   : > { %368 = vadd.xlane.f32.xlu1 %v355_v43  ;;  %370 = vadd.xlane.f32.xlu0 %v356_v46 }
  0xe2   : > { %372 = vadd.xlane.f32.xlu1 %v357_v47 }
 0x15f   : > { %v359_v13 = vpop.xlane.xlu0 %358 }
 0x160   : > { %v374_v14 = vmul.f32 0.0078125, %v359_v13 }
 0x162   : > { %v382_v15 = vadd.f32 1e-05, %v374_v14 }
 0x163   : > { %v361_v16 = vpop.xlane.xlu1 %360  ;;  %v363_v17 = vpop.xlane.xlu0 %362 }
 0x164   : > { %7670 = vrsqrt.f32 %v382_v15  ;;  %v375_v19 = vmul.f32 0.0078125, %v361_v16  ;;  %v376_v22 = vmul.f32 0.0078125, %v363_v17 }
 0x166   : > { %v383_v23 = vadd.f32 1e-05, %v375_v19  ;;  %v384_v24 = vadd.f32 1e-05, %v376_v22 }
 0x167   : > { %v365_v25 = vpop.xlane.xlu1 %364  ;;  %v367_v26 = vpop.xlane.xlu0 %366 }
 0x168   : > { %7672 = vrsqrt.f32 %v383_v23  ;;  %v377_v30 = vmul.f32 0.0078125, %v365_v25  ;;  %v378_v31 = vmul.f32 0.0078125, %v367_v26 }
 0x169   : > { %7674 = vrsqrt.f32 %v384_v24 }
 0x16a   : > { %v385_v32 = vadd.f32 1e-05, %v377_v30  ;;  %v386_v33 = vadd.f32 1e-05, %v378_v31 }
 0x16b   : > { %v369_v34 = vpop.xlane.xlu1 %368  ;;  %v371_v35 = vpop.xlane.xlu0 %370 }
 0x16c   : > { %7676 = vrsqrt.f32 %v385_v32  ;;  %v379_v39 = vmul.f32 0.0078125, %v369_v34  ;;  %v380_v40 = vmul.f32 0.0078125, %v371_v35  ;;  %v10633_v32 = vsub.s32 3, %v8519_v27 }
 0x16d   : > { %7678 = vrsqrt.f32 %v386_v33  ;;  %v10632_v33 = vsub.s32 4, %v8519_v27 }
 0x16e   : > { %v7671_v42 = vpop.eup %7670  ;;  %v387_v43 = vadd.f32 1e-05, %v379_v39  ;;  %v388_v46 = vadd.f32 1e-05, %v380_v40  ;;  %v8558_v35 = vrot.slane %v8527_v41, %v10633_v32 }
 0x16f   : > { %v373_v47 = vpop.xlane.xlu1 %372  ;;  %v398_v48 = vmul.f32 %v7671_v42, %v8419_v20 }
 0x170   : > { %7680 = vrsqrt.f32 %v387_v43  ;;  %v381_v51 = vmul.f32 0.0078125, %v373_v47  ;;  %v767_v47 = vrot.slane %v8527_v41, %v10632_v33 }
 0x171   : > { %7682 = vrsqrt.f32 %v388_v46  ;;  %v410_v56 = vmul.f32 %v409_v49, %v398_v48 }
 0x172   : > { %v7673_v52 = vpop.eup %7672  ;;  %v389_v53 = vadd.f32 1e-05, %v381_v51 }
 0x173   : > { %v7675_v54 = vpop.eup %7674  ;;  %v399_v55 = vmul.f32 %v7673_v52, %v8429_v28  ;;  %v422_v62 = vadd.f32 %v421_v57, %v410_v56 }
 0x174   : > { %7684 = vrsqrt.f32 %v389_v53  ;;  %v400_v20 = vmul.f32 %v7675_v54, %v8422_v21 }
 0x175   : > { %v411_v58 = vmul.f32 %v409_v49, %v399_v55 }
 0x176   : > { %v7677_v59 = vpop.eup %7676  ;;  %v412_v60 = vmul.f32 %v409_v49, %v400_v20 }
 0x177   : > { %v7679_v61 = vpop.eup %7678  ;;  %v423_v63 = vadd.f32 %v421_v57, %v411_v58  ;;  %v401_v0 = vmul.f32 %v7677_v59, %v8432_v29 }
 0x178   : > { %v402_v1 = vmul.f32 %v7679_v61, %v8439_v36  ;;  %v424_v13 = vadd.f32 %v421_v57, %v412_v60 }
 0x179   : > { %v462_v4 = vpack.c.bf16 %v423_v63, %v422_v62  ;;  %v413_v12 = vmul.f32 %v409_v49, %v401_v0 }
 0x17a   : > { %v7681_v28 = vpop.eup %7680  ;;  %v414_v16 = vmul.f32 %v409_v49, %v402_v1 }
 0x17b   : > { %v7683_v14 = vpop.eup %7682  ;;  %627 = vmatmul.mubr.bf16.vlgmr.msra.gmra.mrb[0].mxu0 %v462_v4  ;;  %6861 = vmatprep.mubr.bf16.mxu1 %v462_v4  ;;  %v425_v15 = vadd.f32 %v421_v57, %v413_v12  ;;  %v403_v21 = vmul.f32 %v7681_v28, %v8442_v37 }
 0x17c   : > { %636 = vmatprep.mubr.bf16.mxu0 %v10635_v7  ;;  %v404_v17 = vmul.f32 %v7683_v14, %v8449_v44  ;;  %v426_v36 = vadd.f32 %v421_v57, %v414_v16  ;;  %v10634_v44 = vsub.s32 2, %v8519_v27 }
 0x17d   : > { %v463_v18 = vpack.c.bf16 %v425_v15, %v424_v13  ;;  %v415_v19 = vmul.f32 %v409_v49, %v403_v21 }
 0x17e   : > { %v7685_v29 = vpop.eup %7684  ;;  %v416_v24 = vmul.f32 %v409_v49, %v404_v17 }
 0x17f   : > { %6862 = vmatmul.mubr.bf16.vlgmr.msra.gmra.mrb[0].mxu1 %v463_v18  ;;  %v427_v22 = vadd.f32 %v421_v57, %v415_v19  ;;  %v405_v23 = vmul.f32 %v7685_v29, %v8452_v45  ;;  %v8552_v45 = vrot.slane %v8527_v41, %v10634_v44 }
 0x180   : > { %v428_v30 = vadd.f32 %v421_v57, %v416_v24 }
 0x181   : > { %v464_v25 = vpack.c.bf16 %v427_v22, %v426_v36  ;;  %v417_v26 = vmul.f32 %v409_v49, %v405_v23 }
 0x183   : > { %637 = vmatmul.mubr.bf16.gmra.mrb[4].mxu0 %v463_v18  ;;  %6865 = vmatprep.mubr.bf16.mxu1 %v464_v25  ;;  %v429_v37 = vadd.f32 %v421_v57, %v417_v26 }
 0x184   : > { %646 = vmatprep.mubr.bf16.mxu0 %v10635_v7 }
 0x185   : > { %v465_v31 = vpack.c.bf16 %v429_v37, %v428_v30 }
 0x187   : > { %6866 = vmatmul.mubr.bf16.gmra.mrb[4].mxu1 %v465_v31 }
 0x18b   : > { %647 = vmatmul.mubr.bf16.gmra.mrb[8].mxu0 %v464_v25 }
 0x18c   : > { %656 = vmatprep.mubr.bf16.mxu0 %v10635_v7 }
 0x193   : > { %657 = vmatmul.mubr.bf16.gmra.mrb[12].mxu0 %v465_v31 }
 0x24e   : > { %v628_v34 = vpop.f32.mrb[0].mxu0 }
 0x24f   : > { %v736_v39 = vadd.f32 %v8552_v45, %v628_v34  ;;  %v630_v40 = vpop.f32.mrb[1].mxu0 }
 0x250   : > { %v632_v42 = vpop.f32.mrb[2].mxu0  ;;  %v756_v48 = vadd.f32 %v8558_v35, %v630_v40 }
 0x251   : > { %v737_v43 = vadd.f32 %v8552_v45, %v632_v42  ;;  %v634_v46 = vpop.f32.mrb[3].mxu0  ;;  %v744_v52 = vmul.f32 0.17677669, %v736_v39 }
 0x252   : > { %v757_v49 = vadd.f32 %v8558_v35, %v634_v46  ;;  %v6863_v51 = vpop.f32.mrb[0].mxu1 }
 0x253   : > { %v745_v53 = vmul.f32 0.17677669, %v737_v43  ;;  %v701_v54 = vpop.f32.mrb[1].mxu1  ;;  %v770_v20 = vadd.f32 %v6863_v51, %v767_v47 }
 0x254   : > { %v8567_v55 = vpack.c.bf16 %v757_v49, %v756_v48  ;;  %v6864_v56 = vpop.f32.mrb[2].mxu1  ;;  %v768_v60 = vadd.f32 %v767_v47, %v701_v54 }
 0x255   : > { %v8569_v57 = vpack.c.bf16 %v745_v53, %v744_v52  ;;  %v771_v58 = vadd.f32 %v6864_v56, %v767_v47  ;;  %v704_v59 = vpop.f32.mrb[3].mxu1 }
 0x256   : > { %v769_v61 = vadd.f32 %v767_v47, %v704_v59  ;;  %v638_v41 = vpop.f32.mrb[4].mxu0  ;;  %7293 = vmatprep.subr.msk.bf16.mxu1 %vm784_vm0, %v8567_v55  ;;  %v792_v62 = vsel %vm784_vm0, %v8567_v55, 0 }
 0x257   : > { %v8575_v63 = vpack.c.bf16 %v771_v58, %v770_v20  ;;  %v738_v0 = vadd.f32 %v8552_v45, %v638_v41  ;;  %v640_v1 = vpop.f32.mrb[5].mxu0  ;;  %6870 = vmatpush3.bf16.xpose.msra.mxu1 %v792_v62  ;;  %6873 = vmatprep.mubr.msk.bf16.mxu1 %vm784_vm0, %v8569_v57 }
 0x258   : > { %v8580_v4 = vpack.c.bf16 %v769_v61, %v768_v60  ;;  %v642_v12 = vpop.f32.mrb[6].mxu0  ;;  %v758_v14 = vadd.f32 %v8558_v35, %v640_v1 }
 0x259   : > { %v739_v28 = vadd.f32 %v8552_v45, %v642_v12  ;;  %v644_v13 = vpop.f32.mrb[7].mxu0  ;;  %v746_v16 = vmul.f32 0.17677669, %v738_v0 }
 0x25a   : > { %v759_v15 = vadd.f32 %v8558_v35, %v644_v13  ;;  %v6867_v21 = vpop.f32.mrb[4].mxu1 }
 0x25b   : > { %v747_v17 = vmul.f32 0.17677669, %v739_v28  ;;  %v774_v18 = vadd.f32 %v6867_v21, %v767_v47  ;;  %v717_v19 = vpop.f32.mrb[5].mxu1 }
 0x25c   : > { %v8585_v29 = vpack.c.bf16 %v759_v15, %v758_v14  ;;  %v6868_v36 = vpop.f32.mrb[6].mxu1  ;;  %v772_v25 = vadd.f32 %v767_v47, %v717_v19 }
 0x25d   : > { %v8587_v22 = vpack.c.bf16 %v747_v17, %v746_v16  ;;  %v775_v23 = vadd.f32 %v6868_v36, %v767_v47  ;;  %v720_v24 = vpop.f32.mrb[7].mxu1 }
 0x25e   : > { %v773_v26 = vadd.f32 %v767_v47, %v720_v24  ;;  %v648_v30 = vpop.f32.mrb[8].mxu0  ;;  %7294 = vmatprep.subr.msk.bf16.mxu1 %vm784_vm0, %v8585_v29  ;;  %v795_v37 = vsel %vm784_vm0, %v8585_v29, 0 }
 0x25f   : > { %v8593_v31 = vpack.c.bf16 %v775_v23, %v774_v18  ;;  %v740_v34 = vadd.f32 %v8552_v45, %v648_v30  ;;  %v650_v39 = vpop.f32.mrb[9].mxu0  ;;  %6872 = vmatpush3.bf16.xpose.msra.mxu1 %v795_v37 }
 0x260   : > { %v8596_v40 = vpack.c.bf16 %v773_v26, %v772_v25  ;;  %v652_v42 = vpop.f32.mrb[10].mxu0  ;;  %v760_v47 = vadd.f32 %v8558_v35, %v650_v39 }
 0x261   : > { %v741_v43 = vadd.f32 %v8552_v45, %v652_v42  ;;  %v654_v46 = vpop.f32.mrb[11].mxu0  ;;  %v748_v49 = vmul.f32 0.17677669, %v740_v34 }
 0x262   : > { %v761_v48 = vadd.f32 %v8558_v35, %v654_v46 }
 0x263   : > { %v749_v51 = vmul.f32 0.17677669, %v741_v43 }
 0x264   : > { %v8601_v52 = vpack.c.bf16 %v761_v48, %v760_v47 }
 0x265   : > { %v8603_v53 = vpack.c.bf16 %v749_v51, %v748_v49 }
 0x266   : > { %v658_v54 = vpop.f32.mrb[12].mxu0  ;;  %6874 = vmatmul.mubr.msk.bf16.vlgmr.msra.gmra.mrb[8].mxu1 %vm784_vm0, %v8587_v22  ;;  %7295 = vmatprep.subr.msk.bf16.mxu1 %vm784_vm0, %v8601_v52  ;;  %v853_v56 = vsel %vm784_vm0, %v8601_v52, 0 }
 0x267   : > { %v742_v20 = vadd.f32 %v8552_v45, %v658_v54  ;;  %v660_v58 = vpop.f32.mrb[13].mxu0  ;;  %6878 = vmatpush3.bf16.xpose.msra.mxu1 %v853_v56  ;;  %6881 = vmatprep.mubr.msk.bf16.mxu1 %vm784_vm0, %v8603_v53 }
 0x268   : > { %v662_v59 = vpop.f32.mrb[14].mxu0  ;;  %v762_v41 = vadd.f32 %v8558_v35, %v660_v58 }
 0x269   : > { %v743_v60 = vadd.f32 %v8552_v45, %v662_v59  ;;  %v664_v61 = vpop.f32.mrb[15].mxu0  ;;  %v750_v0 = vmul.f32 0.17677669, %v742_v20 }
 0x26a   : > { %v763_v62 = vadd.f32 %v8558_v35, %v664_v61 }
 0x26b   : > { %v751_v1 = vmul.f32 0.17677669, %v743_v60 }
 0x26c   : > { %v8617_v12 = vpack.c.bf16 %v763_v62, %v762_v41 }
 0x26d   : > { %v8619_v28 = vpack.c.bf16 %v751_v1, %v750_v0 }
 0x26e   : > { %7296 = vmatprep.subr.msk.bf16.mxu1 %vm784_vm0, %v8617_v12  ;;  %v856_v13 = vsel %vm784_vm0, %v8617_v12, 0 }
 0x26f   : > { %6880 = vmatpush3.bf16.xpose.msra.mxu1 %v856_v13 }
 0x270   : > { %6885 = vmatprep.subr.bf16.mxu1 %v8580_v4 }
 0x276   : > { %6882 = vmatmul.mubr.msk.bf16.vlgmr.msra.gmra.mrb[12].mxu1 %vm784_vm0, %v8619_v28 }
 0x277   : > { %6886 = vmatpush3.bf16.msra.mxu1 %v8580_v4 }
 0x278   : > { %6887 = vmatprep.subr.bf16.mxu1 %v8575_v63 }
 0x27b   : > { %6888 = vmatpush3.bf16.msra.mxu1 %v8575_v63 }
 0x27c   : > { %6893 = vmatprep.subr.bf16.mxu1 %v8596_v40 }
 0x339   : > { %v6875_v45 = vpop.f32.mrb[8].mxu1 }
 0x33a   : > { %v831_v35 = vpop.f32.mrb[9].mxu1  ;;  %v913_v17 = vsel %vm784_vm0, %v6875_v45, -inf }
 0x33b   : > { %v6876_v14 = vpop.f32.mrb[10].mxu1  ;;  %v907_v15 = vsel %vm784_vm0, %v831_v35, -inf }
 0x33c   : > { %908 = vmax.xlane.f32.xlu0 %v907_v15  ;;  %v834_v21 = vpop.f32.mrb[11].mxu1  ;;  %v916_v18 = vsel %vm784_vm0, %v6876_v14, -inf }
 0x33d   : > { %v910_v16 = vsel %vm784_vm0, %v834_v21, -inf }
 0x33e   : > { %911 = vmax.xlane.f32.xlu1 %v910_v16 }
 0x340   : > { %914 = vmax.xlane.f32.xlu0 %v913_v17 }
 0x342   : > { %917 = vmax.xlane.f32.xlu1 %v916_v18 }
 0x349   : > { %v8636_v19 = vpop.f32.mrb[12].mxu1 }
 0x34a   : > { %v8638_v36 = vpop.f32.mrb[13].mxu1  ;;  %v925_v30 = vsel %vm784_vm0, %v8636_v19, -inf }
 0x34b   : > { %v6884_v23 = vpop.f32.mrb[14].mxu1  ;;  %v919_v24 = vsel %vm784_vm0, %v8638_v36, -inf }
 0x34c   : > { %920 = vmax.xlane.f32.xlu0 %v919_v24  ;;  %v895_v25 = vpop.f32.mrb[15].mxu1  ;;  %v928_v37 = vsel %vm784_vm0, %v6884_v23, -inf }
 0x34d   : > { %v922_v26 = vsel %vm784_vm0, %v895_v25, -inf }
 0x34e   : > { %923 = vmax.xlane.f32.xlu1 %v922_v26 }
 0x350   : > { %926 = vmax.xlane.f32.xlu0 %v925_v30 }
 0x352   : > { %929 = vmax.xlane.f32.xlu1 %v928_v37 }
 0x363   : > { %1123 = vrot.lane.b32.xlu1 %v8585_v29, %s8227_s12 }
 0x367   : > { %1115 = vrot.lane.b32.xlu1 %v8569_v57, %s8227_s12 }
 0x3c9   : > { %v909_v34 = vpop.xlane.xlu0 %908 }
 0x3ca   : > { %v931_v39 = vsub.f32 %v831_v35, %v909_v34 }
 0x3cb   : > { %v912_v42 = vpop.xlane.xlu1 %911 }
 0x3cc   : > { %v932_v46 = vsub.f32 %v834_v21, %v912_v42  ;;  %v939_v48 = vmul.f32 1.442695, %v931_v39 }
 0x3cd   : > { %v915_v43 = vpop.xlane.xlu0 %914 }
 0x3ce   : > { %v933_v47 = vsub.f32 %v6875_v45, %v915_v43  ;;  %v941_v56 = vmul.f32 1.442695, %v932_v46 }
 0x3cf   : > { %v918_v49 = vpop.xlane.xlu1 %917 }
 0x3d0   : > { %v943_v51 = vmul.f32 1.442695, %v933_v47  ;;  %v934_v54 = vsub.f32 %v6876_v14, %v918_v49 }
 0x3d2   : > { %7686 = vpow2.f32 %v943_v51  ;;  %v945_v20 = vmul.f32 1.442695, %v934_v54 }
 0x3d3   : > { %7688 = vpow2.f32 %v939_v48 }
 0x3d4   : > { %7690 = vpow2.f32 %v945_v20 }
 0x3d5   : > { %7692 = vpow2.f32 %v941_v56 }
 0x3d9   : > { %v921_v26 = vpop.xlane.xlu0 %920 }
 0x3da   : > { %v935_v34 = vsub.f32 %v8638_v36, %v921_v26 }
 0x3db   : > { %v924_v58 = vpop.xlane.xlu1 %923 }
 0x3dc   : > { %v8650_v59 = vpop.eup %7686  ;;  %v936_v62 = vsub.f32 %v895_v25, %v924_v58  ;;  %v947_v42 = vmul.f32 1.442695, %v935_v34 }
 0x3dd   : > { %v8652_v60 = vpop.eup %7688  ;;  %v961_v61 = vsel %vm784_vm0, %v8650_v59, 0.0  ;;  %v927_v30 = vpop.xlane.xlu0 %926 }
 0x3de   : > { %v7691_v41 = vpop.eup %7690  ;;  %962 = vadd.xlane.f32.xlu0 %v961_v61  ;;  %v955_v35 = vsel %vm784_vm0, %v8652_v60, 0.0  ;;  %v949_v14 = vmul.f32 1.442695, %v936_v62  ;;  %v937_v37 = vsub.f32 %v8636_v19, %v927_v30 }
 0x3df   : > { %v930_v0 = vpop.xlane.xlu1 %929  ;;  %v964_v1 = vsel %vm784_vm0, %v7691_v41, 0.0  ;;  %v7693_v13 = vpop.eup %7692 }
 0x3e0   : > { %v938_v45 = vsub.f32 %v6884_v23, %v930_v0  ;;  %965 = vadd.xlane.f32.xlu1 %v964_v1  ;;  %v958_v16 = vsel %vm784_vm0, %v7693_v13, 0.0  ;;  %v951_v39 = vmul.f32 1.442695, %v937_v37 }
 0x3e2   : > { %v953_v15 = vmul.f32 1.442695, %v938_v45  ;;  %956 = vadd.xlane.f32.xlu0 %v955_v35 }
 0x3e3   : > { %v1124_v21 = vpop.permute.xlu1 %1123 }
 0x3e4   : > { %7694 = vpow2.f32 %v953_v15  ;;  %959 = vadd.xlane.f32.xlu1 %v958_v16  ;;  %v1135_v1 = vsel %vm784_vm0, %v1124_v21, 0 }
 0x3e5   : > { %7696 = vpow2.f32 %v949_v14 }
 0x3e6   : > { %7698 = vpow2.f32 %v951_v39 }
 0x3e7   : > { %v1116_v17 = vpop.permute.xlu1 %1115  ;;  %7700 = vpow2.f32 %v947_v42 }
 0x3e8   : > { %6905 = vmatprep.mubr.msk.bf16.mxu0 %vm784_vm0, %v1116_v17 }
 0x3ee   : > { %v8661_v18 = vpop.eup %7694 }
 0x3ef   : > { %v976_v23 = vsel %vm784_vm0, %v8661_v18, 0.0  ;;  %v8665_v24 = vpop.eup %7696 }
 0x3f0   : > { %977 = vadd.xlane.f32.xlu1 %v976_v23  ;;  %v970_v25 = vsel %vm784_vm0, %v8665_v24, 0.0  ;;  %v7699_v43 = vpop.eup %7698 }
 0x3f1   : > { %v973_v46 = vsel %vm784_vm0, %v7699_v43, 0.0  ;;  %v7701_v47 = vpop.eup %7700 }
 0x3f2   : > { %v967_v19 = vsel %vm784_vm0, %v7701_v47, 0.0 }
 0x3f4   : > { %971 = vadd.xlane.f32.xlu1 %v970_v25 }
 0x3f8   : > { %1121 = vrot.lane.b32.xlu0 %v8567_v55, %s8227_s12 }
 0x405   : > { %1117 = vrot.lane.b32.xlu1 %v8587_v22, %s8227_s12 }
 0x409   : > { %1196 = vrot.lane.b32.xlu1 %v8617_v12, %s8227_s12 }
 0x40d   : > { %1190 = vrot.lane.b32.xlu1 %v8619_v28, %s8227_s12 }
 0x417   : > { %974 = vadd.xlane.f32.xlu0 %v973_v46 }
 0x41b   : > { %968 = vadd.xlane.f32.xlu0 %v967_v19 }
 0x431   : > { %1194 = vrot.lane.b32.xlu0 %v8601_v52, %s8227_s12 }
 0x435   : > { %1188 = vrot.lane.b32.xlu0 %v8603_v53, %s8227_s12 }
 0x46b   : > { %v963_v36 = vpop.xlane.xlu0 %962 }
 0x46d   : > { %v966_v48 = vpop.xlane.xlu1 %965 }
 0x46e   : > { %7702 = vrcp.f32 %v966_v48 }
 0x46f   : > { %v957_v49 = vpop.xlane.xlu0 %956 }
 0x470   : > { %7704 = vrcp.f32 %v957_v49 }
 0x471   : > { %7706 = vrcp.f32 %v963_v36  ;;  %v960_v51 = vpop.xlane.xlu1 %959 }
 0x472   : > { %7708 = vrcp.f32 %v960_v51 }
 0x473   : > { %v1122_v54 = vpop.permute.xlu0 %1121 }
 0x474   : > { %7297 = vmatprep.subr.msk.bf16.mxu0 %vm784_vm0, %v1122_v54  ;;  %v1132_v56 = vsel %vm784_vm0, %v1122_v54, 0 }
 0x475   : > { %6902 = vmatpush3.bf16.xpose.msra.mxu0 %v1132_v56 }
 0x476   : > { %7298 = vmatprep.subr.msk.bf16.mxu0 %vm784_vm0, %v1124_v21 }
 0x478   : > { %v7703_v20 = vpop.eup %7702 }
 0x479   : > { %v990_v0 = vmul.f32 %v7703_v20, %v7691_v41 }
 0x47a   : > { %v7705_v58 = vpop.eup %7704 }
 0x47b   : > { %v7707_v61 = vpop.eup %7706  ;;  %v987_v35 = vmul.f32 %v7705_v58, %v8652_v60 }
 0x47c   : > { %v7709_v62 = vpop.eup %7708  ;;  %v989_v15 = vmul.f32 %v7707_v61, %v8650_v59 }
 0x47d   : > { %6904 = vmatpush3.bf16.xpose.msra.mxu0 %v1135_v1  ;;  %v978_v45 = vpop.xlane.xlu1 %977  ;;  %v988_v14 = vmul.f32 %v7709_v62, %v7693_v13 }
 0x47e   : > { %v996_v17 = vpack.c.bf16 %v990_v0, %v989_v15 }
 0x47f   : > { %v995_v16 = vpack.c.bf16 %v988_v14, %v987_v35 }
 0x481   : > { %6889 = vmatprep.mubr.msk.bf16.mxu1 %vm784_vm0, %v995_v16  ;;  %v972_v23 = vpop.xlane.xlu1 %971 }
 0x482   : > { %6890 = vmatmul.mubr.msk.bf16.vlgmr.msra.gmra.mrb[16].mxu1 %vm784_vm0, %v996_v17 }
 0x483   : > { %6894 = vmatpush3.bf16.msra.mxu1 %v8596_v40 }
 0x484   : > { %6895 = vmatprep.subr.bf16.mxu1 %v8593_v31 }
 0x485   : > { %v1118_v41 = vpop.permute.xlu1 %1117 }
 0x486   : > { %6906 = vmatmul.mubr.msk.bf16.vlgmr.msra.gmra.mrb[16].mxu0 %vm784_vm0, %v1118_v41 }
 0x487   : > { %6896 = vmatpush3.bf16.msra.mxu1 %v8593_v31 }
 0x489   : > { %v1197_v49 = vpop.permute.xlu1 %1196 }
 0x4a4   : > { %v975_v60 = vpop.xlane.xlu0 %974 }
 0x4a5   : > { %7710 = vrcp.f32 %v975_v60 }
 0x4a6   : > { %7712 = vrcp.f32 %v972_v23 }
 0x4a7   : > { %7714 = vrcp.f32 %v978_v45 }
 0x4a8   : > { %v969_v59 = vpop.xlane.xlu0 %968 }
 0x4a9   : > { %7716 = vrcp.f32 %v969_v59 }
 0x4ac   : > { %v1195_v13 = vpop.permute.xlu0 %1194 }
 0x4ad   : > { %7299 = vmatprep.subr.msk.bf16.mxu1 %vm784_vm0, %v1195_v13  ;;  %v1205_v48 = vsel %vm784_vm0, %v1195_v13, 0 }
 0x4af   : > { %v7711_v21 = vpop.eup %7710 }
 0x4b0   : > { %v7713_v25 = vpop.eup %7712  ;;  %v993_v37 = vmul.f32 %v7711_v21, %v7699_v43  ;;  %v1189_v36 = vpop.permute.xlu0 %1188  ;;  %v1208_v43 = vsel %vm784_vm0, %v1197_v49, 0 }
 0x4b1   : > { %v7715_v26 = vpop.eup %7714  ;;  %v992_v39 = vmul.f32 %v7713_v25, %v8665_v24  ;;  %v1191_v24 = vpop.permute.xlu1 %1190 }
 0x4b2   : > { %v994_v42 = vmul.f32 %v7715_v26, %v8661_v18 }
 0x4b3   : > { %v7717_v30 = vpop.eup %7716 }
 0x4b4   : > { %v991_v34 = vmul.f32 %v7717_v30, %v7701_v47  ;;  %v998_v19 = vpack.c.bf16 %v994_v42, %v993_v37 }
 0x4b6   : > { %v997_v46 = vpack.c.bf16 %v992_v39, %v991_v34 }
 0x4b8   : > { %6897 = vmatprep.mubr.msk.bf16.mxu1 %vm784_vm0, %v997_v46 }
 0x4b9   : > { %6898 = vmatmul.mubr.msk.bf16.vlgmr.msra.gmra.mrb[20].mxu1 %vm784_vm0, %v998_v19 }
 0x4ba   : > { %6910 = vmatpush3.bf16.xpose.msra.mxu1 %v1205_v48  ;;  %6913 = vmatprep.mubr.msk.bf16.mxu1 %vm784_vm0, %v1189_v36 }
 0x4bb   : > { %7300 = vmatprep.subr.msk.bf16.mxu1 %vm784_vm0, %v1197_v49 }
 0x4c2   : > { %6912 = vmatpush3.bf16.xpose.msra.mxu1 %v1208_v43 }
 0x4c9   : > { %6914 = vmatmul.mubr.msk.bf16.vlgmr.msra.gmra.mrb[24].mxu1 %vm784_vm0, %v1191_v24 }
 0x555   : > { %v8707_v18 = vpop.f32.mrb[16].mxu1 }
 0x556   : > { %v8709_v47 = vpop.f32.mrb[17].mxu1 }
 0x557   : > { %v8711_v51 = vpop.f32.mrb[18].mxu1 }
 0x558   : > { %v8713_v54 = vpop.f32.mrb[19].mxu1 }
 0x559   : > { %v6907_v56 = vpop.f32.mrb[16].mxu0 }
 0x55a   : > { %v1171_v20 = vpop.f32.mrb[17].mxu0  ;;  %v1265_v1 = vsel %vm784_vm0, %v6907_v56, -inf }
 0x55b   : > { %v6908_v58 = vpop.f32.mrb[18].mxu0  ;;  %v1259_v61 = vsel %vm784_vm0, %v1171_v20, -inf }
 0x55c   : > { %1260 = vmax.xlane.f32.xlu0 %v1259_v61  ;;  %v1174_v62 = vpop.f32.mrb[19].mxu0  ;;  %v1268_v45 = vsel %vm784_vm0, %v6908_v58, -inf }
 0x55d   : > { %v1262_v0 = vsel %vm784_vm0, %v1174_v62, -inf }
 0x55e   : > { %1263 = vmax.xlane.f32.xlu1 %v1262_v0 }
 0x560   : > { %1266 = vmax.xlane.f32.xlu0 %v1265_v1 }
 0x564   : > { %1269 = vmax.xlane.f32.xlu0 %v1268_v45 }
 0x58c   : > { %v8719_v35 = vpop.f32.mrb[20].mxu1 }
 0x58d   : > { %v8721_v14 = vpop.f32.mrb[21].mxu1 }
 0x58e   : > { %v8723_v15 = vpop.f32.mrb[22].mxu1 }
 0x58f   : > { %v8725_v16 = vpop.f32.mrb[23].mxu1 }
 0x59c   : > { %v6915_v17 = vpop.f32.mrb[24].mxu1 }
 0x59d   : > { %v1244_v23 = vpop.f32.mrb[25].mxu1  ;;  %v1277_v21 = vsel %vm784_vm0, %v6915_v17, -inf }
 0x59e   : > { %v6916_v41 = vpop.f32.mrb[26].mxu1  ;;  %v1271_v60 = vsel %vm784_vm0, %v1244_v23, -inf }
 0x59f   : > { %1272 = vmax.xlane.f32.xlu0 %v1271_v60  ;;  %v1247_v59 = vpop.f32.mrb[27].mxu1  ;;  %v1280_v25 = vsel %vm784_vm0, %v6916_v41, -inf }
 0x5a0   : > { %v1274_v13 = vsel %vm784_vm0, %v1247_v59, -inf }
 0x5a1   : > { %1275 = vmax.xlane.f32.xlu1 %v1274_v13 }
 0x5a3   : > { %1278 = vmax.xlane.f32.xlu0 %v1277_v21 }
 0x5a5   : > { %1281 = vmax.xlane.f32.xlu1 %v1280_v25 }
 0x5e9   : > { %v1261_v26 = vpop.xlane.xlu0 %1260 }
 0x5ea   : > { %v1283_v30 = vsub.f32 %v1171_v20, %v1261_v26 }
 0x5eb   : > { %v1264_v37 = vpop.xlane.xlu1 %1263 }
 0x5ec   : > { %v1291_v34 = vmul.f32 1.442695, %v1283_v30  ;;  %v1284_v39 = vsub.f32 %v1174_v62, %v1264_v37 }
 0x5ed   : > { %v1267_v42 = vpop.xlane.xlu0 %1266 }
 0x5ee   : > { %7718 = vpow2.f32 %v1291_v34  ;;  %v1293_v46 = vmul.f32 1.442695, %v1284_v39  ;;  %v1285_v19 = vsub.f32 %v6907_v56, %v1267_v42 }
 0x5f0   : > { %7720 = vpow2.f32 %v1293_v46  ;;  %v1295_v36 = vmul.f32 1.442695, %v1285_v19 }
 0x5f1   : > { %v1270_v48 = vpop.xlane.xlu0 %1269 }
 0x5f2   : > { %7722 = vpow2.f32 %v1295_v36  ;;  %v1286_v49 = vsub.f32 %v6908_v58, %v1270_v48 }
 0x5f4   : > { %v1297_v43 = vmul.f32 1.442695, %v1286_v49 }
 0x5f6   : > { %7724 = vpow2.f32 %v1297_v43 }
 0x5f8   : > { %v8731_v24 = vpop.eup %7718 }
 0x5f9   : > { %v1307_v61 = vsel %vm784_vm0, %v8731_v24, 0.0 }
 0x5fa   : > { %v8735_v20 = vpop.eup %7720  ;;  %1308 = vadd.xlane.f32.xlu0 %v1307_v61 }
 0x5fb   : > { %v1310_v62 = vsel %vm784_vm0, %v8735_v20, 0.0 }
 0x5fc   : > { %v8739_v0 = vpop.eup %7722  ;;  %1311 = vadd.xlane.f32.xlu1 %v1310_v62 }
 0x5fd   : > { %v1313_v56 = vsel %vm784_vm0, %v8739_v0, 0.0 }
 0x5fe   : > { %1314 = vadd.xlane.f32.xlu0 %v1313_v56 }
 0x600   : > { %v8743_v58 = vpop.eup %7724 }
 0x601   : > { %v1316_v1 = vsel %vm784_vm0, %v8743_v58, 0.0 }
 0x602   : > { %1317 = vadd.xlane.f32.xlu1 %v1316_v1 }
 0x613   : > { %1355 = vrot.lane.b32.xlu1 %v8575_v63, %s8227_s12 }
 0x614   : > { %1353 = vrot.lane.b32.xlu0 %v8580_v4, %s8227_s12 }
 0x617   : > { %1416 = vrot.lane.b32.xlu1 %v8596_v40, %s8227_s12 }
 0x618   : > { %1481 = vrot.lane.b32.xlu0 %v8567_v55, %s8228_s13 }
 0x61b   : > { %1483 = vrot.lane.b32.xlu1 %v8585_v29, %s8228_s13 }
 0x61c   : > { %1418 = vrot.lane.b32.xlu0 %v8593_v31, %s8227_s12 }
 0x620   : > { %1477 = vrot.lane.b32.xlu0 %v8569_v57, %s8228_s13 }
 0x62c   : > { %v1273_v45 = vpop.xlane.xlu0 %1272 }
 0x62d   : > { %v1287_v60 = vsub.f32 %v1244_v23, %v1273_v45 }
 0x62e   : > { %v1276_v13 = vpop.xlane.xlu1 %1275 }
 0x62f   : > { %v1299_v21 = vmul.f32 1.442695, %v1287_v60  ;;  %v1288_v37 = vsub.f32 %v1247_v59, %v1276_v13 }
 0x630   : > { %v1279_v25 = vpop.xlane.xlu0 %1278 }
 0x631   : > { %7726 = vpow2.f32 %v1299_v21  ;;  %v1289_v26 = vsub.f32 %v6915_v17, %v1279_v25  ;;  %v1301_v46 = vmul.f32 1.442695, %v1288_v37 }
 0x632   : > { %v1282_v30 = vpop.xlane.xlu1 %1281 }
 0x633   : > { %v1303_v34 = vmul.f32 1.442695, %v1289_v26  ;;  %v1290_v39 = vsub.f32 %v6916_v41, %v1282_v30 }
 0x635   : > { %7728 = vpow2.f32 %v1303_v34  ;;  %v1305_v42 = vmul.f32 1.442695, %v1290_v39 }
 0x637   : > { %7730 = vpow2.f32 %v1305_v42 }
 0x638   : > { %7732 = vpow2.f32 %v1301_v46 }
 0x63b   : > { %v8761_v19 = vpop.eup %7726 }
 0x63c   : > { %v1319_v36 = vsel %vm784_vm0, %v8761_v19, 0.0 }
 0x63f   : > { %v8765_v23 = vpop.eup %7728  ;;  %1320 = vadd.xlane.f32.xlu0 %v1319_v36 }
 0x640   : > { %v1325_v17 = vsel %vm784_vm0, %v8765_v23, 0.0 }
 0x641   : > { %v8769_v48 = vpop.eup %7730  ;;  %1326 = vadd.xlane.f32.xlu1 %v1325_v17 }
 0x642   : > { %v1328_v41 = vsel %vm784_vm0, %v8769_v48, 0.0  ;;  %v8773_v59 = vpop.eup %7732 }
 0x643   : > { %v1322_v49 = vsel %vm784_vm0, %v8773_v59, 0.0 }
 0x645   : > { %1329 = vadd.xlane.f32.xlu1 %v1328_v41 }
 0x649   : > { %1323 = vadd.xlane.f32.xlu1 %v1322_v49 }
 0x655   : > { %1550 = vrot.lane.b32.xlu0 %v8601_v52, %s8228_s13 }
 0x659   : > { %1546 = vrot.lane.b32.xlu0 %v8603_v53, %s8228_s13 }
 0x65a   : > { %1479 = vrot.lane.b32.xlu1 %v8587_v22, %s8228_s13 }
 0x65e   : > { %1552 = vrot.lane.b32.xlu1 %v8617_v12, %s8228_s13 }
 0x662   : > { %1548 = vrot.lane.b32.xlu1 %v8619_v28, %s8228_s13 }
 0x687   : > { %v1309_v43 = vpop.xlane.xlu0 %1308 }
 0x688   : > { %7734 = vrcp.f32 %v1309_v43 }
 0x689   : > { %v1312_v61 = vpop.xlane.xlu1 %1311 }
 0x68a   : > { %7736 = vrcp.f32 %v1312_v61 }
 0x68b   : > { %v1315_v62 = vpop.xlane.xlu0 %1314 }
 0x68c   : > { %7738 = vrcp.f32 %v1315_v62 }
 0x68f   : > { %v1354_v56 = vpop.permute.xlu0 %1353  ;;  %v1318_v1 = vpop.xlane.xlu1 %1317 }
 0x690   : > { %7740 = vrcp.f32 %v1318_v1  ;;  %6917 = vmatprep.subr.bf16.mxu0 %v1354_v56 }
 0x691   : > { %6918 = vmatpush3.bf16.msra.mxu0 %v1354_v56 }
 0x692   : > { %v7735_v45 = vpop.eup %7734 }
 0x693   : > { %v1482_v60 = vpop.permute.xlu0 %1481  ;;  %v1356_v13 = vpop.permute.xlu1 %1355  ;;  %v1339_v25 = vmul.f32 %v7735_v45, %v8731_v24 }
 0x694   : > { %v7737_v21 = vpop.eup %7736  ;;  %6919 = vmatprep.subr.bf16.mxu0 %v1356_v13 }
 0x695   : > { %6920 = vmatpush3.bf16.msra.mxu0 %v1356_v13  ;;  %v1340_v26 = vmul.f32 %v7737_v21, %v8735_v20  ;;  %v1492_v20 = vsel %vm784_vm0, %v1482_v60, 0 }
 0x696   : > { %7301 = vmatprep.subr.msk.bf16.mxu0 %vm784_vm0, %v1482_v60  ;;  %v7739_v34 = vpop.eup %7738 }
 0x697   : > { %v1417_v30 = vpop.permute.xlu1 %1416  ;;  %v1347_v37 = vpack.c.bf16 %v1340_v26, %v1339_v25  ;;  %v1419_v39 = vpop.permute.xlu0 %1418  ;;  %v1341_v46 = vmul.f32 %v7739_v34, %v8739_v0 }
 0x698   : > { %6925 = vmatprep.subr.bf16.mxu1 %v1417_v30 }
 0x699   : > { %6921 = vmatprep.mubr.msk.bf16.mxu0 %vm784_vm0, %v1347_v37  ;;  %6926 = vmatpush3.bf16.msra.mxu1 %v1417_v30 }
 0x69a   : > { %v7741_v42 = vpop.eup %7740  ;;  %6927 = vmatprep.subr.bf16.mxu1 %v1419_v39 }
 0x69b   : > { %v1342_v36 = vmul.f32 %v7741_v42, %v8743_v58  ;;  %v1478_v17 = vpop.permute.xlu0 %1477  ;;  %v1484_v41 = vpop.permute.xlu1 %1483 }
 0x69c   : > { %v1495_v49 = vsel %vm784_vm0, %v1484_v41, 0 }
 0x69d   : > { %6928 = vmatpush3.bf16.msra.mxu1 %v1419_v39  ;;  %v1348_v24 = vpack.c.bf16 %v1342_v36, %v1341_v46 }
 0x69f   : > { %6922 = vmatmul.mubr.msk.bf16.vlgmr.msra.gmra.mrb[20].mxu0 %vm784_vm0, %v1348_v24 }
 0x6a0   : > { %6934 = vmatpush3.bf16.xpose.msra.mxu0 %v1492_v20  ;;  %6937 = vmatprep.mubr.msk.bf16.mxu0 %vm784_vm0, %v1478_v17 }
 0x6a1   : > { %7302 = vmatprep.subr.msk.bf16.mxu0 %vm784_vm0, %v1484_v41 }
 0x6a8   : > { %6936 = vmatpush3.bf16.xpose.msra.mxu0 %v1495_v49 }
 0x6cc   : > { %v1321_v43 = vpop.xlane.xlu0 %1320 }
 0x6ce   : > { %v1327_v0 = vpop.xlane.xlu1 %1326 }
 0x6d0   : > { %v1551_v61 = vpop.permute.xlu0 %1550 }
 0x6d1   : > { %7303 = vmatprep.subr.msk.bf16.mxu1 %vm784_vm0, %v1551_v61  ;;  %v1561_v42 = vsel %vm784_vm0, %v1551_v61, 0 }
 0x6d2   : > { %v1330_v58 = vpop.xlane.xlu1 %1329 }
 0x6d3   : > { %7742 = vrcp.f32 %v1330_v58 }
 0x6d4   : > { %7744 = vrcp.f32 %v1321_v43  ;;  %v1547_v39 = vpop.permute.xlu0 %1546 }
 0x6d5   : > { %7746 = vrcp.f32 %v1327_v0 }
 0x6d6   : > { %v1324_v62 = vpop.xlane.xlu1 %1323 }
 0x6d7   : > { %7748 = vrcp.f32 %v1324_v62 }
 0x6da   : > { %v1480_v56 = vpop.permute.xlu1 %1479 }
 0x6db   : > { %6938 = vmatmul.mubr.msk.bf16.vlgmr.msra.gmra.mrb[24].mxu0 %vm784_vm0, %v1480_v56 }
 0x6dd   : > { %v7743_v1 = vpop.eup %7742 }
 0x6de   : > { %v7745_v45 = vpop.eup %7744  ;;  %v1346_v21 = vmul.f32 %v7743_v1, %v8769_v48  ;;  %v1553_v46 = vpop.permute.xlu1 %1552 }
 0x6df   : > { %v7747_v60 = vpop.eup %7746  ;;  %v1343_v25 = vmul.f32 %v7745_v45, %v8761_v19  ;;  %v1564_v19 = vsel %vm784_vm0, %v1553_v46, 0 }
 0x6e0   : > { %v1345_v30 = vmul.f32 %v7747_v60, %v8765_v23 }
 0x6e1   : > { %v7749_v13 = vpop.eup %7748 }
 0x6e2   : > { %v1344_v26 = vmul.f32 %v7749_v13, %v8773_v59  ;;  %v1350_v34 = vpack.c.bf16 %v1346_v21, %v1345_v30  ;;  %v1549_v48 = vpop.permute.xlu1 %1548 }
 0x6e4   : > { %v1349_v37 = vpack.c.bf16 %v1344_v26, %v1343_v25 }
 0x6e6   : > { %6929 = vmatprep.mubr.msk.bf16.mxu1 %vm784_vm0, %v1349_v37 }
 0x6e7   : > { %6930 = vmatmul.mubr.msk.bf16.vlgmr.msra.gmra.mrb[28].mxu1 %vm784_vm0, %v1350_v34 }
 0x6e8   : > { %6942 = vmatpush3.bf16.xpose.msra.mxu1 %v1561_v42  ;;  %6945 = vmatprep.mubr.msk.bf16.mxu1 %vm784_vm0, %v1547_v39 }
 0x6e9   : > { %7304 = vmatprep.subr.msk.bf16.mxu1 %vm784_vm0, %v1553_v46 }
 0x6f0   : > { %6944 = vmatpush3.bf16.xpose.msra.mxu1 %v1564_v19 }
 0x6f7   : > { %6946 = vmatmul.mubr.msk.bf16.vlgmr.msra.gmra.mrb[32].mxu1 %vm784_vm0, %v1549_v48 }
 0x772   : > { %v8811_v23 = vpop.f32.mrb[20].mxu0 }
 0x773   : > { %v8813_v59 = vpop.f32.mrb[21].mxu0 }
 0x774   : > { %v8815_v36 = vpop.f32.mrb[22].mxu0 }
 0x775   : > { %v8819_v17 = vpop.f32.mrb[23].mxu0 }
 0x776   : > { %v7404_v20 = vpack.i.bf16 %v8819_v17, %v8813_v59 }
 0x7ae   : > { %v6939_v41 = vpop.f32.mrb[24].mxu0 }
 0x7af   : > { %v1531_v49 = vpop.f32.mrb[25].mxu0  ;;  %v1621_v62 = vsel %vm784_vm0, %v6939_v41, -inf }
 0x7b0   : > { %v6940_v43 = vpop.f32.mrb[26].mxu0  ;;  %v1615_v0 = vsel %vm784_vm0, %v1531_v49, -inf }
 0x7b1   : > { %1616 = vmax.xlane.f32.xlu0 %v1615_v0  ;;  %v1534_v61 = vpop.f32.mrb[27].mxu0  ;;  %v1624_v56 = vsel %vm784_vm0, %v6940_v43, -inf }
 0x7b2   : > { %v1618_v58 = vsel %vm784_vm0, %v1534_v61, -inf }
 0x7b3   : > { %1619 = vmax.xlane.f32.xlu1 %v1618_v58 }
 0x7b5   : > { %1622 = vmax.xlane.f32.xlu0 %v1621_v62 }
 0x7b9   : > { %1625 = vmax.xlane.f32.xlu0 %v1624_v56 }
 0x7ba   : > { %v8827_v1 = vpop.f32.mrb[28].mxu1 }
 0x7bb   : > { %v8829_v45 = vpop.f32.mrb[29].mxu1 }
 0x7bc   : > { %v8831_v60 = vpop.f32.mrb[30].mxu1 }
 0x7bd   : > { %v8835_v21 = vpop.f32.mrb[31].mxu1 }
 0x7ca   : > { %v6947_v26 = vpop.f32.mrb[32].mxu1 }
 0x7cb   : > { %v1600_v30 = vpop.f32.mrb[33].mxu1  ;;  %v1633_v46 = vsel %vm784_vm0, %v6947_v26, -inf }
 0x7cc   : > { %v6948_v37 = vpop.f32.mrb[34].mxu1  ;;  %v1627_v34 = vsel %vm784_vm0, %v1600_v30, -inf }
 0x7cd   : > { %1628 = vmax.xlane.f32.xlu0 %v1627_v34  ;;  %v1603_v39 = vpop.f32.mrb[35].mxu1  ;;  %v1636_v19 = vsel %vm784_vm0, %v6948_v37, -inf }
 0x7ce   : > { %v1630_v42 = vsel %vm784_vm0, %v1603_v39, -inf }
 0x7cf   : > { %1631 = vmax.xlane.f32.xlu1 %v1630_v42 }
 0x7d1   : > { %1634 = vmax.xlane.f32.xlu0 %v1633_v46 }
 0x7d3   : > { %1637 = vmax.xlane.f32.xlu1 %v1636_v19 }
 0x83e   : > { %v1617_v48 = vpop.xlane.xlu0 %1616 }
 0x83f   : > { %v1639_v0 = vsub.f32 %v1531_v49, %v1617_v48 }
 0x840   : > { %v1620_v58 = vpop.xlane.xlu1 %1619 }
 0x841   : > { %v1647_v62 = vmul.f32 1.442695, %v1639_v0  ;;  %v1640_v56 = vsub.f32 %v1534_v61, %v1620_v58 }
 0x842   : > { %v1623_v33 = vpop.xlane.xlu0 %1622 }
 0x843   : > { %7750 = vpow2.f32 %v1647_v62  ;;  %v1649_v32 = vmul.f32 1.442695, %v1640_v56  ;;  %v1641_v44 = vsub.f32 %v6939_v41, %v1623_v33 }
 0x845   : > { %7752 = vpow2.f32 %v1649_v32  ;;  %v1651_v34 = vmul.f32 1.442695, %v1641_v44 }
 0x846   : > { %v1626_v7 = vpop.xlane.xlu0 %1625 }
 0x847   : > { %7754 = vpow2.f32 %v1651_v34  ;;  %v1642_v42 = vsub.f32 %v6940_v43, %v1626_v7 }
 0x849   : > { %v1653_v25 = vmul.f32 1.442695, %v1642_v42 }
 0x84b   : > { %7756 = vpow2.f32 %v1653_v25 }
 0x84d   : > { %v8843_v46 = vpop.eup %7750 }
 0x84e   : > { %v1663_v19 = vsel %vm784_vm0, %v8843_v46, 0.0 }
 0x84f   : > { %v8847_v49 = vpop.eup %7752  ;;  %1664 = vadd.xlane.f32.xlu0 %v1663_v19 }
 0x850   : > { %v1666_v61 = vsel %vm784_vm0, %v8847_v49, 0.0 }
 0x851   : > { %v8851_v48 = vpop.eup %7754  ;;  %1667 = vadd.xlane.f32.xlu1 %v1666_v61 }
 0x852   : > { %v1669_v44 = vsel %vm784_vm0, %v8851_v48, 0.0 }
 0x853   : > { %1670 = vadd.xlane.f32.xlu0 %v1669_v44 }
 0x855   : > { %v8855_v7 = vpop.eup %7756 }
 0x856   : > { %v1672_v32 = vsel %vm784_vm0, %v8855_v7, 0.0 }
 0x857   : > { %1673 = vadd.xlane.f32.xlu1 %v1672_v32 }
 0x85a   : > { %v1629_v33 = vpop.xlane.xlu0 %1628 }
 0x85b   : > { %v1643_v25 = vsub.f32 %v1600_v30, %v1629_v33 }
 0x85c   : > { %v1632_v41 = vpop.xlane.xlu1 %1631 }
 0x85d   : > { %v1655_v62 = vmul.f32 1.442695, %v1643_v25 }
 0x85e   : > { %v1635_v43 = vpop.xlane.xlu0 %1634 }
 0x85f   : > { %v1645_v0 = vsub.f32 %v6947_v26, %v1635_v43  ;;  %7758 = vpow2.f32 %v1655_v62 }
 0x860   : > { %v1638_v58 = vpop.xlane.xlu1 %1637 }
 0x861   : > { %v1659_v56 = vmul.f32 1.442695, %v1645_v0  ;;  %v1646_v34 = vsub.f32 %v6948_v37, %v1638_v58 }
 0x863   : > { %7760 = vpow2.f32 %v1659_v56  ;;  %v1661_v42 = vmul.f32 1.442695, %v1646_v34 }
 0x865   : > { %7762 = vpow2.f32 %v1661_v42 }
 0x868   : > { %1709 = vrot.lane.b32.xlu1 %v8575_v63, %s8228_s13 }
 0x869   : > { %1707 = vrot.lane.b32.xlu0 %v8580_v4, %s8228_s13  ;;  %v8873_v19 = vpop.eup %7758 }
 0x86c   : > { %1768 = vrot.lane.b32.xlu1 %v8596_v40, %s8228_s13 }
 0x86d   : > { %1833 = vrot.lane.b32.xlu0 %v8567_v55, %s8229_s8  ;;  %v1644_v55 = vsub.f32 %v1603_v39, %v1632_v41  ;;  %v8875_v61 = vpop.eup %7760 }
 0x86e   : > { %v1681_v26 = vsel %vm784_vm0, %v8875_v61, 0.0 }
 0x86f   : > { %v8881_v30 = vpop.eup %7762 }
 0x870   : > { %1835 = vrot.lane.b32.xlu1 %v8585_v29, %s8229_s8  ;;  %v1657_v29 = vmul.f32 1.442695, %v1644_v55  ;;  %v1684_v37 = vsel %vm784_vm0, %v8881_v30, 0.0 }
 0x871   : > { %1770 = vrot.lane.b32.xlu0 %v8593_v31, %s8228_s13 }
 0x872   : > { %7764 = vpow2.f32 %v1657_v29 }
 0x875   : > { %1829 = vrot.lane.b32.xlu0 %v8569_v57, %s8229_s8  ;;  %v1675_v57 = vsel %vm784_vm0, %v8873_v19, 0.0 }
 0x87c   : > { %v8885_v39 = vpop.eup %7764 }
 0x87d   : > { %v1678_v44 = vsel %vm784_vm0, %v8885_v39, 0.0 }
 0x894   : > { %1676 = vadd.xlane.f32.xlu0 %v1675_v57  ;;  %1682 = vadd.xlane.f32.xlu1 %v1681_v26 }
 0x898   : > { %1685 = vadd.xlane.f32.xlu1 %v1684_v37 }
 0x89c   : > { %1679 = vadd.xlane.f32.xlu1 %v1678_v44 }
 0x8aa   : > { %1902 = vrot.lane.b32.xlu0 %v8601_v52, %s8229_s8 }
 0x8ad   : > { %1831 = vrot.lane.b32.xlu1 %v8587_v22, %s8229_s8 }
 0x8ae   : > { %1898 = vrot.lane.b32.xlu0 %v8603_v53, %s8229_s8 }
 0x8b1   : > { %1904 = vrot.lane.b32.xlu1 %v8617_v12, %s8229_s8 }
 0x8b5   : > { %1900 = vrot.lane.b32.xlu1 %v8619_v28, %s8229_s8 }
 0x8dc   : > { %v1665_v32 = vpop.xlane.xlu0 %1664 }
 0x8dd   : > { %7766 = vrcp.f32 %v1665_v32 }
 0x8de   : > { %v1668_v33 = vpop.xlane.xlu1 %1667 }
 0x8df   : > { %7768 = vrcp.f32 %v1668_v33 }
 0x8e0   : > { %v1671_v41 = vpop.xlane.xlu0 %1670 }
 0x8e1   : > { %7770 = vrcp.f32 %v1671_v41 }
 0x8e4   : > { %v1708_v43 = vpop.permute.xlu0 %1707  ;;  %v1674_v52 = vpop.xlane.xlu1 %1673 }
 0x8e5   : > { %7772 = vrcp.f32 %v1674_v52  ;;  %6949 = vmatprep.subr.bf16.mxu0 %v1708_v43 }
 0x8e6   : > { %6950 = vmatpush3.bf16.msra.mxu0 %v1708_v43 }
 0x8e7   : > { %v7767_v22 = vpop.eup %7766 }
 0x8e8   : > { %v1834_v25 = vpop.permute.xlu0 %1833  ;;  %v1710_v53 = vpop.permute.xlu1 %1709  ;;  %v1695_v12 = vmul.f32 %v7767_v22, %v8843_v46 }
 0x8e9   : > { %v7769_v0 = vpop.eup %7768  ;;  %6951 = vmatprep.subr.bf16.mxu0 %v1710_v53 }
 0x8ea   : > { %6952 = vmatpush3.bf16.msra.mxu0 %v1710_v53  ;;  %v1696_v28 = vmul.f32 %v7769_v0, %v8847_v49  ;;  %v1844_v49 = vsel %vm784_vm0, %v1834_v25, 0 }
 0x8eb   : > { %7305 = vmatprep.subr.msk.bf16.mxu0 %vm784_vm0, %v1834_v25  ;;  %v7771_v56 = vpop.eup %7770 }
 0x8ec   : > { %v1769_v58 = vpop.permute.xlu1 %1768  ;;  %v1703_v62 = vpack.c.bf16 %v1696_v28, %v1695_v12  ;;  %v1771_v34 = vpop.permute.xlu0 %1770  ;;  %v1697_v42 = vmul.f32 %v7771_v56, %v8851_v48 }
 0x8ed   : > { %6957 = vmatprep.subr.bf16.mxu1 %v1769_v58 }
 0x8ee   : > { %6953 = vmatprep.mubr.msk.bf16.mxu0 %vm784_vm0, %v1703_v62  ;;  %6958 = vmatpush3.bf16.msra.mxu1 %v1769_v58 }
 0x8ef   : > { %v7773_v55 = vpop.eup %7772  ;;  %6959 = vmatprep.subr.bf16.mxu1 %v1771_v34 }
 0x8f0   : > { %v1698_v29 = vmul.f32 %v7773_v55, %v8855_v7  ;;  %v1830_v57 = vpop.permute.xlu0 %1829  ;;  %v1836_v26 = vpop.permute.xlu1 %1835 }
 0x8f1   : > { %v1847_v37 = vsel %vm784_vm0, %v1836_v26, 0 }
 0x8f2   : > { %6960 = vmatpush3.bf16.msra.mxu1 %v1771_v34  ;;  %v1704_v46 = vpack.c.bf16 %v1698_v29, %v1697_v42 }
 0x8f4   : > { %6954 = vmatmul.mubr.msk.bf16.vlgmr.msra.gmra.mrb[28].mxu0 %vm784_vm0, %v1704_v46 }
 0x8f5   : > { %6966 = vmatpush3.bf16.xpose.msra.mxu0 %v1844_v49  ;;  %6969 = vmatprep.mubr.msk.bf16.mxu0 %vm784_vm0, %v1830_v57 }
 0x8f6   : > { %7306 = vmatprep.subr.msk.bf16.mxu0 %vm784_vm0, %v1836_v26 }
 0x8fd   : > { %6968 = vmatpush3.bf16.xpose.msra.mxu0 %v1847_v37 }
 0x921   : > { %v1677_v44 = vpop.xlane.xlu0 %1676  ;;  %v1683_v48 = vpop.xlane.xlu1 %1682 }
 0x925   : > { %v1903_v32 = vpop.permute.xlu0 %1902  ;;  %v1686_v7 = vpop.xlane.xlu1 %1685 }
 0x926   : > { %7307 = vmatprep.subr.msk.bf16.mxu1 %vm784_vm0, %v1903_v32  ;;  %7774 = vrcp.f32 %v1686_v7  ;;  %v1913_v34 = vsel %vm784_vm0, %v1903_v32, 0 }
 0x927   : > { %7776 = vrcp.f32 %v1677_v44 }
 0x928   : > { %7778 = vrcp.f32 %v1683_v48 }
 0x929   : > { %v1680_v33 = vpop.xlane.xlu1 %1679  ;;  %v1899_v56 = vpop.permute.xlu0 %1898 }
 0x92a   : > { %7780 = vrcp.f32 %v1680_v33 }
 0x92d   : > { %v1832_v41 = vpop.permute.xlu1 %1831 }
 0x92e   : > { %6970 = vmatmul.mubr.msk.bf16.vlgmr.msra.gmra.mrb[32].mxu0 %vm784_vm0, %v1832_v41 }
 0x930   : > { %v7775_v43 = vpop.eup %7774 }
 0x931   : > { %v7777_v52 = vpop.eup %7776  ;;  %v1702_v53 = vmul.f32 %v7775_v43, %v8881_v30  ;;  %v1905_v55 = vpop.permute.xlu1 %1904 }
 0x932   : > { %v7779_v22 = vpop.eup %7778  ;;  %v1699_v0 = vmul.f32 %v7777_v52, %v8873_v19  ;;  %v1916_v19 = vsel %vm784_vm0, %v1905_v55, 0 }
 0x933   : > { %v1701_v28 = vmul.f32 %v7779_v22, %v8875_v61 }
 0x934   : > { %v7781_v25 = vpop.eup %7780 }
 0x935   : > { %v1700_v12 = vmul.f32 %v7781_v25, %v8885_v39  ;;  %v1706_v62 = vpack.c.bf16 %v1702_v53, %v1701_v28  ;;  %v1901_v30 = vpop.permute.xlu1 %1900 }
 0x937   : > { %v1705_v58 = vpack.c.bf16 %v1700_v12, %v1699_v0 }
 0x939   : > { %6961 = vmatprep.mubr.msk.bf16.mxu1 %vm784_vm0, %v1705_v58 }
 0x93a   : > { %6962 = vmatmul.mubr.msk.bf16.vlgmr.msra.gmra.mrb[36].mxu1 %vm784_vm0, %v1706_v62 }
 0x93b   : > { %6974 = vmatpush3.bf16.xpose.msra.mxu1 %v1913_v34  ;;  %6977 = vmatprep.mubr.msk.bf16.mxu1 %vm784_vm0, %v1899_v56 }
 0x93c   : > { %7308 = vmatprep.subr.msk.bf16.mxu1 %vm784_vm0, %v1905_v55 }
 0x943   : > { %6976 = vmatpush3.bf16.xpose.msra.mxu1 %v1916_v19 }
 0x94a   : > { %6978 = vmatmul.mubr.msk.bf16.vlgmr.msra.gmra.mrb[40].mxu1 %vm784_vm0, %v1901_v30 }
 0x9c7   : > { %v8923_v61 = vpop.f32.mrb[28].mxu0 }
 0x9c8   : > { %v8925_v39 = vpop.f32.mrb[29].mxu0 }
 0x9c9   : > { %v8927_v42 = vpop.f32.mrb[30].mxu0 }
 0x9ca   : > { %v8931_v46 = vpop.f32.mrb[31].mxu0  ;;  %v10668_v59 = vpack.i.bf16 %v8927_v42, %v8923_v61 }
 0x9cb   : > { %v7414_v57 = vpack.i.bf16 %v8931_v46, %v8925_v39 }
 0xa01   : > { %v6971_v49 = vpop.f32.mrb[32].mxu0 }
 0xa02   : > { %v1883_v26 = vpop.f32.mrb[33].mxu0  ;;  %v1973_v7 = vsel %vm784_vm0, %v6971_v49, -inf }
 0xa03   : > { %v6972_v37 = vpop.f32.mrb[34].mxu0  ;;  %v1967_v44 = vsel %vm784_vm0, %v1883_v26, -inf }
 0xa04   : > { %1968 = vmax.xlane.f32.xlu0 %v1967_v44  ;;  %v1886_v48 = vpop.f32.mrb[35].mxu0  ;;  %v1976_v33 = vsel %vm784_vm0, %v6972_v37, -inf }
 0xa05   : > { %v1970_v32 = vsel %vm784_vm0, %v1886_v48, -inf }
 0xa06   : > { %1971 = vmax.xlane.f32.xlu1 %v1970_v32 }
 0xa08   : > { %1974 = vmax.xlane.f32.xlu0 %v1973_v7 }
 0xa0c   : > { %1977 = vmax.xlane.f32.xlu0 %v1976_v33 }
 0xa0d   : > { %v8939_v41 = vpop.f32.mrb[36].mxu1 }
 0xa0e   : > { %v8941_v43 = vpop.f32.mrb[37].mxu1 }
 0xa0f   : > { %v8943_v52 = vpop.f32.mrb[38].mxu1 }
 0xa10   : > { %v8947_v25 = vpop.f32.mrb[39].mxu1 }
 0xa1d   : > { %v6979_v0 = vpop.f32.mrb[40].mxu1 }
 0xa1e   : > { %v1952_v12 = vpop.f32.mrb[41].mxu1  ;;  %v1985_v34 = vsel %vm784_vm0, %v6979_v0, -inf }
 0xa1f   : > { %v6980_v28 = vpop.f32.mrb[42].mxu1  ;;  %v1979_v58 = vsel %vm784_vm0, %v1952_v12, -inf }
 0xa20   : > { %1980 = vmax.xlane.f32.xlu0 %v1979_v58  ;;  %v1955_v62 = vpop.f32.mrb[43].mxu1  ;;  %v1988_v55 = vsel %vm784_vm0, %v6980_v28, -inf }
 0xa21   : > { %v1982_v56 = vsel %vm784_vm0, %v1955_v62, -inf }
 0xa22   : > { %1983 = vmax.xlane.f32.xlu1 %v1982_v56 }
 0xa24   : > { %1986 = vmax.xlane.f32.xlu0 %v1985_v34 }
 0xa26   : > { %1989 = vmax.xlane.f32.xlu1 %v1988_v55 }
 0xa91   : > { %v1969_v19 = vpop.xlane.xlu0 %1968 }
 0xa92   : > { %v1991_v30 = vsub.f32 %v1883_v26, %v1969_v19 }
 0xa93   : > { %v1972_v44 = vpop.xlane.xlu1 %1971 }
 0xa94   : > { %v1999_v32 = vmul.f32 1.442695, %v1991_v30  ;;  %v1992_v7 = vsub.f32 %v1886_v48, %v1972_v44 }
 0xa95   : > { %v1975_v33 = vpop.xlane.xlu0 %1974 }
 0xa96   : > { %7782 = vpow2.f32 %v1999_v32  ;;  %v2001_v53 = vmul.f32 1.442695, %v1992_v7  ;;  %v1993_v22 = vsub.f32 %v6971_v49, %v1975_v33 }
 0xa98   : > { %7784 = vpow2.f32 %v2001_v53  ;;  %v2003_v58 = vmul.f32 1.442695, %v1993_v22 }
 0xa99   : > { %v1978_v13 = vpop.xlane.xlu0 %1977 }
 0xa9a   : > { %7786 = vpow2.f32 %v2003_v58  ;;  %v1994_v56 = vsub.f32 %v6972_v37, %v1978_v13 }
 0xa9c   : > { %v2005_v29 = vmul.f32 1.442695, %v1994_v56 }
 0xa9e   : > { %7788 = vpow2.f32 %v2005_v29 }
 0xaa0   : > { %v7783_v34 = vpop.eup %7782 }
 0xaa1   : > { %v2015_v24 = vsel %vm784_vm0, %v7783_v34, 0.0 }
 0xaa2   : > { %v7785_v55 = vpop.eup %7784  ;;  %2016 = vadd.xlane.f32.xlu0 %v2015_v24 }
 0xaa3   : > { %v2018_v26 = vsel %vm784_vm0, %v7785_v55, 0.0 }
 0xaa4   : > { %v8957_v19 = vpop.eup %7786  ;;  %2019 = vadd.xlane.f32.xlu1 %v2018_v26 }
 0xaa5   : > { %v2021_v49 = vsel %vm784_vm0, %v8957_v19, 0.0 }
 0xaa6   : > { %2022 = vadd.xlane.f32.xlu0 %v2021_v49 }
 0xaa8   : > { %v8961_v48 = vpop.eup %7788 }
 0xaa9   : > { %v2024_v13 = vsel %vm784_vm0, %v8961_v48, 0.0 }
 0xaaa   : > { %2025 = vadd.xlane.f32.xlu1 %v2024_v13 }
 0xaad   : > { %v1981_v29 = vpop.xlane.xlu0 %1980 }
 0xaae   : > { %v1995_v37 = vsub.f32 %v1952_v12, %v1981_v29 }
 0xaaf   : > { %v1984_v12 = vpop.xlane.xlu1 %1983 }
 0xab0   : > { %v2007_v24 = vmul.f32 1.442695, %v1995_v37  ;;  %v1996_v56 = vsub.f32 %v1955_v62, %v1984_v12 }
 0xab1   : > { %v1987_v22 = vpop.xlane.xlu0 %1986 }
 0xab2   : > { %v1997_v53 = vsub.f32 %v6979_v0, %v1987_v22  ;;  %v2009_v26 = vmul.f32 1.442695, %v1996_v56 }
 0xab3   : > { %v1990_v33 = vpop.xlane.xlu1 %1989 }
 0xab4   : > { %v2011_v30 = vmul.f32 1.442695, %v1997_v53  ;;  %v1998_v58 = vsub.f32 %v6980_v28, %v1990_v33 }
 0xab6   : > { %7790 = vpow2.f32 %v2011_v30 }
 0xab7   : > { %7792 = vpow2.f32 %v2007_v24 }
 0xabb   : > { %2061 = vrot.lane.b32.xlu1 %v8575_v63, %s8229_s8  ;;  %v2013_v63 = vmul.f32 1.442695, %v1998_v58 }
 0xabd   : > { %7794 = vpow2.f32 %v2013_v63 }
 0xabe   : > { %7796 = vpow2.f32 %v2009_v26 }
 0xabf   : > { %2120 = vrot.lane.b32.xlu1 %v8596_v40, %s8229_s8 }
 0xac0   : > { %v8969_v44 = vpop.eup %7790 }
 0xac1   : > { %v2033_v32 = vsel %vm784_vm0, %v8969_v44, 0.0  ;;  %v8973_v7 = vpop.eup %7792 }
 0xac2   : > { %2034 = vadd.xlane.f32.xlu0 %v2033_v32  ;;  %v2027_v0 = vsel %vm784_vm0, %v8973_v7, 0.0 }
 0xac6   : > { %2028 = vadd.xlane.f32.xlu0 %v2027_v0 }
 0xac7   : > { %v7795_v40 = vpop.eup %7794 }
 0xac8   : > { %v2036_v49 = vsel %vm784_vm0, %v7795_v40, 0.0  ;;  %v7797_v13 = vpop.eup %7796 }
 0xac9   : > { %v2030_v28 = vsel %vm784_vm0, %v7797_v13, 0.0 }
 0xadc   : > { %2059 = vrot.lane.b32.xlu0 %v8580_v4, %s8229_s8  ;;  %v10667_v4 = vpack.i.bf16 %v8815_v36, %v8811_v23 }
 0xae0   : > { %7405 = vrot.lane.b32.xlu0 %v7404_v20, %s8229_s8 }
 0xae3   : > { %2037 = vadd.xlane.f32.xlu1 %v2036_v49 }
 0xae4   : > { %7415 = vrot.lane.b32.xlu0 %v7414_v57, %s8228_s13 }
 0xae7   : > { %2031 = vadd.xlane.f32.xlu1 %v2030_v28 }
 0xaf8   : > { %2122 = vrot.lane.b32.xlu1 %v8593_v31, %s8229_s8 }
 0xafc   : > { %7410 = vrot.lane.b32.xlu1 %v10667_v4, %s8229_s8 }
 0xb00   : > { %7420 = vrot.lane.b32.xlu1 %v10668_v59, %s8228_s13  ;;  %v7556_v59 = vld [vmem:[%s10626_s2 + $0xc] ss:$40 sps:$4 sm:$0xff]  }
 0xb2f   : > { %v2017_v17 = vpop.xlane.xlu0 %2016 }
 0xb30   : > { %7798 = vrcp.f32 %v2017_v17  ;;  %v7557_v17 = vld [vmem:[%s10626_s2 + $0x5c] ss:$40 sps:$4 sm:$0xff]  }
 0xb31   : > { %v2020_v20 = vpop.xlane.xlu1 %2019 }
 0xb32   : > { %7800 = vrcp.f32 %v2020_v20  ;;  %v7562_v20 = vld [vmem:[%s10626_s2 + $0x1ec] ss:$40 sps:$4 sm:$0xff]  }
 0xb33   : > { %v2023_v23 = vpop.xlane.xlu0 %2022 }
 0xb37   : > { %v2026_v39 = vpop.xlane.xlu1 %2025 }
 0xb38   : > { %7802 = vrcp.f32 %v2026_v39  ;;  %v7563_v39 = vld [vmem:[%s10626_s2 + $0x23c] ss:$40 sps:$4 sm:$0xff]  }
 0xb39   : > { %7804 = vrcp.f32 %v2023_v23  ;;  %v10670_v23 = vpack.i.bf16 %v8835_v21, %v8829_v45 }
 0xb3a   : > { %v7799_v46 = vpop.eup %7798 }
 0xb3b   : > { %v2062_v57 = vpop.permute.xlu1 %2061  ;;  %v2047_v29 = vmul.f32 %v7799_v46, %v7783_v34 }
 0xb3c   : > { %v7801_v62 = vpop.eup %7800 }
 0xb3d   : > { %v2048_v31 = vmul.f32 %v7801_v62, %v7785_v55 }
 0xb3f   : > { %v2121_v37 = vpop.permute.xlu1 %2120  ;;  %v2055_v22 = vpack.c.bf16 %v2048_v31, %v2047_v29 }
 0xb40   : > { %6989 = vmatprep.subr.bf16.mxu1 %v2121_v37 }
 0xb41   : > { %6985 = vmatprep.mubr.msk.bf16.mxu0 %vm784_vm0, %v2055_v22  ;;  %6990 = vmatpush3.bf16.msra.mxu1 %v2121_v37  ;;  %v10669_v22 = vpack.i.bf16 %v8831_v60, %v8827_v1 }
 0xb42   : > { %v7803_v42 = vpop.eup %7802 }
 0xb43   : > { %v7805_v24 = vpop.eup %7804  ;;  %v2050_v30 = vmul.f32 %v7803_v42, %v8961_v48 }
 0xb44   : > { %v2049_v34 = vmul.f32 %v7805_v24, %v8957_v19 }
 0xb46   : > { %v2056_v55 = vpack.c.bf16 %v2050_v30, %v2049_v34 }
 0xb4f   : > { %v2035_v36 = vpop.xlane.xlu0 %2034 }
 0xb53   : > { %v2029_v61 = vpop.xlane.xlu0 %2028 }
 0xb57   : > { %v2060_v53 = vpop.permute.xlu0 %2059 }
 0xb58   : > { %6981 = vmatprep.subr.bf16.mxu0 %v2060_v53 }
 0xb59   : > { %6982 = vmatpush3.bf16.msra.mxu0 %v2060_v53 }
 0xb5a   : > { %6983 = vmatprep.subr.bf16.mxu0 %v2062_v57 }
 0xb5b   : > { %v7406_v21 = vpop.permute.xlu0 %7405 }
 0xb5d   : > { %6984 = vmatpush3.bf16.msra.mxu0 %v2062_v57 }
 0xb5e   : > { %6997 = vmatprep.subr.bf16.mxu0 %v7556_v59 }
 0xb60   : > { %6986 = vmatmul.mubr.msk.bf16.vlgmr.msra.gmra.mrb[36].mxu0 %vm784_vm0, %v2056_v55  ;;  %v7416_v55 = vpop.permute.xlu0 %7415 }
 0xb61   : > { %6998 = vmatpush3.bf16.msra.mxu0 %v7556_v59 }
 0xb62   : > { %6999 = vmatprep.subr.bf16.mxu0 %v7557_v17 }
 0xb65   : > { %7000 = vmatpush3.bf16.msra.mxu0 %v7557_v17 }
 0xb70   : > { %v2038_v32 = vpop.xlane.xlu1 %2037 }
 0xb71   : > { %7806 = vrcp.f32 %v2038_v32 }
 0xb72   : > { %7808 = vrcp.f32 %v2029_v61  ;;  %v10672_v61 = vpack.i.bf16 %v8947_v25, %v8941_v43 }
 0xb73   : > { %7810 = vrcp.f32 %v2035_v36  ;;  %v10671_v36 = vpack.i.bf16 %v8943_v52, %v8939_v41  ;;  %v7408_v41 = vunpack.i.h.bf16 %v7406_v21  ;;  %v7407_v52 = vunpack.i.l.bf16 %v7406_v21 }
 0xb74   : > { %v2032_v12 = vpop.xlane.xlu1 %2031 }
 0xb75   : > { %7812 = vrcp.f32 %v2032_v12 }
 0xb78   : > { %v2123_v0 = vpop.permute.xlu1 %2122 }
 0xb79   : > { %6991 = vmatprep.subr.bf16.mxu1 %v2123_v0 }
 0xb7a   : > { %6992 = vmatpush3.bf16.msra.mxu1 %v2123_v0  ;;  %v7418_v0 = vunpack.i.h.bf16 %v7416_v55 }
 0xb7b   : > { %v7807_v33 = vpop.eup %7806 }
 0xb7c   : > { %v7809_v58 = vpop.eup %7808  ;;  %v2054_v63 = vmul.f32 %v7807_v33, %v7795_v40  ;;  %v7560_v40 = vld [vmem:[%s10626_s2 + $0x14c] ss:$40 sps:$4 sm:$0xff]   ;;  %v7411_v45 = vpop.permute.xlu1 %7410  ;;  %v7417_v33 = vunpack.i.l.bf16 %v7416_v55 }
 0xb7d   : > { %v7811_v56 = vpop.eup %7810  ;;  %v2051_v19 = vmul.f32 %v7809_v58, %v8973_v7  ;;  %v7559_v7 = vld [vmem:[%s10626_s2 + $0xfc] ss:$40 sps:$4 sm:$0xff]   ;;  %v7413_v32 = vunpack.i.h.bf16 %v7411_v45  ;;  %v7412_v12 = vunpack.i.l.bf16 %v7411_v45  ;;  %v2278_v58 = vsel %vm784_vm0, %v8713_v54, %v7408_v41 }
 0xb7e   : > { %v2053_v49 = vmul.f32 %v7811_v56, %v8969_v44  ;;  %v7558_v44 = vld [vmem:[%s10626_s2 + $0xac] ss:$40 sps:$4 sm:$0xff]   ;;  %v2277_v56 = vsel %vm784_vm0, %v8709_v47, %v7407_v52 }
 0xb7f   : > { %v7813_v48 = vpop.eup %7812  ;;  %7001 = vmatprep.subr.bf16.mxu0 %v7558_v44 }
 0xb80   : > { %v2052_v26 = vmul.f32 %v7813_v48, %v7797_v13  ;;  %v2058_v4 = vpack.c.bf16 %v2054_v63, %v2053_v49  ;;  %7002 = vmatpush3.bf16.msra.mxu0 %v7558_v44  ;;  %v7561_v13 = vld [vmem:[%s10626_s2 + $0x19c] ss:$40 sps:$4 sm:$0xff]   ;;  %v7421_v34 = vpop.permute.xlu1 %7420  ;;  %v2280_v63 = vsel %vm784_vm0, %v8711_v51, %v7413_v32  ;;  %v2287_v51 = vsel %vm2285_vm1, %v2278_v58, %v7418_v0 }
 0xb81   : > { %7003 = vmatprep.subr.bf16.mxu0 %v7559_v7  ;;  %v7423_v43 = vunpack.i.h.bf16 %v7421_v34  ;;  %v7422_v25 = vunpack.i.l.bf16 %v7421_v34 }
 0xb82   : > { %v2057_v28 = vpack.c.bf16 %v2052_v26, %v2051_v19  ;;  %v2279_v19 = vsel %vm784_vm0, %v8707_v18, %v7412_v12 }
 0xb83   : > { %v2289_v59 = vsel %vm2285_vm1, %v2280_v63, %v7423_v43 }
 0xb84   : > { %6993 = vmatprep.mubr.msk.bf16.mxu1 %vm784_vm0, %v2057_v28  ;;  %7004 = vmatpush3.bf16.msra.mxu0 %v7559_v7  ;;  %v2286_v7 = vsel %vm2285_vm1, %v2277_v56, %v7417_v33  ;;  %v10637_v33 = vsub.s32 5, %v8519_v27  ;;  %v9087_v56 = vld [vmem:[%s10628_s4] sm:$0xff] }
 0xb85   : > { %6994 = vmatmul.mubr.msk.bf16.vlgmr.msra.gmra.mrb[44].mxu1 %vm784_vm0, %v2058_v4  ;;  %7005 = vmatprep.subr.bf16.mxu0 %v7560_v40  ;;  %v2288_v4 = vsel %vm2285_vm1, %v2279_v19, %v7422_v25 }
 0xb88   : > { %7006 = vmatpush3.bf16.msra.mxu0 %v7560_v40 }
 0xb89   : > { %7007 = vmatprep.subr.bf16.mxu0 %v7561_v13 }
 0xb8c   : > { %7008 = vmatpush3.bf16.msra.mxu0 %v7561_v13 }
 0xb8d   : > { %7009 = vmatprep.subr.bf16.mxu0 %v7562_v20 }
 0xb90   : > { %7010 = vmatpush3.bf16.msra.mxu0 %v7562_v20 }
 0xb91   : > { %7011 = vmatprep.subr.bf16.mxu0 %v7563_v39 }
 0xb94   : > { %7012 = vmatpush3.bf16.msra.mxu0 %v7563_v39 }
 0xc33   : > { %v6987_v46 = vpop.f32.mrb[36].mxu0 }
 0xc34   : > { %v2105_v57 = vpop.f32.mrb[37].mxu0 }
 0xc35   : > { %v6988_v62 = vpop.f32.mrb[38].mxu0 }
 0xc36   : > { %v7429_v29 = vpack.i.bf16 %v6988_v62, %v6987_v46  ;;  %v2108_v31 = vpop.f32.mrb[39].mxu0 }
 0xc37   : > { %v7424_v37 = vpack.i.bf16 %v2108_v31, %v2105_v57 }
 0xc38   : > { %7430 = vrot.lane.b32.xlu1 %v7429_v29, %s8227_s12 }
 0xc39   : > { %7425 = vrot.lane.b32.xlu0 %v7424_v37, %s8227_s12 }
 0xc3c   : > { %7440 = vrot.lane.b32.xlu1 %v10669_v22, %s8229_s8 }
 0xc3d   : > { %7435 = vrot.lane.b32.xlu0 %v10670_v23, %s8229_s8 }
 0xc40   : > { %7450 = vrot.lane.b32.xlu1 %v10671_v36, %s8228_s13 }
 0xc41   : > { %7445 = vrot.lane.b32.xlu0 %v10672_v61, %s8228_s13 }
 0xc58   : > { %v6995_v42 = vpop.f32.mrb[44].mxu1 }
 0xc59   : > { %v2166_v53 = vpop.f32.mrb[45].mxu1 }
 0xc5a   : > { %v6996_v24 = vpop.f32.mrb[46].mxu1 }
 0xc5b   : > { %v7459_v1 = vpack.i.bf16 %v6996_v24, %v6995_v42  ;;  %v2169_v60 = vpop.f32.mrb[47].mxu1 }
 0xc5c   : > { %v7454_v30 = vpack.i.bf16 %v2169_v60, %v2166_v53 }
 0xc5d   : > { %7460 = vrot.lane.b32.xlu1 %v7459_v1, %s8227_s12 }
 0xc5e   : > { %7455 = vrot.lane.b32.xlu0 %v7454_v30, %s8227_s12 }
 0xcaa   : > { %v7431_v48 = vpop.permute.xlu1 %7430 }
 0xcab   : > { %v7433_v26 = vunpack.i.h.bf16 %v7431_v48  ;;  %v7432_v49 = vunpack.i.l.bf16 %v7431_v48  ;;  %v7426_v28 = vpop.permute.xlu0 %7425  ;;  %v2447_v48 = vrot.slane %v9087_v56, %v10637_v33 }
 0xcac   : > { %v7428_v54 = vunpack.i.h.bf16 %v7426_v28  ;;  %v7427_v17 = vunpack.i.l.bf16 %v7426_v28 }
 0xcad   : > { %v2297_v47 = vsel %vm2294_vm2, %v2288_v4, %v7432_v49  ;;  %v2298_v44 = vsel %vm2294_vm2, %v2289_v59, %v7433_v26 }
 0xcae   : > { %v2295_v40 = vsel %vm2294_vm2, %v2286_v7, %v7427_v17  ;;  %v2296_v18 = vsel %vm2294_vm2, %v2287_v51, %v7428_v54  ;;  %v2320_v13 = vpack.c.bf16 %v2298_v44, %v2297_v47  ;;  %v7441_v39 = vpop.permute.xlu1 %7440 }
 0xcaf   : > { %v2319_v20 = vpack.c.bf16 %v2296_v18, %v2295_v40  ;;  %v7436_v46 = vpop.permute.xlu0 %7435  ;;  %v7443_v62 = vunpack.i.h.bf16 %v7441_v39  ;;  %v7442_v29 = vunpack.i.l.bf16 %v7441_v39 }
 0xcb0   : > { %v7438_v37 = vunpack.i.h.bf16 %v7436_v46  ;;  %v7437_v22 = vunpack.i.l.bf16 %v7436_v46 }
 0xcb1   : > { %7013 = vmatprep.mubr.bf16.mxu0 %v2319_v20  ;;  %v2284_v53 = vsel %vm784_vm0, %v8723_v15, %v7443_v62  ;;  %v2283_v24 = vsel %vm784_vm0, %v8719_v35, %v7442_v29 }
 0xcb2   : > { %7014 = vmatmul.mubr.bf16.vlgmr.msra.gmra.mrb[40].mxu0 %v2320_v13  ;;  %v7451_v57 = vpop.permute.xlu1 %7450  ;;  %v2282_v60 = vsel %vm784_vm0, %v8725_v16, %v7438_v37  ;;  %v2281_v30 = vsel %vm784_vm0, %v8721_v14, %v7437_v22 }
 0xcb3   : > { %v7446_v31 = vpop.permute.xlu0 %7445  ;;  %v7453_v23 = vunpack.i.h.bf16 %v7451_v57  ;;  %v7452_v36 = vunpack.i.l.bf16 %v7451_v57 }
 0xcb4   : > { %v7448_v61 = vunpack.i.h.bf16 %v7446_v31  ;;  %v7447_v42 = vunpack.i.l.bf16 %v7446_v31 }
 0xcb5   : > { %v2292_v55 = vsel %vm2285_vm1, %v2283_v24, %v7452_v36  ;;  %v2293_v32 = vsel %vm2285_vm1, %v2284_v53, %v7453_v23 }
 0xcb6   : > { %v2290_v15 = vsel %vm2285_vm1, %v2281_v30, %v7447_v42  ;;  %v2291_v35 = vsel %vm2285_vm1, %v2282_v60, %v7448_v61  ;;  %v7565_v60 = vld [vmem:[%s10626_s2 + $0x60] ss:$40 sps:$4 sm:$0xff]   ;;  %v7566_v30 = vld [vmem:[%s10626_s2 + $0xb0] ss:$40 sps:$4 sm:$0xff]  }
 0xccf   : > { %v7461_v1 = vpop.permute.xlu1 %7460 }
 0xcd0   : > { %v7463_v45 = vunpack.i.h.bf16 %v7461_v1  ;;  %v7462_v21 = vunpack.i.l.bf16 %v7461_v1  ;;  %v7456_v34 = vpop.permute.xlu0 %7455 }
 0xcd1   : > { %v7458_v41 = vunpack.i.h.bf16 %v7456_v34  ;;  %v7457_v52 = vunpack.i.l.bf16 %v7456_v34  ;;  %v7569_v34 = vld [vmem:[%s10626_s2 + $0x1a0] ss:$40 sps:$4 sm:$0xff]  }
 0xcd2   : > { %v2301_v12 = vsel %vm2294_vm2, %v2292_v55, %v7462_v21  ;;  %v2302_v16 = vsel %vm2294_vm2, %v2293_v32, %v7463_v45  ;;  %v7567_v45 = vld [vmem:[%s10626_s2 + $0x100] ss:$40 sps:$4 sm:$0xff]   ;;  %v7568_v21 = vld [vmem:[%s10626_s2 + $0x150] ss:$40 sps:$4 sm:$0xff]  }
 0xcd3   : > { %v2299_v43 = vsel %vm2294_vm2, %v2290_v15, %v7457_v52  ;;  %v2300_v14 = vsel %vm2294_vm2, %v2291_v35, %v7458_v41  ;;  %v2322_v25 = vpack.c.bf16 %v2302_v16, %v2301_v12  ;;  %v7570_v55 = vld [vmem:[%s10626_s2 + $0x1f0] ss:$40 sps:$4 sm:$0xff]  }
 0xcd4   : > { %v2321_v0 = vpack.c.bf16 %v2300_v14, %v2299_v43 }
 0xcd6   : > { %7017 = vmatprep.mubr.bf16.mxu0 %v2321_v0 }
 0xcd7   : > { %7018 = vmatmul.mubr.bf16.gmra.mrb[44].mxu0 %v2322_v25 }
 0xd85   : > { %v7015_v58 = vpop.f32.mrb[40].mxu0 }
 0xd86   : > { %v2405_v63 = vpop.f32.mrb[41].mxu0  ;;  %v2438_v28 = vadd.f32 %v7015_v58, %v8384_v3 }
 0xd87   : > { %v2436_v19 = vadd.f32 %v8382_v2, %v2405_v63  ;;  %v7016_v26 = vpop.f32.mrb[42].mxu0 }
 0xd88   : > { %v2408_v49 = vpop.f32.mrb[43].mxu0  ;;  %v9100_v17 = vadd.f32 %v2447_v48, %v2438_v28  ;;  %v2439_v47 = vadd.f32 %v7016_v26, %v8390_v6  ;;  %v7571_v26 = vld [vmem:[%s10626_s2 + $0x240] ss:$40 sps:$4 sm:$0xff]  }
 0xd89   : > { %v9094_v4 = vadd.f32 %v2447_v48, %v2436_v19  ;;  %v2437_v59 = vadd.f32 %v8388_v5, %v2408_v49  ;;  %v9195_v28 = vld [vmem:[%s9192_s26] sm:$0xff] }
 0xd8a   : > { %10675 = vst [vmem:[#allocation13_spill] sm:$0xff] %v9100_v17  ;;  %v9105_v2 = vadd.f32 %v2447_v48, %v2439_v47  ;;  %v9201_v47 = vld [vmem:[%s9192_s26 + $0x10] sm:$0xff] }
 0xd8b   : > { %10673 = vst [vmem:[#allocation11_spill] sm:$0xff] %v9094_v4  ;;  %v9097_v54 = vadd.f32 %v2447_v48, %v2437_v59  ;;  %2456 = vadd.xlane.f32.xlu0 %v9094_v4  ;;  %v9198_v59 = vld [vmem:[%s9192_s26 + $0x8] sm:$0xff] }
 0xd8c   : > { %10676 = vst [vmem:[#allocation14_spill] sm:$0xff] %v9105_v2 }
 0xd8d   : > { %10674 = vst [vmem:[#allocation12_spill] sm:$0xff] %v9097_v54  ;;  %2458 = vadd.xlane.f32.xlu1 %v9097_v54 }
 0xd8f   : > { %2460 = vadd.xlane.f32.xlu0 %v9100_v17 }
 0xd93   : > { %2462 = vadd.xlane.f32.xlu0 %v9105_v2 }
 0xdaa   : > { %v7019_v3 = vpop.f32.mrb[44].mxu0 }
 0xdab   : > { %v2421_v44 = vpop.f32.mrb[45].mxu0  ;;  %v2442_v40 = vadd.f32 %v7019_v3, %v8400_v10  ;;  %v9205_v3 = vcombine.low %v9195_v28, %v9198_v59 }
 0xdac   : > { %v2440_v5 = vadd.f32 %v8394_v8, %v2421_v44  ;;  %v7020_v7 = vpop.f32.mrb[46].mxu0  ;;  %v7564_v8 = vld [vmem:[%s10626_s2 + $0x10] ss:$40 sps:$4 sm:$0xff]  }
 0xdad   : > { %v2424_v51 = vpop.f32.mrb[47].mxu0  ;;  %v2443_v13 = vadd.f32 %v7020_v7, %v8402_v11  ;;  %v9117_v39 = vadd.f32 %v2447_v48, %v2442_v40  ;;  %7021 = vmatprep.subr.bf16.mxu1 %v7564_v8  ;;  %v9208_v44 = vld [vmem:[%s9192_s26 + $0x18] sm:$0xff]  ;;  %7309 = vmatprep.subr.msk.bf16.mxu0 %vm784_vm0, %v9205_v3  ;;  %v2769_v7 = vsel %vm784_vm0, %v9205_v3, 0  ;;  %v9224_v40 = vld [vmem:[%s9192_s26 + $0x28] sm:$0xff] }
 0xdae   : > { %v9110_v18 = vadd.f32 %v2447_v48, %v2440_v5  ;;  %v2441_v6 = vadd.f32 %v8396_v9, %v2424_v51  ;;  %7022 = vmatpush3.bf16.msra.mxu1 %v7564_v8  ;;  %v9212_v5 = vcombine.low %v9201_v47, %v9208_v44  ;;  %7046 = vmatpush3.bf16.xpose.msra.mxu0 %v2769_v7  ;;  %v9221_v51 = vld [vmem:[%s9192_s26 + $0x20] sm:$0xff]  ;;  %v9235_v8 = vld [vmem:[%s9192_s26 + $0x30] sm:$0xff] }
 0xdaf   : > { %10679 = vst [vmem:[#allocation17_spill] sm:$0xff] %v9117_v39  ;;  %v9120_v46 = vadd.f32 %v2447_v48, %v2443_v13  ;;  %7023 = vmatprep.subr.bf16.mxu1 %v7565_v60  ;;  %v9230_v13 = vcombine.low %v9221_v51, %v9224_v40 }
 0xdb0   : > { %10677 = vst [vmem:[#allocation15_spill] sm:$0xff] %v9110_v18  ;;  %v9114_v20 = vadd.f32 %v2447_v48, %v2441_v6  ;;  %2464 = vadd.xlane.f32.xlu0 %v9110_v18  ;;  %7310 = vmatprep.subr.msk.bf16.mxu0 %vm784_vm0, %v9212_v5  ;;  %v2772_v6 = vsel %vm784_vm0, %v9212_v5, 0 }
 0xdb1   : > { %10680 = vst [vmem:[#allocation18_spill] sm:$0xff] %v9120_v46 }
 0xdb2   : > { %10678 = vst [vmem:[#allocation16_spill] sm:$0xff] %v9114_v20  ;;  %2466 = vadd.xlane.f32.xlu1 %v9114_v20  ;;  %7024 = vmatpush3.bf16.msra.mxu1 %v7565_v60 }
 0xdb3   : > { %7025 = vmatprep.subr.bf16.mxu1 %v7566_v30 }
 0xdb4   : > { %2468 = vadd.xlane.f32.xlu0 %v9117_v39 }
 0xdb6   : > { %2470 = vadd.xlane.f32.xlu1 %v9120_v46  ;;  %7026 = vmatpush3.bf16.msra.mxu1 %v7566_v30 }
 0xdb7   : > { %7027 = vmatprep.subr.bf16.mxu1 %v7567_v45  ;;  %7048 = vmatpush3.bf16.xpose.msra.mxu0 %v2772_v6 }
 0xdb8   : > { %7311 = vmatprep.subr.msk.bf16.mxu0 %vm784_vm0, %v9230_v13 }
 0xdba   : > { %7028 = vmatpush3.bf16.msra.mxu1 %v7567_v45 }
 0xdbb   : > { %7029 = vmatprep.subr.bf16.mxu1 %v7568_v21 }
 0xdbe   : > { %7030 = vmatpush3.bf16.msra.mxu1 %v7568_v21  ;;  %v2546_v21 = vsub.s32 6, %v8519_v27 }
 0xdbf   : > { %7031 = vmatprep.subr.bf16.mxu1 %v7569_v34 }
 0xdc2   : > { %7032 = vmatpush3.bf16.msra.mxu1 %v7569_v34 }
 0xdc3   : > { %7033 = vmatprep.subr.bf16.mxu1 %v7570_v55 }
 0xdc6   : > { %7034 = vmatpush3.bf16.msra.mxu1 %v7570_v55 }
 0xdc7   : > { %7035 = vmatprep.subr.bf16.mxu1 %v7571_v26 }
 0xdca   : > { %7036 = vmatpush3.bf16.msra.mxu1 %v7571_v26 }
 0xe18   : > { %v2457_v9 = vpop.xlane.xlu0 %2456 }
 0xe19   : > { %v2472_v10 = vmul.f32 0.0078125, %v2457_v9  ;;  %v9238_v9 = vld [vmem:[%s9192_s26 + $0x38] sm:$0xff] }
 0xe1a   : > { %v2459_v11 = vpop.xlane.xlu1 %2458 }
 0xe1b   : > { %v9128_v57 = vsub.f32 %v9094_v4, %v2472_v10  ;;  %v2473_v62 = vmul.f32 0.0078125, %v2459_v11  ;;  %v2775_v10 = vsel %vm784_vm0, %v9230_v13, 0  ;;  %v9244_v11 = vcombine.low %v9235_v8, %v9238_v9 }
 0xe1c   : > { %v2461_v29 = vpop.xlane.xlu0 %2460  ;;  %7050 = vmatpush3.bf16.xpose.msra.mxu0 %v2775_v10 }
 0xe1d   : > { %v9131_v31 = vsub.f32 %v9097_v54, %v2473_v62  ;;  %v2474_v37 = vmul.f32 0.0078125, %v2461_v29  ;;  %v2488_v22 = vmul.f32 %v9128_v57, %v9128_v57  ;;  %7312 = vmatprep.subr.msk.bf16.mxu0 %vm784_vm0, %v9244_v11  ;;  %v2778_v62 = vsel %vm784_vm0, %v9244_v11, 0 }
 0xe1f   : > { %v9136_v23 = vsub.f32 %v9100_v17, %v2474_v37  ;;  %2496 = vadd.xlane.f32.xlu0 %v2488_v22  ;;  %v2489_v36 = vmul.f32 %v9131_v31, %v9131_v31 }
 0xe20   : > { %v2463_v61 = vpop.xlane.xlu0 %2462 }
 0xe21   : > { %v2475_v42 = vmul.f32 0.0078125, %v2463_v61  ;;  %2498 = vadd.xlane.f32.xlu1 %v2489_v36  ;;  %v2490_v53 = vmul.f32 %v9136_v23, %v9136_v23 }
 0xe23   : > { %v9143_v24 = vsub.f32 %v9105_v2, %v2475_v42  ;;  %2500 = vadd.xlane.f32.xlu0 %v2490_v53 }
 0xe24   : > { %7052 = vmatpush3.bf16.xpose.msra.mxu0 %v2778_v62 }
 0xe25   : > { %v2491_v1 = vmul.f32 %v9143_v24, %v9143_v24 }
 0xe27   : > { %2502 = vadd.xlane.f32.xlu1 %v2491_v1 }
 0xe3d   : > { %v2465_v41 = vpop.xlane.xlu0 %2464 }
 0xe3e   : > { %v2476_v52 = vmul.f32 0.0078125, %v2465_v41  ;;  %v2547_v41 = vrot.slane %v9087_v56, %v2546_v21 }
 0xe3f   : > { %v2467_v32 = vpop.xlane.xlu1 %2466 }
 0xe40   : > { %v9166_v15 = vsub.f32 %v9110_v18, %v2476_v52  ;;  %v2477_v35 = vmul.f32 0.0078125, %v2467_v32  ;;  %v2558_v52 = vsub.s32 7, %v8519_v27 }
 0xe41   : > { %v2469_v12 = vpop.xlane.xlu0 %2468 }
 0xe42   : > { %v9169_v16 = vsub.f32 %v9114_v20, %v2477_v35  ;;  %v2478_v43 = vmul.f32 0.0078125, %v2469_v12  ;;  %v2492_v14 = vmul.f32 %v9166_v15, %v9166_v15 }
 0xe43   : > { %v2471_v25 = vpop.xlane.xlu1 %2470 }
 0xe44   : > { %v9174_v0 = vsub.f32 %v9117_v39, %v2478_v43  ;;  %v2479_v58 = vmul.f32 0.0078125, %v2471_v25  ;;  %2504 = vadd.xlane.f32.xlu0 %v2492_v14  ;;  %v2493_v48 = vmul.f32 %v9169_v16, %v9169_v16  ;;  %v2559_v14 = vrot.slane %v9087_v56, %v2558_v52 }
 0xe46   : > { %v9179_v63 = vsub.f32 %v9120_v46, %v2479_v58  ;;  %2506 = vadd.xlane.f32.xlu1 %v2493_v48  ;;  %v2494_v19 = vmul.f32 %v9174_v0, %v9174_v0 }
 0xe48   : > { %2508 = vadd.xlane.f32.xlu0 %v2494_v19  ;;  %v2495_v49 = vmul.f32 %v9179_v63, %v9179_v63 }
 0xe4a   : > { %2510 = vadd.xlane.f32.xlu1 %v2495_v49 }
 0xeac   : > { %v2497_v29 = vpop.xlane.xlu0 %2496 }
 0xead   : > { %v2512_v37 = vmul.f32 0.0078125, %v2497_v29 }
 0xeae   : > { %v2499_v22 = vpop.xlane.xlu1 %2498 }
 0xeaf   : > { %v2520_v36 = vadd.f32 1e-05, %v2512_v37  ;;  %v2513_v61 = vmul.f32 0.0078125, %v2499_v22 }
 0xeb0   : > { %v2501_v42 = vpop.xlane.xlu0 %2500 }
 0xeb1   : > { %7814 = vrsqrt.f32 %v2520_v36  ;;  %v2521_v53 = vadd.f32 1e-05, %v2513_v61  ;;  %v2514_v1 = vmul.f32 0.0078125, %v2501_v42 }
 0xeb3   : > { %7816 = vrsqrt.f32 %v2521_v53  ;;  %v2522_v60 = vadd.f32 1e-05, %v2514_v1 }
 0xeb4   : > { %v2503_v30 = vpop.xlane.xlu1 %2502 }
 0xeb5   : > { %7818 = vrsqrt.f32 %v2522_v60  ;;  %v2515_v45 = vmul.f32 0.0078125, %v2503_v30 }
 0xeb7   : > { %v2523_v34 = vadd.f32 1e-05, %v2515_v45 }
 0xeb9   : > { %7820 = vrsqrt.f32 %v2523_v34 }
 0xebb   : > { %v7815_v55 = vpop.eup %7814 }
 0xebc   : > { %v2536_v32 = vmul.f32 %v7815_v55, %v9128_v57 }
 0xebd   : > { %v7817_v35 = vpop.eup %7816 }
 0xebe   : > { %v2537_v12 = vmul.f32 %v7817_v35, %v9131_v31  ;;  %v2548_v43 = vmul.f32 %v2547_v41, %v2536_v32 }
 0xebf   : > { %v7819_v25 = vpop.eup %7818 }
 0xec0   : > { %v2549_v58 = vmul.f32 %v2547_v41, %v2537_v12  ;;  %v2538_v48 = vmul.f32 %v7819_v25, %v9136_v23  ;;  %v2560_v19 = vadd.f32 %v2559_v14, %v2548_v43 }
 0xec2   : > { %v2561_v26 = vadd.f32 %v2559_v14, %v2549_v58  ;;  %v2550_v10 = vmul.f32 %v2547_v41, %v2538_v48 }
 0xec3   : > { %v7821_v49 = vpop.eup %7820 }
 0xec4   : > { %v2584_v7 = vpack.c.bf16 %v2561_v26, %v2560_v19  ;;  %v2539_v6 = vmul.f32 %v7821_v49, %v9143_v24  ;;  %v2562_v57 = vadd.f32 %v2559_v14, %v2550_v10  ;;  %v9280_v10 = vld [vmem:[%s9192_s26 + $0x58] sm:$0xff] }
 0xec6   : > { %7037 = vmatprep.mubr.bf16.mxu1 %v2584_v7  ;;  %v2551_v62 = vmul.f32 %v2547_v41, %v2539_v6  ;;  %v9263_v6 = vld [vmem:[%s9192_s26 + $0x40] sm:$0xff] }
 0xec8   : > { %v2563_v29 = vadd.f32 %v2559_v14, %v2551_v62 }
 0xeca   : > { %v2585_v37 = vpack.c.bf16 %v2563_v29, %v2562_v57  ;;  %v9291_v29 = vld [vmem:[%s9192_s26 + $0x60] sm:$0xff] }
 0xecc   : > { %7038 = vmatmul.mubr.bf16.vlgmr.msra.gmra.mrb[48].mxu1 %v2585_v37  ;;  %v9294_v37 = vld [vmem:[%s9192_s26 + $0x68] sm:$0xff] }
 0xed1   : > { %v2505_v31 = vpop.xlane.xlu0 %2504 }
 0xed2   : > { %v2516_v22 = vmul.f32 0.0078125, %v2505_v31  ;;  %v9297_v31 = vld [vmem:[%s9192_s26 + $0x70] sm:$0xff] }
 0xed3   : > { %v2507_v56 = vpop.xlane.xlu1 %2506 }
 0xed4   : > { %v2524_v36 = vadd.f32 1e-05, %v2516_v22  ;;  %v2517_v61 = vmul.f32 0.0078125, %v2507_v56  ;;  %v9301_v22 = vcombine.low %v9291_v29, %v9294_v37  ;;  %v9304_v56 = vld [vmem:[%s9192_s26 + $0x78] sm:$0xff] }
 0xed5   : > { %v2509_v42 = vpop.xlane.xlu0 %2508 }
 0xed6   : > { %7822 = vrsqrt.f32 %v2524_v36  ;;  %v2525_v23 = vadd.f32 1e-05, %v2517_v61  ;;  %v2518_v53 = vmul.f32 0.0078125, %v2509_v42  ;;  %v9308_v36 = vcombine.low %v9297_v31, %v9304_v56  ;;  %v9317_v42 = vld [vmem:[%s9192_s26 + $0x80] sm:$0xff] }
 0xed7   : > { %v2511_v1 = vpop.xlane.xlu1 %2510  ;;  %v2867_v61 = vsel %vm784_vm0, %v9301_v22, 0 }
 0xed8   : > { %7824 = vrsqrt.f32 %v2525_v23  ;;  %v2526_v60 = vadd.f32 1e-05, %v2518_v53  ;;  %v2519_v24 = vmul.f32 0.0078125, %v2511_v1  ;;  %v9320_v23 = vld [vmem:[%s9192_s26 + $0x88] sm:$0xff]  ;;  %v2870_v53 = vsel %vm784_vm0, %v9308_v36, 0 }
 0xed9   : > { %v9326_v1 = vcombine.low %v9317_v42, %v9320_v23 }
 0xeda   : > { %7826 = vrsqrt.f32 %v2526_v60  ;;  %v2527_v30 = vadd.f32 1e-05, %v2519_v24  ;;  %v9333_v24 = vld [vmem:[%s9192_s26 + $0x90] sm:$0xff] }
 0xedb   : > { %v2873_v60 = vsel %vm784_vm0, %v9326_v1, 0 }
 0xedc   : > { %7828 = vrsqrt.f32 %v2527_v30  ;;  %v9336_v30 = vld [vmem:[%s9192_s26 + $0x98] sm:$0x77] }
 0xee0   : > { %v7823_v45 = vpop.eup %7822 }
 0xee1   : > { %v2540_v21 = vmul.f32 %v7823_v45, %v9166_v15  ;;  %v9340_v45 = vcombine.low %v9333_v24, %v9336_v30 }
 0xee2   : > { %v7825_v34 = vpop.eup %7824 }
 0xee3   : > { %v2541_v52 = vmul.f32 %v7825_v34, %v9169_v16  ;;  %v2552_v55 = vmul.f32 %v2547_v41, %v2540_v21  ;;  %v2876_v21 = vsel %vm784_vm0, %v9340_v45, 0  ;;  %v300_v34 = vld [vmem:[%s10628_s4 + $0x8] sm:$0x3f] }
 0xee4   : > { %v7827_v32 = vpop.eup %7826 }
 0xee5   : > { %v2553_v35 = vmul.f32 %v2547_v41, %v2541_v52  ;;  %v2542_v12 = vmul.f32 %v7827_v32, %v9174_v0  ;;  %v2564_v25 = vadd.f32 %v2559_v14, %v2552_v55  ;;  %v9266_v0 = vld [vmem:[%s9192_s26 + $0x48] sm:$0x77]  ;;  %v2591_v52 = vrot.slane %v300_v34, %v8522_v38 }
 0xee6   : > { %v7829_v43 = vpop.eup %7828 }
 0xee7   : > { %v2565_v58 = vadd.f32 %v2559_v14, %v2553_v35  ;;  %v2543_v48 = vmul.f32 %v7829_v43, %v9179_v63  ;;  %v2554_v19 = vmul.f32 %v2547_v41, %v2542_v12  ;;  %v9270_v63 = vcombine.low %v9263_v6, %v9266_v0 }
 0xee9   : > { %v2586_v26 = vpack.c.bf16 %v2565_v58, %v2564_v25  ;;  %v2555_v15 = vmul.f32 %v2547_v41, %v2543_v48  ;;  %v2566_v49 = vadd.f32 %v2559_v14, %v2554_v19  ;;  %7313 = vmatprep.subr.msk.bf16.mxu0 %vm784_vm0, %v9270_v63  ;;  %v2781_v41 = vsel %vm784_vm0, %v9270_v63, 0 }
 0xeea   : > { %7054 = vmatpush3.bf16.xpose.msra.mxu0 %v2781_v41 }
 0xeeb   : > { %7041 = vmatprep.mubr.bf16.mxu1 %v2586_v26  ;;  %v2567_v16 = vadd.f32 %v2559_v14, %v2555_v15  ;;  %v9277_v14 = vld [vmem:[%s9192_s26 + $0x50] sm:$0xff] }
 0xeec   : > { %v9284_v62 = vcombine.low %v9277_v14, %v9280_v10 }
 0xeed   : > { %v2587_v7 = vpack.c.bf16 %v2567_v16, %v2566_v49 }
 0xeee   : > { %7314 = vmatprep.subr.msk.bf16.mxu1 %vm784_vm0, %v9284_v62  ;;  %v2864_v57 = vsel %vm784_vm0, %v9284_v62, 0 }
 0xeef   : > { %7042 = vmatmul.mubr.bf16.gmra.mrb[52].mxu1 %v2587_v7 }
 0xef0   : > { %7060 = vmatpush3.bf16.xpose.msra.mxu1 %v2864_v57 }
 0xef1   : > { %7315 = vmatprep.subr.msk.bf16.mxu1 %vm784_vm0, %v9301_v22 }
 0xef8   : > { %7062 = vmatpush3.bf16.xpose.msra.mxu1 %v2867_v61 }
 0xef9   : > { %7316 = vmatprep.subr.msk.bf16.mxu1 %vm784_vm0, %v9308_v36 }
 0xf00   : > { %7064 = vmatpush3.bf16.xpose.msra.mxu1 %v2870_v53 }
 0xf01   : > { %7317 = vmatprep.subr.msk.bf16.mxu1 %vm784_vm0, %v9326_v1 }
 0xf08   : > { %7066 = vmatpush3.bf16.xpose.msra.mxu1 %v2873_v60 }
 0xf09   : > { %7318 = vmatprep.subr.msk.bf16.mxu1 %vm784_vm0, %v9340_v45 }
 0xf10   : > { %7068 = vmatpush3.bf16.xpose.msra.mxu1 %v2876_v21 }
 0xf9f   : > { %v7039_v55 = vpop.f32.mrb[48].mxu1 }
 0xfa0   : > { %v2683_v32 = vadd.f32 %v7039_v55, %v2591_v52  ;;  %v2674_v35 = vpop.f32.mrb[49].mxu1 }
 0xfa1   : > { %v2675_v12 = vadd.f32 %v2674_v35, %v2591_v52  ;;  %v7040_v43 = vpop.f32.mrb[50].mxu1 }
 0xfa2   : > { %v2686_v25 = vadd.f32 %v7040_v43, %v2591_v52  ;;  %v2677_v58 = vpop.f32.mrb[51].mxu1  ;;  %v2707_v19 = vmul.f32 0.17677669, %v2683_v32 }
 0xfa3   : > { %v2678_v48 = vadd.f32 %v2677_v58, %v2591_v52  ;;  %v2705_v15 = vmul.f32 0.17677669, %v2675_v12 }
 0xfa4   : > { %v2708_v26 = vmul.f32 0.17677669, %v2686_v25 }
 0xfa5   : > { %v2706_v49 = vmul.f32 0.17677669, %v2678_v48 }
 0xfa6   : > { %v9350_v16 = vpack.c.bf16 %v2708_v26, %v2707_v19 }
 0xfa7   : > { %v9352_v7 = vpack.c.bf16 %v2706_v49, %v2705_v15 }
 0xfa9   : > { %7055 = vmatprep.mubr.msk.bf16.mxu0 %vm784_vm0, %v9352_v7 }
 0xfaa   : > { %7056 = vmatmul.mubr.msk.bf16.vlgmr.msra.gmra.mrb[48].mxu0 %vm784_vm0, %v9350_v16 }
 0xfc2   : > { %v7043_v41 = vpop.f32.mrb[52].mxu1 }
 0xfc3   : > { %v2699_v57 = vadd.f32 %v7043_v41, %v2591_v52  ;;  %v2690_v61 = vpop.f32.mrb[53].mxu1 }
 0xfc4   : > { %v2691_v53 = vadd.f32 %v2690_v61, %v2591_v52  ;;  %v7044_v60 = vpop.f32.mrb[54].mxu1 }
 0xfc5   : > { %v2702_v21 = vadd.f32 %v7044_v60, %v2591_v52  ;;  %v2693_v34 = vpop.f32.mrb[55].mxu1  ;;  %v2711_v32 = vmul.f32 0.17677669, %v2699_v57 }
 0xfc6   : > { %v2694_v55 = vadd.f32 %v2693_v34, %v2591_v52  ;;  %v2709_v12 = vmul.f32 0.17677669, %v2691_v53 }
 0xfc7   : > { %v2712_v35 = vmul.f32 0.17677669, %v2702_v21 }
 0xfc8   : > { %v2710_v43 = vmul.f32 0.17677669, %v2694_v55 }
 0xfc9   : > { %v9358_v25 = vpack.c.bf16 %v2712_v35, %v2711_v32 }
 0xfca   : > { %v9360_v58 = vpack.c.bf16 %v2710_v43, %v2709_v12 }
 0xfcc   : > { %7069 = vmatprep.mubr.msk.bf16.mxu1 %vm784_vm0, %v9360_v58 }
 0xfcd   : > { %7070 = vmatmul.mubr.msk.bf16.vlgmr.msra.gmra.mrb[56].mxu1 %vm784_vm0, %v9358_v25 }
0x107d   : > { %v7057_v48 = vpop.f32.mrb[48].mxu0 }
0x107e   : > { %v2817_v19 = vpop.f32.mrb[49].mxu0  ;;  %v2934_v41 = vsel %vm2927_vm3, %v7057_v48, -inf }
0x107f   : > { %v7058_v26 = vpop.f32.mrb[50].mxu0  ;;  %v2928_v52 = vsel %vm2927_vm3, %v2817_v19, -inf }
0x1080   : > { %2929 = vmax.xlane.f32.xlu0 %v2928_v52  ;;  %v2820_v15 = vpop.f32.mrb[51].mxu0  ;;  %v2937_v57 = vsel %vm2927_vm3, %v7058_v26, -inf }
0x1081   : > { %v2931_v49 = vsel %vm2927_vm3, %v2820_v15, -inf }
0x1082   : > { %2932 = vmax.xlane.f32.xlu1 %v2931_v49 }
0x1084   : > { %2935 = vmax.xlane.f32.xlu0 %v2934_v41 }
0x1086   : > { %2938 = vmax.xlane.f32.xlu1 %v2937_v57 }
0x10a0   : > { %v9370_v61 = vpop.f32.mrb[56].mxu1 }
0x10a1   : > { %v2912_v53 = vpop.f32.mrb[57].mxu1  ;;  %v2946_v32 = vsel %vm2927_vm3, %v9370_v61, -inf }
0x10a2   : > { %v9372_v60 = vpop.f32.mrb[58].mxu1  ;;  %v2940_v21 = vsel %vm2927_vm3, %v2912_v53, -inf }
0x10a3   : > { %2941 = vmax.xlane.f32.xlu0 %v2940_v21  ;;  %v9375_v34 = vpop.f32.mrb[59].mxu1  ;;  %v2949_v35 = vsel %vm2927_vm3, %v9372_v60, -inf }
0x10a4   : > { %v2943_v55 = vsel %vm2927_vm3, %v9375_v34, -inf }
0x10a5   : > { %2944 = vmax.xlane.f32.xlu1 %v2943_v55 }
0x10a7   : > { %2947 = vmax.xlane.f32.xlu0 %v2946_v32 }
0x10a9   : > { %2950 = vmax.xlane.f32.xlu1 %v2949_v35 }
0x110d   : > { %v2930_v12 = vpop.xlane.xlu0 %2929 }
0x110e   : > { %v2952_v43 = vsub.f32 %v2817_v19, %v2930_v12 }
0x110f   : > { %v2933_v52 = vpop.xlane.xlu1 %2932 }
0x1110   : > { %v2960_v49 = vmul.f32 1.442695, %v2952_v43  ;;  %v2953_v41 = vsub.f32 %v2820_v15, %v2933_v52  ;;  %v3022_v43 = vrot.slane %v9201_v47, 4  ;;  %v3023_v52 = vrot.slane %v9208_v44, 4 }
0x1111   : > { %v2936_v57 = vpop.xlane.xlu0 %2935 }
0x1112   : > { %7830 = vpow2.f32 %v2960_v49  ;;  %v2962_v21 = vmul.f32 1.442695, %v2953_v41  ;;  %v2954_v33 = vsub.f32 %v7057_v48, %v2936_v57  ;;  %v3021_v48 = vrot.slane %v9198_v59, 4 }
0x1113   : > { %v2939_v46 = vpop.xlane.xlu1 %2938  ;;  %v6301_v49 = vcombine.low %v3022_v43, %v3023_v52  ;;  %v3024_v57 = vrot.slane %v9221_v51, 4  ;;  %v3028_v43 = vrot.slane %v9263_v6, 4 }
0x1114   : > { %7832 = vpow2.f32 %v2962_v21  ;;  %v2964_v55 = vmul.f32 1.442695, %v2954_v33  ;;  %v2955_v39 = vsub.f32 %v7058_v26, %v2939_v46  ;;  %v3025_v21 = vrot.slane %v9224_v40, 4 }
0x1116   : > { %7834 = vpow2.f32 %v2964_v55  ;;  %v2966_v20 = vmul.f32 1.442695, %v2955_v39  ;;  %v3020_v39 = vrot.slane %v9195_v28, 4 }
0x1118   : > { %7836 = vpow2.f32 %v2966_v20  ;;  %v6300_v26 = vcombine.low %v3020_v39, %v3021_v48  ;;  %v3027_v39 = vrot.slane %v9238_v9, 4 }
0x111a   : > { %7073 = vmatprep.subr.bf16.mxu0 %v6300_v26 }
0x111b   : > { %7074 = vmatpush3.bf16.msra.mxu0 %v6300_v26 }
0x111c   : > { %v9383_v32 = vpop.eup %7830  ;;  %7075 = vmatprep.subr.bf16.mxu0 %v6301_v49 }
0x111d   : > { %v2976_v35 = vsel %vm2927_vm3, %v9383_v32, 0.0 }
0x111e   : > { %v9387_v19 = vpop.eup %7832  ;;  %2977 = vadd.xlane.f32.xlu0 %v2976_v35  ;;  %v6302_v35 = vcombine.low %v3024_v57, %v3025_v21 }
0x111f   : > { %v2979_v15 = vsel %vm2927_vm3, %v9387_v19, 0.0  ;;  %7076 = vmatpush3.bf16.msra.mxu0 %v6301_v49 }
0x1120   : > { %v9391_v12 = vpop.eup %7834  ;;  %2980 = vadd.xlane.f32.xlu1 %v2979_v15  ;;  %7077 = vmatprep.subr.bf16.mxu0 %v6302_v35 }
0x1121   : > { %v2982_v33 = vsel %vm2927_vm3, %v9391_v12, 0.0 }
0x1122   : > { %v9395_v46 = vpop.eup %7836  ;;  %2983 = vadd.xlane.f32.xlu0 %v2982_v33 }
0x1123   : > { %v2985_v20 = vsel %vm2927_vm3, %v9395_v46, 0.0  ;;  %7078 = vmatpush3.bf16.msra.mxu0 %v6302_v35 }
0x1124   : > { %2986 = vadd.xlane.f32.xlu1 %v2985_v20  ;;  %v3026_v20 = vrot.slane %v9235_v8, 4 }
0x1126   : > { %v6303_v52 = vcombine.low %v3026_v20, %v3027_v39 }
0x1128   : > { %7079 = vmatprep.subr.bf16.mxu0 %v6303_v52 }
0x1129   : > { %7080 = vmatpush3.bf16.msra.mxu0 %v6303_v52 }
0x1130   : > { %v2942_v41 = vpop.xlane.xlu0 %2941 }
0x1131   : > { %v2956_v55 = vsub.f32 %v2912_v53, %v2942_v41  ;;  %v3029_v53 = vrot.slane %v9266_v0, 4 }
0x1133   : > { %v2968_v48 = vmul.f32 1.442695, %v2956_v55  ;;  %v6304_v41 = vcombine.low %v3028_v43, %v3029_v53  ;;  %v2945_v55 = vpop.xlane.xlu1 %2944 }
0x1134   : > { %v2948_v15 = vpop.xlane.xlu0 %2947 }
0x1135   : > { %v2958_v33 = vsub.f32 %v9370_v61, %v2948_v15  ;;  %3206 = vrot.lane.b32.xlu1 %v9212_v5, %s8227_s12  ;;  %v8230_v61 = vmov 65535  }
0x1136   : > { %v3057_v49 = vsel %vm3055_vm4, 4294967295, %v8230_v61 }
0x1137   : > { %v2972_v26 = vmul.f32 1.442695, %v2958_v33  ;;  %v9414_v57 = vsel %vm3056_vm5, %v3057_v49, 0  ;;  %v2951_v15 = vpop.xlane.xlu1 %2950 }
0x1138   : > { %v3060_v21 = vand.u32 %v6304_v41, %v9414_v57  ;;  %v2959_v39 = vsub.f32 %v9372_v60, %v2951_v15  ;;  %v3112_v41 = vrot.slane %v9280_v10, 4  ;;  %v3114_v15 = vrot.slane %v9294_v37, 4 }
0x1139   : > { %7838 = vpow2.f32 %v2972_v26  ;;  %3208 = vrot.lane.b32.xlu1 %v9230_v13, %s8227_s12  ;;  %v2957_v26 = vsub.f32 %v9375_v34, %v2945_v55  ;;  %v3111_v34 = vrot.slane %v9277_v14, 4  ;;  %v3113_v55 = vrot.slane %v9291_v29, 4 }
0x113a   : > { %7840 = vpow2.f32 %v2968_v48  ;;  %7081 = vmatprep.subr.bf16.mxu0 %v3060_v21  ;;  %v2974_v43 = vmul.f32 1.442695, %v2959_v39  ;;  %v3115_v39 = vrot.slane %v9297_v31, 4 }
0x113b   : > { %7082 = vmatpush3.bf16.msra.mxu0 %v3060_v21  ;;  %v2970_v52 = vmul.f32 1.442695, %v2957_v26  ;;  %v6307_v21 = vcombine.low %v3111_v34, %v3112_v41  ;;  %v3120_v34 = vrot.slane %v9336_v30, 4 }
0x113c   : > { %7842 = vpow2.f32 %v2974_v43  ;;  %v3117_v43 = vrot.slane %v9317_v42, 4 }
0x113d   : > { %7844 = vpow2.f32 %v2970_v52  ;;  %7087 = vmatprep.subr.bf16.mxu1 %v6307_v21  ;;  %v3118_v52 = vrot.slane %v9320_v23, 4 }
0x113e   : > { %7088 = vmatpush3.bf16.msra.mxu1 %v6307_v21 }
0x1143   : > { %v9417_v35 = vpop.eup %7838 }
0x1144   : > { %v2994_v33 = vsel %vm2927_vm3, %v9417_v35, 0.0  ;;  %v9421_v20 = vpop.eup %7840 }
0x1145   : > { %2995 = vadd.xlane.f32.xlu0 %v2994_v33  ;;  %v2988_v48 = vsel %vm2927_vm3, %v9421_v20, 0.0  ;;  %v6308_v33 = vcombine.low %v3113_v55, %v3114_v15 }
0x1146   : > { %v9427_v53 = vpop.eup %7842 }
0x1147   : > { %v2997_v61 = vsel %vm2927_vm3, %v9427_v53, 0.0  ;;  %v9431_v49 = vpop.eup %7844  ;;  %7089 = vmatprep.subr.bf16.mxu1 %v6308_v33 }
0x1148   : > { %v2991_v60 = vsel %vm2927_vm3, %v9431_v49, 0.0  ;;  %7090 = vmatpush3.bf16.msra.mxu1 %v6308_v33 }
0x1149   : > { %2989 = vadd.xlane.f32.xlu0 %v2988_v48  ;;  %v3116_v48 = vrot.slane %v9304_v56, 4 }
0x114b   : > { %v6309_v26 = vcombine.low %v3115_v39, %v3116_v48 }
0x114d   : > { %7091 = vmatprep.subr.bf16.mxu1 %v6309_v26 }
0x114e   : > { %7092 = vmatpush3.bf16.msra.mxu1 %v6309_v26 }
0x115d   : > { %2998 = vadd.xlane.f32.xlu1 %v2997_v61  ;;  %v6310_v61 = vcombine.low %v3117_v43, %v3118_v52 }
0x115f   : > { %3204 = vrot.lane.b32.xlu0 %v9205_v3, %s8227_s12  ;;  %7093 = vmatprep.subr.bf16.mxu1 %v6310_v61 }
0x1160   : > { %7094 = vmatpush3.bf16.msra.mxu1 %v6310_v61 }
0x1161   : > { %2992 = vadd.xlane.f32.xlu1 %v2991_v60  ;;  %v3119_v60 = vrot.slane %v9333_v24, 4 }
0x1163   : > { %3210 = vrot.lane.b32.xlu0 %v9244_v11, %s8227_s12  ;;  %v6311_v41 = vcombine.low %v3119_v60, %v3120_v34 }
0x1165   : > { %v3147_v21 = vand.u32 %v6311_v41, %v9414_v57 }
0x1167   : > { %3212 = vrot.lane.b32.xlu0 %v9270_v63, %s8227_s12  ;;  %7095 = vmatprep.subr.bf16.mxu1 %v3147_v21 }
0x1168   : > { %7096 = vmatpush3.bf16.msra.mxu1 %v3147_v21 }
0x116b   : > { %3200 = vrot.lane.b32.xlu0 %v9352_v7, %s8227_s12 }
0x116f   : > { %3296 = vrot.lane.b32.xlu0 %v9326_v1, %s8227_s12 }
0x1172   : > { %3290 = vrot.lane.b32.xlu1 %v9284_v62, %s8227_s12 }
0x1173   : > { %3286 = vrot.lane.b32.xlu0 %v9360_v58, %s8227_s12 }
0x1176   : > { %3292 = vrot.lane.b32.xlu1 %v9301_v22, %s8227_s12 }
0x117a   : > { %3294 = vrot.lane.b32.xlu1 %v9308_v36, %s8227_s12 }
0x117e   : > { %3202 = vrot.lane.b32.xlu1 %v9350_v16, %s8227_s12 }
0x1182   : > { %3298 = vrot.lane.b32.xlu1 %v9340_v45, %s8227_s12 }
0x1186   : > { %3288 = vrot.lane.b32.xlu1 %v9358_v25, %s8227_s12 }
0x11ab   : > { %v2978_v55 = vpop.xlane.xlu0 %2977 }
0x11ac   : > { %7846 = vrcp.f32 %v2978_v55 }
0x11ad   : > { %v2981_v15 = vpop.xlane.xlu1 %2980 }
0x11ae   : > { %7848 = vrcp.f32 %v2981_v15 }
0x11af   : > { %v2984_v33 = vpop.xlane.xlu0 %2983 }
0x11b0   : > { %7850 = vrcp.f32 %v2984_v33 }
0x11b1   : > { %v2987_v39 = vpop.xlane.xlu1 %2986 }
0x11b2   : > { %7852 = vrcp.f32 %v2987_v39 }
0x11b6   : > { %v7847_v48 = vpop.eup %7846 }
0x11b7   : > { %v3008_v43 = vmul.f32 %v7847_v48, %v9383_v32 }
0x11b8   : > { %v7849_v26 = vpop.eup %7848 }
0x11b9   : > { %v3009_v52 = vmul.f32 %v7849_v26, %v9387_v19  ;;  %v3207_v19 = vpop.permute.xlu1 %3206 }
0x11ba   : > { %v7851_v61 = vpop.eup %7850 }
0x11bb   : > { %v3016_v60 = vpack.c.bf16 %v3009_v52, %v3008_v43  ;;  %v3010_v41 = vmul.f32 %v7851_v61, %v9391_v12 }
0x11bc   : > { %v7853_v34 = vpop.eup %7852 }
0x11bd   : > { %v3011_v21 = vmul.f32 %v7853_v34, %v9395_v46  ;;  %7083 = vmatprep.mubr.msk.bf16.mxu0 %vm2927_vm3, %v3016_v60  ;;  %v3224_v46 = vsel %vm784_vm0, %v3207_v19, 0  ;;  %v3209_v26 = vpop.permute.xlu1 %3208 }
0x11be   : > { %v3227_v61 = vsel %vm784_vm0, %v3209_v26, 0 }
0x11bf   : > { %v3017_v55 = vpack.c.bf16 %v3011_v21, %v3010_v41 }
0x11c1   : > { %7084 = vmatmul.mubr.msk.bf16.vlgmr.msra.gmra.mrb[52].mxu0 %vm2927_vm3, %v3017_v55 }
0x11d2   : > { %v2996_v15 = vpop.xlane.xlu0 %2995 }
0x11d6   : > { %v2990_v33 = vpop.xlane.xlu0 %2989 }
0x11da   : > { %v3205_v39 = vpop.permute.xlu0 %3204 }
0x11db   : > { %7319 = vmatprep.subr.msk.bf16.mxu0 %vm784_vm0, %v3205_v39  ;;  %v3221_v32 = vsel %vm784_vm0, %v3205_v39, 0 }
0x11dc   : > { %7102 = vmatpush3.bf16.xpose.msra.mxu0 %v3221_v32 }
0x11dd   : > { %7320 = vmatprep.subr.msk.bf16.mxu0 %vm784_vm0, %v3207_v19 }
0x11de   : > { %v3211_v48 = vpop.permute.xlu0 %3210 }
0x11df   : > { %v3230_v34 = vsel %vm784_vm0, %v3211_v48, 0 }
0x11e2   : > { %v3213_v12 = vpop.permute.xlu0 %3212 }
0x11e4   : > { %7104 = vmatpush3.bf16.xpose.msra.mxu0 %v3224_v46 }
0x11e5   : > { %7321 = vmatprep.subr.msk.bf16.mxu0 %vm784_vm0, %v3209_v26 }
0x11e6   : > { %v3201_v43 = vpop.permute.xlu0 %3200 }
0x11e7   : > { %7111 = vmatprep.mubr.msk.bf16.mxu0 %vm784_vm0, %v3201_v43 }
0x11ea   : > { %v2999_v52 = vpop.xlane.xlu1 %2998  ;;  %v3297_v46 = vpop.permute.xlu0 %3296 }
0x11eb   : > { %7854 = vrcp.f32 %v2999_v52 }
0x11ec   : > { %7106 = vmatpush3.bf16.xpose.msra.mxu0 %v3227_v61  ;;  %7856 = vrcp.f32 %v2990_v33 }
0x11ed   : > { %7322 = vmatprep.subr.msk.bf16.mxu0 %vm784_vm0, %v3211_v48  ;;  %7858 = vrcp.f32 %v2996_v15  ;;  %v3233_v15 = vsel %vm784_vm0, %v3213_v12, 0 }
0x11ee   : > { %v2993_v60 = vpop.xlane.xlu1 %2992 }
0x11ef   : > { %7860 = vrcp.f32 %v2993_v60 }
0x11f2   : > { %v3291_v41 = vpop.permute.xlu1 %3290 }
0x11f3   : > { %7324 = vmatprep.subr.msk.bf16.mxu1 %vm784_vm0, %v3291_v41 }
0x11f4   : > { %7108 = vmatpush3.bf16.xpose.msra.mxu0 %v3230_v34  ;;  %v3287_v34 = vpop.permute.xlu0 %3286 }
0x11f5   : > { %7323 = vmatprep.subr.msk.bf16.mxu0 %vm784_vm0, %v3213_v12  ;;  %v7855_v21 = vpop.eup %7854  ;;  %v3316_v12 = vsel %vm784_vm0, %v3297_v46, 0 }
0x11f6   : > { %v3293_v55 = vpop.permute.xlu1 %3292  ;;  %v7857_v39 = vpop.eup %7856  ;;  %v3015_v33 = vmul.f32 %v7855_v21, %v9427_v53  ;;  %v3307_v53 = vsel %vm784_vm0, %v3291_v41, 0 }
0x11f7   : > { %v7859_v32 = vpop.eup %7858  ;;  %v3012_v26 = vmul.f32 %v7857_v39, %v9421_v20 }
0x11f8   : > { %v3014_v43 = vmul.f32 %v7859_v32, %v9417_v35  ;;  %v3310_v35 = vsel %vm784_vm0, %v3293_v55, 0 }
0x11f9   : > { %v7861_v19 = vpop.eup %7860 }
0x11fa   : > { %v3013_v48 = vmul.f32 %v7861_v19, %v9431_v49  ;;  %v3295_v52 = vpop.permute.xlu1 %3294  ;;  %v3019_v60 = vpack.c.bf16 %v3015_v33, %v3014_v43 }
0x11fb   : > { %v3313_v49 = vsel %vm784_vm0, %v3295_v52, 0 }
0x11fc   : > { %7110 = vmatpush3.bf16.xpose.msra.mxu0 %v3233_v15  ;;  %v3018_v61 = vpack.c.bf16 %v3013_v48, %v3012_v26 }
0x11fe   : > { %7097 = vmatprep.mubr.msk.bf16.mxu1 %vm2927_vm3, %v3018_v61  ;;  %v3203_v20 = vpop.permute.xlu1 %3202 }
0x11ff   : > { %7098 = vmatmul.mubr.msk.bf16.vlgmr.msra.gmra.mrb[60].mxu1 %vm2927_vm3, %v3019_v60 }
0x1200   : > { %7116 = vmatpush3.bf16.xpose.msra.mxu1 %v3307_v53  ;;  %7125 = vmatprep.mubr.msk.bf16.mxu1 %vm784_vm0, %v3287_v34 }
0x1201   : > { %7325 = vmatprep.subr.msk.bf16.mxu1 %vm784_vm0, %v3293_v55 }
0x1202   : > { %v3299_v41 = vpop.permute.xlu1 %3298 }
0x1203   : > { %7112 = vmatmul.mubr.msk.bf16.vlgmr.msra.gmra.mrb[56].mxu0 %vm784_vm0, %v3203_v20  ;;  %v3319_v21 = vsel %vm784_vm0, %v3299_v41, 0 }
0x1206   : > { %v3289_v39 = vpop.permute.xlu1 %3288 }
0x1208   : > { %7118 = vmatpush3.bf16.xpose.msra.mxu1 %v3310_v35 }
0x1209   : > { %7326 = vmatprep.subr.msk.bf16.mxu1 %vm784_vm0, %v3295_v52 }
0x1210   : > { %7120 = vmatpush3.bf16.xpose.msra.mxu1 %v3313_v49 }
0x1211   : > { %7327 = vmatprep.subr.msk.bf16.mxu1 %vm784_vm0, %v3297_v46 }
0x1218   : > { %7122 = vmatpush3.bf16.xpose.msra.mxu1 %v3316_v12 }
0x1219   : > { %7328 = vmatprep.subr.msk.bf16.mxu1 %vm784_vm0, %v3299_v41 }
0x1220   : > { %7124 = vmatpush3.bf16.xpose.msra.mxu1 %v3319_v21 }
0x1227   : > { %7126 = vmatmul.mubr.msk.bf16.vlgmr.msra.gmra.mrb[64].mxu1 %vm784_vm0, %v3289_v39 }
0x1294   : > { %v9506_v55 = vpop.f32.mrb[52].mxu0 }
0x1295   : > { %10681 = vst [vmem:[#allocation19_spill] sm:$0xff] %v9506_v55  ;;  %v9508_v32 = vpop.f32.mrb[53].mxu0 }
0x1296   : > { %10682 = vst [vmem:[#allocation20_spill] sm:$0xff] %v9508_v32  ;;  %v9510_v19 = vpop.f32.mrb[54].mxu0 }
0x1297   : > { %10683 = vst [vmem:[#allocation21_spill] sm:$0xff] %v9510_v19  ;;  %v9512_v33 = vpop.f32.mrb[55].mxu0 }
0x1298   : > { %10684 = vst [vmem:[#allocation22_spill] sm:$0xff] %v9512_v33 }
0x12d2   : > { %v9514_v15 = vpop.f32.mrb[60].mxu1 }
0x12d3   : > { %10685 = vst [vmem:[#allocation23_spill] sm:$0xff] %v9514_v15  ;;  %v9516_v46 = vpop.f32.mrb[61].mxu1 }
0x12d4   : > { %10686 = vst [vmem:[#allocation24_spill] sm:$0xff] %v9516_v46  ;;  %v9518_v26 = vpop.f32.mrb[62].mxu1 }
0x12d5   : > { %10687 = vst [vmem:[#allocation25_spill] sm:$0xff] %v9518_v26  ;;  %v9520_v48 = vpop.f32.mrb[63].mxu1 }
0x12d6   : > { %10688 = vst [vmem:[#allocation26_spill] sm:$0xff] %v9520_v48  ;;  %v7113_v43 = vpop.f32.mrb[56].mxu0 }
0x12d7   : > { %v3269_v52 = vpop.f32.mrb[57].mxu0  ;;  %v3376_v20 = vsel %vm2927_vm3, %v7113_v43, -inf }
0x12d8   : > { %v7114_v61 = vpop.f32.mrb[58].mxu0  ;;  %v3370_v60 = vsel %vm2927_vm3, %v3269_v52, -inf }
0x12d9   : > { %3371 = vmax.xlane.f32.xlu0 %v3370_v60  ;;  %v3272_v34 = vpop.f32.mrb[59].mxu0  ;;  %v3379_v35 = vsel %vm2927_vm3, %v7114_v61, -inf }
0x12da   : > { %v3373_v53 = vsel %vm2927_vm3, %v3272_v34, -inf }
0x12db   : > { %3374 = vmax.xlane.f32.xlu1 %v3373_v53 }
0x12dd   : > { %3377 = vmax.xlane.f32.xlu0 %v3376_v20 }
0x12e1   : > { %3380 = vmax.xlane.f32.xlu0 %v3379_v35 }
0x12ec   : > { %3464 = vrot.lane.b32.xlu1 %v9198_v59, %s8227_s12 }
0x12f7   : > { %3462 = vrot.lane.b32.xlu0 %v9195_v28, %s8227_s12 }
0x12fa   : > { %v9530_v49 = vpop.f32.mrb[64].mxu1 }
0x12fb   : > { %v9532_v12 = vpop.f32.mrb[65].mxu1 }
0x12fc   : > { %v9534_v41 = vpop.f32.mrb[66].mxu1 }
0x12fd   : > { %v9536_v21 = vpop.f32.mrb[67].mxu1 }
0x1366   : > { %v3372_v39 = vpop.xlane.xlu0 %3371 }
0x1367   : > { %v3394_v60 = vsub.f32 %v3269_v52, %v3372_v39 }
0x1368   : > { %v3375_v53 = vpop.xlane.xlu1 %3374 }
0x1369   : > { %v3402_v20 = vmul.f32 1.442695, %v3394_v60  ;;  %v3395_v18 = vsub.f32 %v3272_v34, %v3375_v53 }
0x136a   : > { %v3378_v35 = vpop.xlane.xlu0 %3377 }
0x136b   : > { %7862 = vpow2.f32 %v3402_v20  ;;  %v3396_v2 = vsub.f32 %v7113_v43, %v3378_v35  ;;  %v3404_v59 = vmul.f32 1.442695, %v3395_v18  ;;  %v3382_v18 = vsel %vm2927_vm3, %v9532_v12, -inf }
0x136c   : > { %v3465_v28 = vpop.permute.xlu1 %3464 }
0x136d   : > { %v3406_v17 = vmul.f32 1.442695, %v3396_v2  ;;  %v3483_v38 = vrot.slane %v3465_v28, 4 }
0x136e   : > { %v3381_v54 = vpop.xlane.xlu0 %3380 }
0x136f   : > { %7864 = vpow2.f32 %v3406_v17  ;;  %v3397_v4 = vsub.f32 %v7114_v61, %v3381_v54 }
0x1370   : > { %7866 = vpow2.f32 %v3404_v59 }
0x1371   : > { %v3408_v27 = vmul.f32 1.442695, %v3397_v4 }
0x1372   : > { %v3463_v50 = vpop.permute.xlu0 %3462 }
0x1373   : > { %7868 = vpow2.f32 %v3408_v27  ;;  %v3482_v46 = vrot.slane %v3463_v50, 4  ;;  %v3388_v50 = vsel %vm2927_vm3, %v9530_v49, -inf }
0x1375   : > { %v9538_v48 = vpop.eup %7862  ;;  %v6318_v52 = vcombine.low %v3482_v46, %v3483_v38 }
0x1376   : > { %v3418_v34 = vsel %vm2927_vm3, %v9538_v48, 0.0 }
0x1377   : > { %3419 = vadd.xlane.f32.xlu0 %v3418_v34  ;;  %7129 = vmatprep.subr.bf16.mxu0 %v6318_v52 }
0x1378   : > { %7130 = vmatpush3.bf16.msra.mxu0 %v6318_v52 }
0x1379   : > { %v9542_v2 = vpop.eup %7864 }
0x137a   : > { %v3424_v54 = vsel %vm2927_vm3, %v9542_v2, 0.0  ;;  %v7867_v17 = vpop.eup %7866 }
0x137b   : > { %3425 = vadd.xlane.f32.xlu1 %v3424_v54  ;;  %v3421_v38 = vsel %vm2927_vm3, %v7867_v17, 0.0 }
0x137d   : > { %v9546_v4 = vpop.eup %7868 }
0x137e   : > { %v3427_v27 = vsel %vm2927_vm3, %v9546_v4, 0.0 }
0x137f   : > { %3428 = vadd.xlane.f32.xlu0 %v3427_v27  ;;  %3422 = vadd.xlane.f32.xlu1 %v3421_v38 }
0x1383   : > { %3389 = vmax.xlane.f32.xlu0 %v3388_v50 }
0x1387   : > { %3383 = vmax.xlane.f32.xlu0 %v3382_v18 }
0x1390   : > { %3468 = vrot.lane.b32.xlu1 %v9208_v44, %s8227_s12  ;;  %v3385_v44 = vsel %vm2927_vm3, %v9536_v21, -inf }
0x1394   : > { %3470 = vrot.lane.b32.xlu1 %v9221_v51, %s8227_s12 }
0x1398   : > { %3472 = vrot.lane.b32.xlu1 %v9224_v40, %s8227_s12 }
0x139c   : > { %3476 = vrot.lane.b32.xlu1 %v9238_v9, %s8227_s12 }
0x139d   : > { %3466 = vrot.lane.b32.xlu0 %v9201_v47, %s8227_s12  ;;  %v3391_v47 = vsel %vm2927_vm3, %v9534_v41, -inf }
0x13a1   : > { %3474 = vrot.lane.b32.xlu0 %v9235_v8, %s8227_s12 }
0x13a5   : > { %3478 = vrot.lane.b32.xlu0 %v9263_v6, %s8227_s12 }
0x13a9   : > { %3569 = vrot.lane.b32.xlu0 %v9277_v14, %s8227_s12 }
0x13ad   : > { %3573 = vrot.lane.b32.xlu0 %v9291_v29, %s8227_s12 }
0x13b1   : > { %3577 = vrot.lane.b32.xlu0 %v9297_v31, %s8227_s12 }
0x13b5   : > { %3581 = vrot.lane.b32.xlu0 %v9317_v42, %s8227_s12 }
0x13b9   : > { %3680 = vrot.lane.b32.xlu0 %v9205_v3, %s8228_s13 }
0x13bd   : > { %3587 = vrot.lane.b32.xlu0 %v9336_v30, %s8227_s12 }
0x13c0   : > { %3392 = vmax.xlane.f32.xlu1 %v3391_v47 }
0x13c4   : > { %3386 = vmax.xlane.f32.xlu1 %v3385_v44 }
0x13d5   : > { %3480 = vrot.lane.b32.xlu1 %v9266_v0, %s8227_s12 }
0x13d9   : > { %3571 = vrot.lane.b32.xlu1 %v9280_v10, %s8227_s12 }
0x13dd   : > { %3575 = vrot.lane.b32.xlu1 %v9294_v37, %s8227_s12 }
0x13e1   : > { %3579 = vrot.lane.b32.xlu1 %v9304_v56, %s8227_s12 }
0x13e5   : > { %3583 = vrot.lane.b32.xlu1 %v9320_v23, %s8227_s12 }
0x13e9   : > { %3585 = vrot.lane.b32.xlu1 %v9333_v24, %s8227_s12 }
0x13ed   : > { %3682 = vrot.lane.b32.xlu1 %v9212_v5, %s8228_s13 }
0x1404   : > { %v3420_v51 = vpop.xlane.xlu0 %3419 }
0x1405   : > { %7870 = vrcp.f32 %v3420_v51 }
0x1408   : > { %v3426_v40 = vpop.xlane.xlu1 %3425 }
0x140c   : > { %v3429_v8 = vpop.xlane.xlu0 %3428  ;;  %v3423_v9 = vpop.xlane.xlu1 %3422 }
0x140d   : > { %7872 = vrcp.f32 %v3423_v9 }
0x140f   : > { %v7871_v31 = vpop.eup %7870 }
0x1410   : > { %v3390_v6 = vpop.xlane.xlu0 %3389  ;;  %v3469_v0 = vpop.permute.xlu1 %3468  ;;  %v3450_v43 = vmul.f32 %v7871_v31, %v9538_v48 }
0x1411   : > { %v3400_v14 = vsub.f32 %v9530_v49, %v3390_v6  ;;  %v3485_v24 = vrot.slane %v3469_v0, 4 }
0x1413   : > { %v3414_v10 = vmul.f32 1.442695, %v3400_v14 }
0x1414   : > { %v3384_v29 = vpop.xlane.xlu0 %3383  ;;  %v3471_v37 = vpop.permute.xlu1 %3470 }
0x1415   : > { %7874 = vpow2.f32 %v3414_v10  ;;  %v3398_v56 = vsub.f32 %v9532_v12, %v3384_v29  ;;  %v3486_v53 = vrot.slane %v3471_v37, 4 }
0x1417   : > { %v3410_v42 = vmul.f32 1.442695, %v3398_v56  ;;  %v7873_v23 = vpop.eup %7872 }
0x1418   : > { %v3467_v30 = vpop.permute.xlu0 %3466  ;;  %v3473_v46 = vpop.permute.xlu1 %3472  ;;  %v3451_v60 = vmul.f32 %v7873_v23, %v7867_v17 }
0x1419   : > { %7876 = vpow2.f32 %v3410_v42  ;;  %v3484_v61 = vrot.slane %v3467_v30, 4  ;;  %v3487_v39 = vrot.slane %v3473_v46, 4 }
0x141a   : > { %v3458_v20 = vpack.c.bf16 %v3451_v60, %v3450_v43  ;;  %7878 = vrcp.f32 %v3429_v8 }
0x141b   : > { %v6319_v49 = vcombine.low %v3484_v61, %v3485_v24  ;;  %v6320_v28 = vcombine.low %v3486_v53, %v3487_v39  ;;  %7880 = vrcp.f32 %v3426_v40 }
0x141c   : > { %v3475_v35 = vpop.permute.xlu0 %3474  ;;  %v3477_v59 = vpop.permute.xlu1 %3476  ;;  %7139 = vmatprep.mubr.msk.bf16.mxu0 %vm2927_vm3, %v3458_v20 }
0x141d   : > { %v3488_v52 = vrot.slane %v3475_v35, 4  ;;  %v3489_v12 = vrot.slane %v3477_v59, 4  ;;  %7131 = vmatprep.subr.bf16.mxu0 %v6319_v49 }
0x141e   : > { %7132 = vmatpush3.bf16.msra.mxu0 %v6319_v49 }
0x141f   : > { %v9603_v34 = vpop.eup %7874  ;;  %7133 = vmatprep.subr.bf16.mxu0 %v6320_v28  ;;  %v6321_v54 = vcombine.low %v3488_v52, %v3489_v12 }
0x1420   : > { %v3436_v48 = vsel %vm2927_vm3, %v9603_v34, 0.0  ;;  %v3479_v38 = vpop.permute.xlu0 %3478 }
0x1421   : > { %3437 = vadd.xlane.f32.xlu0 %v3436_v48  ;;  %v3490_v10 = vrot.slane %v3479_v38, 4 }
0x1422   : > { %7134 = vmatpush3.bf16.msra.mxu0 %v6320_v28 }
0x1423   : > { %v9607_v17 = vpop.eup %7876  ;;  %7135 = vmatprep.subr.bf16.mxu0 %v6321_v54 }
0x1424   : > { %v3430_v27 = vsel %vm2927_vm3, %v9607_v17, 0.0  ;;  %v3570_v50 = vpop.permute.xlu0 %3569  ;;  %v7879_v8 = vpop.eup %7878 }
0x1425   : > { %3431 = vadd.xlane.f32.xlu0 %v3430_v27  ;;  %v3589_v42 = vrot.slane %v3570_v50, 4  ;;  %v3453_v23 = vmul.f32 %v7879_v8, %v9546_v4 }
0x1426   : > { %7136 = vmatpush3.bf16.msra.mxu0 %v6321_v54 }
0x1428   : > { %v3574_v18 = vpop.permute.xlu0 %3573 }
0x1429   : > { %v3591_v43 = vrot.slane %v3574_v18, 4 }
0x142c   : > { %v3578_v9 = vpop.permute.xlu0 %3577 }
0x1430   : > { %v3582_v31 = vpop.permute.xlu0 %3581 }
0x1431   : > { %v3595_v48 = vrot.slane %v3582_v31, 4 }
0x1434   : > { %v3681_v39 = vpop.permute.xlu0 %3680 }
0x1435   : > { %v3697_v12 = vsel %vm784_vm0, %v3681_v39, 0 }
0x1438   : > { %v3588_v27 = vpop.permute.xlu0 %3587 }
0x1439   : > { %v3598_v18 = vrot.slane %v3588_v27, 4 }
0x143b   : > { %3684 = vrot.lane.b32.xlu0 %v9230_v13, %s8228_s13 }
0x143f   : > { %3686 = vrot.lane.b32.xlu0 %v9244_v11, %s8228_s13 }
0x1443   : > { %3688 = vrot.lane.b32.xlu0 %v9270_v63, %s8228_s13 }
0x1447   : > { %3676 = vrot.lane.b32.xlu0 %v9352_v7, %s8228_s13 }
0x144b   : > { %3770 = vrot.lane.b32.xlu0 %v9326_v1, %s8228_s13 }
0x144d   : > { %v3393_v47 = vpop.xlane.xlu1 %3392 }
0x144e   : > { %v3401_v44 = vsub.f32 %v9534_v41, %v3393_v47  ;;  %v7881_v41 = vpop.eup %7880 }
0x144f   : > { %3760 = vrot.lane.b32.xlu0 %v9360_v58, %s8228_s13 }
0x1450   : > { %v3416_v51 = vmul.f32 1.442695, %v3401_v44 }
0x1451   : > { %v3387_v6 = vpop.xlane.xlu1 %3386 }
0x1452   : > { %7882 = vpow2.f32 %v3416_v51  ;;  %v3399_v0 = vsub.f32 %v9536_v21, %v3387_v6  ;;  %v3452_v21 = vmul.f32 %v7881_v41, %v9542_v2  ;;  %v3593_v2 = vrot.slane %v3578_v9, 4 }
0x1454   : > { %v3412_v14 = vmul.f32 1.442695, %v3399_v0  ;;  %v3459_v49 = vpack.c.bf16 %v3453_v23, %v3452_v21 }
0x1455   : > { %v3481_v29 = vpop.permute.xlu1 %3480 }
0x1456   : > { %7884 = vpow2.f32 %v3412_v14  ;;  %v3491_v37 = vrot.slane %v3481_v29, 4 }
0x1458   : > { %v6322_v56 = vcombine.low %v3490_v10, %v3491_v37 }
0x1459   : > { %v3572_v40 = vpop.permute.xlu1 %3571 }
0x145a   : > { %v3518_v24 = vand.u32 %v6322_v56, %v9414_v57  ;;  %v3590_v30 = vrot.slane %v3572_v40, 4 }
0x145c   : > { %v9627_v46 = vpop.eup %7882  ;;  %7137 = vmatprep.subr.bf16.mxu0 %v3518_v24  ;;  %v6325_v61 = vcombine.low %v3589_v42, %v3590_v30 }
0x145d   : > { %7138 = vmatpush3.bf16.msra.mxu0 %v3518_v24  ;;  %v3439_v60 = vsel %vm2927_vm3, %v9627_v46, 0.0  ;;  %v3576_v53 = vpop.permute.xlu1 %3575 }
0x145e   : > { %3440 = vadd.xlane.f32.xlu1 %v3439_v60  ;;  %v3592_v20 = vrot.slane %v3576_v53, 4  ;;  %7143 = vmatprep.subr.bf16.mxu1 %v6325_v61 }
0x145f   : > { %7144 = vmatpush3.bf16.msra.mxu1 %v6325_v61  ;;  %7329 = vmatprep.subr.msk.bf16.mxu0 %vm784_vm0, %v3681_v39 }
0x1460   : > { %v9633_v4 = vpop.eup %7884  ;;  %7140 = vmatmul.mubr.msk.bf16.vlgmr.msra.gmra.mrb[60].mxu0 %vm2927_vm3, %v3459_v49  ;;  %v6326_v35 = vcombine.low %v3591_v43, %v3592_v20 }
0x1461   : > { %v3433_v59 = vsel %vm2927_vm3, %v9633_v4, 0.0  ;;  %v3580_v28 = vpop.permute.xlu1 %3579 }
0x1462   : > { %3434 = vadd.xlane.f32.xlu1 %v3433_v59  ;;  %v3594_v52 = vrot.slane %v3580_v28, 4  ;;  %7145 = vmatprep.subr.bf16.mxu1 %v6326_v35 }
0x1463   : > { %7146 = vmatpush3.bf16.msra.mxu1 %v6326_v35 }
0x1464   : > { %v6327_v54 = vcombine.low %v3593_v2, %v3594_v52 }
0x1465   : > { %v3584_v38 = vpop.permute.xlu1 %3583 }
0x1466   : > { %v3596_v50 = vrot.slane %v3584_v38, 4  ;;  %7147 = vmatprep.subr.bf16.mxu1 %v6327_v54  ;;  %7158 = vmatpush3.bf16.xpose.msra.mxu0 %v3697_v12 }
0x1467   : > { %7148 = vmatpush3.bf16.msra.mxu1 %v6327_v54 }
0x1468   : > { %v6328_v47 = vcombine.low %v3595_v48, %v3596_v50 }
0x1469   : > { %v3586_v44 = vpop.permute.xlu1 %3585 }
0x146a   : > { %7149 = vmatprep.subr.bf16.mxu1 %v6328_v47  ;;  %v3597_v51 = vrot.slane %v3586_v44, 4 }
0x146b   : > { %7150 = vmatpush3.bf16.msra.mxu1 %v6328_v47 }
0x146c   : > { %v6329_v9 = vcombine.low %v3597_v51, %v3598_v18 }
0x146d   : > { %v3683_v6 = vpop.permute.xlu1 %3682 }
0x146e   : > { %v3625_v0 = vand.u32 %v6329_v9, %v9414_v57  ;;  %7330 = vmatprep.subr.msk.bf16.mxu0 %vm784_vm0, %v3683_v6  ;;  %v3700_v14 = vsel %vm784_vm0, %v3683_v6, 0 }
0x146f   : > { %7160 = vmatpush3.bf16.xpose.msra.mxu0 %v3700_v14 }
0x1470   : > { %7151 = vmatprep.subr.bf16.mxu1 %v3625_v0 }
0x1471   : > { %7152 = vmatpush3.bf16.msra.mxu1 %v3625_v0 }
0x1473   : > { %3764 = vrot.lane.b32.xlu1 %v9284_v62, %s8228_s13 }
0x1477   : > { %3766 = vrot.lane.b32.xlu1 %v9301_v22, %s8228_s13 }
0x147b   : > { %3768 = vrot.lane.b32.xlu1 %v9308_v36, %s8228_s13 }
0x147f   : > { %3678 = vrot.lane.b32.xlu1 %v9350_v16, %s8228_s13 }
0x1483   : > { %3772 = vrot.lane.b32.xlu1 %v9340_v45, %s8228_s13 }
0x1487   : > { %3762 = vrot.lane.b32.xlu1 %v9358_v25, %s8228_s13 }
0x14ae   : > { %v3438_v10 = vpop.xlane.xlu0 %3437 }
0x14b2   : > { %v3432_v29 = vpop.xlane.xlu0 %3431 }
0x14b6   : > { %v3685_v37 = vpop.permute.xlu0 %3684 }
0x14b7   : > { %7331 = vmatprep.subr.msk.bf16.mxu0 %vm784_vm0, %v3685_v37  ;;  %v3703_v31 = vsel %vm784_vm0, %v3685_v37, 0 }
0x14b8   : > { %7162 = vmatpush3.bf16.xpose.msra.mxu0 %v3703_v31 }
0x14ba   : > { %v3687_v8 = vpop.permute.xlu0 %3686 }
0x14bb   : > { %7332 = vmatprep.subr.msk.bf16.mxu0 %vm784_vm0, %v3687_v8  ;;  %v3706_v56 = vsel %vm784_vm0, %v3687_v8, 0 }
0x14be   : > { %v3689_v42 = vpop.permute.xlu0 %3688 }
0x14bf   : > { %v3709_v40 = vsel %vm784_vm0, %v3689_v42, 0 }
0x14c0   : > { %7164 = vmatpush3.bf16.xpose.msra.mxu0 %v3706_v56 }
0x14c1   : > { %7333 = vmatprep.subr.msk.bf16.mxu0 %vm784_vm0, %v3689_v42 }
0x14c2   : > { %v3677_v41 = vpop.permute.xlu0 %3676 }
0x14c3   : > { %7167 = vmatprep.mubr.msk.bf16.mxu0 %vm784_vm0, %v3677_v41 }
0x14c6   : > { %v3771_v53 = vpop.permute.xlu0 %3770 }
0x14c8   : > { %7166 = vmatpush3.bf16.xpose.msra.mxu0 %v3709_v40 }
0x14ca   : > { %v3761_v48 = vpop.permute.xlu0 %3760 }
0x14eb   : > { %v3441_v23 = vpop.xlane.xlu1 %3440 }
0x14ec   : > { %7886 = vrcp.f32 %v3441_v23 }
0x14ed   : > { %7888 = vrcp.f32 %v3432_v29 }
0x14ee   : > { %7890 = vrcp.f32 %v3438_v10 }
0x14ef   : > { %v3435_v24 = vpop.xlane.xlu1 %3434 }
0x14f0   : > { %7892 = vrcp.f32 %v3435_v24 }
0x14f3   : > { %v3765_v30 = vpop.permute.xlu1 %3764 }
0x14f4   : > { %7334 = vmatprep.subr.msk.bf16.mxu1 %vm784_vm0, %v3765_v30  ;;  %v3781_v54 = vsel %vm784_vm0, %v3765_v30, 0  ;;  %v9709_v30 = vld [vmem:[%s9192_s26 + $0x8] sm:$0xff] }
0x14f6   : > { %v7887_v21 = vpop.eup %7886 }
0x14f7   : > { %v3767_v43 = vpop.permute.xlu1 %3766  ;;  %v7889_v61 = vpop.eup %7888  ;;  %v3457_v49 = vmul.f32 %v7887_v21, %v9627_v46  ;;  %v3790_v46 = vsel %vm784_vm0, %v3771_v53, 0  ;;  %v9714_v21 = vld [vmem:[%s9192_s26] sm:$0xff] }
0x14f8   : > { %v7891_v39 = vpop.eup %7890  ;;  %v3454_v2 = vmul.f32 %v7889_v61, %v9607_v17  ;;  %v3784_v17 = vsel %vm784_vm0, %v3767_v43, 0 }
0x14f9   : > { %v3456_v59 = vmul.f32 %v7891_v39, %v9603_v34 }
0x14fa   : > { %v7893_v60 = vpop.eup %7892 }
0x14fb   : > { %v3769_v20 = vpop.permute.xlu1 %3768  ;;  %v3455_v35 = vmul.f32 %v7893_v60, %v9633_v4  ;;  %v3461_v52 = vpack.c.bf16 %v3457_v49, %v3456_v59 }
0x14fc   : > { %v3787_v34 = vsel %vm784_vm0, %v3769_v20, 0 }
0x14fd   : > { %v3460_v28 = vpack.c.bf16 %v3455_v35, %v3454_v2 }
0x14ff   : > { %7153 = vmatprep.mubr.msk.bf16.mxu1 %vm2927_vm3, %v3460_v28  ;;  %v3679_v12 = vpop.permute.xlu1 %3678 }
0x1500   : > { %7154 = vmatmul.mubr.msk.bf16.vlgmr.msra.gmra.mrb[68].mxu1 %vm2927_vm3, %v3461_v52  ;;  %7168 = vmatmul.mubr.msk.bf16.vlgmr.msra.gmra.mrb[64].mxu0 %vm784_vm0, %v3679_v12 }
0x1501   : > { %7172 = vmatpush3.bf16.xpose.msra.mxu1 %v3781_v54  ;;  %7181 = vmatprep.mubr.msk.bf16.mxu1 %vm784_vm0, %v3761_v48 }
0x1502   : > { %7335 = vmatprep.subr.msk.bf16.mxu1 %vm784_vm0, %v3767_v43 }
0x1503   : > { %v3773_v4 = vpop.permute.xlu1 %3772 }
0x1504   : > { %v3793_v27 = vsel %vm784_vm0, %v3773_v4, 0 }
0x1507   : > { %v3763_v38 = vpop.permute.xlu1 %3762 }
0x1509   : > { %7174 = vmatpush3.bf16.xpose.msra.mxu1 %v3784_v17 }
0x150a   : > { %7336 = vmatprep.subr.msk.bf16.mxu1 %vm784_vm0, %v3769_v20 }
0x1511   : > { %7176 = vmatpush3.bf16.xpose.msra.mxu1 %v3787_v34 }
0x1512   : > { %7337 = vmatprep.subr.msk.bf16.mxu1 %vm784_vm0, %v3771_v53 }
0x1519   : > { %7178 = vmatpush3.bf16.xpose.msra.mxu1 %v3790_v46 }
0x151a   : > { %7338 = vmatprep.subr.msk.bf16.mxu1 %vm784_vm0, %v3773_v4 }
0x1521   : > { %7180 = vmatpush3.bf16.xpose.msra.mxu1 %v3793_v27 }
0x1528   : > { %7182 = vmatmul.mubr.msk.bf16.vlgmr.msra.gmra.mrb[72].mxu1 %vm784_vm0, %v3763_v38 }
0x1533   : > { %v9680_v50 = vpop.f32.mrb[60].mxu0 }
0x1534   : > { %10689 = vst [vmem:[#allocation27_spill] sm:$0xff] %v9680_v50  ;;  %v9682_v18 = vpop.f32.mrb[61].mxu0 }
0x1535   : > { %10690 = vst [vmem:[#allocation28_spill] sm:$0xff] %v9682_v18  ;;  %v9684_v47 = vpop.f32.mrb[62].mxu0 }
0x1536   : > { %v9688_v51 = vpop.f32.mrb[63].mxu0 }
0x1537   : > { %10691 = vst [vmem:[#allocation29_spill] sm:$0xff] %v9688_v51 }
0x15d3   : > { %v9692_v6 = vpop.f32.mrb[68].mxu1  ;;  %v7169_v0 = vpop.f32.mrb[64].mxu0 }
0x15d4   : > { %10692 = vst [vmem:[#allocation30_spill] sm:$0xff] %v9692_v6  ;;  %v9694_v14 = vpop.f32.mrb[69].mxu1  ;;  %v3745_v10 = vpop.f32.mrb[65].mxu0  ;;  %v3850_v23 = vsel %vm2927_vm3, %v7169_v0, -inf }
0x15d5   : > { %10693 = vst [vmem:[#allocation31_spill] sm:$0xff] %v9694_v14  ;;  %v9696_v29 = vpop.f32.mrb[70].mxu1  ;;  %v7170_v37 = vpop.f32.mrb[66].mxu0  ;;  %v3844_v31 = vsel %vm2927_vm3, %v3745_v10, -inf }
0x15d6   : > { %10694 = vst [vmem:[#allocation32_spill] sm:$0xff] %v9696_v29  ;;  %v9701_v56 = vpop.f32.mrb[71].mxu1  ;;  %3845 = vmax.xlane.f32.xlu0 %v3844_v31  ;;  %v3748_v42 = vpop.f32.mrb[67].mxu0  ;;  %v3853_v24 = vsel %vm2927_vm3, %v7170_v37, -inf }
0x15d7   : > { %10695 = vst [vmem:[#allocation33_spill] sm:$0xff] %v9701_v56  ;;  %v3847_v40 = vsel %vm2927_vm3, %v3748_v42, -inf }
0x15d8   : > { %3848 = vmax.xlane.f32.xlu1 %v3847_v40 }
0x15da   : > { %3851 = vmax.xlane.f32.xlu0 %v3850_v23 }
0x15de   : > { %3854 = vmax.xlane.f32.xlu0 %v3853_v24 }
0x15e9   : > { %3938 = vrot.lane.b32.xlu1 %v9709_v30, %s8228_s13 }
0x15f4   : > { %3936 = vrot.lane.b32.xlu0 %v9714_v21, %s8228_s13 }
0x15fb   : > { %v9718_v43 = vpop.f32.mrb[72].mxu1 }
0x15fc   : > { %v9720_v61 = vpop.f32.mrb[73].mxu1 }
0x15fd   : > { %v9722_v39 = vpop.f32.mrb[74].mxu1 }
0x15fe   : > { %v9724_v60 = vpop.f32.mrb[75].mxu1 }
0x1663   : > { %v3846_v53 = vpop.xlane.xlu0 %3845 }
0x1664   : > { %v3868_v49 = vsub.f32 %v3745_v10, %v3846_v53  ;;  %v3862_v53 = vsel %vm2927_vm3, %v9718_v43, -inf }
0x1665   : > { %v3849_v20 = vpop.xlane.xlu1 %3848 }
0x1666   : > { %v3876_v2 = vmul.f32 1.442695, %v3868_v49  ;;  %v3869_v35 = vsub.f32 %v3748_v42, %v3849_v20  ;;  %v3856_v49 = vsel %vm2927_vm3, %v9720_v61, -inf  ;;  %v9747_v20 = vld [vmem:[%s9192_s26 + $0x18] sm:$0xff] }
0x1667   : > { %v3852_v59 = vpop.xlane.xlu0 %3851 }
0x1668   : > { %7894 = vpow2.f32 %v3876_v2  ;;  %v3870_v28 = vsub.f32 %v7169_v0, %v3852_v59  ;;  %v3878_v52 = vmul.f32 1.442695, %v3869_v35  ;;  %v9752_v2 = vld [vmem:[%s9192_s26 + $0x20] sm:$0xff]  ;;  %v9757_v35 = vld [vmem:[%s9192_s26 + $0x28] sm:$0xff]  ;;  %v9762_v59 = vld [vmem:[%s9192_s26 + $0x38] sm:$0xff] }
0x1669   : > { %v3939_v54 = vpop.permute.xlu1 %3938 }
0x166a   : > { %v3880_v12 = vmul.f32 1.442695, %v3870_v28  ;;  %v3957_v46 = vrot.slane %v3939_v54, 4  ;;  %v9767_v28 = vld [vmem:[%s9192_s26 + $0x10] sm:$0xff]  ;;  %v9787_v54 = vld [vmem:[%s9192_s26 + $0x60] sm:$0xff] }
0x166b   : > { %v3855_v48 = vpop.xlane.xlu0 %3854 }
0x166c   : > { %7896 = vpow2.f32 %v3880_v12  ;;  %v3871_v17 = vsub.f32 %v7170_v37, %v3855_v48  ;;  %v9777_v12 = vld [vmem:[%s9192_s26 + $0x40] sm:$0xff]  ;;  %v9782_v48 = vld [vmem:[%s9192_s26 + $0x50] sm:$0xff] }
0x166d   : > { %7898 = vpow2.f32 %v3878_v52  ;;  %v9772_v52 = vld [vmem:[%s9192_s26 + $0x30] sm:$0xff] }
0x166e   : > { %v3882_v34 = vmul.f32 1.442695, %v3871_v17  ;;  %v9792_v17 = vld [vmem:[%s9192_s26 + $0x70] sm:$0xff] }
0x166f   : > { %v3937_v4 = vpop.permute.xlu0 %3936 }
0x1670   : > { %7900 = vpow2.f32 %v3882_v34  ;;  %v3956_v27 = vrot.slane %v3937_v4, 4  ;;  %v9797_v34 = vld [vmem:[%s9192_s26 + $0x80] sm:$0xff]  ;;  %v3865_v4 = vsel %vm2927_vm3, %v9722_v39, -inf }
0x1672   : > { %v9726_v38 = vpop.eup %7894  ;;  %v6336_v10 = vcombine.low %v3956_v27, %v3957_v46  ;;  %v9804_v46 = vld [vmem:[%s9192_s26 + $0x98] sm:$0x77]  ;;  %v3859_v27 = vsel %vm2927_vm3, %v9724_v60, -inf }
0x1673   : > { %v3892_v31 = vsel %vm2927_vm3, %v9726_v38, 0.0 }
0x1674   : > { %3893 = vadd.xlane.f32.xlu0 %v3892_v31  ;;  %7185 = vmatprep.subr.bf16.mxu0 %v6336_v10  ;;  %v9823_v31 = vld [vmem:[%s9192_s26 + $0x68] sm:$0xff] }
0x1675   : > { %7186 = vmatpush3.bf16.msra.mxu0 %v6336_v10  ;;  %v9813_v10 = vld [vmem:[%s9192_s26 + $0x48] sm:$0x77] }
0x1676   : > { %v9730_v0 = vpop.eup %7896 }
0x1677   : > { %v3898_v37 = vsel %vm2927_vm3, %v9730_v0, 0.0  ;;  %v9734_v42 = vpop.eup %7898 }
0x1678   : > { %3899 = vadd.xlane.f32.xlu1 %v3898_v37  ;;  %v3895_v24 = vsel %vm2927_vm3, %v9734_v42, 0.0  ;;  %v9828_v37 = vld [vmem:[%s9192_s26 + $0x78] sm:$0xff] }
0x167a   : > { %v9736_v40 = vpop.eup %7900 }
0x167b   : > { %v3901_v23 = vsel %vm2927_vm3, %v9736_v40, 0.0 }
0x167c   : > { %3902 = vadd.xlane.f32.xlu0 %v3901_v23  ;;  %3896 = vadd.xlane.f32.xlu1 %v3895_v24  ;;  %v9833_v23 = vld [vmem:[%s9192_s26 + $0x88] sm:$0xff]  ;;  %v9838_v24 = vld [vmem:[%s9192_s26 + $0x90] sm:$0xff] }
0x1680   : > { %3863 = vmax.xlane.f32.xlu0 %v3862_v53 }
0x1684   : > { %3857 = vmax.xlane.f32.xlu0 %v3856_v49 }
0x168d   : > { %3942 = vrot.lane.b32.xlu1 %v9747_v20, %s8228_s13 }
0x1691   : > { %3944 = vrot.lane.b32.xlu1 %v9752_v2, %s8228_s13 }
0x1695   : > { %3946 = vrot.lane.b32.xlu1 %v9757_v35, %s8228_s13 }
0x1699   : > { %3950 = vrot.lane.b32.xlu1 %v9762_v59, %s8228_s13 }
0x169a   : > { %3940 = vrot.lane.b32.xlu0 %v9767_v28, %s8228_s13 }
0x169e   : > { %3948 = vrot.lane.b32.xlu0 %v9772_v52, %s8228_s13 }
0x16a2   : > { %3952 = vrot.lane.b32.xlu0 %v9777_v12, %s8228_s13 }
0x16a6   : > { %4043 = vrot.lane.b32.xlu0 %v9782_v48, %s8228_s13 }
0x16aa   : > { %4047 = vrot.lane.b32.xlu0 %v9787_v54, %s8228_s13 }
0x16ae   : > { %4051 = vrot.lane.b32.xlu0 %v9792_v17, %s8228_s13 }
0x16b2   : > { %4055 = vrot.lane.b32.xlu0 %v9797_v34, %s8228_s13 }
0x16b6   : > { %4154 = vrot.lane.b32.xlu0 %v9205_v3, %s8229_s8  ;;  %v9818_v3 = vld [vmem:[%s9192_s26 + $0x58] sm:$0xff] }
0x16ba   : > { %4061 = vrot.lane.b32.xlu0 %v9804_v46, %s8228_s13 }
0x16bd   : > { %3866 = vmax.xlane.f32.xlu1 %v3865_v4 }
0x16c1   : > { %3860 = vmax.xlane.f32.xlu1 %v3859_v27 }
0x16d2   : > { %3954 = vrot.lane.b32.xlu1 %v9813_v10, %s8228_s13 }
0x16d6   : > { %4045 = vrot.lane.b32.xlu1 %v9818_v3, %s8228_s13 }
0x16da   : > { %4049 = vrot.lane.b32.xlu1 %v9823_v31, %s8228_s13 }
0x16de   : > { %4053 = vrot.lane.b32.xlu1 %v9828_v37, %s8228_s13 }
0x16e2   : > { %4057 = vrot.lane.b32.xlu1 %v9833_v23, %s8228_s13 }
0x16e6   : > { %4059 = vrot.lane.b32.xlu1 %v9838_v24, %s8228_s13 }
0x16ea   : > { %4156 = vrot.lane.b32.xlu1 %v9212_v5, %s8229_s8 }
0x1701   : > { %v3894_v53 = vpop.xlane.xlu0 %3893 }
0x1702   : > { %7902 = vrcp.f32 %v3894_v53 }
0x1705   : > { %v3900_v49 = vpop.xlane.xlu1 %3899 }
0x1709   : > { %v3903_v4 = vpop.xlane.xlu0 %3902  ;;  %v3897_v27 = vpop.xlane.xlu1 %3896 }
0x170a   : > { %7904 = vrcp.f32 %v3897_v27 }
0x170c   : > { %v7903_v55 = vpop.eup %7902 }
0x170d   : > { %v3864_v41 = vpop.xlane.xlu0 %3863  ;;  %v3943_v8 = vpop.permute.xlu1 %3942  ;;  %v3924_v53 = vmul.f32 %v7903_v55, %v9726_v38 }
0x170e   : > { %v3874_v9 = vsub.f32 %v9718_v43, %v3864_v41  ;;  %v3959_v5 = vrot.slane %v3943_v8, 4 }
0x1710   : > { %v3888_v44 = vmul.f32 1.442695, %v3874_v9 }
0x1711   : > { %v3858_v15 = vpop.xlane.xlu0 %3857  ;;  %v3945_v26 = vpop.permute.xlu1 %3944 }
0x1712   : > { %7906 = vpow2.f32 %v3888_v44  ;;  %v3872_v19 = vsub.f32 %v9720_v61, %v3858_v15  ;;  %v3960_v41 = vrot.slane %v3945_v26, 4 }
0x1714   : > { %v3884_v32 = vmul.f32 1.442695, %v3872_v19  ;;  %v7905_v33 = vpop.eup %7904 }
0x1715   : > { %v3941_v14 = vpop.permute.xlu0 %3940  ;;  %v3947_v56 = vpop.permute.xlu1 %3946  ;;  %v3925_v29 = vmul.f32 %v7905_v33, %v9734_v42 }
0x1716   : > { %7908 = vpow2.f32 %v3884_v32  ;;  %v3958_v27 = vrot.slane %v3941_v14, 4  ;;  %v3961_v6 = vrot.slane %v3947_v56, 4 }
0x1717   : > { %v3932_v43 = vpack.c.bf16 %v3925_v29, %v3924_v53  ;;  %7910 = vrcp.f32 %v3903_v4 }
0x1718   : > { %v6337_v9 = vcombine.low %v3958_v27, %v3959_v5  ;;  %v6338_v44 = vcombine.low %v3960_v41, %v3961_v6  ;;  %7912 = vrcp.f32 %v3900_v49 }
0x1719   : > { %v3949_v18 = vpop.permute.xlu0 %3948  ;;  %v3951_v51 = vpop.permute.xlu1 %3950  ;;  %7195 = vmatprep.mubr.msk.bf16.mxu0 %vm2927_vm3, %v3932_v43 }
0x171a   : > { %v3962_v50 = vrot.slane %v3949_v18, 4  ;;  %v3963_v19 = vrot.slane %v3951_v51, 4  ;;  %7187 = vmatprep.subr.bf16.mxu0 %v6337_v9 }
0x171b   : > { %7188 = vmatpush3.bf16.msra.mxu0 %v6337_v9 }
0x171c   : > { %v9849_v15 = vpop.eup %7906  ;;  %7189 = vmatprep.subr.bf16.mxu0 %v6338_v44  ;;  %v6339_v32 = vcombine.low %v3962_v50, %v3963_v19 }
0x171d   : > { %v3910_v55 = vsel %vm2927_vm3, %v9849_v15, 0.0  ;;  %v3953_v18 = vpop.permute.xlu0 %3952 }
0x171e   : > { %3911 = vadd.xlane.f32.xlu0 %v3910_v55 }
0x171f   : > { %7190 = vmatpush3.bf16.msra.mxu0 %v6338_v44 }
0x1720   : > { %v9853_v33 = vpop.eup %7908  ;;  %7191 = vmatprep.subr.bf16.mxu0 %v6339_v32 }
0x1721   : > { %v3904_v26 = vsel %vm2927_vm3, %v9853_v33, 0.0  ;;  %v4044_v50 = vpop.permute.xlu0 %4043  ;;  %v7911_v38 = vpop.eup %7910 }
0x1722   : > { %3905 = vadd.xlane.f32.xlu0 %v3904_v26  ;;  %v4063_v4 = vrot.slane %v4044_v50, 4  ;;  %v3927_v5 = vmul.f32 %v7911_v38, %v9736_v40 }
0x1723   : > { %7192 = vmatpush3.bf16.msra.mxu0 %v6339_v32 }
0x1725   : > { %v4048_v51 = vpop.permute.xlu0 %4047 }
0x1726   : > { %v4065_v41 = vrot.slane %v4048_v51, 4 }
0x1738   : > { %4158 = vrot.lane.b32.xlu0 %v9230_v13, %s8229_s8 }
0x173c   : > { %4160 = vrot.lane.b32.xlu0 %v9244_v11, %s8229_s8  ;;  %v4052_v11 = vpop.permute.xlu0 %4051 }
0x1740   : > { %4162 = vrot.lane.b32.xlu0 %v9270_v63, %s8229_s8 }
0x1744   : > { %4150 = vrot.lane.b32.xlu0 %v9352_v7, %s8229_s8  ;;  %v3964_v7 = vrot.slane %v3953_v18, 4 }
0x1748   : > { %4244 = vrot.lane.b32.xlu0 %v9326_v1, %s8229_s8  ;;  %v4056_v1 = vpop.permute.xlu0 %4055 }
0x174a   : > { %v3867_v6 = vpop.xlane.xlu1 %3866 }
0x174b   : > { %v3875_v14 = vsub.f32 %v9722_v39, %v3867_v6  ;;  %v7913_v39 = vpop.eup %7912 }
0x174c   : > { %4234 = vrot.lane.b32.xlu0 %v9360_v58, %s8229_s8  ;;  %v4155_v43 = vpop.permute.xlu0 %4154 }
0x174d   : > { %v3890_v13 = vmul.f32 1.442695, %v3875_v14  ;;  %v4171_v6 = vsel %vm784_vm0, %v4155_v43, 0  ;;  %v4069_v14 = vrot.slane %v4056_v1, 4 }
0x174e   : > { %v3861_v29 = vpop.xlane.xlu1 %3860 }
0x174f   : > { %7914 = vpow2.f32 %v3890_v13  ;;  %v3873_v63 = vsub.f32 %v9724_v60, %v3861_v29  ;;  %v3926_v60 = vmul.f32 %v7913_v39, %v9730_v0  ;;  %v4067_v0 = vrot.slane %v4052_v11, 4 }
0x1750   : > { %v4062_v29 = vpop.permute.xlu0 %4061 }
0x1751   : > { %v3886_v8 = vmul.f32 1.442695, %v3873_v63  ;;  %v3933_v55 = vpack.c.bf16 %v3927_v5, %v3926_v60  ;;  %v4072_v11 = vrot.slane %v4062_v29, 4 }
0x1752   : > { %v3955_v56 = vpop.permute.xlu1 %3954 }
0x1753   : > { %7916 = vpow2.f32 %v3886_v8  ;;  %v3965_v61 = vrot.slane %v3955_v56, 4 }
0x1755   : > { %v6340_v42 = vcombine.low %v3964_v7, %v3965_v61 }
0x1756   : > { %v4046_v49 = vpop.permute.xlu1 %4045 }
0x1757   : > { %v3992_v58 = vand.u32 %v6340_v42, %v9414_v57  ;;  %v4064_v53 = vrot.slane %v4046_v49, 4 }
0x1759   : > { %v9873_v27 = vpop.eup %7914  ;;  %7193 = vmatprep.subr.bf16.mxu0 %v3992_v58  ;;  %v6343_v9 = vcombine.low %v4063_v4, %v4064_v53 }
0x175a   : > { %7194 = vmatpush3.bf16.msra.mxu0 %v3992_v58  ;;  %v3913_v44 = vsel %vm2927_vm3, %v9873_v27, 0.0  ;;  %v4050_v19 = vpop.permute.xlu1 %4049 }
0x175b   : > { %3914 = vadd.xlane.f32.xlu1 %v3913_v44  ;;  %v4066_v32 = vrot.slane %v4050_v19, 4  ;;  %7199 = vmatprep.subr.bf16.mxu1 %v6343_v9 }
0x175c   : > { %7200 = vmatpush3.bf16.msra.mxu1 %v6343_v9  ;;  %7339 = vmatprep.subr.msk.bf16.mxu0 %vm784_vm0, %v4155_v43 }
0x175d   : > { %v9879_v40 = vpop.eup %7916  ;;  %7196 = vmatmul.mubr.msk.bf16.vlgmr.msra.gmra.mrb[68].mxu0 %vm2927_vm3, %v3933_v55  ;;  %v6344_v26 = vcombine.low %v4065_v41, %v4066_v32 }
0x175e   : > { %v3907_v18 = vsel %vm2927_vm3, %v9879_v40, 0.0  ;;  %v4054_v50 = vpop.permute.xlu1 %4053 }
0x175f   : > { %3908 = vadd.xlane.f32.xlu1 %v3907_v18  ;;  %v4068_v51 = vrot.slane %v4054_v50, 4  ;;  %7201 = vmatprep.subr.bf16.mxu1 %v6344_v26 }
0x1760   : > { %7202 = vmatpush3.bf16.msra.mxu1 %v6344_v26 }
0x1761   : > { %v6345_v13 = vcombine.low %v4067_v0, %v4068_v51 }
0x1762   : > { %v4058_v63 = vpop.permute.xlu1 %4057 }
0x1763   : > { %v4070_v8 = vrot.slane %v4058_v63, 4  ;;  %7203 = vmatprep.subr.bf16.mxu1 %v6345_v13  ;;  %7214 = vmatpush3.bf16.xpose.msra.mxu0 %v4171_v6 }
0x1764   : > { %7204 = vmatpush3.bf16.msra.mxu1 %v6345_v13 }
0x1765   : > { %v6346_v7 = vcombine.low %v4069_v14, %v4070_v8 }
0x1766   : > { %v4060_v56 = vpop.permute.xlu1 %4059 }
0x1767   : > { %7205 = vmatprep.subr.bf16.mxu1 %v6346_v7  ;;  %v4071_v61 = vrot.slane %v4060_v56, 4 }
0x1768   : > { %7206 = vmatpush3.bf16.msra.mxu1 %v6346_v7 }
0x1769   : > { %v6347_v38 = vcombine.low %v4071_v61, %v4072_v11 }
0x176a   : > { %v4157_v42 = vpop.permute.xlu1 %4156 }
0x176b   : > { %v4099_v4 = vand.u32 %v6347_v38, %v9414_v57  ;;  %v4174_v39 = vsel %vm784_vm0, %v4157_v42, 0  ;;  %7340 = vmatprep.subr.msk.bf16.mxu0 %vm784_vm0, %v4157_v42 }
0x176c   : > { %7216 = vmatpush3.bf16.xpose.msra.mxu0 %v4174_v39 }
0x176d   : > { %7207 = vmatprep.subr.bf16.mxu1 %v4099_v4 }
0x176e   : > { %7208 = vmatpush3.bf16.msra.mxu1 %v4099_v4 }
0x1770   : > { %4238 = vrot.lane.b32.xlu1 %v9284_v62, %s8229_s8 }
0x1774   : > { %4240 = vrot.lane.b32.xlu1 %v9301_v22, %s8229_s8 }
0x1778   : > { %4242 = vrot.lane.b32.xlu1 %v9308_v36, %s8229_s8 }
0x177c   : > { %4152 = vrot.lane.b32.xlu1 %v9350_v16, %s8229_s8 }
0x1780   : > { %4246 = vrot.lane.b32.xlu1 %v9340_v45, %s8229_s8 }
0x1784   : > { %4236 = vrot.lane.b32.xlu1 %v9358_v25, %s8229_s8 }
0x17ab   : > { %v3912_v1 = vpop.xlane.xlu0 %3911 }
0x17af   : > { %v3906_v49 = vpop.xlane.xlu0 %3905 }
0x17b3   : > { %v4159_v5 = vpop.permute.xlu0 %4158 }
0x17b4   : > { %v4177_v62 = vsel %vm784_vm0, %v4159_v5, 0  ;;  %7341 = vmatprep.subr.msk.bf16.mxu0 %vm784_vm0, %v4159_v5 }
0x17b5   : > { %7218 = vmatpush3.bf16.xpose.msra.mxu0 %v4177_v62 }
0x17b7   : > { %v4161_v22 = vpop.permute.xlu0 %4160 }
0x17b8   : > { %7342 = vmatprep.subr.msk.bf16.mxu0 %vm784_vm0, %v4161_v22  ;;  %v4180_v36 = vsel %vm784_vm0, %v4161_v22, 0 }
0x17bb   : > { %v4163_v16 = vpop.permute.xlu0 %4162 }
0x17bc   : > { %v4183_v25 = vsel %vm784_vm0, %v4163_v16, 0 }
0x17bd   : > { %7220 = vmatpush3.bf16.xpose.msra.mxu0 %v4180_v36 }
0x17be   : > { %7343 = vmatprep.subr.msk.bf16.mxu0 %vm784_vm0, %v4163_v16 }
0x17bf   : > { %v4151_v45 = vpop.permute.xlu0 %4150 }
0x17c0   : > { %7223 = vmatprep.mubr.msk.bf16.mxu0 %vm784_vm0, %v4151_v45 }
0x17c3   : > { %v4245_v55 = vpop.permute.xlu0 %4244 }
0x17c5   : > { %7222 = vmatpush3.bf16.xpose.msra.mxu0 %v4183_v25 }
0x17c7   : > { %v4235_v13 = vpop.permute.xlu0 %4234 }
0x17e8   : > { %v3915_v58 = vpop.xlane.xlu1 %3914 }
0x17e9   : > { %7918 = vrcp.f32 %v3915_v58 }
0x17ea   : > { %7920 = vrcp.f32 %v3906_v49 }
0x17eb   : > { %7922 = vrcp.f32 %v3912_v1 }
0x17ec   : > { %v3909_v53 = vpop.xlane.xlu1 %3908 }
0x17ed   : > { %7924 = vrcp.f32 %v3909_v53 }
0x17f0   : > { %v4239_v60 = vpop.permute.xlu1 %4238 }
0x17f1   : > { %7344 = vmatprep.subr.msk.bf16.mxu1 %vm784_vm0, %v4239_v60  ;;  %v4255_v29 = vsel %vm784_vm0, %v4239_v60, 0 }
0x17f3   : > { %v7919_v41 = vpop.eup %7918 }
0x17f4   : > { %v4241_v9 = vpop.permute.xlu1 %4240  ;;  %v7921_v43 = vpop.eup %7920  ;;  %v3931_v32 = vmul.f32 %v7919_v41, %v9873_v27  ;;  %v4264_v27 = vsel %vm784_vm0, %v4245_v55, 0 }
0x17f5   : > { %v7923_v44 = vpop.eup %7922  ;;  %v3928_v26 = vmul.f32 %v7921_v43, %v9853_v33  ;;  %v4258_v33 = vsel %vm784_vm0, %v4241_v9, 0 }
0x17f6   : > { %v3930_v50 = vmul.f32 %v7923_v44, %v9849_v15 }
0x17f7   : > { %v7925_v19 = vpop.eup %7924 }
0x17f8   : > { %v4243_v0 = vpop.permute.xlu1 %4242  ;;  %v3929_v18 = vmul.f32 %v7925_v19, %v9879_v40  ;;  %v3935_v6 = vpack.c.bf16 %v3931_v32, %v3930_v50 }
0x17f9   : > { %v4261_v15 = vsel %vm784_vm0, %v4243_v0, 0 }
0x17fa   : > { %v3934_v51 = vpack.c.bf16 %v3929_v18, %v3928_v26 }
0x17fc   : > { %7209 = vmatprep.mubr.msk.bf16.mxu1 %vm2927_vm3, %v3934_v51  ;;  %v4153_v14 = vpop.permute.xlu1 %4152 }
0x17fd   : > { %7210 = vmatmul.mubr.msk.bf16.vlgmr.msra.gmra.mrb[76].mxu1 %vm2927_vm3, %v3935_v6  ;;  %7224 = vmatmul.mubr.msk.bf16.vlgmr.msra.gmra.mrb[72].mxu0 %vm784_vm0, %v4153_v14 }
0x17fe   : > { %7228 = vmatpush3.bf16.xpose.msra.mxu1 %v4255_v29  ;;  %7237 = vmatprep.mubr.msk.bf16.mxu1 %vm784_vm0, %v4235_v13 }
0x17ff   : > { %7345 = vmatprep.subr.msk.bf16.mxu1 %vm784_vm0, %v4241_v9 }
0x1800   : > { %v4247_v40 = vpop.permute.xlu1 %4246 }
0x1801   : > { %v4267_v63 = vsel %vm784_vm0, %v4247_v40, 0 }
0x1804   : > { %v4237_v8 = vpop.permute.xlu1 %4236 }
0x1806   : > { %7230 = vmatpush3.bf16.xpose.msra.mxu1 %v4258_v33 }
0x1807   : > { %7346 = vmatprep.subr.msk.bf16.mxu1 %vm784_vm0, %v4243_v0 }
0x180e   : > { %7232 = vmatpush3.bf16.xpose.msra.mxu1 %v4261_v15 }
0x180f   : > { %7347 = vmatprep.subr.msk.bf16.mxu1 %vm784_vm0, %v4245_v55 }
0x1816   : > { %7234 = vmatpush3.bf16.xpose.msra.mxu1 %v4264_v27 }
0x1817   : > { %7348 = vmatprep.subr.msk.bf16.mxu1 %vm784_vm0, %v4247_v40 }
0x181e   : > { %7236 = vmatpush3.bf16.xpose.msra.mxu1 %v4267_v63 }
0x1825   : > { %7238 = vmatmul.mubr.msk.bf16.vlgmr.msra.gmra.mrb[80].mxu1 %vm784_vm0, %v4237_v8 }
0x1830   : > { %v9926_v11 = vpop.f32.mrb[68].mxu0 }
0x1831   : > { %v9928_v7 = vpop.f32.mrb[69].mxu0 }
0x1832   : > { %v9930_v56 = vpop.f32.mrb[70].mxu0 }
0x1833   : > { %v7479_v61 = vpack.i.bf16 %v9930_v56, %v9926_v11  ;;  %v9934_v38 = vpop.f32.mrb[71].mxu0  ;;  %v7585_v11 = vld [vmem:[%s10626_s2 + $0x104] ss:$40 sps:$4 sm:$0xff]  }
0x1834   : > { %v7474_v42 = vpack.i.bf16 %v9934_v38, %v9928_v7  ;;  %v7586_v7 = vld [vmem:[%s10626_s2 + $0x154] ss:$40 sps:$4 sm:$0xff]   ;;  %v7587_v56 = vld [vmem:[%s10626_s2 + $0x1a4] ss:$40 sps:$4 sm:$0xff]  }
0x18d0   : > { %v9938_v4 = vpop.f32.mrb[76].mxu1  ;;  %v7225_v39 = vpop.f32.mrb[72].mxu0 }
0x18d1   : > { %v9940_v1 = vpop.f32.mrb[77].mxu1  ;;  %v4219_v49 = vpop.f32.mrb[73].mxu0  ;;  %v4324_v53 = vsel %vm2927_vm3, %v7225_v39, -inf }
0x18d2   : > { %v9942_v5 = vpop.f32.mrb[78].mxu1  ;;  %v7226_v62 = vpop.f32.mrb[74].mxu0  ;;  %v4318_v22 = vsel %vm2927_vm3, %v4219_v49, -inf }
0x18d3   : > { %v7509_v36 = vpack.i.bf16 %v9942_v5, %v9938_v4  ;;  %v9947_v16 = vpop.f32.mrb[79].mxu1  ;;  %4319 = vmax.xlane.f32.xlu0 %v4318_v22  ;;  %v4222_v45 = vpop.f32.mrb[75].mxu0  ;;  %v4327_v60 = vsel %vm2927_vm3, %v7226_v62, -inf  ;;  %v10709_v5 = vld [vmem:[#allocation20_spill] sm:$0xff] }
0x18d4   : > { %v7504_v25 = vpack.i.bf16 %v9947_v16, %v9940_v1  ;;  %v4321_v58 = vsel %vm2927_vm3, %v4222_v45, -inf  ;;  %v10710_v16 = vld [vmem:[#allocation21_spill] sm:$0xff] }
0x18d5   : > { %4322 = vmax.xlane.f32.xlu1 %v4321_v58 }
0x18d7   : > { %4325 = vmax.xlane.f32.xlu0 %v4324_v53 }
0x18db   : > { %4328 = vmax.xlane.f32.xlu0 %v4327_v60 }
0x18e6   : > { %4412 = vrot.lane.b32.xlu1 %v9709_v30, %s8229_s8 }
0x18ea   : > { %4414 = vrot.lane.b32.xlu1 %v9767_v28, %s8229_s8 }
0x18ee   : > { %4416 = vrot.lane.b32.xlu1 %v9747_v20, %s8229_s8 }
0x18f1   : > { %4410 = vrot.lane.b32.xlu0 %v9714_v21, %s8229_s8 }
0x18f2   : > { %4420 = vrot.lane.b32.xlu1 %v9757_v35, %s8229_s8 }
0x18f5   : > { %4418 = vrot.lane.b32.xlu0 %v9752_v2, %s8229_s8 }
0x18f8   : > { %v9966_v41 = vpop.f32.mrb[80].mxu1 }
0x18f9   : > { %v9968_v9 = vpop.f32.mrb[81].mxu1 }
0x18fa   : > { %v9970_v30 = vpop.f32.mrb[82].mxu1 }
0x18fb   : > { %v9972_v43 = vpop.f32.mrb[83].mxu1 }
0x1960   : > { %v4320_v28 = vpop.xlane.xlu0 %4319 }
0x1961   : > { %v4342_v20 = vsub.f32 %v4219_v49, %v4320_v28 }
0x1962   : > { %v4323_v44 = vpop.xlane.xlu1 %4322 }
0x1963   : > { %v4350_v32 = vmul.f32 1.442695, %v4342_v20  ;;  %v4343_v0 = vsub.f32 %v4222_v45, %v4323_v44  ;;  %v4336_v20 = vsel %vm2927_vm3, %v9966_v41, -inf }
0x1964   : > { %v4326_v19 = vpop.xlane.xlu0 %4325 }
0x1965   : > { %v4344_v55 = vsub.f32 %v7225_v39, %v4326_v19  ;;  %v4352_v50 = vmul.f32 1.442695, %v4343_v0 }
0x1966   : > { %v4413_v21 = vpop.permute.xlu1 %4412 }
0x1967   : > { %v4354_v35 = vmul.f32 1.442695, %v4344_v55  ;;  %v4431_v6 = vrot.slane %v4413_v21, 4  ;;  %v4330_v55 = vsel %vm2927_vm3, %v9968_v9, -inf  ;;  %v4339_v21 = vsel %vm2927_vm3, %v9970_v30, -inf }
0x1968   : > { %v4329_v26 = vpop.xlane.xlu0 %4328 }
0x1969   : > { %7926 = vpow2.f32 %v4354_v35  ;;  %v4345_v2 = vsub.f32 %v7226_v62, %v4329_v26 }
0x196a   : > { %v4415_v18 = vpop.permute.xlu1 %4414  ;;  %7928 = vpow2.f32 %v4350_v32 }
0x196b   : > { %v4356_v51 = vmul.f32 1.442695, %v4345_v2  ;;  %v4432_v29 = vrot.slane %v4415_v18, 4 }
0x196c   : > { %v4411_v14 = vpop.permute.xlu0 %4410 }
0x196d   : > { %7930 = vpow2.f32 %v4356_v51  ;;  %v4430_v13 = vrot.slane %v4411_v14, 4 }
0x196e   : > { %v4417_v33 = vpop.permute.xlu1 %4416  ;;  %7932 = vpow2.f32 %v4352_v50 }
0x196f   : > { %v6354_v15 = vcombine.low %v4430_v13, %v4431_v6  ;;  %v4433_v27 = vrot.slane %v4417_v33, 4 }
0x1970   : > { %v4419_v40 = vpop.permute.xlu0 %4418 }
0x1971   : > { %v6355_v63 = vcombine.low %v4432_v29, %v4433_v27  ;;  %7241 = vmatprep.subr.bf16.mxu0 %v6354_v15  ;;  %v4434_v8 = vrot.slane %v4419_v40, 4 }
0x1972   : > { %7242 = vmatpush3.bf16.msra.mxu0 %v6354_v15  ;;  %v4421_v39 = vpop.permute.xlu1 %4420 }
0x1973   : > { %v7927_v49 = vpop.eup %7926  ;;  %7243 = vmatprep.subr.bf16.mxu0 %v6355_v63  ;;  %v4435_v62 = vrot.slane %v4421_v39, 4 }
0x1974   : > { %v4372_v22 = vsel %vm2927_vm3, %v7927_v49, 0.0  ;;  %v7929_v45 = vpop.eup %7928 }
0x1975   : > { %4373 = vadd.xlane.f32.xlu0 %v4372_v22  ;;  %v6356_v58 = vcombine.low %v4434_v8, %v4435_v62  ;;  %v4366_v60 = vsel %vm2927_vm3, %v7929_v45, 0.0 }
0x1976   : > { %7244 = vmatpush3.bf16.msra.mxu0 %v6355_v63 }
0x1977   : > { %v7931_v53 = vpop.eup %7930  ;;  %7245 = vmatprep.subr.bf16.mxu0 %v6356_v58 }
0x1978   : > { %v4375_v28 = vsel %vm2927_vm3, %v7931_v53, 0.0  ;;  %v7933_v44 = vpop.eup %7932 }
0x1979   : > { %4367 = vadd.xlane.f32.xlu0 %v4366_v60  ;;  %4376 = vadd.xlane.f32.xlu1 %v4375_v28  ;;  %v4369_v19 = vsel %vm2927_vm3, %v7933_v44, 0.0 }
0x197a   : > { %7246 = vmatpush3.bf16.msra.mxu0 %v6356_v58 }
0x197d   : > { %4337 = vmax.xlane.f32.xlu0 %v4336_v20  ;;  %4370 = vadd.xlane.f32.xlu1 %v4369_v19 }
0x1981   : > { %4331 = vmax.xlane.f32.xlu0 %v4330_v55 }
0x198e   : > { %4424 = vrot.lane.b32.xlu1 %v9762_v59, %s8229_s8  ;;  %v4333_v59 = vsel %vm2927_vm3, %v9972_v43, -inf }
0x1997   : > { %4422 = vrot.lane.b32.xlu0 %v9772_v52, %s8229_s8 }
0x199b   : > { %4517 = vrot.lane.b32.xlu0 %v9782_v48, %s8229_s8 }
0x199f   : > { %4521 = vrot.lane.b32.xlu0 %v9787_v54, %s8229_s8 }
0x19a3   : > { %4525 = vrot.lane.b32.xlu0 %v9792_v17, %s8229_s8 }
0x19a7   : > { %4529 = vrot.lane.b32.xlu0 %v9797_v34, %s8229_s8 }
0x19b2   : > { %4340 = vmax.xlane.f32.xlu1 %v4339_v21 }
0x19b6   : > { %4334 = vmax.xlane.f32.xlu1 %v4333_v59 }
0x19c7   : > { %4426 = vrot.lane.b32.xlu1 %v9777_v12, %s8229_s8 }
0x19cb   : > { %4428 = vrot.lane.b32.xlu1 %v9813_v10, %s8229_s8 }
0x19cf   : > { %4519 = vrot.lane.b32.xlu1 %v9818_v3, %s8229_s8 }
0x19d3   : > { %4523 = vrot.lane.b32.xlu1 %v9823_v31, %s8229_s8 }
0x19d7   : > { %4527 = vrot.lane.b32.xlu1 %v9828_v37, %s8229_s8 }
0x19db   : > { %4531 = vrot.lane.b32.xlu1 %v9833_v23, %s8229_s8 }
0x1a02   : > { %v4374_v52 = vpop.xlane.xlu0 %4373 }
0x1a03   : > { %7934 = vrcp.f32 %v4374_v52 }
0x1a06   : > { %v4368_v48 = vpop.xlane.xlu0 %4367  ;;  %v4377_v54 = vpop.xlane.xlu1 %4376 }
0x1a07   : > { %7936 = vrcp.f32 %v4377_v54 }
0x1a08   : > { %7938 = vrcp.f32 %v4368_v48 }
0x1a0a   : > { %v4338_v12 = vpop.xlane.xlu0 %4337  ;;  %v4371_v17 = vpop.xlane.xlu1 %4370 }
0x1a0b   : > { %v4348_v34 = vsub.f32 %v9966_v41, %v4338_v12  ;;  %7940 = vrcp.f32 %v4371_v17 }
0x1a0d   : > { %v4362_v10 = vmul.f32 1.442695, %v4348_v34  ;;  %v7935_v31 = vpop.eup %7934 }
0x1a0e   : > { %v4332_v3 = vpop.xlane.xlu0 %4331  ;;  %v4425_v32 = vpop.permute.xlu1 %4424  ;;  %v4400_v35 = vmul.f32 %v7935_v31, %v7927_v49 }
0x1a0f   : > { %7942 = vpow2.f32 %v4362_v10  ;;  %v4346_v37 = vsub.f32 %v9968_v9, %v4332_v3  ;;  %v4437_v50 = vrot.slane %v4425_v32, 4 }
0x1a11   : > { %v4358_v0 = vmul.f32 1.442695, %v4346_v37  ;;  %v7937_v23 = vpop.eup %7936 }
0x1a12   : > { %v4423_v26 = vpop.permute.xlu0 %4422  ;;  %v7939_v2 = vpop.eup %7938  ;;  %v4401_v18 = vmul.f32 %v7937_v23, %v7931_v53 }
0x1a13   : > { %7944 = vpow2.f32 %v4358_v0  ;;  %v4436_v51 = vrot.slane %v4423_v26, 4  ;;  %v4398_v13 = vmul.f32 %v7939_v2, %v7929_v45 }
0x1a14   : > { %v4407_v41 = vpack.c.bf16 %v4401_v18, %v4400_v35 }
0x1a15   : > { %v7941_v6 = vpop.eup %7940  ;;  %v6357_v14 = vcombine.low %v4436_v51, %v4437_v50  ;;  %v10696_v50 = vld [vmem:[#allocation27_spill] sm:$0xff] }
0x1a16   : > { %v4399_v29 = vmul.f32 %v7941_v6, %v7933_v44  ;;  %v4518_v22 = vpop.permute.xlu0 %4517  ;;  %v10697_v51 = vpack.i.bf16 %v9684_v47, %v10696_v50  ;;  %v10698_v6 = vld [vmem:[#allocation29_spill] sm:$0xff]  ;;  %v7582_v47 = vld [vmem:[%s10626_s2 + $0x14] ss:$40 sps:$4 sm:$0xff]  }
0x1a17   : > { %7247 = vmatprep.subr.bf16.mxu0 %v6357_v14  ;;  %v4537_v55 = vrot.slane %v4518_v22, 4  ;;  %v10708_v50 = vld [vmem:[#allocation22_spill] sm:$0xff] }
0x1a18   : > { %7248 = vmatpush3.bf16.msra.mxu0 %v6357_v14  ;;  %v4406_v33 = vpack.c.bf16 %v4399_v29, %v4398_v13  ;;  %v10699_v14 = vld [vmem:[#allocation28_spill] sm:$0xff] }
0x1a19   : > { %v10012_v15 = vpop.eup %7942 }
0x1a1a   : > { %7251 = vmatprep.mubr.msk.bf16.mxu0 %vm2927_vm3, %v4406_v33  ;;  %v4384_v9 = vsel %vm2927_vm3, %v10012_v15, 0.0  ;;  %v4522_v28 = vpop.permute.xlu0 %4521 }
0x1a1b   : > { %4385 = vadd.xlane.f32.xlu0 %v4384_v9  ;;  %v4539_v54 = vrot.slane %v4522_v28, 4 }
0x1a1d   : > { %v10017_v27 = vpop.eup %7944 }
0x1a1e   : > { %v4378_v40 = vsel %vm2927_vm3, %v10017_v27, 0.0  ;;  %v4526_v52 = vpop.permute.xlu0 %4525 }
0x1a1f   : > { %4379 = vadd.xlane.f32.xlu0 %v4378_v40  ;;  %v4541_v3 = vrot.slane %v4526_v52, 4  ;;  %v10703_v52 = vld [vmem:[#allocation30_spill] sm:$0xff] }
0x1a22   : > { %v4530_v37 = vpop.permute.xlu0 %4529 }
0x1a23   : > { %v4543_v23 = vrot.slane %v4530_v37, 4 }
0x1a3f   : > { %v4341_v63 = vpop.xlane.xlu1 %4340 }
0x1a40   : > { %v4349_v8 = vsub.f32 %v9970_v30, %v4341_v63 }
0x1a42   : > { %v4364_v39 = vmul.f32 1.442695, %v4349_v8 }
0x1a43   : > { %v4335_v49 = vpop.xlane.xlu1 %4334 }
0x1a44   : > { %7946 = vpow2.f32 %v4364_v39  ;;  %v4347_v62 = vsub.f32 %v9972_v43, %v4335_v49 }
0x1a46   : > { %v4360_v45 = vmul.f32 1.442695, %v4347_v62 }
0x1a47   : > { %v4427_v58 = vpop.permute.xlu1 %4426 }
0x1a48   : > { %7948 = vpow2.f32 %v4360_v45  ;;  %v4438_v53 = vrot.slane %v4427_v58, 4 }
0x1a4b   : > { %v4429_v60 = vpop.permute.xlu1 %4428 }
0x1a4c   : > { %v4439_v44 = vrot.slane %v4429_v60, 4 }
0x1a4e   : > { %v10023_v20 = vpop.eup %7946  ;;  %v6358_v19 = vcombine.low %v4438_v53, %v4439_v44 }
0x1a4f   : > { %v4387_v30 = vsel %vm2927_vm3, %v10023_v20, 0.0  ;;  %v4520_v21 = vpop.permute.xlu1 %4519 }
0x1a50   : > { %4388 = vadd.xlane.f32.xlu0 %v4387_v30  ;;  %v4466_v59 = vand.u32 %v6358_v19, %v9414_v57  ;;  %v4538_v43 = vrot.slane %v4520_v21, 4 }
0x1a52   : > { %v10028_v48 = vpop.eup %7948  ;;  %7249 = vmatprep.subr.bf16.mxu0 %v4466_v59  ;;  %v6361_v12 = vcombine.low %v4537_v55, %v4538_v43  ;;  %v10701_v55 = vmov 0   ;;  %v10702_v43 = vld [vmem:[#allocation32_spill] sm:$0xff] }
0x1a53   : > { %7250 = vmatpush3.bf16.msra.mxu0 %v4466_v59  ;;  %v4381_v17 = vsel %vm2927_vm3, %v10028_v48, 0.0  ;;  %v4524_v34 = vpop.permute.xlu1 %4523 }
0x1a54   : > { %4382 = vadd.xlane.f32.xlu1 %v4381_v17  ;;  %v4540_v10 = vrot.slane %v4524_v34, 4  ;;  %7255 = vmatprep.subr.bf16.mxu1 %v6361_v12 }
0x1a55   : > { %7256 = vmatpush3.bf16.msra.mxu1 %v6361_v12  ;;  %7269 = vmatprep.subr.bf16.mxu0 %v7582_v47  ;;  %v10706_v12 = vld [vmem:[#allocation31_spill] sm:$0xff] }
0x1a56   : > { %7252 = vmatmul.mubr.msk.bf16.vlgmr.msra.gmra.mrb[76].mxu0 %vm2927_vm3, %v4407_v41  ;;  %v6362_v31 = vcombine.low %v4539_v54, %v4540_v10  ;;  %v10700_v41 = vpack.i.bf16 %v10698_v6, %v10699_v14  ;;  %v10705_v54 = vld [vmem:[#allocation33_spill] sm:$0xff] }
0x1a57   : > { %v4528_v32 = vpop.permute.xlu1 %4527  ;;  %7270 = vmatpush3.bf16.msra.mxu0 %v7582_v47  ;;  %v10707_v17 = vpack.i.bf16 %v10705_v54, %v10706_v12 }
0x1a58   : > { %v4542_v0 = vrot.slane %v4528_v32, 4  ;;  %7257 = vmatprep.subr.bf16.mxu1 %v6362_v31 }
0x1a59   : > { %7258 = vmatpush3.bf16.msra.mxu1 %v6362_v31 }
0x1a5a   : > { %v6363_v35 = vcombine.low %v4541_v3, %v4542_v0 }
0x1a5b   : > { %v4532_v26 = vpop.permute.xlu1 %4531 }
0x1a5c   : > { %v4544_v2 = vrot.slane %v4532_v26, 4  ;;  %7259 = vmatprep.subr.bf16.mxu1 %v6363_v35 }
0x1a5d   : > { %7260 = vmatpush3.bf16.msra.mxu1 %v6363_v35 }
0x1a5e   : > { %v6364_v18 = vcombine.low %v4543_v23, %v4544_v2 }
0x1a60   : > { %7261 = vmatprep.subr.bf16.mxu1 %v6364_v18 }
0x1a61   : > { %7262 = vmatpush3.bf16.msra.mxu1 %v6364_v18 }
0x1a65   : > { %4535 = vrot.lane.b32.xlu1 %v9804_v46, %s8229_s8  ;;  %v7583_v46 = vld [vmem:[%s10626_s2 + $0x64] ss:$40 sps:$4 sm:$0xff]  }
0x1a66   : > { %4533 = vrot.lane.b32.xlu0 %v9838_v24, %s8229_s8  ;;  %7271 = vmatprep.subr.bf16.mxu0 %v7583_v46  ;;  %v7584_v24 = vld [vmem:[%s10626_s2 + $0xb4] ss:$40 sps:$4 sm:$0xff]  }
0x1a67   : > { %7272 = vmatpush3.bf16.msra.mxu0 %v7583_v46 }
0x1a68   : > { %7273 = vmatprep.subr.bf16.mxu0 %v7584_v24 }
0x1a69   : > { %7470 = vrot.lane.b32.xlu1 %v10697_v51, %s8229_s8  ;;  %v10711_v51 = vld [vmem:[#allocation19_spill] sm:$0xff] }
0x1a6a   : > { %7465 = vrot.lane.b32.xlu0 %v10700_v41, %s8229_s8 }
0x1a6b   : > { %7274 = vmatpush3.bf16.msra.mxu0 %v7584_v24 }
0x1a6c   : > { %7275 = vmatprep.subr.bf16.mxu0 %v7585_v11 }
0x1a6d   : > { %7480 = vrot.lane.b32.xlu1 %v7479_v61, %s8228_s13  ;;  %v7588_v61 = vld [vmem:[%s10626_s2 + $0x1f4] ss:$40 sps:$4 sm:$0xff]  }
0x1a6e   : > { %7475 = vrot.lane.b32.xlu0 %v7474_v42, %s8228_s13 }
0x1a6f   : > { %7276 = vmatpush3.bf16.msra.mxu0 %v7585_v11 }
0x1a70   : > { %7277 = vmatprep.subr.bf16.mxu0 %v7586_v7 }
0x1a73   : > { %7278 = vmatpush3.bf16.msra.mxu0 %v7586_v7 }
0x1a74   : > { %7279 = vmatprep.subr.bf16.mxu0 %v7587_v56 }
0x1a77   : > { %7280 = vmatpush3.bf16.msra.mxu0 %v7587_v56 }
0x1a78   : > { %7281 = vmatprep.subr.bf16.mxu0 %v7588_v61 }
0x1a7b   : > { %7282 = vmatpush3.bf16.msra.mxu0 %v7588_v61 }
0x1aa8   : > { %v4386_v38 = vpop.xlane.xlu0 %4385 }
0x1aac   : > { %v4380_v42 = vpop.xlane.xlu0 %4379 }
0x1add   : > { %v4389_v13 = vpop.xlane.xlu0 %4388 }
0x1ade   : > { %7950 = vrcp.f32 %v4389_v13 }
0x1adf   : > { %7952 = vrcp.f32 %v4380_v42 }
0x1ae0   : > { %7954 = vrcp.f32 %v4386_v38 }
0x1ae1   : > { %v4383_v29 = vpop.xlane.xlu1 %4382  ;;  %v4534_v33 = vpop.permute.xlu0 %4533 }
0x1ae2   : > { %7956 = vrcp.f32 %v4383_v29  ;;  %v4545_v9 = vrot.slane %v4534_v33, 4 }
0x1ae5   : > { %v4536_v40 = vpop.permute.xlu1 %4535  ;;  %v7466_v10 = vpop.permute.xlu0 %7465 }
0x1ae6   : > { %v4546_v63 = vrot.slane %v4536_v40, 4  ;;  %v7468_v31 = vunpack.i.h.bf16 %v7466_v10  ;;  %v7467_v37 = vunpack.i.l.bf16 %v7466_v10  ;;  %v7590_v40 = vld [vmem:[%s10626_s2 + $0x18] ss:$40 sps:$4 sm:$0xff]  }
0x1ae8   : > { %v6365_v8 = vcombine.low %v4545_v9, %v4546_v63  ;;  %v7951_v39 = vpop.eup %7950  ;;  %v4721_v4 = vsel %vm784_vm0, %v10708_v50, %v7468_v31  ;;  %v7592_v63 = vld [vmem:[%s10626_s2 + $0x1c] ss:$40 sps:$4 sm:$0xff]   ;;  %v10714_v50 = vld [vmem:[#allocation26_spill] sm:$0xff] }
0x1ae9   : > { %v7953_v49 = vpop.eup %7952  ;;  %v4405_v58 = vmul.f32 %v7951_v39, %v10023_v20  ;;  %v7471_v34 = vpop.permute.xlu1 %7470  ;;  %v7595_v39 = vld [vmem:[%s10626_s2 + $0x6c] ss:$40 sps:$4 sm:$0xff]  }
0x1aea   : > { %v7955_v62 = vpop.eup %7954  ;;  %v4573_v22 = vand.u32 %v6365_v8, %v9414_v57  ;;  %v4402_v53 = vmul.f32 %v7953_v49, %v10017_v27  ;;  %v7589_v57 = vld [vmem:[%s10626_s2 + $0x244] ss:$40 sps:$4 sm:$0xff]   ;;  %v7476_v32 = vpop.permute.xlu0 %7475  ;;  %v7473_v0 = vunpack.i.h.bf16 %v7471_v34  ;;  %v7472_v23 = vunpack.i.l.bf16 %v7471_v34 }
0x1aeb   : > { %v4404_v28 = vmul.f32 %v7955_v62, %v10012_v15  ;;  %7283 = vmatprep.subr.bf16.mxu0 %v7589_v57  ;;  %v7478_v2 = vunpack.i.h.bf16 %v7476_v32  ;;  %v7477_v18 = vunpack.i.l.bf16 %v7476_v32 }
0x1aec   : > { %v7957_v45 = vpop.eup %7956  ;;  %7263 = vmatprep.subr.bf16.mxu1 %v4573_v22  ;;  %7284 = vmatpush3.bf16.msra.mxu0 %v7589_v57  ;;  %v4722_v6 = vsel %vm784_vm0, %v10711_v51, %v7472_v23  ;;  %v7604_v57 = vld [vmem:[%s10626_s2 + $0x15c] ss:$40 sps:$4 sm:$0xff]   ;;  %v10712_v23 = vld [vmem:[#allocation25_spill] sm:$0xff] }
0x1aed   : > { %v4403_v60 = vmul.f32 %v7957_v45, %v10028_v48  ;;  %7264 = vmatpush3.bf16.msra.mxu1 %v4573_v22  ;;  %v4409_v19 = vpack.c.bf16 %v4405_v58, %v4404_v28  ;;  %v10704_v48 = vpack.i.bf16 %v10702_v43, %v10703_v52  ;;  %v7481_v3 = vpop.permute.xlu1 %7480  ;;  %v4729_v61 = vsel %vm2285_vm1, %v4721_v4, %v7478_v2  ;;  %v7593_v22 = vld [vmem:[%s10626_s2 + $0x68] ss:$40 sps:$4 sm:$0xff]   ;;  %v7596_v28 = vld [vmem:[%s10626_s2 + $0xb8] ss:$40 sps:$4 sm:$0xff]  }
0x1aee   : > { %v7483_v35 = vunpack.i.h.bf16 %v7481_v3  ;;  %v7482_v26 = vunpack.i.l.bf16 %v7481_v3  ;;  %4993 = vmatprep.subr.bf16.mxu1 %v7592_v63  ;;  %v7611_v43 = vld [vmem:[%s10626_s2 + $0x248] ss:$40 sps:$4 sm:$0xff]  }
0x1aef   : > { %v4408_v44 = vpack.c.bf16 %v4403_v60, %v4402_v53  ;;  %v7598_v53 = vld [vmem:[%s10626_s2 + $0xbc] ss:$40 sps:$4 sm:$0xff]  }
0x1af0   : > { %v4730_v46 = vsel %vm2285_vm1, %v4722_v6, %v7482_v26  ;;  %v10713_v26 = vld [vmem:[#allocation23_spill] sm:$0xff] }
0x1af1   : > { %7265 = vmatprep.mubr.msk.bf16.mxu1 %vm2927_vm3, %v4408_v44  ;;  %v7601_v44 = vld [vmem:[%s10626_s2 + $0x10c] ss:$40 sps:$4 sm:$0xff]  }
0x1af2   : > { %7266 = vmatmul.mubr.msk.bf16.vlgmr.msra.gmra.mrb[84].mxu1 %vm2927_vm3, %v4409_v19  ;;  %v7599_v19 = vld [vmem:[%s10626_s2 + $0x108] ss:$40 sps:$4 sm:$0xff]  }
0x1af3   : > { %5025 = vmatprep.mubr.bf16.mxu1 %v10701_v55  ;;  %4994 = vmatpush1.bf16.msra.mxu1 %v7590_v40 }
0x1af4   : > { %4995 = vmatprep.subr.bf16.mxu1 %v7595_v39 }
0x1af7   : > { %4996 = vmatpush1.bf16.msra.mxu1 %v7593_v22 }
0x1af8   : > { %4997 = vmatprep.subr.bf16.mxu1 %v7598_v53  ;;  %v7615_v53 = vld [vmem:[%s10627_s3] ss:$8 sps:$4 sm:$0xff]  }
0x1afb   : > { %4998 = vmatpush1.bf16.msra.mxu1 %v7596_v28  ;;  %v7617_v28 = vld [vmem:[%s10627_s3 + $0x10] ss:$8 sps:$4 sm:$0xff]  }
0x1afc   : > { %4999 = vmatprep.subr.bf16.mxu1 %v7601_v44  ;;  %v7618_v44 = vld [vmem:[%s10627_s3 + $0xa0] ss:$8 sps:$4 sm:$0xff]  }
0x1aff   : > { %5000 = vmatpush1.bf16.msra.mxu1 %v7599_v19  ;;  %v7619_v19 = vld [vmem:[%s10627_s3 + $0x20] ss:$8 sps:$4 sm:$0xff]  }
0x1b00   : > { %5001 = vmatprep.subr.bf16.mxu1 %v7604_v57  ;;  %v7620_v57 = vld [vmem:[%s10627_s3 + $0xb0] ss:$8 sps:$4 sm:$0xff]  }
0x1b29   : > { %v7253_v27 = vpop.f32.mrb[76].mxu0 }
0x1b2a   : > { %v4502_v20 = vpop.f32.mrb[77].mxu0 }
0x1b2b   : > { %v7254_v30 = vpop.f32.mrb[78].mxu0 }
0x1b2c   : > { %v7489_v21 = vpack.i.bf16 %v7254_v30, %v7253_v27  ;;  %v4505_v15 = vpop.f32.mrb[79].mxu0  ;;  %v7602_v27 = vld [vmem:[%s10626_s2 + $0x158] ss:$40 sps:$4 sm:$0xff]   ;;  %v7605_v30 = vld [vmem:[%s10626_s2 + $0x1a8] ss:$40 sps:$4 sm:$0xff]  }
0x1b2d   : > { %v7484_v59 = vpack.i.bf16 %v4505_v15, %v4502_v20  ;;  %v7607_v20 = vld [vmem:[%s10626_s2 + $0x1ac] ss:$40 sps:$4 sm:$0xff]   ;;  %5002 = vmatpush1.bf16.msra.mxu1 %v7602_v27  ;;  %v7608_v15 = vld [vmem:[%s10626_s2 + $0x1f8] ss:$40 sps:$4 sm:$0xff]  }
0x1b2e   : > { %7490 = vrot.lane.b32.xlu1 %v7489_v21, %s8227_s12  ;;  %5003 = vmatprep.subr.bf16.mxu1 %v7607_v20  ;;  %v7610_v21 = vld [vmem:[%s10626_s2 + $0x1fc] ss:$40 sps:$4 sm:$0xff]   ;;  %v7621_v27 = vld [vmem:[%s10627_s3 + $0x30] ss:$8 sps:$4 sm:$0xff]   ;;  %v7622_v20 = vld [vmem:[%s10627_s3 + $0xc0] ss:$8 sps:$4 sm:$0xff]  }
0x1b2f   : > { %7485 = vrot.lane.b32.xlu0 %v7484_v59, %s8227_s12  ;;  %v7613_v59 = vld [vmem:[%s10626_s2 + $0x24c] ss:$40 sps:$4 sm:$0xff]  }
0x1b31   : > { %5004 = vmatpush1.bf16.msra.mxu1 %v7605_v30  ;;  %v7623_v30 = vld [vmem:[%s10627_s3 + $0x40] ss:$8 sps:$4 sm:$0xff]  }
0x1b32   : > { %7500 = vrot.lane.b32.xlu1 %v10704_v48, %s8229_s8  ;;  %5005 = vmatprep.subr.bf16.mxu1 %v7610_v21  ;;  %v7624_v21 = vld [vmem:[%s10627_s3 + $0xd0] ss:$8 sps:$4 sm:$0xff]  }
0x1b33   : > { %7495 = vrot.lane.b32.xlu0 %v10707_v17, %s8229_s8  ;;  %s8159_s8 = sshll.u32 %s8231_s25, 4  ;;  %s8160_s8 = int_to_ptr.vmem [resolvable:$false] %s8159_s8 }
0x1b34   : > { %s8161_s17 = scalar_lea.vmem %s8160_s8, 1024  ;;  %p8162_p10 = scmp.lt.s32.totalorder %s10572_s7, %s8160_s8 }
0x1b35   : > { %5006 = vmatpush1.bf16.msra.mxu1 %v7608_v15  ;;  %v7625_v15 = vld [vmem:[%s10627_s3 + $0x50] ss:$8 sps:$4 sm:$0xff]   ;;  %p8163_p0 = scmp.lt.s32.totalorder %s8161_s17, %s8155_s15 }
0x1b36   : > { %7510 = vrot.lane.b32.xlu1 %v7509_v36, %s8228_s13  ;;  %v4720_v36 = vsel %vm784_vm0, %v10709_v5, %v7467_v37  ;;  %5007 = vmatprep.subr.bf16.mxu1 %v7613_v59  ;;  %v10715_v5 = vld [vmem:[#allocation24_spill] sm:$0xff] }
0x1b37   : > { %7505 = vrot.lane.b32.xlu0 %v7504_v25, %s8228_s13  ;;  %v4723_v25 = vsel %vm784_vm0, %v10710_v16, %v7473_v0  ;;  %v4728_v56 = vsel %vm2285_vm1, %v4720_v36, %v7477_v18  ;;  %v7626_v59 = vld [vmem:[%s10627_s3 + $0xe0] ss:$8 sps:$4 sm:$0xff]   ;;  %p8164_p2 = por %p8163_p0, %p8162_p10 }
0x1b38   : > { %v4731_v24 = vsel %vm2285_vm1, %v4723_v25, %v7483_v35 }
0x1b39   : > { %5008 = vmatpush1.bf16.msra.mxu1 %v7611_v43  ;;  %v7627_v43 = vld [vmem:[%s10627_s3 + $0x60] ss:$8 sps:$4 sm:$0xff]   ;;  %p8165_p4 = pnand %p8164_p2, %p8158_p8 }
0x1ba0   : > { %v7491_v1 = vpop.permute.xlu1 %7490 }
0x1ba1   : > { %v7493_v14 = vunpack.i.h.bf16 %v7491_v1  ;;  %v7492_v41 = vunpack.i.l.bf16 %v7491_v1  ;;  %v7486_v47 = vpop.permute.xlu0 %7485 }
0x1ba2   : > { %v7488_v11 = vunpack.i.h.bf16 %v7486_v47  ;;  %v7487_v7 = vunpack.i.l.bf16 %v7486_v47 }
0x1ba3   : > { %v4738_v38 = vsel %vm2294_vm2, %v4730_v46, %v7492_v41  ;;  %v4739_v42 = vsel %vm2294_vm2, %v4731_v24, %v7493_v14 }
0x1ba4   : > { %v4761_v13 = vpack.c.bf16 %v4739_v42, %v4738_v38  ;;  %v4736_v29 = vsel %vm2294_vm2, %v4728_v56, %v7487_v7  ;;  %v4737_v33 = vsel %vm2294_vm2, %v4729_v61, %v7488_v11  ;;  %v7501_v52 = vpop.permute.xlu1 %7500  ;;  %v10188_v42 = vld [vmem:[%s10628_s4 + $0x8] sm:$0x3f] }
0x1ba5   : > { %v4760_v9 = vpack.c.bf16 %v4737_v33, %v4736_v29  ;;  %v7496_v48 = vpop.permute.xlu0 %7495  ;;  %v7503_v12 = vunpack.i.h.bf16 %v7501_v52  ;;  %v7502_v17 = vunpack.i.l.bf16 %v7501_v52  ;;  %v7628_v52 = vld [vmem:[%s10627_s3 + $0xf0] ss:$8 sps:$4 sm:$0xff]  }
0x1ba6   : > { %v7498_v10 = vunpack.i.h.bf16 %v7496_v48  ;;  %v7497_v3 = vunpack.i.l.bf16 %v7496_v48  ;;  %v7629_v48 = vld [vmem:[%s10627_s3 + $0x70] ss:$8 sps:$4 sm:$0xff]  }
0x1ba7   : > { %7285 = vmatprep.mubr.bf16.mxu0 %v4760_v9  ;;  %v4727_v35 = vsel %vm784_vm0, %v10712_v23, %v7503_v12  ;;  %v4726_v2 = vsel %vm784_vm0, %v10713_v26, %v7502_v17  ;;  %v4901_v23 = vld [vmem:[%s10629_s5] ss:$2 sm:$0x3] }
0x1ba8   : > { %7286 = vmatmul.mubr.bf16.vlgmr.msra.gmra.mrb[80].mxu0 %v4761_v13  ;;  %v7511_v54 = vpop.permute.xlu1 %7510  ;;  %v4725_v4 = vsel %vm784_vm0, %v10714_v50, %v7498_v10  ;;  %v4724_v36 = vsel %vm784_vm0, %v10715_v5, %v7497_v3  ;;  %v10716_v13 = vld [vmem:[#allocation10_spill] sm:$0xff] }
0x1ba9   : > { %v7506_v34 = vpop.permute.xlu0 %7505  ;;  %v7513_v31 = vunpack.i.h.bf16 %v7511_v54  ;;  %v7512_v37 = vunpack.i.l.bf16 %v7511_v54  ;;  %v4767_v29 = vrot.slane %v10188_v42, %v10716_v13 }
0x1baa   : > { %v7508_v32 = vunpack.i.h.bf16 %v7506_v34  ;;  %v7507_v0 = vunpack.i.l.bf16 %v7506_v34 }
0x1bab   : > { %v4734_v51 = vsel %vm2285_vm1, %v4726_v2, %v7512_v37  ;;  %v4735_v6 = vsel %vm2285_vm1, %v4727_v35, %v7513_v31  ;;  %v10717_v35 = vld [vmem:[#allocation9_spill] sm:$0xff]  ;;  %v10251_v2 = vrot.slane %v4901_v23, %v10716_v13 }
0x1bac   : > { %v4732_v47 = vsel %vm2285_vm1, %v4724_v36, %v7507_v0  ;;  %v4733_v46 = vsel %vm2285_vm1, %v4725_v4, %v7508_v32  ;;  %v10248_v26 = vrot.slane %v4901_v23, %v10717_v35 }
0x1bc5   : > { %v7267_v8 = vpop.f32.mrb[84].mxu1 }
0x1bc6   : > { %v4609_v49 = vpop.f32.mrb[85].mxu1 }
0x1bc7   : > { %v7268_v62 = vpop.f32.mrb[86].mxu1 }
0x1bc8   : > { %v7519_v45 = vpack.i.bf16 %v7268_v62, %v7267_v8  ;;  %v4612_v58 = vpop.f32.mrb[87].mxu1 }
0x1bc9   : > { %v7514_v60 = vpack.i.bf16 %v4612_v58, %v4609_v49  ;;  %v7614_v58 = vld [vmem:[%s10627_s3 + $0x80] ss:$8 sps:$4 sm:$0xff]  }
0x1bca   : > { %7520 = vrot.lane.b32.xlu1 %v7519_v45, %s8227_s12  ;;  %6765 = vmatprep.subr.bf16.mxu0 %v7614_v58 }
0x1bcb   : > { %7515 = vrot.lane.b32.xlu0 %v7514_v60, %s8227_s12  ;;  %6766 = vmatpush3.bf16.msra.mxu0 %v7615_v53  ;;  %v7616_v60 = vld [vmem:[%s10627_s3 + $0x90] ss:$8 sps:$4 sm:$0xff]  }
0x1bcc   : > { %6767 = vmatprep.subr.bf16.mxu0 %v7616_v60 }
0x1bcf   : > { %6768 = vmatpush3.bf16.msra.mxu0 %v7617_v28 }
0x1bd0   : > { %6769 = vmatprep.subr.bf16.mxu0 %v7618_v44 }
0x1bd3   : > { %6770 = vmatpush3.bf16.msra.mxu0 %v7619_v19 }
0x1bd4   : > { %6771 = vmatprep.subr.bf16.mxu0 %v7620_v57 }
0x1bd7   : > { %6772 = vmatpush3.bf16.msra.mxu0 %v7621_v27 }
0x1bd8   : > { %6773 = vmatprep.subr.bf16.mxu0 %v7622_v20 }
0x1bdb   : > { %6774 = vmatpush3.bf16.msra.mxu0 %v7623_v30 }
0x1bdc   : > { %6775 = vmatprep.subr.bf16.mxu0 %v7624_v21 }
0x1bdf   : > { %6776 = vmatpush3.bf16.msra.mxu0 %v7625_v15 }
0x1be0   : > { %6777 = vmatprep.subr.bf16.mxu0 %v7626_v59 }
0x1be3   : > { %6778 = vmatpush3.bf16.msra.mxu0 %v7627_v43 }
0x1be4   : > { %6779 = vmatprep.subr.bf16.mxu0 %v7628_v52 }
0x1be7   : > { %6780 = vmatpush3.bf16.msra.mxu0 %v7629_v48 }
0x1c3c   : > { %v7521_v18 = vpop.permute.xlu1 %7520 }
0x1c3d   : > { %v7523_v1 = vunpack.i.h.bf16 %v7521_v18  ;;  %v7522_v16 = vunpack.i.l.bf16 %v7521_v18  ;;  %v7516_v25 = vpop.permute.xlu0 %7515 }
0x1c3e   : > { %v7518_v14 = vunpack.i.h.bf16 %v7516_v25  ;;  %v7517_v41 = vunpack.i.l.bf16 %v7516_v25 }
0x1c3f   : > { %v4742_v24 = vsel %vm2294_vm2, %v4734_v51, %v7522_v16  ;;  %v4743_v11 = vsel %vm2294_vm2, %v4735_v6, %v7523_v1 }
0x1c40   : > { %v4740_v7 = vsel %vm2294_vm2, %v4732_v47, %v7517_v41  ;;  %v4741_v56 = vsel %vm2294_vm2, %v4733_v46, %v7518_v14  ;;  %v4763_v61 = vpack.c.bf16 %v4743_v11, %v4742_v24 }
0x1c41   : > { %v4762_v38 = vpack.c.bf16 %v4741_v56, %v4740_v7 }
0x1c43   : > { %7289 = vmatprep.mubr.bf16.mxu0 %v4762_v38 }
0x1c44   : > { %7290 = vmatmul.mubr.bf16.gmra.mrb[84].mxu0 %v4763_v61 }
0x1c7b   : > { %v7287_v33 = vpop.f32.mrb[80].mxu0 }
0x1c7c   : > { %v4850_v9 = vpop.f32.mrb[81].mxu0  ;;  %v4859_v63 = vadd.f32 %v7287_v33, %v4767_v29 }
0x1c7d   : > { %v7288_v40 = vpop.f32.mrb[82].mxu0  ;;  %v4851_v49 = vadd.f32 %v4850_v9, %v4767_v29 }
0x1c7e   : > { %v4862_v8 = vadd.f32 %v7288_v40, %v4767_v29  ;;  %v4853_v39 = vpop.f32.mrb[83].mxu0 }
0x1c7f   : > { %v4854_v62 = vadd.f32 %v4853_v39, %v4767_v29 }
0x1c80   : > { %v4898_v22 = vpack.c.bf16 %v4862_v8, %v4859_v63 }
0x1c81   : > { %v4897_v45 = vpack.c.bf16 %v4854_v62, %v4851_v49 }
0x1c83   : > { %5026 = vmatmul.mubr.bf16.vlgmr.msra.gmra.mrb[88].mxu1 %v4897_v45 }
0x1c84   : > { %5035 = vmatprep.mubr.bf16.mxu1 %v10701_v55 }
0x1c8b   : > { %5036 = vmatmul.mubr.bf16.gmra.mrb[92].mxu1 %v4898_v22 }
0x1c8c   : > { %5045 = vmatprep.mubr.bf16.mxu1 %v10701_v55 }
0x1d17   : > { %v7291_v54 = vpop.f32.mrb[84].mxu0 }
0x1d18   : > { %v4866_v12 = vpop.f32.mrb[85].mxu0  ;;  %v4875_v34 = vadd.f32 %v7291_v54, %v4767_v29 }
0x1d19   : > { %v7292_v17 = vpop.f32.mrb[86].mxu0  ;;  %v4867_v31 = vadd.f32 %v4866_v12, %v4767_v29 }
0x1d1a   : > { %v4878_v10 = vadd.f32 %v7292_v17, %v4767_v29  ;;  %v4869_v3 = vpop.f32.mrb[87].mxu0 }
0x1d1b   : > { %v4870_v37 = vadd.f32 %v4869_v3, %v4767_v29 }
0x1d1c   : > { %v4900_v32 = vpack.c.bf16 %v4878_v10, %v4875_v34 }
0x1d1d   : > { %v4899_v0 = vpack.c.bf16 %v4870_v37, %v4867_v31 }
0x1d1f   : > { %5046 = vmatmul.mubr.bf16.gmra.mrb[96].mxu1 %v4899_v0 }
0x1d20   : > { %5055 = vmatprep.mubr.bf16.mxu1 %v10701_v55 }
0x1d27   : > { %5056 = vmatmul.mubr.bf16.gmra.mrb[100].mxu1 %v4900_v32 }
0x1d28   : > { %5672 = vmatprep.mubr.bf16.mxu1 %v10701_v55 }
0x1d56   : > { %v5027_v18 = vpop.f32.mrb[88].mxu1 }
0x1d57   : > { %v10254_v50 = vadd.f32 %v5027_v18, %v10248_v26  ;;  %v5029_v4 = vpop.f32.mrb[89].mxu1 }
0x1d58   : > { %v10257_v5 = vadd.f32 %v5029_v4, %v10251_v2  ;;  %v5031_v36 = vpop.f32.mrb[90].mxu1 }
0x1d59   : > { %v6392_v1 = vmul.f32 -1.702, %v10254_v50  ;;  %v10261_v16 = vadd.f32 %v5031_v36, %v10248_v26  ;;  %v5033_v25 = vpop.f32.mrb[91].mxu1 }
0x1d5a   : > { %v6393_v51 = vmul.f32 -1.702, %v10257_v5  ;;  %v5034_v6 = vadd.f32 %v5033_v25, %v10251_v2 }
0x1d5b   : > { %v5098_v14 = vmul.f32 1.442695, %v6392_v1  ;;  %v6394_v41 = vmul.f32 -1.702, %v10261_v16 }
0x1d5c   : > { %v5100_v47 = vmul.f32 1.442695, %v6393_v51  ;;  %v6395_v46 = vmul.f32 -1.702, %v5034_v6 }
0x1d5d   : > { %7958 = vpow2.f32 %v5098_v14  ;;  %v5102_v24 = vmul.f32 1.442695, %v6394_v41 }
0x1d5e   : > { %7960 = vpow2.f32 %v5100_v47  ;;  %v5104_v11 = vmul.f32 1.442695, %v6395_v46  ;;  %v5037_v7 = vpop.f32.mrb[92].mxu1 }
0x1d5f   : > { %7962 = vpow2.f32 %v5102_v24  ;;  %v5038_v56 = vadd.f32 %v5037_v7, %v10248_v26  ;;  %v5039_v61 = vpop.f32.mrb[93].mxu1 }
0x1d60   : > { %7964 = vpow2.f32 %v5104_v11  ;;  %v5040_v38 = vadd.f32 %v5039_v61, %v10251_v2  ;;  %v5041_v29 = vpop.f32.mrb[94].mxu1 }
0x1d61   : > { %v6396_v33 = vmul.f32 -1.702, %v5038_v56  ;;  %v5042_v9 = vadd.f32 %v5041_v29, %v10248_v26  ;;  %v5043_v40 = vpop.f32.mrb[95].mxu1 }
0x1d62   : > { %v6397_v63 = vmul.f32 -1.702, %v5040_v38  ;;  %v5044_v8 = vadd.f32 %v5043_v40, %v10251_v2 }
0x1d63   : > { %v5106_v39 = vmul.f32 1.442695, %v6396_v33  ;;  %v6398_v49 = vmul.f32 -1.702, %v5042_v9 }
0x1d64   : > { %v5108_v62 = vmul.f32 1.442695, %v6397_v63  ;;  %v6399_v22 = vmul.f32 -1.702, %v5044_v8 }
0x1d65   : > { %7966 = vpow2.f32 %v5106_v39  ;;  %v5110_v45 = vmul.f32 1.442695, %v6398_v49 }
0x1d66   : > { %7968 = vpow2.f32 %v5108_v62  ;;  %v5112_v58 = vmul.f32 1.442695, %v6399_v22 }
0x1d67   : > { %v7959_v53 = vpop.eup %7958  ;;  %7970 = vpow2.f32 %v5110_v45 }
0x1d68   : > { %v7961_v60 = vpop.eup %7960  ;;  %v5130_v28 = vadd.f32 1.0, %v7959_v53  ;;  %7972 = vpow2.f32 %v5112_v58 }
0x1d69   : > { %v7963_v44 = vpop.eup %7962  ;;  %v5131_v19 = vadd.f32 1.0, %v7961_v60 }
0x1d6a   : > { %v7965_v57 = vpop.eup %7964  ;;  %7974 = vrcp.f32 %v5130_v28  ;;  %v5132_v27 = vadd.f32 1.0, %v7963_v44 }
0x1d6b   : > { %7976 = vrcp.f32 %v5131_v19  ;;  %v5133_v20 = vadd.f32 1.0, %v7965_v57 }
0x1d6c   : > { %7978 = vrcp.f32 %v5132_v27 }
0x1d6d   : > { %7980 = vrcp.f32 %v5133_v20 }
0x1d6f   : > { %v7967_v30 = vpop.eup %7966 }
0x1d70   : > { %v7969_v21 = vpop.eup %7968  ;;  %v5134_v15 = vadd.f32 1.0, %v7967_v30 }
0x1d71   : > { %v7971_v59 = vpop.eup %7970  ;;  %v5135_v43 = vadd.f32 1.0, %v7969_v21 }
0x1d72   : > { %v7973_v52 = vpop.eup %7972  ;;  %7982 = vrcp.f32 %v5134_v15  ;;  %v5136_v48 = vadd.f32 1.0, %v7971_v59 }
0x1d73   : > { %7984 = vrcp.f32 %v5135_v43  ;;  %v5137_v54 = vadd.f32 1.0, %v7973_v52 }
0x1d74   : > { %v7975_v12 = vpop.eup %7974  ;;  %7986 = vrcp.f32 %v5136_v48 }
0x1d75   : > { %v7977_v17 = vpop.eup %7976  ;;  %7988 = vrcp.f32 %v5137_v54  ;;  %v5178_v3 = vmul.f32 %v7975_v12, %v10254_v50 }
0x1d76   : > { %v7979_v34 = vpop.eup %7978  ;;  %v5179_v37 = vmul.f32 %v7977_v17, %v10257_v5 }
0x1d77   : > { %v7981_v10 = vpop.eup %7980  ;;  %v5180_v31 = vmul.f32 %v7979_v34, %v10261_v16 }
0x1d78   : > { %v5181_v32 = vmul.f32 %v7981_v10, %v5034_v6 }
0x1d79   : > { %v5226_v0 = vpack.c.bf16 %v5180_v31, %v5178_v3 }
0x1d7a   : > { %v5227_v23 = vpack.c.bf16 %v5181_v32, %v5179_v37 }
0x1d7c   : > { %v7983_v18 = vpop.eup %7982  ;;  %5362 = vmatprep.mubr.bf16.mxu0 %v5227_v23 }
0x1d7d   : > { %v7985_v4 = vpop.eup %7984  ;;  %5363 = vmatmul.mubr.bf16.vlgmr.msra.gmra.mrb[88].mxu0 %v5226_v0  ;;  %v5182_v25 = vmul.f32 %v7983_v18, %v5038_v56 }
0x1d7e   : > { %v7987_v36 = vpop.eup %7986  ;;  %v5183_v14 = vmul.f32 %v7985_v4, %v5040_v38 }
0x1d7f   : > { %v7989_v1 = vpop.eup %7988  ;;  %v5184_v51 = vmul.f32 %v7987_v36, %v5042_v9 }
0x1d80   : > { %v5185_v41 = vmul.f32 %v7989_v1, %v5044_v8 }
0x1d81   : > { %v5228_v47 = vpack.c.bf16 %v5184_v51, %v5182_v25 }
0x1d82   : > { %v5229_v46 = vpack.c.bf16 %v5185_v41, %v5183_v14 }
0x1d84   : > { %5370 = vmatprep.mubr.bf16.mxu0 %v5229_v46 }
0x1d85   : > { %5371 = vmatmul.mubr.bf16.gmra.mrb[92].mxu0 %v5228_v47 }
0x1df2   : > { %v5047_v50 = vpop.f32.mrb[96].mxu1 }
0x1df3   : > { %v10274_v5 = vadd.f32 %v5047_v50, %v10248_v26  ;;  %v5049_v16 = vpop.f32.mrb[97].mxu1 }
0x1df4   : > { %v10277_v6 = vadd.f32 %v5049_v16, %v10251_v2  ;;  %v5051_v24 = vpop.f32.mrb[98].mxu1 }
0x1df5   : > { %v6400_v11 = vmul.f32 -1.702, %v10274_v5  ;;  %v10281_v7 = vadd.f32 %v5051_v24, %v10248_v26  ;;  %v5053_v56 = vpop.f32.mrb[99].mxu1 }
0x1df6   : > { %v6401_v61 = vmul.f32 -1.702, %v10277_v6  ;;  %v5054_v38 = vadd.f32 %v5053_v56, %v10251_v2 }
0x1df7   : > { %v5114_v29 = vmul.f32 1.442695, %v6400_v11  ;;  %v6402_v33 = vmul.f32 -1.702, %v10281_v7 }
0x1df8   : > { %v5116_v9 = vmul.f32 1.442695, %v6401_v61  ;;  %v6403_v40 = vmul.f32 -1.702, %v5054_v38 }
0x1df9   : > { %7990 = vpow2.f32 %v5114_v29  ;;  %v5118_v63 = vmul.f32 1.442695, %v6402_v33 }
0x1dfa   : > { %7992 = vpow2.f32 %v5116_v9  ;;  %v5120_v8 = vmul.f32 1.442695, %v6403_v40  ;;  %v5057_v39 = vpop.f32.mrb[100].mxu1  ;;  %v10718_v9 = vld [vmem:[#allocation8_spill] sm:$0xff] }
0x1dfb   : > { %7994 = vpow2.f32 %v5118_v63  ;;  %v5058_v49 = vadd.f32 %v5057_v39, %v10248_v26  ;;  %v5059_v62 = vpop.f32.mrb[101].mxu1  ;;  %v10719_v40 = vsub.s32 2, %v10718_v9  ;;  %v10720_v39 = vld [vmem:[#allocation11_spill] sm:$0xff] }
0x1dfc   : > { %7996 = vpow2.f32 %v5120_v8  ;;  %v5060_v22 = vadd.f32 %v5059_v62, %v10251_v2  ;;  %v5061_v45 = vpop.f32.mrb[102].mxu1 }
0x1dfd   : > { %v6404_v58 = vmul.f32 -1.702, %v5058_v49  ;;  %v5062_v53 = vadd.f32 %v5061_v45, %v10248_v26  ;;  %v5063_v60 = vpop.f32.mrb[103].mxu1  ;;  %v5406_v63 = vrot.slane %v10188_v42, %v10719_v40 }
0x1dfe   : > { %v6405_v28 = vmul.f32 -1.702, %v5060_v22  ;;  %v5064_v44 = vadd.f32 %v5063_v60, %v10251_v2 }
0x1dff   : > { %v5122_v19 = vmul.f32 1.442695, %v6404_v58  ;;  %v6406_v57 = vmul.f32 -1.702, %v5062_v53 }
0x1e00   : > { %v5124_v27 = vmul.f32 1.442695, %v6405_v28  ;;  %v6407_v20 = vmul.f32 -1.702, %v5064_v44 }
0x1e01   : > { %7998 = vpow2.f32 %v5122_v19  ;;  %v5126_v30 = vmul.f32 1.442695, %v6406_v57 }
0x1e02   : > { %8000 = vpow2.f32 %v5124_v27  ;;  %v5128_v21 = vmul.f32 1.442695, %v6407_v20  ;;  %v10722_v27 = vld [vmem:[#allocation13_spill] sm:$0xff] }
0x1e03   : > { %v7991_v15 = vpop.eup %7990  ;;  %8002 = vpow2.f32 %v5126_v30 }
0x1e04   : > { %v7993_v59 = vpop.eup %7992  ;;  %v5138_v43 = vadd.f32 1.0, %v7991_v15  ;;  %8004 = vpow2.f32 %v5128_v21  ;;  %v10723_v21 = vld [vmem:[#allocation14_spill] sm:$0xff] }
0x1e05   : > { %v7995_v52 = vpop.eup %7994  ;;  %v5139_v48 = vadd.f32 1.0, %v7993_v59 }
0x1e06   : > { %v7997_v26 = vpop.eup %7996  ;;  %8006 = vrcp.f32 %v5138_v43  ;;  %v5140_v54 = vadd.f32 1.0, %v7995_v52 }
0x1e07   : > { %8008 = vrcp.f32 %v5139_v48  ;;  %v5141_v2 = vadd.f32 1.0, %v7997_v26 }
0x1e08   : > { %8010 = vrcp.f32 %v5140_v54 }
0x1e09   : > { %8012 = vrcp.f32 %v5141_v2 }
0x1e0b   : > { %v7999_v12 = vpop.eup %7998 }
0x1e0c   : > { %v8001_v17 = vpop.eup %8000  ;;  %v5142_v34 = vadd.f32 1.0, %v7999_v12 }
0x1e0d   : > { %v8003_v10 = vpop.eup %8002  ;;  %v5143_v3 = vadd.f32 1.0, %v8001_v17  ;;  %v10724_v17 = vld [vmem:[#allocation15_spill] sm:$0xff] }
0x1e0e   : > { %v8005_v31 = vpop.eup %8004  ;;  %8014 = vrcp.f32 %v5142_v34  ;;  %v5144_v37 = vadd.f32 1.0, %v8003_v10 }
0x1e0f   : > { %8016 = vrcp.f32 %v5143_v3  ;;  %v5145_v32 = vadd.f32 1.0, %v8005_v31  ;;  %v10725_v3 = vld [vmem:[#allocation16_spill] sm:$0xff] }
0x1e10   : > { %v8007_v0 = vpop.eup %8006  ;;  %8018 = vrcp.f32 %v5144_v37 }
0x1e11   : > { %v8009_v23 = vpop.eup %8008  ;;  %8020 = vrcp.f32 %v5145_v32  ;;  %v5186_v36 = vmul.f32 %v8007_v0, %v10274_v5 }
0x1e12   : > { %v8011_v18 = vpop.eup %8010  ;;  %v5187_v25 = vmul.f32 %v8009_v23, %v10277_v6 }
0x1e13   : > { %v8013_v4 = vpop.eup %8012  ;;  %v5188_v1 = vmul.f32 %v8011_v18, %v10281_v7 }
0x1e14   : > { %v5189_v51 = vmul.f32 %v8013_v4, %v5054_v38 }
0x1e15   : > { %v5230_v14 = vpack.c.bf16 %v5188_v1, %v5186_v36 }
0x1e16   : > { %v5231_v41 = vpack.c.bf16 %v5189_v51, %v5187_v25 }
0x1e18   : > { %v8015_v47 = vpop.eup %8014  ;;  %5378 = vmatprep.mubr.bf16.mxu0 %v5231_v41  ;;  %v10726_v41 = vld [vmem:[#allocation17_spill] sm:$0xff] }
0x1e19   : > { %v8017_v46 = vpop.eup %8016  ;;  %5379 = vmatmul.mubr.bf16.gmra.mrb[96].mxu0 %v5230_v14  ;;  %v5190_v24 = vmul.f32 %v8015_v47, %v5058_v49  ;;  %v10721_v49 = vld [vmem:[#allocation12_spill] sm:$0xff] }
0x1e1a   : > { %v8019_v50 = vpop.eup %8018  ;;  %v5191_v56 = vmul.f32 %v8017_v46, %v5060_v22 }
0x1e1b   : > { %v8021_v16 = vpop.eup %8020  ;;  %v5192_v11 = vmul.f32 %v8019_v50, %v5062_v53 }
0x1e1c   : > { %v5193_v61 = vmul.f32 %v8021_v16, %v5064_v44 }
0x1e1d   : > { %v5232_v29 = vpack.c.bf16 %v5192_v11, %v5190_v24  ;;  %v10727_v11 = vld [vmem:[#allocation18_spill] sm:$0xff] }
0x1e1e   : > { %v5233_v33 = vpack.c.bf16 %v5193_v61, %v5191_v56 }
0x1e20   : > { %5386 = vmatprep.mubr.bf16.mxu0 %v5233_v33 }
0x1e21   : > { %5387 = vmatmul.mubr.bf16.gmra.mrb[100].mxu0 %v5232_v29 }
0x1e50   : > { %v6781_v5 = vpop.f32.mrb[88].mxu0 }
0x1e51   : > { %v6782_v7 = vpop.f32.mrb[89].mxu0 }
0x1e52   : > { %v6783_v6 = vadd.f32 %v6782_v7, %v6781_v5  ;;  %v6784_v38 = vpop.f32.mrb[90].mxu0 }
0x1e53   : > { %v6785_v8 = vpop.f32.mrb[91].mxu0 }
0x1e54   : > { %v5395_v62 = vadd.f32 %v6783_v6, %v10720_v39  ;;  %v6786_v45 = vadd.f32 %v6785_v8, %v6784_v38  ;;  %v7630_v39 = vld [vmem:[%s10626_s2 + $0x20] ss:$40 sps:$4 sm:$0xff]  }
0x1e56   : > { %v5396_v58 = vadd.f32 %v6786_v45, %v10721_v49  ;;  %v10298_v22 = vadd.f32 %v5406_v63, %v5395_v62  ;;  %v7632_v62 = vld [vmem:[%s10626_s2 + $0x24] ss:$40 sps:$4 sm:$0xff]   ;;  %v7635_v45 = vld [vmem:[%s10626_s2 + $0x74] ss:$40 sps:$4 sm:$0xff]   ;;  %v7633_v49 = vld [vmem:[%s10626_s2 + $0x70] ss:$40 sps:$4 sm:$0xff]  }
0x1e57   : > { %5640 = vmatprep.subr.bf16.mxu1 %v7632_v62 }
0x1e58   : > { %v6787_v53 = vpop.f32.mrb[92].mxu0  ;;  %5415 = vadd.xlane.f32.xlu0 %v10298_v22  ;;  %v10301_v60 = vadd.f32 %v5406_v63, %v5396_v58  ;;  %5641 = vmatpush1.bf16.msra.mxu1 %v7630_v39  ;;  %v7638_v58 = vld [vmem:[%s10626_s2 + $0xc4] ss:$40 sps:$4 sm:$0xff]  }
0x1e59   : > { %v6788_v28 = vpop.f32.mrb[93].mxu0  ;;  %5642 = vmatprep.subr.bf16.mxu1 %v7635_v45  ;;  %v10729_v45 = vsub.s32 4, %v10718_v9 }
0x1e5a   : > { %v6789_v44 = vadd.f32 %v6788_v28, %v6787_v53  ;;  %v6790_v19 = vpop.f32.mrb[94].mxu0  ;;  %5417 = vadd.xlane.f32.xlu1 %v10301_v60  ;;  %v7636_v53 = vld [vmem:[%s10626_s2 + $0xc0] ss:$40 sps:$4 sm:$0xff]   ;;  %v7641_v28 = vld [vmem:[%s10626_s2 + $0x114] ss:$40 sps:$4 sm:$0xff]  }
0x1e5b   : > { %v6791_v57 = vpop.f32.mrb[95].mxu0 }
0x1e5c   : > { %v5397_v20 = vadd.f32 %v6789_v44, %v10722_v27  ;;  %v6792_v30 = vadd.f32 %v6791_v57, %v6790_v19  ;;  %5643 = vmatpush1.bf16.msra.mxu1 %v7633_v49  ;;  %v7639_v44 = vld [vmem:[%s10626_s2 + $0x110] ss:$40 sps:$4 sm:$0xff]   ;;  %v7644_v19 = vld [vmem:[%s10626_s2 + $0x164] ss:$40 sps:$4 sm:$0xff]   ;;  %v7642_v57 = vld [vmem:[%s10626_s2 + $0x160] ss:$40 sps:$4 sm:$0xff]   ;;  %v10425_v49 = vrot.slane %v10188_v42, %v10729_v45 }
0x1e5d   : > { %5644 = vmatprep.subr.bf16.mxu1 %v7638_v58  ;;  %v7647_v27 = vld [vmem:[%s10626_s2 + $0x1b4] ss:$40 sps:$4 sm:$0xff]  }
0x1e5e   : > { %v5398_v15 = vadd.f32 %v6792_v30, %v10723_v21  ;;  %v10306_v59 = vadd.f32 %v5406_v63, %v5397_v20  ;;  %v7645_v20 = vld [vmem:[%s10626_s2 + $0x1b0] ss:$40 sps:$4 sm:$0xff]   ;;  %v7650_v30 = vld [vmem:[%s10626_s2 + $0x204] ss:$40 sps:$4 sm:$0xff]   ;;  %v7648_v21 = vld [vmem:[%s10626_s2 + $0x200] ss:$40 sps:$4 sm:$0xff]  }
0x1e60   : > { %5419 = vadd.xlane.f32.xlu0 %v10306_v59  ;;  %v10309_v43 = vadd.f32 %v5406_v63, %v5398_v15  ;;  %5645 = vmatpush1.bf16.msra.mxu1 %v7636_v53  ;;  %v7653_v15 = vld [vmem:[%s10626_s2 + $0x254] ss:$40 sps:$4 sm:$0xff]  }
0x1e61   : > { %5646 = vmatprep.subr.bf16.mxu1 %v7641_v28 }
0x1e64   : > { %5421 = vadd.xlane.f32.xlu0 %v10309_v43  ;;  %5647 = vmatpush1.bf16.msra.mxu1 %v7639_v44 }
0x1e65   : > { %5648 = vmatprep.subr.bf16.mxu1 %v7644_v19 }
0x1e68   : > { %5649 = vmatpush1.bf16.msra.mxu1 %v7642_v57 }
0x1e69   : > { %5650 = vmatprep.subr.bf16.mxu1 %v7647_v27 }
0x1e6c   : > { %5651 = vmatpush1.bf16.msra.mxu1 %v7645_v20 }
0x1e6d   : > { %5652 = vmatprep.subr.bf16.mxu1 %v7650_v30 }
0x1e70   : > { %5653 = vmatpush1.bf16.msra.mxu1 %v7648_v21 }
0x1e71   : > { %5654 = vmatprep.subr.bf16.mxu1 %v7653_v15 }
0x1ee5   : > { %v5416_v2 = vpop.xlane.xlu0 %5415 }
0x1ee6   : > { %v5431_v36 = vmul.f32 0.0078125, %v5416_v2 }
0x1ee7   : > { %v5418_v18 = vpop.xlane.xlu1 %5417 }
0x1ee8   : > { %v5432_v14 = vmul.f32 0.0078125, %v5418_v18  ;;  %v10322_v16 = vsub.f32 %v10298_v22, %v5431_v36 }
0x1eea   : > { %v10328_v29 = vsub.f32 %v10301_v60, %v5432_v14  ;;  %v5447_v6 = vmul.f32 %v10322_v16, %v10322_v16 }
0x1eec   : > { %v6793_v52 = vpop.f32.mrb[96].mxu0  ;;  %v5448_v40 = vmul.f32 %v10328_v29, %v10328_v29 }
0x1eed   : > { %v6794_v48 = vpop.f32.mrb[97].mxu0  ;;  %v5420_v32 = vpop.xlane.xlu0 %5419 }
0x1eee   : > { %v6795_v26 = vadd.f32 %v6794_v48, %v6793_v52  ;;  %v6796_v54 = vpop.f32.mrb[98].mxu0  ;;  %v5433_v24 = vmul.f32 0.0078125, %v5420_v32  ;;  %v7651_v52 = vld [vmem:[%s10626_s2 + $0x250] ss:$40 sps:$4 sm:$0xff]  }
0x1eef   : > { %v6797_v12 = vpop.f32.mrb[99].mxu0  ;;  %5655 = vmatpush1.bf16.msra.mxu1 %v7651_v52 }
0x1ef0   : > { %v5399_v34 = vadd.f32 %v6795_v26, %v10724_v17  ;;  %v6798_v10 = vadd.f32 %v6797_v12, %v6796_v54  ;;  %v10334_v7 = vsub.f32 %v10306_v59, %v5433_v24 }
0x1ef1   : > { %v5422_v50 = vpop.xlane.xlu0 %5421 }
0x1ef2   : > { %v5400_v31 = vadd.f32 %v6798_v10, %v10725_v3  ;;  %v10314_v37 = vadd.f32 %v5406_v63, %v5399_v34  ;;  %v5434_v33 = vmul.f32 0.0078125, %v5422_v50 }
0x1ef4   : > { %v6799_v0 = vpop.f32.mrb[100].mxu0  ;;  %5423 = vadd.xlane.f32.xlu0 %v10314_v37  ;;  %v10317_v23 = vadd.f32 %v5406_v63, %v5400_v31  ;;  %v10340_v38 = vsub.f32 %v10309_v43, %v5434_v33 }
0x1ef5   : > { %v6800_v4 = vpop.f32.mrb[101].mxu0 }
0x1ef6   : > { %v6801_v1 = vadd.f32 %v6800_v4, %v6799_v0  ;;  %v6802_v25 = vpop.f32.mrb[102].mxu0  ;;  %5425 = vadd.xlane.f32.xlu1 %v10317_v23  ;;  %v5450_v8 = vmul.f32 %v10340_v38, %v10340_v38 }
0x1ef7   : > { %v6803_v51 = vpop.f32.mrb[103].mxu0 }
0x1ef8   : > { %v5401_v47 = vadd.f32 %v6801_v1, %v10726_v41  ;;  %v6804_v46 = vadd.f32 %v6803_v51, %v6802_v25 }
0x1efa   : > { %v5402_v56 = vadd.f32 %v6804_v46, %v10727_v11  ;;  %v10325_v61 = vadd.f32 %v5406_v63, %v5401_v47 }
0x1efc   : > { %5427 = vadd.xlane.f32.xlu0 %v10325_v61  ;;  %v10331_v5 = vadd.f32 %v5406_v63, %v5402_v56  ;;  %v5449_v63 = vmul.f32 %v10334_v7, %v10334_v7 }
0x1efe   : > { %5429 = vadd.xlane.f32.xlu1 %v10331_v5 }
0x1f00   : > { %5455 = vadd.xlane.f32.xlu0 %v5447_v6 }
0x1f02   : > { %5457 = vadd.xlane.f32.xlu1 %v5448_v40  ;;  %v10728_v40 = vsub.s32 3, %v10718_v9 }
0x1f04   : > { %5459 = vadd.xlane.f32.xlu0 %v5449_v63  ;;  %v10419_v63 = vrot.slane %v10188_v42, %v10728_v40 }
0x1f06   : > { %5461 = vadd.xlane.f32.xlu1 %v5450_v8 }
0x1f81   : > { %v5424_v48 = vpop.xlane.xlu0 %5423 }
0x1f82   : > { %v5435_v26 = vmul.f32 0.0078125, %v5424_v48  ;;  %v7656_v48 = vld [vmem:[%s10627_s3 + $0x94] ss:$8 sps:$4 sm:$0xff]  }
0x1f83   : > { %v5426_v54 = vpop.xlane.xlu1 %5425 }
0x1f84   : > { %v10397_v2 = vsub.f32 %v10314_v37, %v5435_v26  ;;  %v5436_v12 = vmul.f32 0.0078125, %v5426_v54  ;;  %v7657_v26 = vld [vmem:[%s10627_s3 + $0x14] ss:$8 sps:$4 sm:$0xff]   ;;  %v7658_v54 = vld [vmem:[%s10627_s3 + $0xa4] ss:$8 sps:$4 sm:$0xff]  }
0x1f86   : > { %v10400_v17 = vsub.f32 %v10317_v23, %v5436_v12  ;;  %v5451_v34 = vmul.f32 %v10397_v2, %v10397_v2  ;;  %v7659_v12 = vld [vmem:[%s10627_s3 + $0x24] ss:$8 sps:$4 sm:$0xff]  }
0x1f88   : > { %5463 = vadd.xlane.f32.xlu0 %v5451_v34  ;;  %v5452_v10 = vmul.f32 %v10400_v17, %v10400_v17  ;;  %v7660_v34 = vld [vmem:[%s10627_s3 + $0xb4] ss:$8 sps:$4 sm:$0xff]  }
0x1f89   : > { %v5428_v3 = vpop.xlane.xlu0 %5427 }
0x1f8a   : > { %v5437_v31 = vmul.f32 0.0078125, %v5428_v3  ;;  %5465 = vadd.xlane.f32.xlu1 %v5452_v10  ;;  %v7661_v10 = vld [vmem:[%s10627_s3 + $0x34] ss:$8 sps:$4 sm:$0xff]   ;;  %v7662_v3 = vld [vmem:[%s10627_s3 + $0xc4] ss:$8 sps:$4 sm:$0xff]  }
0x1f8b   : > { %v5430_v32 = vpop.xlane.xlu1 %5429 }
0x1f8c   : > { %v10407_v0 = vsub.f32 %v10325_v61, %v5437_v31  ;;  %v5438_v18 = vmul.f32 0.0078125, %v5430_v32  ;;  %v7663_v31 = vld [vmem:[%s10627_s3 + $0x44] ss:$8 sps:$4 sm:$0xff]  }
0x1f8d   : > { %v5456_v4 = vpop.xlane.xlu0 %5455 }
0x1f8e   : > { %v10410_v36 = vsub.f32 %v10331_v5, %v5438_v18  ;;  %v5471_v1 = vmul.f32 0.0078125, %v5456_v4  ;;  %v5453_v25 = vmul.f32 %v10407_v0, %v10407_v0  ;;  %v7664_v18 = vld [vmem:[%s10627_s3 + $0xd4] ss:$8 sps:$4 sm:$0xff]  }
0x1f8f   : > { %v5458_v51 = vpop.xlane.xlu1 %5457 }
0x1f90   : > { %v5479_v14 = vadd.f32 1e-05, %v5471_v1  ;;  %v5472_v41 = vmul.f32 0.0078125, %v5458_v51  ;;  %5467 = vadd.xlane.f32.xlu0 %v5453_v25  ;;  %v5454_v47 = vmul.f32 %v10410_v36, %v10410_v36  ;;  %v7665_v1 = vld [vmem:[%s10627_s3 + $0x54] ss:$8 sps:$4 sm:$0xff]  }
0x1f91   : > { %v5460_v46 = vpop.xlane.xlu0 %5459 }
0x1f92   : > { %8022 = vrsqrt.f32 %v5479_v14  ;;  %v5480_v50 = vadd.f32 1e-05, %v5472_v41  ;;  %v5473_v24 = vmul.f32 0.0078125, %v5460_v46  ;;  %5469 = vadd.xlane.f32.xlu1 %v5454_v47  ;;  %v7666_v41 = vld [vmem:[%s10627_s3 + $0xe4] ss:$8 sps:$4 sm:$0xff]  }
0x1f93   : > { %v5462_v11 = vpop.xlane.xlu1 %5461  ;;  %v7667_v46 = vld [vmem:[%s10627_s3 + $0x64] ss:$8 sps:$4 sm:$0xff]  }
0x1f94   : > { %8024 = vrsqrt.f32 %v5480_v50  ;;  %v5481_v56 = vadd.f32 1e-05, %v5473_v24  ;;  %v5474_v33 = vmul.f32 0.0078125, %v5462_v11  ;;  %v7668_v24 = vld [vmem:[%s10627_s3 + $0xf4] ss:$8 sps:$4 sm:$0xff]  }
0x1f96   : > { %8026 = vrsqrt.f32 %v5481_v56  ;;  %v5482_v6 = vadd.f32 1e-05, %v5474_v33  ;;  %v7669_v56 = vld [vmem:[%s10627_s3 + $0x74] ss:$8 sps:$4 sm:$0xff]  }
0x1f98   : > { %8028 = vrsqrt.f32 %v5482_v6 }
0x1f9c   : > { %v8023_v8 = vpop.eup %8022 }
0x1f9d   : > { %v5495_v39 = vmul.f32 %v8023_v8, %v10322_v16 }
0x1f9e   : > { %v8025_v62 = vpop.eup %8024 }
0x1f9f   : > { %v5507_v58 = vmul.f32 %v10419_v63, %v5495_v39  ;;  %v5496_v53 = vmul.f32 %v8025_v62, %v10328_v29 }
0x1fa0   : > { %v8027_v28 = vpop.eup %8026 }
0x1fa1   : > { %v5508_v44 = vmul.f32 %v10419_v63, %v5496_v53  ;;  %v5519_v57 = vadd.f32 %v10425_v49, %v5507_v58  ;;  %v5497_v16 = vmul.f32 %v8027_v28, %v10334_v7  ;;  %v7654_v7 = vld [vmem:[%s10627_s3 + $0x84] ss:$8 sps:$4 sm:$0xff]  }
0x1fa2   : > { %v8029_v19 = vpop.eup %8028  ;;  %6805 = vmatprep.subr.bf16.mxu0 %v7654_v7 }
0x1fa3   : > { %v5520_v27 = vadd.f32 %v10425_v49, %v5508_v44  ;;  %v5498_v20 = vmul.f32 %v8029_v19, %v10340_v38  ;;  %v5509_v21 = vmul.f32 %v10419_v63, %v5497_v16  ;;  %v7655_v38 = vld [vmem:[%s10627_s3 + $0x4] ss:$8 sps:$4 sm:$0xff]  }
0x1fa4   : > { %6806 = vmatpush3.bf16.msra.mxu0 %v7655_v38 }
0x1fa5   : > { %v5543_v30 = vpack.c.bf16 %v5520_v27, %v5519_v57  ;;  %v5510_v42 = vmul.f32 %v10419_v63, %v5498_v20  ;;  %v5521_v15 = vadd.f32 %v10425_v49, %v5509_v21  ;;  %6807 = vmatprep.subr.bf16.mxu0 %v7656_v48 }
0x1fa7   : > { %5673 = vmatmul.mubr.bf16.vlgmr.msra.gmra.mrb[104].mxu1 %v5543_v30  ;;  %v5522_v29 = vadd.f32 %v10425_v49, %v5510_v42 }
0x1fa8   : > { %5682 = vmatprep.mubr.bf16.mxu1 %v10701_v55  ;;  %6808 = vmatpush3.bf16.msra.mxu0 %v7657_v26 }
0x1fa9   : > { %v5544_v52 = vpack.c.bf16 %v5522_v29, %v5521_v15  ;;  %6809 = vmatprep.subr.bf16.mxu0 %v7658_v54 }
0x1fac   : > { %6810 = vmatpush3.bf16.msra.mxu0 %v7659_v12 }
0x1fad   : > { %6811 = vmatprep.subr.bf16.mxu0 %v7660_v34 }
0x1faf   : > { %5683 = vmatmul.mubr.bf16.gmra.mrb[108].mxu1 %v5544_v52 }
0x1fb0   : > { %5692 = vmatprep.mubr.bf16.mxu1 %v10701_v55  ;;  %6812 = vmatpush3.bf16.msra.mxu0 %v7661_v10 }
0x1fb1   : > { %6813 = vmatprep.subr.bf16.mxu0 %v7662_v3 }
0x1fb4   : > { %6814 = vmatpush3.bf16.msra.mxu0 %v7663_v31 }
0x1fb5   : > { %6815 = vmatprep.subr.bf16.mxu0 %v7664_v18 }
0x1fb8   : > { %6816 = vmatpush3.bf16.msra.mxu0 %v7665_v1 }
0x1fb9   : > { %6817 = vmatprep.subr.bf16.mxu0 %v7666_v41 }
0x1fbc   : > { %6818 = vmatpush3.bf16.msra.mxu0 %v7667_v46 }
0x1fbd   : > { %6819 = vmatprep.subr.bf16.mxu0 %v7668_v24 }
0x1fc0   : > { %6820 = vmatpush3.bf16.msra.mxu0 %v7669_v56 }
0x2015   : > { %v5464_v32 = vpop.xlane.xlu0 %5463 }
0x2016   : > { %v5475_v4 = vmul.f32 0.0078125, %v5464_v32 }
0x2017   : > { %v5466_v25 = vpop.xlane.xlu1 %5465 }
0x2018   : > { %v5483_v51 = vadd.f32 1e-05, %v5475_v4  ;;  %v5476_v14 = vmul.f32 0.0078125, %v5466_v25 }
0x201a   : > { %8030 = vrsqrt.f32 %v5483_v51  ;;  %v5484_v47 = vadd.f32 1e-05, %v5476_v14 }
0x201c   : > { %8032 = vrsqrt.f32 %v5484_v47 }
0x201d   : > { %v5468_v50 = vpop.xlane.xlu0 %5467 }
0x201e   : > { %v5477_v11 = vmul.f32 0.0078125, %v5468_v50 }
0x201f   : > { %v5470_v33 = vpop.xlane.xlu1 %5469 }
0x2020   : > { %v5485_v6 = vadd.f32 1e-05, %v5477_v11  ;;  %v5478_v40 = vmul.f32 0.0078125, %v5470_v33 }
0x2022   : > { %8034 = vrsqrt.f32 %v5485_v6  ;;  %v5486_v8 = vadd.f32 1e-05, %v5478_v40 }
0x2024   : > { %v8031_v39 = vpop.eup %8030  ;;  %8036 = vrsqrt.f32 %v5486_v8 }
0x2025   : > { %v5499_v62 = vmul.f32 %v8031_v39, %v10397_v2 }
0x2026   : > { %v8033_v45 = vpop.eup %8032 }
0x2027   : > { %v5500_v58 = vmul.f32 %v8033_v45, %v10400_v17  ;;  %v5511_v53 = vmul.f32 %v10419_v63, %v5499_v62 }
0x2029   : > { %v5512_v28 = vmul.f32 %v10419_v63, %v5500_v58  ;;  %v5523_v44 = vadd.f32 %v10425_v49, %v5511_v53 }
0x202b   : > { %v5524_v19 = vadd.f32 %v10425_v49, %v5512_v28 }
0x202c   : > { %v8035_v57 = vpop.eup %8034 }
0x202d   : > { %v5545_v27 = vpack.c.bf16 %v5524_v19, %v5523_v44  ;;  %v5501_v16 = vmul.f32 %v8035_v57, %v10407_v0  ;;  %v6424_v0 = vld [vmem:[%s10629_s5 + $0x1] ss:$2 sm:$0x3] }
0x202e   : > { %v8037_v20 = vpop.eup %8036  ;;  %v10505_v15 = vrot.slane %v6424_v0, %v10717_v35 }
0x202f   : > { %5693 = vmatmul.mubr.bf16.gmra.mrb[112].mxu1 %v5545_v27  ;;  %v5502_v30 = vmul.f32 %v8037_v20, %v10410_v36  ;;  %v5513_v2 = vmul.f32 %v10419_v63, %v5501_v16  ;;  %v10508_v36 = vrot.slane %v6424_v0, %v10716_v13 }
0x2030   : > { %5702 = vmatprep.mubr.bf16.mxu1 %v10701_v55 }
0x2031   : > { %v5514_v17 = vmul.f32 %v10419_v63, %v5502_v30  ;;  %v5525_v42 = vadd.f32 %v10425_v49, %v5513_v2 }
0x2033   : > { %v5526_v21 = vadd.f32 %v10425_v49, %v5514_v17 }
0x2035   : > { %v5546_v29 = vpack.c.bf16 %v5526_v21, %v5525_v42 }
0x2037   : > { %5703 = vmatmul.mubr.bf16.gmra.mrb[116].mxu1 %v5546_v29 }
0x207a   : > { %v5674_v52 = vpop.f32.mrb[104].mxu1 }
0x207b   : > { %v10511_v55 = vadd.f32 %v5674_v52, %v10505_v15  ;;  %v5676_v63 = vpop.f32.mrb[105].mxu1 }
0x207c   : > { %v10514_v7 = vadd.f32 %v5676_v63, %v10508_v36  ;;  %v5678_v49 = vpop.f32.mrb[106].mxu1 }
0x207d   : > { %v6441_v38 = vmul.f32 -1.702, %v10511_v55  ;;  %v10518_v48 = vadd.f32 %v5678_v49, %v10505_v15  ;;  %v5680_v26 = vpop.f32.mrb[107].mxu1 }
0x207e   : > { %v6442_v35 = vmul.f32 -1.702, %v10514_v7  ;;  %v5681_v13 = vadd.f32 %v5680_v26, %v10508_v36 }
0x207f   : > { %v5745_v54 = vmul.f32 1.442695, %v6441_v38  ;;  %v6443_v12 = vmul.f32 -1.702, %v10518_v48 }
0x2080   : > { %v5747_v34 = vmul.f32 1.442695, %v6442_v35  ;;  %v6444_v10 = vmul.f32 -1.702, %v5681_v13 }
0x2081   : > { %8038 = vpow2.f32 %v5745_v54  ;;  %v5749_v3 = vmul.f32 1.442695, %v6443_v12 }
0x2082   : > { %8040 = vpow2.f32 %v5747_v34  ;;  %v5751_v31 = vmul.f32 1.442695, %v6444_v10  ;;  %v5684_v32 = vpop.f32.mrb[108].mxu1 }
0x2083   : > { %8042 = vpow2.f32 %v5749_v3  ;;  %v5685_v18 = vadd.f32 %v5684_v32, %v10505_v15  ;;  %v5686_v4 = vpop.f32.mrb[109].mxu1 }
0x2084   : > { %8044 = vpow2.f32 %v5751_v31  ;;  %v5687_v1 = vadd.f32 %v5686_v4, %v10508_v36  ;;  %v5688_v25 = vpop.f32.mrb[110].mxu1 }
0x2085   : > { %v6445_v51 = vmul.f32 -1.702, %v5685_v18  ;;  %v5689_v14 = vadd.f32 %v5688_v25, %v10505_v15  ;;  %v5690_v41 = vpop.f32.mrb[111].mxu1 }
0x2086   : > { %v6446_v47 = vmul.f32 -1.702, %v5687_v1  ;;  %v5691_v46 = vadd.f32 %v5690_v41, %v10508_v36 }
0x2087   : > { %v5753_v50 = vmul.f32 1.442695, %v6445_v51  ;;  %v6447_v24 = vmul.f32 -1.702, %v5689_v14 }
0x2088   : > { %v5755_v11 = vmul.f32 1.442695, %v6446_v47  ;;  %v6448_v56 = vmul.f32 -1.702, %v5691_v46 }
0x2089   : > { %8046 = vpow2.f32 %v5753_v50  ;;  %v5757_v33 = vmul.f32 1.442695, %v6447_v24 }
0x208a   : > { %8048 = vpow2.f32 %v5755_v11  ;;  %v5759_v6 = vmul.f32 1.442695, %v6448_v56 }
0x208b   : > { %v8039_v40 = vpop.eup %8038  ;;  %8050 = vpow2.f32 %v5757_v33 }
0x208c   : > { %v8041_v8 = vpop.eup %8040  ;;  %v5777_v39 = vadd.f32 1.0, %v8039_v40  ;;  %8052 = vpow2.f32 %v5759_v6 }
0x208d   : > { %v8043_v62 = vpop.eup %8042  ;;  %v5778_v45 = vadd.f32 1.0, %v8041_v8 }
0x208e   : > { %v8045_v58 = vpop.eup %8044  ;;  %8054 = vrcp.f32 %v5777_v39  ;;  %v5779_v53 = vadd.f32 1.0, %v8043_v62 }
0x208f   : > { %8056 = vrcp.f32 %v5778_v45  ;;  %v5780_v28 = vadd.f32 1.0, %v8045_v58 }
0x2090   : > { %8058 = vrcp.f32 %v5779_v53 }
0x2091   : > { %8060 = vrcp.f32 %v5780_v28 }
0x2093   : > { %v8047_v44 = vpop.eup %8046 }
0x2094   : > { %v8049_v19 = vpop.eup %8048  ;;  %v5781_v57 = vadd.f32 1.0, %v8047_v44 }
0x2095   : > { %v8051_v27 = vpop.eup %8050  ;;  %v5782_v16 = vadd.f32 1.0, %v8049_v19 }
0x2096   : > { %v8053_v20 = vpop.eup %8052  ;;  %8062 = vrcp.f32 %v5781_v57  ;;  %v5783_v30 = vadd.f32 1.0, %v8051_v27 }
0x2097   : > { %8064 = vrcp.f32 %v5782_v16  ;;  %v5784_v2 = vadd.f32 1.0, %v8053_v20 }
0x2098   : > { %v8055_v17 = vpop.eup %8054  ;;  %8066 = vrcp.f32 %v5783_v30 }
0x2099   : > { %v8057_v42 = vpop.eup %8056  ;;  %8068 = vrcp.f32 %v5784_v2  ;;  %v5825_v0 = vmul.f32 %v8055_v17, %v10511_v55 }
0x209a   : > { %v8059_v21 = vpop.eup %8058  ;;  %v5826_v63 = vmul.f32 %v8057_v42, %v10514_v7 }
0x209b   : > { %v8061_v29 = vpop.eup %8060  ;;  %v5827_v52 = vmul.f32 %v8059_v21, %v10518_v48 }
0x209c   : > { %v5828_v49 = vmul.f32 %v8061_v29, %v5681_v13 }
0x209d   : > { %v5873_v38 = vpack.c.bf16 %v5827_v52, %v5825_v0 }
0x209e   : > { %v5874_v26 = vpack.c.bf16 %v5828_v49, %v5826_v63 }
0x20a0   : > { %v8063_v35 = vpop.eup %8062  ;;  %6009 = vmatprep.mubr.bf16.mxu0 %v5874_v26 }
0x20a1   : > { %v8065_v54 = vpop.eup %8064  ;;  %6010 = vmatmul.mubr.bf16.vlgmr.msra.gmra.mrb[104].mxu0 %v5873_v38  ;;  %v5829_v10 = vmul.f32 %v8063_v35, %v5685_v18 }
0x20a2   : > { %v8067_v12 = vpop.eup %8066  ;;  %v5830_v31 = vmul.f32 %v8065_v54, %v5687_v1 }
0x20a3   : > { %v8069_v34 = vpop.eup %8068  ;;  %v5831_v3 = vmul.f32 %v8067_v12, %v5689_v14 }
0x20a4   : > { %v5832_v32 = vmul.f32 %v8069_v34, %v5691_v46 }
0x20a5   : > { %v5875_v4 = vpack.c.bf16 %v5831_v3, %v5829_v10 }
0x20a6   : > { %v5876_v25 = vpack.c.bf16 %v5832_v32, %v5830_v31 }
0x20a8   : > { %6017 = vmatprep.mubr.bf16.mxu0 %v5876_v25 }
0x20a9   : > { %6018 = vmatmul.mubr.bf16.gmra.mrb[108].mxu0 %v5875_v4 }
0x2102   : > { %v5694_v55 = vpop.f32.mrb[112].mxu1 }
0x2103   : > { %v10531_v7 = vadd.f32 %v5694_v55, %v10505_v15  ;;  %v5696_v48 = vpop.f32.mrb[113].mxu1 }
0x2104   : > { %v10534_v13 = vadd.f32 %v5696_v48, %v10508_v36  ;;  %v5698_v51 = vpop.f32.mrb[114].mxu1 }
0x2105   : > { %v6449_v41 = vmul.f32 -1.702, %v10531_v7  ;;  %v10538_v18 = vadd.f32 %v5698_v51, %v10505_v15  ;;  %v5700_v1 = vpop.f32.mrb[115].mxu1 }
0x2106   : > { %v6450_v14 = vmul.f32 -1.702, %v10534_v13  ;;  %v5701_v47 = vadd.f32 %v5700_v1, %v10508_v36 }
0x2107   : > { %v5761_v46 = vmul.f32 1.442695, %v6449_v41  ;;  %v6451_v50 = vmul.f32 -1.702, %v10538_v18 }
0x2108   : > { %v5763_v24 = vmul.f32 1.442695, %v6450_v14  ;;  %v6452_v11 = vmul.f32 -1.702, %v5701_v47 }
0x2109   : > { %8070 = vpow2.f32 %v5761_v46  ;;  %v5765_v56 = vmul.f32 1.442695, %v6451_v50 }
0x210a   : > { %8072 = vpow2.f32 %v5763_v24  ;;  %v5767_v33 = vmul.f32 1.442695, %v6452_v11  ;;  %v5704_v6 = vpop.f32.mrb[116].mxu1 }
0x210b   : > { %8074 = vpow2.f32 %v5765_v56  ;;  %v5705_v40 = vadd.f32 %v5704_v6, %v10505_v15  ;;  %v5706_v8 = vpop.f32.mrb[117].mxu1 }
0x210c   : > { %8076 = vpow2.f32 %v5767_v33  ;;  %v5707_v39 = vadd.f32 %v5706_v8, %v10508_v36  ;;  %v5708_v62 = vpop.f32.mrb[118].mxu1 }
0x210d   : > { %v6453_v45 = vmul.f32 -1.702, %v5705_v40  ;;  %v5709_v58 = vadd.f32 %v5708_v62, %v10505_v15  ;;  %v5710_v53 = vpop.f32.mrb[119].mxu1 }
0x210e   : > { %v6454_v28 = vmul.f32 -1.702, %v5707_v39  ;;  %v5711_v44 = vadd.f32 %v5710_v53, %v10508_v36 }
0x210f   : > { %v5769_v19 = vmul.f32 1.442695, %v6453_v45  ;;  %v6455_v57 = vmul.f32 -1.702, %v5709_v58  ;;  %v8124_v45 = vld [vmem:[%s10628_s4 + $0x8] sm:$0x3f] }
0x2110   : > { %v5771_v27 = vmul.f32 1.442695, %v6454_v28  ;;  %v6456_v16 = vmul.f32 -1.702, %v5711_v44 }
0x2111   : > { %8078 = vpow2.f32 %v5769_v19  ;;  %v5773_v20 = vmul.f32 1.442695, %v6455_v57 }
0x2112   : > { %8080 = vpow2.f32 %v5771_v27  ;;  %v5775_v30 = vmul.f32 1.442695, %v6456_v16 }
0x2113   : > { %v8071_v2 = vpop.eup %8070  ;;  %8082 = vpow2.f32 %v5773_v20 }
0x2114   : > { %v8073_v17 = vpop.eup %8072  ;;  %v5785_v42 = vadd.f32 1.0, %v8071_v2  ;;  %8084 = vpow2.f32 %v5775_v30 }
0x2115   : > { %v8075_v21 = vpop.eup %8074  ;;  %v5786_v29 = vadd.f32 1.0, %v8073_v17 }
0x2116   : > { %v8077_v15 = vpop.eup %8076  ;;  %8086 = vrcp.f32 %v5785_v42  ;;  %v5787_v0 = vadd.f32 1.0, %v8075_v21 }
0x2117   : > { %8088 = vrcp.f32 %v5786_v29  ;;  %v5788_v36 = vadd.f32 1.0, %v8077_v15 }
0x2118   : > { %8090 = vrcp.f32 %v5787_v0 }
0x2119   : > { %8092 = vrcp.f32 %v5788_v36 }
0x211b   : > { %v8079_v52 = vpop.eup %8078 }
0x211c   : > { %v8081_v63 = vpop.eup %8080  ;;  %v5789_v49 = vadd.f32 1.0, %v8079_v52 }
0x211d   : > { %v8083_v38 = vpop.eup %8082  ;;  %v5790_v26 = vadd.f32 1.0, %v8081_v63 }
0x211e   : > { %v8085_v35 = vpop.eup %8084  ;;  %8094 = vrcp.f32 %v5789_v49  ;;  %v5791_v54 = vadd.f32 1.0, %v8083_v38 }
0x211f   : > { %8096 = vrcp.f32 %v5790_v26  ;;  %v5792_v12 = vadd.f32 1.0, %v8085_v35 }
0x2120   : > { %v8087_v34 = vpop.eup %8086  ;;  %8098 = vrcp.f32 %v5791_v54 }
0x2121   : > { %v8089_v10 = vpop.eup %8088  ;;  %8100 = vrcp.f32 %v5792_v12  ;;  %v5833_v32 = vmul.f32 %v8087_v34, %v10531_v7 }
0x2122   : > { %v8091_v3 = vpop.eup %8090  ;;  %v5834_v25 = vmul.f32 %v8089_v10, %v10534_v13 }
0x2123   : > { %v8093_v31 = vpop.eup %8092  ;;  %v5835_v4 = vmul.f32 %v8091_v3, %v10538_v18 }
0x2124   : > { %v5836_v55 = vmul.f32 %v8093_v31, %v5701_v47 }
0x2125   : > { %v5877_v48 = vpack.c.bf16 %v5835_v4, %v5833_v32 }
0x2126   : > { %v5878_v51 = vpack.c.bf16 %v5836_v55, %v5834_v25 }
0x2128   : > { %v8095_v41 = vpop.eup %8094  ;;  %6025 = vmatprep.mubr.bf16.mxu0 %v5878_v51 }
0x2129   : > { %v8097_v1 = vpop.eup %8096  ;;  %6026 = vmatmul.mubr.bf16.gmra.mrb[112].mxu0 %v5877_v48  ;;  %v5837_v50 = vmul.f32 %v8095_v41, %v5705_v40  ;;  %v10730_v40 = vsub.s32 5, %v10718_v9 }
0x212a   : > { %v8099_v14 = vpop.eup %8098  ;;  %v5838_v11 = vmul.f32 %v8097_v1, %v5707_v39 }
0x212b   : > { %v8101_v46 = vpop.eup %8100  ;;  %v5839_v24 = vmul.f32 %v8099_v14, %v5709_v58  ;;  %v6053_v39 = vrot.slane %v8124_v45, %v10730_v40 }
0x212c   : > { %v5840_v56 = vmul.f32 %v8101_v46, %v5711_v44 }
0x212d   : > { %v5879_v33 = vpack.c.bf16 %v5839_v24, %v5837_v50 }
0x212e   : > { %v5880_v6 = vpack.c.bf16 %v5840_v56, %v5838_v11 }
0x2130   : > { %6033 = vmatprep.mubr.bf16.mxu0 %v5880_v6 }
0x2131   : > { %6034 = vmatmul.mubr.bf16.gmra.mrb[116].mxu0 %v5879_v33 }
0x2174   : > { %v6821_v7 = vpop.f32.mrb[104].mxu0 }
0x2175   : > { %v6822_v18 = vpop.f32.mrb[105].mxu0 }
0x2176   : > { %v6823_v13 = vadd.f32 %v6822_v18, %v6821_v7  ;;  %v6824_v47 = vpop.f32.mrb[106].mxu0 }
0x2177   : > { %v6825_v8 = vpop.f32.mrb[107].mxu0 }
0x2178   : > { %v6042_v62 = vadd.f32 %v6823_v13, %v10298_v22  ;;  %v6826_v58 = vadd.f32 %v6825_v8, %v6824_v47 }
0x217a   : > { %v6043_v53 = vadd.f32 %v6826_v58, %v10301_v60  ;;  %v6054_v28 = vadd.f32 %v6053_v39, %v6042_v62 }
0x217c   : > { %v6055_v44 = vadd.f32 %v6053_v39, %v6043_v53  ;;  %v6827_v19 = vpop.f32.mrb[108].mxu0 }
0x217d   : > { %v6828_v57 = vpop.f32.mrb[109].mxu0 }
0x217e   : > { %v6518_v27 = vpack.c.bf16 %v6055_v44, %v6054_v28  ;;  %v6829_v16 = vadd.f32 %v6828_v57, %v6827_v19  ;;  %v6830_v20 = vpop.f32.mrb[110].mxu0 }
0x217f   : > { %v6831_v30 = vpop.f32.mrb[111].mxu0 }
0x2180   : > { %6519 = vst [vmem:[%s10559_s18] sm:$0xff] %v6518_v27   ;;  %v6044_v9 = vadd.f32 %v6829_v16, %v10306_v59  ;;  %v6832_v22 = vadd.f32 %v6831_v30, %v6830_v20 }
0x2182   : > { %v6045_v2 = vadd.f32 %v6832_v22, %v10309_v43  ;;  %v6056_v60 = vadd.f32 %v6053_v39, %v6044_v9 }
0x2184   : > { %v6057_v17 = vadd.f32 %v6053_v39, %v6045_v2 }
0x2186   : > { %v6523_v42 = vpack.c.bf16 %v6057_v17, %v6056_v60 }
0x2188   : > { %6538 = vst [vmem:[%s10559_s18 + $0x8] sm:$0xff] %v6523_v42  }
0x21fc   : > { %v6833_v21 = vpop.f32.mrb[112].mxu0 }
0x21fd   : > { %v6834_v29 = vpop.f32.mrb[113].mxu0 }
0x21fe   : > { %v6835_v15 = vadd.f32 %v6834_v29, %v6833_v21  ;;  %v6836_v0 = vpop.f32.mrb[114].mxu0 }
0x21ff   : > { %v6837_v36 = vpop.f32.mrb[115].mxu0 }
0x2200   : > { %v6046_v52 = vadd.f32 %v6835_v15, %v10314_v37  ;;  %v6838_v63 = vadd.f32 %v6837_v36, %v6836_v0 }
0x2202   : > { %v6047_v59 = vadd.f32 %v6838_v63, %v10317_v23  ;;  %v6058_v49 = vadd.f32 %v6053_v39, %v6046_v52 }
0x2204   : > { %v6059_v38 = vadd.f32 %v6053_v39, %v6047_v59  ;;  %v6839_v43 = vpop.f32.mrb[116].mxu0 }
0x2205   : > { %v6840_v26 = vpop.f32.mrb[117].mxu0 }
0x2206   : > { %v6528_v35 = vpack.c.bf16 %v6059_v38, %v6058_v49  ;;  %v6841_v54 = vadd.f32 %v6840_v26, %v6839_v43  ;;  %v6842_v12 = vpop.f32.mrb[118].mxu0 }
0x2207   : > { %v6843_v34 = vpop.f32.mrb[119].mxu0 }
0x2208   : > { %6539 = vst [vmem:[%s10559_s18 + $0x10] sm:$0xff] %v6528_v35   ;;  %v6048_v10 = vadd.f32 %v6841_v54, %v10325_v61  ;;  %v6844_v3 = vadd.f32 %v6843_v34, %v6842_v12 }
0x220a   : > { %v6049_v37 = vadd.f32 %v6844_v3, %v10331_v5  ;;  %v6060_v23 = vadd.f32 %v6053_v39, %v6048_v10 }
0x220c   : > { %v6061_v31 = vadd.f32 %v6053_v39, %v6049_v37 }
0x220e   : > { %v6533_v32 = vpack.c.bf16 %v6061_v31, %v6060_v23 }
0x2210   : > { %6540 = vst [vmem:[%s10559_s18 + $0x18] sm:$0xff] %v6533_v32  }
0x2211   : > { %8168 = shalt.err (!%p8165_p4)
}
0x2212   : > { %s8169_s26 = scalar_lea.hbm %s10577_s11, 512  ;;  %s8173_s18 = scalar_lea.hbm %s10630_s6, 1024 }
0x2213   : > { %p8170_p5 = scmp.ne.s32.totalorder %s10577_s11, %s8169_s26  ;;  %p8174_p1 = scmp.lt.u32.totalorder %s10577_s11, %s10630_s6 }
0x2214   : > { %p8175_p3 = scmp.lt.u32.totalorder %s8173_s18, %s8169_s26  ;;  %p8177_p11 = scmp.lt.u32.totalorder %s8169_s26, %s10577_s11 }
0x2215   : > { %p8171_p7 = pnand %p8170_p5, %p10731_p12 }
0x2216   : > { %p8176_p6 = por %p8175_p3, %p8174_p1 }
0x2217   : > { %p8172_p9 = pneg %p8171_p7 }
0x2218   : > { %p8178_p13 = por %p8177_p11, %p8176_p6 }
0x221a   : > { %p8179_p8 = pnand %p8178_p13, %p8172_p9 }
0x221c   : > { %8182 = shalt.err (!%p8179_p8)
}
0x221d   : > { %s8232_s20 = smov 4  }
0x221e   : > { %7352 = dma.vmem_to_hbm [thread:$0]  (%p10731_p12), %s10572_s7, 512, %s10577_s11, %s6103_s14, %s8228_s13, %s8228_s13, %s8232_s20  }
0x221f PF: > { %s6132_s15 = sand.u32 1, %s8209_s21   ;;  %p10732_p10 = scmp.ne.s32.totalorder %s10662_s10, 0 }
0x2220   : > { %p10733_p0 = scmp.ge.s32.totalorder %s8221_s24, 2  ;;  %s6133_s25 = scalar_lea.sflag [#allocation4], %s6132_s15 }
0x2222   : > { %p7359_p2 = pnand %p10733_p0, %p10732_p10 }
0x2224   : > { %8204 = dma.done.wait (!%p7359_p2), %s6133_s25, 512  }
0x2225   : > { %8206 = vsyncadd (!%p7359_p2), %s6133_s25, 4294966784  ;;  %p19_p4 = scmp.ge.s32.totalorder %s8293_s27, 4   ;;  %s10734_s21 = smov %s8213_s22 }
0x2226   : > { %s10735_s22 = smov %s8217_s23  ;;  %s10736_s23 = smov %s8305_s30 }
0x2227   : > { %s10737_s24 = smov %s8293_s27  ;;  %21 = sbr.rel (!%p19_p4) target bundleno = 5 (0x5), region = 93 }
0x222e   :  { %6138 = vsyncpa [#allocation3], 1 }
0x222f   :  { %6140 = vsyncpa [#allocation3 + $0x1], 1 }
0x2230   :  { %6141 = vsyncpa [#allocation4], 1 }
0x2231   :  { %6143 = vsyncpa [#allocation4 + $0x1], 1 }

</bundles_post_ra>
